<compile_context>
chip_gen: v7x
topology: tpu7x:2x2x1
jax: 0.10.0
libtpu: 0.0.40
codegen_flags: <defaults>
</compile_context>

<pallas_src>
import jax
import jax.numpy as jnp
from jax import lax
from jax.experimental import pallas as pl
from jax.experimental.pallas import tpu as pltpu

EPS = 1e-5
IN_FEATS = 64        # Cin * L_in of layer 1
IN_FEATS_PAD = 128   # zero-padded to a full 128-lane width

_LAYER_CFG = [  # (Cin, Cout, K, pad, L_in)
    (1, 16, 5, 2, 64),
    (16, 32, 5, 2, 32),
    (32, 64, 5, 2, 16),
    (64, 96, 3, 1, 8),
]


def _cdiv(a, b):
    return -(-a // b)


def _round_up(n, m):
    return ((n + m - 1) // m) * m


# ----------------------------- Pallas kernel --------------------------------
def cnn_kernel(x_ref,
               w1_ref, s1_ref, w2_ref, s2_ref, w3_ref, s3_ref, w4_ref, s4_ref,
               wfc_ref, bfc_ref, out_ref):
    def conv_block(a, w_ref, s_ref):
        # conv+BN (folded into one dense matmul) + bias/shift.
        y = jnp.dot(a, w_ref[...], preferred_element_type=jnp.float32)
        y = y + s_ref[...]
        # columns are [even conv positions | odd conv positions] (channel-major
        # within each half) -> MaxPool1d(k=2, s=2) + ReLU is a pairwise max of
        # the two lane-aligned halves.
        h = y.shape[-1] // 2
        y = jnp.maximum(jnp.maximum(y[:, :h], y[:, h:]), 0.0)
        return y.astype(a.dtype)

    a = x_ref[...]                                   # (TB, 128) bf16 (64 real)
    a = conv_block(a, w1_ref, s1_ref)                # (TB, 16*32)
    a = conv_block(a, w2_ref, s2_ref)                # (TB, 32*16)
    a = conv_block(a, w3_ref, s3_ref)                # (TB, 64*8)
    a = conv_block(a, w4_ref, s4_ref)                # (TB, 96*4) == torch flatten order
    out_ref[...] = (jnp.dot(a, wfc_ref[...], preferred_element_type=jnp.float32)
                    + bfc_ref[...]).astype(out_ref.dtype)   # (TB, 128) bf16 lane-dense


# ----------------------------- host-side folding ----------------------------
def _fold_conv_layer(layer, cfg, dtype):
    """Fold conv+BN into a dense (Cin*L_in, 2*Cout*(L_out//2)) matmul weight.

    Row index   : ci * L_in + li                        (channel-major input)
    Column index: parity*(Cout*half) + co*half + m      (lo = 2*m + parity)
    so the in-kernel pool is max(first half, second half) of the columns.
    """
    cin, cout, k, pad, l_in = cfg
    w, b = layer["w"], layer["b"]                       # (Cout, Cin, K), (Cout,)
    s = layer["gamma"] / jnp.sqrt(layer["var"] + EPS)   # BN scale
    t = layer["beta"] - layer["mean"] * s               # BN shift
    l_out = l_in                                        # 'same' conv, stride 1
    half = l_out // 2

    li = jnp.arange(l_in)
    lo = jnp.arange(l_out)
    kk = li[:, None] - lo[None, :] + pad                # (l_in, l_out)
    valid = (kk >= 0) & (kk < k)
    kk = jnp.clip(kk, 0, k - 1)

    wk = w[:, :, kk]                                    # (cout, cin, l_in, l_out)
    wk = jnp.where(valid[None, None], wk, 0.0)
    wk = wk * s[:, None, None, None]                    # fold BN scale
    wk = jnp.transpose(wk, (1, 2, 0, 3))                # (cin, l_in, cout, l_out)
    wk = wk.reshape(cin, l_in, cout, half, 2)           # lo -> (m, parity)
    wk = jnp.transpose(wk, (0, 1, 4, 2, 3))             # (cin, l_in, 2, cout, half)
    w_mat = wk.reshape(cin * l_in, 2 * cout * half)

    val = b * s + t                                     # folded bias+shift, (cout,)
    shift = jnp.broadcast_to(val[None, :, None], (2, cout, half))
    shift = shift.reshape(1, 2 * cout * half)
    return w_mat.astype(dtype), shift.astype(jnp.float32)


def _fold_fc(params, out_cols, dtype):
    nc = params["fc_w"].shape[0]
    w_fc = jnp.transpose(params["fc_w"], (1, 0))        # (384, nc); rows = c*4 + l
    w_fc = jnp.pad(w_fc, ((0, 0), (0, out_cols - nc)))  # lane-dense output
    b_fc = jnp.pad(params["fc_b"], (0, out_cols - nc)).reshape(1, out_cols)
    return w_fc.astype(dtype), b_fc.astype(jnp.float32)


# ----------------------------- tiling / launch --------------------------------
def _choose_batch_tiling(B, batch_tile):
    """Minimal-padding batch tiling; >=2 (even) grid steps for v7x's 2 TCs."""
    if B <= 16:
        return 16, 1
    num_tiles = max(_cdiv(B, batch_tile), 2)
    num_tiles += num_tiles % 2          # even step count -> balanced across 2 TCs
    tb = _round_up(_cdiv(B, num_tiles), 16)
    return tb, num_tiles


def _run_pallas(x_flat, folded, wfc, bfc, tb, num_tiles, out_cols,
                single_buffer_weights):
    # Weights/shifts have constant index_maps (resident in VMEM); single-buffer
    # them to avoid dead double-buffer copies.
    wkw = dict(pipeline_mode=pl.Buffered(1)) if single_buffer_weights else {}

    args = [x_flat]
    in_specs = [pl.BlockSpec((tb, IN_FEATS_PAD), lambda i: (i, 0))]
    for w_mat, shift in folded:
        args += [w_mat, shift]
        in_specs += [pl.BlockSpec(w_mat.shape, lambda i: (0, 0), **wkw),
                     pl.BlockSpec(shift.shape, lambda i: (0, 0), **wkw)]
    args += [wfc, bfc]
    in_specs += [pl.BlockSpec(wfc.shape, lambda i: (0, 0), **wkw),
                 pl.BlockSpec(bfc.shape, lambda i: (0, 0), **wkw)]

    return pl.pallas_call(
        cnn_kernel,
        out_shape=jax.ShapeDtypeStruct((x_flat.shape[0], out_cols), jnp.bfloat16),
        grid=(num_tiles,),
        in_specs=in_specs,
        out_specs=pl.BlockSpec((tb, out_cols), lambda i: (i, 0)),
        compiler_params=pltpu.CompilerParams(
            dimension_semantics=("parallel",),
            vmem_limit_bytes=48 * 1024 * 1024),
    )(*args)


def example_cnn1d_forward(x_ncl, params, *, batch_tile=2048,
                          compute_dtype=jnp.bfloat16):
    """x_ncl: (B, 1, 64) float32 (PyTorch NCL layout). Returns (B, num_classes) f32."""
    B = x_ncl.shape[0]
    num_classes = params["fc_w"].shape[0]
    out_cols = _round_up(max(num_classes, 1), 128)      # lane-dense output width

    folded = [_fold_conv_layer(l, c, compute_dtype)
              for l, c in zip(params["layers"], _LAYER_CFG)]
    # Pad layer-1 weight rows 64 -> 128 to match the lane-dense padded input.
    w1, s1 = folded[0]
    folded[0] = (jnp.pad(w1, ((0, IN_FEATS_PAD - IN_FEATS), (0, 0))), s1)
    wfc, bfc = _fold_fc(params, out_cols, compute_dtype)

    # (B, 1, 64) -> flat channel-major (B, 64), cast to bf16, pad lanes to 128.
    x_flat = x_ncl.reshape(B, IN_FEATS).astype(compute_dtype)
    x_flat = jnp.pad(x_flat, ((0, 0), (0, IN_FEATS_PAD - IN_FEATS)))

    tb, num_tiles = _choose_batch_tiling(B, batch_tile)
    b_pad = tb * num_tiles
    if b_pad != B:
        x_flat = jnp.pad(x_flat, ((0, b_pad - B), (0, 0)))

    try:
        out = _run_pallas(x_flat, folded, wfc, bfc, tb, num_tiles, out_cols,
                          single_buffer_weights=True)
    except Exception:
        # Fallback if pipeline_mode=pl.Buffered(1) is unsupported in this jax build.
        out = _run_pallas(x_flat, folded, wfc, bfc, tb, num_tiles, out_cols,
                          single_buffer_weights=False)
    return out[:B, :num_classes].astype(jnp.float32)


# ----------------------------- params / reference ----------------------------
def init_params(key, num_classes=10):
    params = {"layers": []}
    for (cin, cout, k, _, _) in _LAYER_CFG:
        key, *ks = jax.random.split(key, 7)
        layer = dict(
            w=0.1 * jax.random.normal(ks[0], (cout, cin, k), jnp.float32),
            b=0.1 * jax.random.normal(ks[1], (cout,), jnp.float32),
            gamma=1.0 + 0.1 * jax.random.normal(ks[2], (cout,), jnp.float32),
            beta=0.1 * jax.random.normal(ks[3], (cout,), jnp.float32),
            mean=0.1 * jax.random.normal(ks[4], (cout,), jnp.float32),
            var=0.5 + jnp.abs(jax.random.normal(ks[5], (cout,), jnp.float32)),
        )
        params["layers"].append(layer)
    key, k1, k2 = jax.random.split(key, 3)
    params["fc_w"] = 0.1 * jax.random.normal(k1, (num_classes, 4 * 96), jnp.float32)
    params["fc_b"] = 0.1 * jax.random.normal(k2, (num_classes,), jnp.float32)
    return params


def reference_forward(x_ncl, params):
    y = x_ncl.astype(jnp.float32)
    for layer, (cin, cout, k, pad, _) in zip(params["layers"], _LAYER_CFG):
        y = lax.conv_general_dilated(
            y, layer["w"], window_strides=(1,), padding=[(pad, pad)],
            dimension_numbers=("NCH", "OIH", "NCH"))
        y = y + layer["b"][None, :, None]
        s = layer["gamma"] / jnp.sqrt(layer["var"] + EPS)
        t = layer["beta"] - layer["mean"] * s
        y = y * s[None, :, None] + t[None, :, None]
        y = jnp.maximum(y, 0.0)
        B, C, L = y.shape
        y = jnp.max(y.reshape(B, C, L // 2, 2), axis=3)
    B = y.shape[0]
    flat = y.reshape(B, -1)                              # PyTorch view order
    return flat @ params["fc_w"].T + params["fc_b"]


# ----------------------------------- main ------------------------------------
if __name__ == "__main__":
    key = jax.random.PRNGKey(0)
    k_x, k_p = jax.random.split(key)

    B, num_classes = 2, 10
    x = jax.random.normal(k_x, (B, 1, 64), jnp.float32)  # (B, Cin=1, L=64)
    params = init_params(k_p, num_classes=num_classes)

    out = jax.block_until_ready(example_cnn1d_forward(x, params))
    ref = jax.block_until_ready(reference_forward(x, params))

    assert out.shape == (B, num_classes)
    err = float(jnp.max(jnp.abs(out - ref)))
    # bf16 activations/weights/output with f32 accumulation -> loosened tolerance.
    if not jnp.allclose(out, ref, atol=5e-2, rtol=5e-2):
        raise AssertionError(f"mismatch: max abs err = {err}")

    print("KERNEL_OK")
</pallas_src>

<mosaic_0001>
module attributes {stable_mosaic.version = 11 : i64} {
  func.func @cnn_kernel(%arg0: i32, %arg1: memref<16x128xbf16, #tpu.memory_space<vmem>>, %arg2: memref<128x1024xbf16, #tpu.memory_space<vmem>>, %arg3: memref<1x1024xf32, #tpu.memory_space<vmem>>, %arg4: memref<512x1024xbf16, #tpu.memory_space<vmem>>, %arg5: memref<1x1024xf32, #tpu.memory_space<vmem>>, %arg6: memref<512x1024xbf16, #tpu.memory_space<vmem>>, %arg7: memref<1x1024xf32, #tpu.memory_space<vmem>>, %arg8: memref<512x768xbf16, #tpu.memory_space<vmem>>, %arg9: memref<1x768xf32, #tpu.memory_space<vmem>>, %arg10: memref<384x128xbf16, #tpu.memory_space<vmem>>, %arg11: memref<1x128xf32, #tpu.memory_space<vmem>>, %arg12: memref<16x128xbf16, #tpu.memory_space<vmem>>) attributes {dimension_semantics = [#tpu.dimension_semantics<parallel>], iteration_bounds = array<i64: 1>, scalar_prefetch = 0 : i64, scratch_operands = 0 : i64, tpu.core_type = #tpu.core_type<tc>, window_params = [{transform_indices = @transform_0, window_bounds = array<i64: 16, 128>}, {pipeline_mode = #tpu.pipeline_mode<synchronous>, transform_indices = @transform_1, window_bounds = array<i64: 128, 1024>}, {pipeline_mode = #tpu.pipeline_mode<synchronous>, transform_indices = @transform_2, window_bounds = array<i64: 1, 1024>}, {pipeline_mode = #tpu.pipeline_mode<synchronous>, transform_indices = @transform_3, window_bounds = array<i64: 512, 1024>}, {pipeline_mode = #tpu.pipeline_mode<synchronous>, transform_indices = @transform_4, window_bounds = array<i64: 1, 1024>}, {pipeline_mode = #tpu.pipeline_mode<synchronous>, transform_indices = @transform_5, window_bounds = array<i64: 512, 1024>}, {pipeline_mode = #tpu.pipeline_mode<synchronous>, transform_indices = @transform_6, window_bounds = array<i64: 1, 1024>}, {pipeline_mode = #tpu.pipeline_mode<synchronous>, transform_indices = @transform_7, window_bounds = array<i64: 512, 768>}, {pipeline_mode = #tpu.pipeline_mode<synchronous>, transform_indices = @transform_8, window_bounds = array<i64: 1, 768>}, {pipeline_mode = #tpu.pipeline_mode<synchronous>, transform_indices = @transform_9, window_bounds = array<i64: 384, 128>}, {pipeline_mode = #tpu.pipeline_mode<synchronous>, transform_indices = @transform_10, window_bounds = array<i64: 1, 128>}, {transform_indices = @transform_11, window_bounds = array<i64: 16, 128>}]} {
    %c0 = arith.constant 0 : index
    %c0_0 = arith.constant 0 : index
    %0 = vector.load %arg1[%c0, %c0_0] : memref<16x128xbf16, #tpu.memory_space<vmem>>, vector<16x128xbf16>
    %c0_1 = arith.constant 0 : index
    %c0_2 = arith.constant 0 : index
    %1 = vector.load %arg2[%c0_1, %c0_2] : memref<128x1024xbf16, #tpu.memory_space<vmem>>, vector<128x1024xbf16>
    %cst = arith.constant dense<0.000000e+00> : vector<16x1024xf32>
    %2 = tpu.matmul %0, %1, %cst {dimension_numbers = #tpu.dot_dimension_numbers<[1], [0], [0], [1], [0, 0, 1, 1], [], []>} : vector<16x128xbf16>, vector<128x1024xbf16>, vector<16x1024xf32> -> vector<16x1024xf32>
    %c0_3 = arith.constant 0 : index
    %c0_4 = arith.constant 0 : index
    %3 = vector.load %arg3[%c0_3, %c0_4] : memref<1x1024xf32, #tpu.memory_space<vmem>>, vector<1x1024xf32>
    %4 = vector.broadcast %3 : vector<1x1024xf32> to vector<16x1024xf32>
    %5 = arith.addf %2, %4 : vector<16x1024xf32>
    %6 = vector.extract_strided_slice %5 {offsets = [0, 0], sizes = [16, 512], strides = [1, 1]} : vector<16x1024xf32> to vector<16x512xf32>
    %7 = vector.extract_strided_slice %5 {offsets = [0, 512], sizes = [16, 512], strides = [1, 1]} : vector<16x1024xf32> to vector<16x512xf32>
    %8 = arith.maximumf %6, %7 : vector<16x512xf32>
    %cst_5 = arith.constant 0.000000e+00 : f32
    %9 = vector.broadcast %cst_5 : f32 to vector<16x512xf32>
    %10 = arith.maximumf %8, %9 : vector<16x512xf32>
    %11 = arith.truncf %10 : vector<16x512xf32> to vector<16x512xbf16>
    %c0_6 = arith.constant 0 : index
    %c0_7 = arith.constant 0 : index
    %12 = vector.load %arg4[%c0_6, %c0_7] : memref<512x1024xbf16, #tpu.memory_space<vmem>>, vector<512x1024xbf16>
    %cst_8 = arith.constant dense<0.000000e+00> : vector<16x1024xf32>
    %13 = tpu.matmul %11, %12, %cst_8 {dimension_numbers = #tpu.dot_dimension_numbers<[1], [0], [0], [1], [0, 0, 1, 1], [], []>} : vector<16x512xbf16>, vector<512x1024xbf16>, vector<16x1024xf32> -> vector<16x1024xf32>
    %c0_9 = arith.constant 0 : index
    %c0_10 = arith.constant 0 : index
    %14 = vector.load %arg5[%c0_9, %c0_10] : memref<1x1024xf32, #tpu.memory_space<vmem>>, vector<1x1024xf32>
    %15 = vector.broadcast %14 : vector<1x1024xf32> to vector<16x1024xf32>
    %16 = arith.addf %13, %15 : vector<16x1024xf32>
    %17 = vector.extract_strided_slice %16 {offsets = [0, 0], sizes = [16, 512], strides = [1, 1]} : vector<16x1024xf32> to vector<16x512xf32>
    %18 = vector.extract_strided_slice %16 {offsets = [0, 512], sizes = [16, 512], strides = [1, 1]} : vector<16x1024xf32> to vector<16x512xf32>
    %19 = arith.maximumf %17, %18 : vector<16x512xf32>
    %cst_11 = arith.constant 0.000000e+00 : f32
    %20 = vector.broadcast %cst_11 : f32 to vector<16x512xf32>
    %21 = arith.maximumf %19, %20 : vector<16x512xf32>
    %22 = arith.truncf %21 : vector<16x512xf32> to vector<16x512xbf16>
    %c0_12 = arith.constant 0 : index
    %c0_13 = arith.constant 0 : index
    %23 = vector.load %arg6[%c0_12, %c0_13] : memref<512x1024xbf16, #tpu.memory_space<vmem>>, vector<512x1024xbf16>
    %cst_14 = arith.constant dense<0.000000e+00> : vector<16x1024xf32>
    %24 = tpu.matmul %22, %23, %cst_14 {dimension_numbers = #tpu.dot_dimension_numbers<[1], [0], [0], [1], [0, 0, 1, 1], [], []>} : vector<16x512xbf16>, vector<512x1024xbf16>, vector<16x1024xf32> -> vector<16x1024xf32>
    %c0_15 = arith.constant 0 : index
    %c0_16 = arith.constant 0 : index
    %25 = vector.load %arg7[%c0_15, %c0_16] : memref<1x1024xf32, #tpu.memory_space<vmem>>, vector<1x1024xf32>
    %26 = vector.broadcast %25 : vector<1x1024xf32> to vector<16x1024xf32>
    %27 = arith.addf %24, %26 : vector<16x1024xf32>
    %28 = vector.extract_strided_slice %27 {offsets = [0, 0], sizes = [16, 512], strides = [1, 1]} : vector<16x1024xf32> to vector<16x512xf32>
    %29 = vector.extract_strided_slice %27 {offsets = [0, 512], sizes = [16, 512], strides = [1, 1]} : vector<16x1024xf32> to vector<16x512xf32>
    %30 = arith.maximumf %28, %29 : vector<16x512xf32>
    %cst_17 = arith.constant 0.000000e+00 : f32
    %31 = vector.broadcast %cst_17 : f32 to vector<16x512xf32>
    %32 = arith.maximumf %30, %31 : vector<16x512xf32>
    %33 = arith.truncf %32 : vector<16x512xf32> to vector<16x512xbf16>
    %c0_18 = arith.constant 0 : index
    %c0_19 = arith.constant 0 : index
    %34 = vector.load %arg8[%c0_18, %c0_19] : memref<512x768xbf16, #tpu.memory_space<vmem>>, vector<512x768xbf16>
    %cst_20 = arith.constant dense<0.000000e+00> : vector<16x768xf32>
    %35 = tpu.matmul %33, %34, %cst_20 {dimension_numbers = #tpu.dot_dimension_numbers<[1], [0], [0], [1], [0, 0, 1, 1], [], []>} : vector<16x512xbf16>, vector<512x768xbf16>, vector<16x768xf32> -> vector<16x768xf32>
    %c0_21 = arith.constant 0 : index
    %c0_22 = arith.constant 0 : index
    %36 = vector.load %arg9[%c0_21, %c0_22] : memref<1x768xf32, #tpu.memory_space<vmem>>, vector<1x768xf32>
    %37 = vector.broadcast %36 : vector<1x768xf32> to vector<16x768xf32>
    %38 = arith.addf %35, %37 : vector<16x768xf32>
    %39 = vector.extract_strided_slice %38 {offsets = [0, 0], sizes = [16, 384], strides = [1, 1]} : vector<16x768xf32> to vector<16x384xf32>
    %40 = vector.extract_strided_slice %38 {offsets = [0, 384], sizes = [16, 384], strides = [1, 1]} : vector<16x768xf32> to vector<16x384xf32>
    %41 = arith.maximumf %39, %40 : vector<16x384xf32>
    %cst_23 = arith.constant 0.000000e+00 : f32
    %42 = vector.broadcast %cst_23 : f32 to vector<16x384xf32>
    %43 = arith.maximumf %41, %42 : vector<16x384xf32>
    %44 = arith.truncf %43 : vector<16x384xf32> to vector<16x384xbf16>
    %c0_24 = arith.constant 0 : index
    %c0_25 = arith.constant 0 : index
    %45 = vector.load %arg10[%c0_24, %c0_25] : memref<384x128xbf16, #tpu.memory_space<vmem>>, vector<384x128xbf16>
    %cst_26 = arith.constant dense<0.000000e+00> : vector<16x128xf32>
    %46 = tpu.matmul %44, %45, %cst_26 {dimension_numbers = #tpu.dot_dimension_numbers<[1], [0], [0], [1], [0, 0, 1, 1], [], []>} : vector<16x384xbf16>, vector<384x128xbf16>, vector<16x128xf32> -> vector<16x128xf32>
    %c0_27 = arith.constant 0 : index
    %c0_28 = arith.constant 0 : index
    %47 = vector.load %arg11[%c0_27, %c0_28] : memref<1x128xf32, #tpu.memory_space<vmem>>, vector<1x128xf32>
    %48 = vector.broadcast %47 : vector<1x128xf32> to vector<16x128xf32>
    %49 = arith.addf %46, %48 : vector<16x128xf32>
    %50 = arith.truncf %49 : vector<16x128xf32> to vector<16x128xbf16>
    %c0_29 = arith.constant 0 : index
    %c0_30 = arith.constant 0 : index
    %51 = vector.load %arg12[%c0_29, %c0_30] : memref<16x128xbf16, #tpu.memory_space<vmem>>, vector<16x128xbf16>
    tpu.vector_store %arg12[%c0_29, %c0_30], %50 {strides = array<i32>} : memref<16x128xbf16, #tpu.memory_space<vmem>>, vector<16x128xbf16>,
    return
  }
  func.func @transform_0(%arg0: i32) -> (i32, i32) {
    %c0_i32 = arith.constant 0 : i32
    %c0_i32_0 = arith.constant 0 : i32
    return %arg0, %c0_i32 : i32, i32
  }
  func.func @transform_1(%arg0: i32) -> (i32, i32) {
    %c0_i32 = arith.constant 0 : i32
    %c0_i32_0 = arith.constant 0 : i32
    %c0_i32_1 = arith.constant 0 : i32
    return %c0_i32, %c0_i32_0 : i32, i32
  }
  func.func @transform_2(%arg0: i32) -> (i32, i32) {
    %c0_i32 = arith.constant 0 : i32
    %c0_i32_0 = arith.constant 0 : i32
    %c0_i32_1 = arith.constant 0 : i32
    return %c0_i32, %c0_i32_0 : i32, i32
  }
  func.func @transform_3(%arg0: i32) -> (i32, i32) {
    %c0_i32 = arith.constant 0 : i32
    %c0_i32_0 = arith.constant 0 : i32
    %c0_i32_1 = arith.constant 0 : i32
    return %c0_i32, %c0_i32_0 : i32, i32
  }
  func.func @transform_4(%arg0: i32) -> (i32, i32) {
    %c0_i32 = arith.constant 0 : i32
    %c0_i32_0 = arith.constant 0 : i32
    %c0_i32_1 = arith.constant 0 : i32
    return %c0_i32, %c0_i32_0 : i32, i32
  }
  func.func @transform_5(%arg0: i32) -> (i32, i32) {
    %c0_i32 = arith.constant 0 : i32
    %c0_i32_0 = arith.constant 0 : i32
    %c0_i32_1 = arith.constant 0 : i32
    return %c0_i32, %c0_i32_0 : i32, i32
  }
  func.func @transform_6(%arg0: i32) -> (i32, i32) {
    %c0_i32 = arith.constant 0 : i32
    %c0_i32_0 = arith.constant 0 : i32
    %c0_i32_1 = arith.constant 0 : i32
    return %c0_i32, %c0_i32_0 : i32, i32
  }
  func.func @transform_7(%arg0: i32) -> (i32, i32) {
    %c0_i32 = arith.constant 0 : i32
    %c0_i32_0 = arith.constant 0 : i32
    %c0_i32_1 = arith.constant 0 : i32
    return %c0_i32, %c0_i32_0 : i32, i32
  }
  func.func @transform_8(%arg0: i32) -> (i32, i32) {
    %c0_i32 = arith.constant 0 : i32
    %c0_i32_0 = arith.constant 0 : i32
    %c0_i32_1 = arith.constant 0 : i32
    return %c0_i32, %c0_i32_0 : i32, i32
  }
  func.func @transform_9(%arg0: i32) -> (i32, i32) {
    %c0_i32 = arith.constant 0 : i32
    %c0_i32_0 = arith.constant 0 : i32
    %c0_i32_1 = arith.constant 0 : i32
    return %c0_i32, %c0_i32_0 : i32, i32
  }
  func.func @transform_10(%arg0: i32) -> (i32, i32) {
    %c0_i32 = arith.constant 0 : i32
    %c0_i32_0 = arith.constant 0 : i32
    %c0_i32_1 = arith.constant 0 : i32
    return %c0_i32, %c0_i32_0 : i32, i32
  }
  func.func @transform_11(%arg0: i32) -> (i32, i32) {
    %c0_i32 = arith.constant 0 : i32
    %c0_i32_0 = arith.constant 0 : i32
    return %arg0, %c0_i32 : i32, i32
  }
}

module attributes {stable_mosaic.version = 11 : i64} {
  func.func @cnn_kernel(%arg0: i32, %arg1: memref<16x128xbf16, #tpu.memory_space<vmem>>, %arg2: memref<128x1024xbf16, #tpu.memory_space<vmem>>, %arg3: memref<1x1024xf32, #tpu.memory_space<vmem>>, %arg4: memref<512x1024xbf16, #tpu.memory_space<vmem>>, %arg5: memref<1x1024xf32, #tpu.memory_space<vmem>>, %arg6: memref<512x1024xbf16, #tpu.memory_space<vmem>>, %arg7: memref<1x1024xf32, #tpu.memory_space<vmem>>, %arg8: memref<512x768xbf16, #tpu.memory_space<vmem>>, %arg9: memref<1x768xf32, #tpu.memory_space<vmem>>, %arg10: memref<384x128xbf16, #tpu.memory_space<vmem>>, %arg11: memref<1x128xf32, #tpu.memory_space<vmem>>, %arg12: memref<16x128xbf16, #tpu.memory_space<vmem>>) attributes {dimension_semantics = [#tpu.dimension_semantics<parallel>], iteration_bounds = array<i64: 1>, scalar_prefetch = 0 : i64, scratch_operands = 0 : i64, tpu.core_type = #tpu.core_type<tc>, window_params = [{transform_indices = @transform_0, window_bounds = array<i64: 16, 128>}, {pipeline_mode = #tpu.pipeline_mode<synchronous>, transform_indices = @transform_1, window_bounds = array<i64: 128, 1024>}, {pipeline_mode = #tpu.pipeline_mode<synchronous>, transform_indices = @transform_2, window_bounds = array<i64: 1, 1024>}, {pipeline_mode = #tpu.pipeline_mode<synchronous>, transform_indices = @transform_3, window_bounds = array<i64: 512, 1024>}, {pipeline_mode = #tpu.pipeline_mode<synchronous>, transform_indices = @transform_4, window_bounds = array<i64: 1, 1024>}, {pipeline_mode = #tpu.pipeline_mode<synchronous>, transform_indices = @transform_5, window_bounds = array<i64: 512, 1024>}, {pipeline_mode = #tpu.pipeline_mode<synchronous>, transform_indices = @transform_6, window_bounds = array<i64: 1, 1024>}, {pipeline_mode = #tpu.pipeline_mode<synchronous>, transform_indices = @transform_7, window_bounds = array<i64: 512, 768>}, {pipeline_mode = #tpu.pipeline_mode<synchronous>, transform_indices = @transform_8, window_bounds = array<i64: 1, 768>}, {pipeline_mode = #tpu.pipeline_mode<synchronous>, transform_indices = @transform_9, window_bounds = array<i64: 384, 128>}, {pipeline_mode = #tpu.pipeline_mode<synchronous>, transform_indices = @transform_10, window_bounds = array<i64: 1, 128>}, {transform_indices = @transform_11, window_bounds = array<i64: 16, 128>}]} {
    %c0 = arith.constant 0 : index
    %c0_0 = arith.constant 0 : index
    %0 = vector.load %arg1[%c0, %c0_0] : memref<16x128xbf16, #tpu.memory_space<vmem>>, vector<16x128xbf16>
    %c0_1 = arith.constant 0 : index
    %c0_2 = arith.constant 0 : index
    %1 = vector.load %arg2[%c0_1, %c0_2] : memref<128x1024xbf16, #tpu.memory_space<vmem>>, vector<128x1024xbf16>
    %cst = arith.constant dense<0.000000e+00> : vector<16x1024xf32>
    %2 = tpu.matmul %0, %1, %cst {dimension_numbers = #tpu.dot_dimension_numbers<[1], [0], [0], [1], [0, 0, 1, 1], [], []>} : vector<16x128xbf16>, vector<128x1024xbf16>, vector<16x1024xf32> -> vector<16x1024xf32>
    %c0_3 = arith.constant 0 : index
    %c0_4 = arith.constant 0 : index
    %3 = vector.load %arg3[%c0_3, %c0_4] : memref<1x1024xf32, #tpu.memory_space<vmem>>, vector<1x1024xf32>
    %4 = vector.broadcast %3 : vector<1x1024xf32> to vector<16x1024xf32>
    %5 = arith.addf %2, %4 : vector<16x1024xf32>
    %6 = vector.extract_strided_slice %5 {offsets = [0, 0], sizes = [16, 512], strides = [1, 1]} : vector<16x1024xf32> to vector<16x512xf32>
    %7 = vector.extract_strided_slice %5 {offsets = [0, 512], sizes = [16, 512], strides = [1, 1]} : vector<16x1024xf32> to vector<16x512xf32>
    %8 = arith.maximumf %6, %7 : vector<16x512xf32>
    %cst_5 = arith.constant 0.000000e+00 : f32
    %9 = vector.broadcast %cst_5 : f32 to vector<16x512xf32>
    %10 = arith.maximumf %8, %9 : vector<16x512xf32>
    %11 = arith.truncf %10 : vector<16x512xf32> to vector<16x512xbf16>
    %c0_6 = arith.constant 0 : index
    %c0_7 = arith.constant 0 : index
    %12 = vector.load %arg4[%c0_6, %c0_7] : memref<512x1024xbf16, #tpu.memory_space<vmem>>, vector<512x1024xbf16>
    %cst_8 = arith.constant dense<0.000000e+00> : vector<16x1024xf32>
    %13 = tpu.matmul %11, %12, %cst_8 {dimension_numbers = #tpu.dot_dimension_numbers<[1], [0], [0], [1], [0, 0, 1, 1], [], []>} : vector<16x512xbf16>, vector<512x1024xbf16>, vector<16x1024xf32> -> vector<16x1024xf32>
    %c0_9 = arith.constant 0 : index
    %c0_10 = arith.constant 0 : index
    %14 = vector.load %arg5[%c0_9, %c0_10] : memref<1x1024xf32, #tpu.memory_space<vmem>>, vector<1x1024xf32>
    %15 = vector.broadcast %14 : vector<1x1024xf32> to vector<16x1024xf32>
    %16 = arith.addf %13, %15 : vector<16x1024xf32>
    %17 = vector.extract_strided_slice %16 {offsets = [0, 0], sizes = [16, 512], strides = [1, 1]} : vector<16x1024xf32> to vector<16x512xf32>
    %18 = vector.extract_strided_slice %16 {offsets = [0, 512], sizes = [16, 512], strides = [1, 1]} : vector<16x1024xf32> to vector<16x512xf32>
    %19 = arith.maximumf %17, %18 : vector<16x512xf32>
    %cst_11 = arith.constant 0.000000e+00 : f32
    %20 = vector.broadcast %cst_11 : f32 to vector<16x512xf32>
    %21 = arith.maximumf %19, %20 : vector<16x512xf32>
    %22 = arith.truncf %21 : vector<16x512xf32> to vector<16x512xbf16>
    %c0_12 = arith.constant 0 : index
    %c0_13 = arith.constant 0 : index
    %23 = vector.load %arg6[%c0_12, %c0_13] : memref<512x1024xbf16, #tpu.memory_space<vmem>>, vector<512x1024xbf16>
    %cst_14 = arith.constant dense<0.000000e+00> : vector<16x1024xf32>
    %24 = tpu.matmul %22, %23, %cst_14 {dimension_numbers = #tpu.dot_dimension_numbers<[1], [0], [0], [1], [0, 0, 1, 1], [], []>} : vector<16x512xbf16>, vector<512x1024xbf16>, vector<16x1024xf32> -> vector<16x1024xf32>
    %c0_15 = arith.constant 0 : index
    %c0_16 = arith.constant 0 : index
    %25 = vector.load %arg7[%c0_15, %c0_16] : memref<1x1024xf32, #tpu.memory_space<vmem>>, vector<1x1024xf32>
    %26 = vector.broadcast %25 : vector<1x1024xf32> to vector<16x1024xf32>
    %27 = arith.addf %24, %26 : vector<16x1024xf32>
    %28 = vector.extract_strided_slice %27 {offsets = [0, 0], sizes = [16, 512], strides = [1, 1]} : vector<16x1024xf32> to vector<16x512xf32>
    %29 = vector.extract_strided_slice %27 {offsets = [0, 512], sizes = [16, 512], strides = [1, 1]} : vector<16x1024xf32> to vector<16x512xf32>
    %30 = arith.maximumf %28, %29 : vector<16x512xf32>
    %cst_17 = arith.constant 0.000000e+00 : f32
    %31 = vector.broadcast %cst_17 : f32 to vector<16x512xf32>
    %32 = arith.maximumf %30, %31 : vector<16x512xf32>
    %33 = arith.truncf %32 : vector<16x512xf32> to vector<16x512xbf16>
    %c0_18 = arith.constant 0 : index
    %c0_19 = arith.constant 0 : index
    %34 = vector.load %arg8[%c0_18, %c0_19] : memref<512x768xbf16, #tpu.memory_space<vmem>>, vector<512x768xbf16>
    %cst_20 = arith.constant dense<0.000000e+00> : vector<16x768xf32>
    %35 = tpu.matmul %33, %34, %cst_20 {dimension_numbers = #tpu.dot_dimension_numbers<[1], [0], [0], [1], [0, 0, 1, 1], [], []>} : vector<16x512xbf16>, vector<512x768xbf16>, vector<16x768xf32> -> vector<16x768xf32>
    %c0_21 = arith.constant 0 : index
    %c0_22 = arith.constant 0 : index
    %36 = vector.load %arg9[%c0_21, %c0_22] : memref<1x768xf32, #tpu.memory_space<vmem>>, vector<1x768xf32>
    %37 = vector.broadcast %36 : vector<1x768xf32> to vector<16x768xf32>
    %38 = arith.addf %35, %37 : vector<16x768xf32>
    %39 = vector.extract_strided_slice %38 {offsets = [0, 0], sizes = [16, 384], strides = [1, 1]} : vector<16x768xf32> to vector<16x384xf32>
    %40 = vector.extract_strided_slice %38 {offsets = [0, 384], sizes = [16, 384], strides = [1, 1]} : vector<16x768xf32> to vector<16x384xf32>
    %41 = arith.maximumf %39, %40 : vector<16x384xf32>
    %cst_23 = arith.constant 0.000000e+00 : f32
    %42 = vector.broadcast %cst_23 : f32 to vector<16x384xf32>
    %43 = arith.maximumf %41, %42 : vector<16x384xf32>
    %44 = arith.truncf %43 : vector<16x384xf32> to vector<16x384xbf16>
    %c0_24 = arith.constant 0 : index
    %c0_25 = arith.constant 0 : index
    %45 = vector.load %arg10[%c0_24, %c0_25] : memref<384x128xbf16, #tpu.memory_space<vmem>>, vector<384x128xbf16>
    %cst_26 = arith.constant dense<0.000000e+00> : vector<16x128xf32>
    %46 = tpu.matmul %44, %45, %cst_26 {dimension_numbers = #tpu.dot_dimension_numbers<[1], [0], [0], [1], [0, 0, 1, 1], [], []>} : vector<16x384xbf16>, vector<384x128xbf16>, vector<16x128xf32> -> vector<16x128xf32>
    %c0_27 = arith.constant 0 : index
    %c0_28 = arith.constant 0 : index
    %47 = vector.load %arg11[%c0_27, %c0_28] : memref<1x128xf32, #tpu.memory_space<vmem>>, vector<1x128xf32>
    %48 = vector.broadcast %47 : vector<1x128xf32> to vector<16x128xf32>
    %49 = arith.addf %46, %48 : vector<16x128xf32>
    %50 = arith.truncf %49 : vector<16x128xf32> to vector<16x128xbf16>
    %c0_29 = arith.constant 0 : index
    %c0_30 = arith.constant 0 : index
    %51 = vector.load %arg12[%c0_29, %c0_30] : memref<16x128xbf16, #tpu.memory_space<vmem>>, vector<16x128xbf16>
    tpu.vector_store %arg12[%c0_29, %c0_30], %50 {strides = array<i32>} : memref<16x128xbf16, #tpu.memory_space<vmem>>, vector<16x128xbf16>,
    return
  }
  func.func @transform_0(%arg0: i32) -> (i32, i32) {
    %c0_i32 = arith.constant 0 : i32
    %c0_i32_0 = arith.constant 0 : i32
    return %arg0, %c0_i32 : i32, i32
  }
  func.func @transform_1(%arg0: i32) -> (i32, i32) {
    %c0_i32 = arith.constant 0 : i32
    %c0_i32_0 = arith.constant 0 : i32
    %c0_i32_1 = arith.constant 0 : i32
    return %c0_i32, %c0_i32_0 : i32, i32
  }
  func.func @transform_2(%arg0: i32) -> (i32, i32) {
    %c0_i32 = arith.constant 0 : i32
    %c0_i32_0 = arith.constant 0 : i32
    %c0_i32_1 = arith.constant 0 : i32
    return %c0_i32, %c0_i32_0 : i32, i32
  }
  func.func @transform_3(%arg0: i32) -> (i32, i32) {
    %c0_i32 = arith.constant 0 : i32
    %c0_i32_0 = arith.constant 0 : i32
    %c0_i32_1 = arith.constant 0 : i32
    return %c0_i32, %c0_i32_0 : i32, i32
  }
  func.func @transform_4(%arg0: i32) -> (i32, i32) {
    %c0_i32 = arith.constant 0 : i32
    %c0_i32_0 = arith.constant 0 : i32
    %c0_i32_1 = arith.constant 0 : i32
    return %c0_i32, %c0_i32_0 : i32, i32
  }
  func.func @transform_5(%arg0: i32) -> (i32, i32) {
    %c0_i32 = arith.constant 0 : i32
    %c0_i32_0 = arith.constant 0 : i32
    %c0_i32_1 = arith.constant 0 : i32
    return %c0_i32, %c0_i32_0 : i32, i32
  }
  func.func @transform_6(%arg0: i32) -> (i32, i32) {
    %c0_i32 = arith.constant 0 : i32
    %c0_i32_0 = arith.constant 0 : i32
    %c0_i32_1 = arith.constant 0 : i32
    return %c0_i32, %c0_i32_0 : i32, i32
  }
  func.func @transform_7(%arg0: i32) -> (i32, i32) {
    %c0_i32 = arith.constant 0 : i32
    %c0_i32_0 = arith.constant 0 : i32
    %c0_i32_1 = arith.constant 0 : i32
    return %c0_i32, %c0_i32_0 : i32, i32
  }
  func.func @transform_8(%arg0: i32) -> (i32, i32) {
    %c0_i32 = arith.constant 0 : i32
    %c0_i32_0 = arith.constant 0 : i32
    %c0_i32_1 = arith.constant 0 : i32
    return %c0_i32, %c0_i32_0 : i32, i32
  }
  func.func @transform_9(%arg0: i32) -> (i32, i32) {
    %c0_i32 = arith.constant 0 : i32
    %c0_i32_0 = arith.constant 0 : i32
    %c0_i32_1 = arith.constant 0 : i32
    return %c0_i32, %c0_i32_0 : i32, i32
  }
  func.func @transform_10(%arg0: i32) -> (i32, i32) {
    %c0_i32 = arith.constant 0 : i32
    %c0_i32_0 = arith.constant 0 : i32
    %c0_i32_1 = arith.constant 0 : i32
    return %c0_i32, %c0_i32_0 : i32, i32
  }
  func.func @transform_11(%arg0: i32) -> (i32, i32) {
    %c0_i32 = arith.constant 0 : i32
    %c0_i32_0 = arith.constant 0 : i32
    return %arg0, %c0_i32 : i32, i32
  }
}

</mosaic_0001>

<bundles_post_ra>
// kernel: tpu_custom_call.1
= control target key start
LH: loop header
LB: loop body
LE: loop exit
PB: predicated region body
PF: predicated region fallthrough
CT: control target
= control target key end

     0   :  { %16 = vsyncpa [#allocation3], 0  ;;  %s8282_s0 = inlined_call_operand.hbm [shape: bf16[16,128], index: 0, kind: input, shape index: {}]   ;;  %s8283_s1 = inlined_call_operand.hbm [shape: bf16[128,1024], index: 1, kind: input, shape index: {}]   ;;  %s8284_s2 = inlined_call_operand.hbm [shape: f32[1,1024], index: 2, kind: input, shape index: {}]   ;;  %s8285_s3 = inlined_call_operand.hbm [shape: bf16[512,1024], index: 3, kind: input, shape index: {}]   ;;  %s8286_s4 = inlined_call_operand.vmem [shape: f32[1,1024], index: 4, kind: input, shape index: {}]   ;;  %s8287_s5 = inlined_call_operand.hbm [shape: bf16[512,1024], index: 5, kind: input, shape index: {}]   ;;  %s8288_s6 = inlined_call_operand.vmem [shape: f32[1,1024], index: 6, kind: input, shape index: {}]   ;;  %s8289_s7 = inlined_call_operand.hbm [shape: bf16[512,768], index: 7, kind: input, shape index: {}]   ;;  %s8290_s8 = inlined_call_operand.vmem [shape: f32[1,768], index: 8, kind: input, shape index: {}]   ;;  %s8291_s9 = inlined_call_operand.hbm [shape: bf16[384,128], index: 9, kind: input, shape index: {}]   ;;  %s8292_s10 = inlined_call_operand.vmem [shape: f32[1,128], index: 10, kind: input, shape index: {}]   ;;  %s8293_s11 = inlined_call_operand.hbm [shape: bf16[16,128], index: 11, kind: output, shape index: {}]  }
   0x1   :  { %17 = vsyncpa [#allocation6], 0 }
   0x2   :  { %18 = vsyncpa [#allocation9], 0 }
   0x3   :  { %19 = vsyncpa [#allocation12], 0 }
   0x4   :  { %20 = vsyncpa [#allocation4], 0  ;;  %s7869_s17 = smov [#allocation5]   ;;  %s7683_s21 = scalar_lea.hbm %s8283_s1, 8192 }
   0x5   :  { %s38_s18 = sshll.u32 %s7869_s17, 4  ;;  %p7684_p0 = scmp.ne.s32.totalorder %s8283_s1, %s7683_s21  ;;  %s39_s18 = int_to_ptr.vmem [resolvable:$true] %s38_s18 }
   0x6   :  { %p7687_p1 = scmp.lt.u32.totalorder %s7683_s21, %s8283_s1 }
   0x8   :  { %p7689_p2 = pnand %p7687_p1, %p7684_p0 }
   0xa   :  { %7692 = shalt.err (!%p7689_p2)
}
   0xb   :  { %s7693_s26 = scalar_lea.vmem %s39_s18, 8192  ;;  %p7698_p4 = scmp.lt.s32.totalorder %s39_s18, %s39_s18 }
   0xc   :  { %p7694_p3 = scmp.ne.s32.totalorder %s39_s18, %s7693_s26  ;;  %p7699_p5 = scmp.lt.s32.totalorder %s7693_s26, %s7693_s26 }
   0xe   :  { %p7700_p6 = por %p7699_p5, %p7698_p4 }
  0x10   :  { %p7701_p7 = pnand %p7700_p6, %p7694_p3 }
  0x12   :  { %7704 = shalt.err (!%p7701_p7)
}
  0x13   :  { %s7870_s27 = smov 512   ;;  %s7871_s28 = smov 32  }
  0x14   :  { %44 = dma.hbm_to_vmem [thread:$0]  %s8283_s1, 8192, %s39_s18, [#allocation6], %s7870_s27, %s7870_s27, %s7871_s28  }
  0x15   :  { %s7872_s12 = smov [#allocation8]   ;;  %s7873_s14 = smov [#allocation11]  }
  0x16   :  { %s60_s13 = sshll.u32 %s7872_s12, 4  ;;  %s88_s15 = sshll.u32 %s7873_s14, 4  ;;  %s61_s13 = int_to_ptr.vmem [resolvable:$true] %s60_s13  ;;  %s89_s15 = int_to_ptr.vmem [resolvable:$true] %s88_s15 }
  0x17   :  { %s7705_s19 = scalar_lea.hbm %s8285_s3, 32768 }
  0x18   :  { %p7706_p8 = scmp.ne.s32.totalorder %s8285_s3, %s7705_s19  ;;  %p7709_p9 = scmp.lt.u32.totalorder %s7705_s19, %s8285_s3 }
  0x1a   :  { %p7711_p10 = pnand %p7709_p9, %p7706_p8 }
  0x1c   :  { %7714 = shalt.err (!%p7711_p10)
}
  0x1d   :  { %s7715_s1 = scalar_lea.vmem %s61_s13, 32768  ;;  %p7720_p12 = scmp.lt.s32.totalorder %s61_s13, %s61_s13 }
  0x1e   :  { %p7716_p11 = scmp.ne.s32.totalorder %s61_s13, %s7715_s1  ;;  %p7721_p13 = scmp.lt.s32.totalorder %s7715_s1, %s7715_s1 }
  0x20   :  { %p7722_p0 = por %p7721_p13, %p7720_p12 }
  0x22   :  { %p7723_p1 = pnand %p7722_p0, %p7716_p11 }
  0x24   :  { %7726 = shalt.err (!%p7723_p1)
}
  0x25   :  { %66 = dma.hbm_to_vmem [thread:$0]  %s8285_s3, 32768, %s61_s13, [#allocation9], %s7870_s27, %s7870_s27, %s7871_s28  }
  0x26   :  { %s7727_s29 = scalar_lea.hbm %s8289_s7, 24576 }
  0x27   :  { %p7728_p2 = scmp.ne.s32.totalorder %s8289_s7, %s7727_s29  ;;  %p7731_p3 = scmp.lt.u32.totalorder %s7727_s29, %s8289_s7 }
  0x29   :  { %p7733_p4 = pnand %p7731_p3, %p7728_p2 }
  0x2b   :  { %7736 = shalt.err (!%p7733_p4)
}
  0x2c   :  { %s7737_s17 = scalar_lea.vmem %s89_s15, 24576  ;;  %p7742_p6 = scmp.lt.s32.totalorder %s89_s15, %s89_s15 }
  0x2d   :  { %p7738_p5 = scmp.ne.s32.totalorder %s89_s15, %s7737_s17  ;;  %p7743_p7 = scmp.lt.s32.totalorder %s7737_s17, %s7737_s17 }
  0x2f   :  { %p7744_p8 = por %p7743_p7, %p7742_p6 }
  0x31   :  { %p7745_p9 = pnand %p7744_p8, %p7738_p5 }
  0x33   :  { %7748 = shalt.err (!%p7745_p9)
}
  0x34   :  { %s7874_s3 = smov 384   ;;  %s7875_s13 = smov 24  }
  0x35   :  { %94 = dma.hbm_to_vmem [thread:$0]  %s8289_s7, 24576, %s89_s15, [#allocation12], %s7874_s3, %s7874_s3, %s7875_s13  }
  0x36   :  { %s7876_s21 = smov [#allocation2]   ;;  %s7749_s18 = scalar_lea.hbm %s8282_s0, 128 }
  0x37   :  { %s26_s22 = sshll.u32 %s7876_s21, 4  ;;  %p7750_p10 = scmp.ne.s32.totalorder %s8282_s0, %s7749_s18  ;;  %s27_s22 = int_to_ptr.vmem [resolvable:$true] %s26_s22 }
  0x38   :  { %p7753_p11 = scmp.lt.u32.totalorder %s7749_s18, %s8282_s0 }
  0x3a   :  { %p7755_p12 = pnand %p7753_p11, %p7750_p10 }
  0x3c   :  { %7758 = shalt.err (!%p7755_p12)
}
  0x3d   :  { %s7759_s30 = scalar_lea.vmem %s27_s22, 128  ;;  %p7764_p0 = scmp.lt.s32.totalorder %s27_s22, %s27_s22 }
  0x3e   :  { %p7760_p13 = scmp.ne.s32.totalorder %s27_s22, %s7759_s30  ;;  %p7765_p1 = scmp.lt.s32.totalorder %s7759_s30, %s7759_s30 }
  0x40   :  { %p7766_p2 = por %p7765_p1, %p7764_p0 }
  0x42   :  { %p7767_p3 = pnand %p7766_p2, %p7760_p13 }
  0x44   :  { %7770 = shalt.err (!%p7767_p3)
}
  0x45   :  { %s7877_s7 = smov 64   ;;  %s7878_s15 = smov 4  }
  0x46   :  { %32 = dma.hbm_to_vmem [thread:$0]  %s8282_s0, 128, %s27_s22, [#allocation3], %s7877_s7, %s7877_s7, %s7878_s15  }
  0x47   :  { %s7879_s16 = smov [#allocation7]   ;;  %s7880_s3 = smov [#allocation10]  }
  0x48   :  { %s51_s17 = sshll.u32 %s7879_s16, 4  ;;  %s74_s13 = sshll.u32 %s7880_s3, 4  ;;  %s52_s17 = int_to_ptr.vmem [resolvable:$true] %s51_s17  ;;  %s8003_s13 = int_to_ptr.vmem [resolvable:$true] %s74_s13 }
  0x49   :  { %s7771_s21 = scalar_lea.hbm %s8284_s2, 128 }
  0x4a   :  { %p7772_p4 = scmp.ne.s32.totalorder %s8284_s2, %s7771_s21  ;;  %p7775_p5 = scmp.lt.u32.totalorder %s7771_s21, %s8284_s2 }
  0x4c   :  { %p7777_p6 = pnand %p7775_p5, %p7772_p4 }
  0x4e   :  { %7780 = shalt.err (!%p7777_p6)
}
  0x4f   :  { %s7781_s0 = scalar_lea.vmem %s52_s17, 128  ;;  %p7786_p8 = scmp.lt.s32.totalorder %s52_s17, %s52_s17 }
  0x50   :  { %p7782_p7 = scmp.ne.s32.totalorder %s52_s17, %s7781_s0  ;;  %p7787_p9 = scmp.lt.s32.totalorder %s7781_s0, %s7781_s0 }
  0x52   :  { %p7788_p10 = por %p7787_p9, %p7786_p8 }
  0x54   :  { %p7789_p11 = pnand %p7788_p10, %p7782_p7 }
  0x56   :  { %7792 = shalt.err (!%p7789_p11)
}
  0x57   :  { %54 = dma.hbm_to_vmem [thread:$0]  %s8284_s2, 128, %s52_s17, [#allocation6]  }
  0x58   :  { %s7793_s30 = scalar_lea.hbm %s8287_s5, 32768 }
  0x59   :  { %p7794_p12 = scmp.ne.s32.totalorder %s8287_s5, %s7793_s30  ;;  %p7797_p13 = scmp.lt.u32.totalorder %s7793_s30, %s8287_s5 }
  0x5b   :  { %p7799_p0 = pnand %p7797_p13, %p7794_p12 }
  0x5d   :  { %7802 = shalt.err (!%p7799_p0)
}
  0x5e   :  { %s7803_s19 = scalar_lea.vmem %s8003_s13, 32768  ;;  %p7808_p2 = scmp.lt.s32.totalorder %s8003_s13, %s8003_s13 }
  0x5f   :  { %p7804_p1 = scmp.ne.s32.totalorder %s8003_s13, %s7803_s19  ;;  %p7809_p3 = scmp.lt.s32.totalorder %s7803_s19, %s7803_s19 }
  0x61   :  { %p7810_p4 = por %p7809_p3, %p7808_p2 }
  0x63   :  { %p7811_p5 = pnand %p7810_p4, %p7804_p1 }
  0x65   :  { %7814 = shalt.err (!%p7811_p5)
}
  0x66   :  { %80 = dma.hbm_to_vmem [thread:$0]  %s8287_s5, 32768, %s8003_s13, [#allocation9], %s7870_s27, %s7870_s27, %s7871_s28  }
  0x67   :  { %s7881_s20 = smov [#allocation13]   ;;  %s7815_s18 = scalar_lea.hbm %s8291_s9, 3072 }
  0x68   :  { %s102_s21 = sshll.u32 %s7881_s20, 4  ;;  %p7816_p6 = scmp.ne.s32.totalorder %s8291_s9, %s7815_s18  ;;  %s103_s21 = int_to_ptr.vmem [resolvable:$true] %s102_s21 }
  0x69   :  { %p7819_p7 = scmp.lt.u32.totalorder %s7815_s18, %s8291_s9 }
  0x6b   :  { %p7821_p8 = pnand %p7819_p7, %p7816_p6 }
  0x6d   :  { %7824 = shalt.err (!%p7821_p8)
}
  0x6e   :  { %s7825_s26 = scalar_lea.vmem %s103_s21, 3072  ;;  %p7830_p10 = scmp.lt.s32.totalorder %s103_s21, %s103_s21 }
  0x6f   :  { %p7826_p9 = scmp.ne.s32.totalorder %s103_s21, %s7825_s26  ;;  %p7831_p11 = scmp.lt.s32.totalorder %s7825_s26, %s7825_s26 }
  0x71   :  { %p7832_p12 = por %p7831_p11, %p7830_p10 }
  0x73   :  { %p7833_p13 = pnand %p7832_p12, %p7826_p9 }
  0x75   :  { %7836 = shalt.err (!%p7833_p13)
}
  0x76   :  { %108 = dma.hbm_to_vmem [thread:$0]  %s8291_s9, 3072, %s103_s21, [#allocation12], %s7877_s7, %s7877_s7, %s7878_s15  }
  0x77   :  { %7859 = dma.done.wait [#allocation3], 128  }
  0x78   :  { %7860 = vsyncadd [#allocation3], 4294967168 }
  0x79   :  { %7861 = dma.done.wait [#allocation6], 8320  }
  0x7a   :  { %7862 = vsyncadd [#allocation6], 4294958976 }
  0x7b   :  { %7863 = dma.done.wait [#allocation9], 65536  }
  0x7c   :  { %7864 = vsyncadd [#allocation9], 4294901760 }
  0x7d   :  { %7865 = dma.done.wait [#allocation12], 27648  }
  0x7e   :  { %7866 = vsyncadd [#allocation12], 4294939648  ;;  %v7882_v0 = vmov 0   ;;  %v135_v1 = vld [vmem:[#allocation5] sm:$0xff]  ;;  %v137_v3 = vld [vmem:[#allocation5 + $0x10] sm:$0xff]  ;;  %vm7884_vm0 = vmmov 0  }
  0x7f   :  { %599 = vmatprep.mubr.bf16.mxu1 %v7882_v0  ;;  %685 = vmatprep.mubr.bf16.mxu0 %v7882_v0  ;;  %v139_v2 = vld [vmem:[#allocation5 + $0x20] sm:$0xff]  ;;  %v141_v5 = vld [vmem:[#allocation5 + $0x30] sm:$0xff]  ;;  %v136_v63 = vld [vmem:[#allocation5 + $0x8] sm:$0xff]  ;;  %s7885_s12 = smov [#allocation14]  }
  0x80   :  { %v6413_v4 = vcombine.high %v135_v1, %v139_v2  ;;  %v6412_v6 = vcombine.low %v135_v1, %v139_v2  ;;  %v143_v7 = vld [vmem:[#allocation5 + $0x40] sm:$0xff]  ;;  %v6417_v9 = vcombine.high %v137_v3, %v141_v5  ;;  %v6416_v10 = vcombine.low %v137_v3, %v141_v5  ;;  %v145_v12 = vld [vmem:[#allocation5 + $0x50] sm:$0xff]  ;;  %v140_v1 = vld [vmem:[#allocation5 + $0x28] sm:$0xff]  ;;  %s6396_s14 = sshll.u32 %s7885_s12, 4  ;;  %s6397_s14 = int_to_ptr.vmem [resolvable:$true] %s6396_s14 }
  0x81   :  { %v147_v8 = vld [vmem:[#allocation5 + $0x60] sm:$0xff]  ;;  %v149_v13 = vld [vmem:[#allocation5 + $0x70] sm:$0xff]  ;;  %v759_v2 = vld [vmem:[#allocation8] sm:$0xff]  ;;  %s7837_s16 = scalar_lea.vmem %s6397_s14, 128  ;;  %p7842_p1 = scmp.lt.s32.totalorder %s6397_s14, %s6397_s14 }
  0x82   :  { %v6421_v11 = vcombine.high %v143_v7, %v147_v8  ;;  %v151_v14 = vld [vmem:[#allocation5 + $0x80] sm:$0xff]  ;;  %567 = vmatprep.subr.bf16.mxu1 %v6413_v4  ;;  %v6425_v15 = vcombine.high %v145_v12, %v149_v13  ;;  %v153_v17 = vld [vmem:[#allocation5 + $0x90] sm:$0xff]  ;;  %653 = vmatprep.subr.bf16.mxu0 %v6417_v9  ;;  %v6420_v19 = vcombine.low %v143_v7, %v147_v8  ;;  %v763_v3 = vld [vmem:[#allocation8 + $0x20] sm:$0xff]  ;;  %p7838_p0 = scmp.ne.s32.totalorder %s6397_s14, %s7837_s16  ;;  %p7843_p2 = scmp.lt.s32.totalorder %s7837_s16, %s7837_s16 }
  0x83   :  { %v155_v16 = vld [vmem:[#allocation5 + $0xa0] sm:$0xff]  ;;  %v157_v18 = vld [vmem:[#allocation5 + $0xb0] sm:$0xff]  ;;  %568 = vmatpush1.bf16.msra.mxu1 %v6412_v6  ;;  %654 = vmatpush1.bf16.msra.mxu0 %v6416_v10  ;;  %v6424_v20 = vcombine.low %v145_v12, %v149_v13  ;;  %v6415_v6 = vcombine.high %v136_v63, %v140_v1  ;;  %v144_v7 = vld [vmem:[#allocation5 + $0x48] sm:$0xff]  ;;  %v6477_v9 = vcombine.high %v759_v2, %v763_v3 }
  0x84   :  { %569 = vmatprep.subr.bf16.mxu1 %v6421_v11  ;;  %v6429_v21 = vcombine.high %v151_v14, %v155_v16  ;;  %655 = vmatprep.subr.bf16.mxu0 %v6425_v15  ;;  %v6433_v22 = vcombine.high %v153_v17, %v157_v18  ;;  %v159_v23 = vld [vmem:[#allocation5 + $0xc0] sm:$0xff]  ;;  %v161_v25 = vld [vmem:[#allocation5 + $0xd0] sm:$0xff]  ;;  %v6428_v27 = vcombine.low %v151_v14, %v155_v16  ;;  %v148_v8 = vld [vmem:[#allocation5 + $0x68] sm:$0xff]  ;;  %p7844_p3 = por %p7843_p2, %p7842_p1 }
  0x85   :  { %v163_v24 = vld [vmem:[#allocation5 + $0xe0] sm:$0xff]  ;;  %v165_v26 = vld [vmem:[#allocation5 + $0xf0] sm:$0xff]  ;;  %v6432_v28 = vcombine.low %v153_v17, %v157_v18  ;;  %v8054_v10 = vld [vmem:[#allocation2] sm:$0xff]   ;;  %v6414_v11 = vcombine.low %v136_v63, %v140_v1  ;;  %v6423_v14 = vcombine.high %v144_v7, %v148_v8  ;;  %v6476_v17 = vcombine.low %v759_v2, %v763_v3 }
  0x86   :  { %v6437_v29 = vcombine.high %v159_v23, %v163_v24  ;;  %v6441_v30 = vcombine.high %v161_v25, %v165_v26  ;;  %v167_v31 = vld [vmem:[#allocation5 + $0x100] sm:$0xff]  ;;  %v169_v33 = vld [vmem:[#allocation5 + $0x110] sm:$0xff]  ;;  %v6436_v35 = vcombine.low %v159_v23, %v163_v24  ;;  %v6440_v36 = vcombine.low %v161_v25, %v165_v26  ;;  %v767_v12 = vld [vmem:[#allocation8 + $0x40] sm:$0xff]  ;;  %p7845_p4 = pnand %p7844_p3, %p7838_p0 }
  0x87   :  { %570 = vmatpush1.bf16.msra.mxu1 %v6420_v19  ;;  %656 = vmatpush1.bf16.msra.mxu0 %v6424_v20  ;;  %v171_v32 = vld [vmem:[#allocation5 + $0x120] sm:$0xff]  ;;  %v173_v34 = vld [vmem:[#allocation5 + $0x130] sm:$0xff]  ;;  %v771_v13 = vld [vmem:[#allocation8 + $0x60] sm:$0xff]  ;;  %v6422_v19 = vcombine.low %v144_v7, %v148_v8 }
  0x88   :  { %571 = vmatprep.subr.bf16.mxu1 %v6429_v21  ;;  %657 = vmatprep.subr.bf16.mxu0 %v6433_v22  ;;  %v6445_v37 = vcombine.high %v167_v31, %v171_v32  ;;  %v6449_v38 = vcombine.high %v169_v33, %v173_v34  ;;  %v175_v39 = vld [vmem:[#allocation5 + $0x140] sm:$0xff]  ;;  %v177_v41 = vld [vmem:[#allocation5 + $0x150] sm:$0xff]  ;;  %v6444_v43 = vcombine.low %v167_v31, %v171_v32  ;;  %v152_v15 = vld [vmem:[#allocation5 + $0x88] sm:$0xff] }
  0x89   :  { %v179_v40 = vld [vmem:[#allocation5 + $0x160] sm:$0xff]  ;;  %v181_v42 = vld [vmem:[#allocation5 + $0x170] sm:$0xff]  ;;  %v6448_v44 = vcombine.low %v169_v33, %v173_v34  ;;  %v156_v16 = vld [vmem:[#allocation5 + $0xa8] sm:$0xff]  ;;  %v6485_v18 = vcombine.high %v767_v12, %v771_v13  ;;  %v6484_v25 = vcombine.low %v767_v12, %v771_v13 }
  0x8a   :  { %v6453_v45 = vcombine.high %v175_v39, %v179_v40  ;;  %v6457_v46 = vcombine.high %v177_v41, %v181_v42  ;;  %v183_v47 = vld [vmem:[#allocation5 + $0x180] sm:$0xff]  ;;  %v185_v49 = vld [vmem:[#allocation5 + $0x190] sm:$0xff]  ;;  %v6452_v51 = vcombine.low %v175_v39, %v179_v40  ;;  %v6456_v52 = vcombine.low %v177_v41, %v181_v42  ;;  %v775_v20 = vld [vmem:[#allocation8 + $0x80] sm:$0xff] }
  0x8b   :  { %572 = vmatpush1.bf16.msra.mxu1 %v6428_v27  ;;  %658 = vmatpush1.bf16.msra.mxu0 %v6432_v28  ;;  %v187_v48 = vld [vmem:[#allocation5 + $0x1a0] sm:$0xff]  ;;  %v189_v50 = vld [vmem:[#allocation5 + $0x1b0] sm:$0xff]  ;;  %v779_v21 = vld [vmem:[#allocation8 + $0xa0] sm:$0xff]  ;;  %v6431_v22 = vcombine.high %v152_v15, %v156_v16 }
  0x8c   :  { %573 = vmatprep.subr.bf16.mxu1 %v6437_v29  ;;  %659 = vmatprep.subr.bf16.mxu0 %v6441_v30  ;;  %v6461_v53 = vcombine.high %v183_v47, %v187_v48  ;;  %v6465_v54 = vcombine.high %v185_v49, %v189_v50  ;;  %v191_v55 = vld [vmem:[#allocation5 + $0x1c0] sm:$0xff]  ;;  %v193_v57 = vld [vmem:[#allocation5 + $0x1d0] sm:$0xff]  ;;  %v6460_v59 = vcombine.low %v183_v47, %v187_v48  ;;  %v160_v23 = vld [vmem:[#allocation5 + $0xc8] sm:$0xff] }
  0x8d   :  { %v195_v56 = vld [vmem:[#allocation5 + $0x1e0] sm:$0xff]  ;;  %v197_v58 = vld [vmem:[#allocation5 + $0x1f0] sm:$0xff]  ;;  %v6464_v60 = vcombine.low %v185_v49, %v189_v50  ;;  %v164_v24 = vld [vmem:[#allocation5 + $0xe8] sm:$0xff]  ;;  %v6493_v26 = vcombine.high %v775_v20, %v779_v21  ;;  %v6430_v29 = vcombine.low %v152_v15, %v156_v16  ;;  %v6492_v33 = vcombine.low %v775_v20, %v779_v21 }
  0x8e   :  { %v6469_v61 = vcombine.high %v191_v55, %v195_v56  ;;  %v6473_v62 = vcombine.high %v193_v57, %v197_v58  ;;  %v6468_v4 = vcombine.low %v191_v55, %v195_v56  ;;  %v6472_v5 = vcombine.low %v193_v57, %v197_v58  ;;  %v783_v27 = vld [vmem:[#allocation8 + $0xc0] sm:$0xff]  ;;  %v142_v63 = vld [vmem:[#allocation5 + $0x38] sm:$0xff] }
  0x8f   :  { %574 = vmatpush1.bf16.msra.mxu1 %v6436_v35  ;;  %660 = vmatpush1.bf16.msra.mxu0 %v6440_v36  ;;  %v787_v28 = vld [vmem:[#allocation8 + $0xe0] sm:$0xff]  ;;  %v6439_v32 = vcombine.high %v160_v23, %v164_v24  ;;  %v146_v7 = vld [vmem:[#allocation5 + $0x58] sm:$0xff] }
  0x90   :  { %575 = vmatprep.subr.bf16.mxu1 %v6445_v37  ;;  %661 = vmatprep.subr.bf16.mxu0 %v6449_v38  ;;  %v168_v30 = vld [vmem:[#allocation5 + $0x108] sm:$0xff]  ;;  %v6501_v36 = vcombine.high %v783_v27, %v787_v28  ;;  %v6438_v37 = vcombine.low %v160_v23, %v164_v24  ;;  %v6500_v41 = vcombine.low %v783_v27, %v787_v28  ;;  %v150_v8 = vld [vmem:[#allocation5 + $0x78] sm:$0xff] }
  0x91   :  { %v172_v31 = vld [vmem:[#allocation5 + $0x128] sm:$0xff]  ;;  %v154_v16 = vld [vmem:[#allocation5 + $0x98] sm:$0xff]  ;;  %v6426_v23 = vcombine.low %v146_v7, %v150_v8 }
  0x92   :  { %v791_v34 = vld [vmem:[#allocation8 + $0x100] sm:$0xff]  ;;  %v6447_v40 = vcombine.high %v168_v30, %v172_v31  ;;  %v162_v24 = vld [vmem:[#allocation5 + $0xd8] sm:$0xff] }
  0x93   :  { %576 = vmatpush1.bf16.msra.mxu1 %v6444_v43  ;;  %662 = vmatpush1.bf16.msra.mxu0 %v6448_v44  ;;  %v795_v35 = vld [vmem:[#allocation8 + $0x120] sm:$0xff] }
  0x94   :  { %577 = vmatprep.subr.bf16.mxu1 %v6453_v45  ;;  %663 = vmatprep.subr.bf16.mxu0 %v6457_v46  ;;  %v176_v38 = vld [vmem:[#allocation5 + $0x148] sm:$0xff]  ;;  %v6509_v44 = vcombine.high %v791_v34, %v795_v35  ;;  %v6446_v45 = vcombine.low %v168_v30, %v172_v31  ;;  %v6508_v49 = vcombine.low %v791_v34, %v795_v35 }
  0x95   :  { %v180_v39 = vld [vmem:[#allocation5 + $0x168] sm:$0xff] }
  0x96   :  { %v799_v42 = vld [vmem:[#allocation8 + $0x140] sm:$0xff]  ;;  %v6455_v48 = vcombine.high %v176_v38, %v180_v39 }
  0x97   :  { %578 = vmatpush1.bf16.msra.mxu1 %v6452_v51  ;;  %664 = vmatpush1.bf16.msra.mxu0 %v6456_v52  ;;  %v803_v43 = vld [vmem:[#allocation8 + $0x160] sm:$0xff] }
  0x98   :  { %579 = vmatprep.subr.bf16.mxu1 %v6461_v53  ;;  %665 = vmatprep.subr.bf16.mxu0 %v6465_v54  ;;  %v184_v46 = vld [vmem:[#allocation5 + $0x188] sm:$0xff]  ;;  %v6517_v52 = vcombine.high %v799_v42, %v803_v43  ;;  %v6454_v53 = vcombine.low %v176_v38, %v180_v39  ;;  %v6516_v57 = vcombine.low %v799_v42, %v803_v43  ;;  %v178_v39 = vld [vmem:[#allocation5 + $0x158] sm:$0xff] }
  0x99   :  { %v188_v47 = vld [vmem:[#allocation5 + $0x1a8] sm:$0xff] }
  0x9a   :  { %v807_v50 = vld [vmem:[#allocation8 + $0x180] sm:$0xff]  ;;  %v6463_v56 = vcombine.high %v184_v46, %v188_v47 }
  0x9b   :  { %580 = vmatpush1.bf16.msra.mxu1 %v6460_v59  ;;  %666 = vmatpush1.bf16.msra.mxu0 %v6464_v60  ;;  %v811_v51 = vld [vmem:[#allocation8 + $0x1a0] sm:$0xff] }
  0x9c   :  { %581 = vmatprep.subr.bf16.mxu1 %v6469_v61  ;;  %667 = vmatprep.subr.bf16.mxu0 %v6473_v62  ;;  %v192_v54 = vld [vmem:[#allocation5 + $0x1c8] sm:$0xff]  ;;  %v6525_v60 = vcombine.high %v807_v50, %v811_v51  ;;  %v6462_v61 = vcombine.low %v184_v46, %v188_v47  ;;  %v138_v62 = vld [vmem:[#allocation5 + $0x18] sm:$0xff]  ;;  %v6524_v2 = vcombine.low %v807_v50, %v811_v51 }
  0x9d   :  { %v196_v55 = vld [vmem:[#allocation5 + $0x1e8] sm:$0xff]  ;;  %v6418_v15 = vcombine.low %v138_v62, %v142_v63  ;;  %v190_v46 = vld [vmem:[#allocation5 + $0x1b8] sm:$0xff] }
  0x9e   :  { %v815_v58 = vld [vmem:[#allocation8 + $0x1c0] sm:$0xff]  ;;  %v6471_v1 = vcombine.high %v192_v54, %v196_v55  ;;  %v194_v50 = vld [vmem:[#allocation5 + $0x1d8] sm:$0xff] }
  0x9f   :  { %582 = vmatpush1.bf16.msra.mxu1 %v6468_v4  ;;  %668 = vmatpush1.bf16.msra.mxu0 %v6472_v5  ;;  %v819_v59 = vld [vmem:[#allocation8 + $0x1e0] sm:$0xff]  ;;  %v198_v51 = vld [vmem:[#allocation5 + $0x1f8] sm:$0xff] }
  0xa0   :  { %610 = vmatprep.subr.bf16.mxu1 %v6415_v6  ;;  %2337 = vmatprep.subr.bf16.mxu0 %v6477_v9  ;;  %v823_v3 = vld [vmem:[#allocation8 + $0x200] sm:$0xff]  ;;  %v6533_v5 = vcombine.high %v815_v58, %v819_v59  ;;  %v6470_v6 = vcombine.low %v192_v54, %v196_v55  ;;  %v6419_v9 = vcombine.high %v138_v62, %v142_v63  ;;  %v760_v54 = vld [vmem:[#allocation8 + $0x8] sm:$0xff] }
  0xa1   :  { %v827_v4 = vld [vmem:[#allocation8 + $0x220] sm:$0xff]  ;;  %v764_v55 = vld [vmem:[#allocation8 + $0x28] sm:$0xff] }
  0xa2   :  { %600 = vmatmul.mubr.bf16.vlgmr.msra.gmra.mrb[0].mxu1 %v8054_v10  ;;  %686 = vmatmul.mubr.bf16.vlgmr.msra.gmra.mrb[0].mxu0 %v8054_v10  ;;  %v831_v12 = vld [vmem:[#allocation8 + $0x240] sm:$0xff]  ;;  %v776_v62 = vld [vmem:[#allocation8 + $0x88] sm:$0xff] }
  0xa3   :  { %611 = vmatpush1.bf16.msra.mxu1 %v6414_v11  ;;  %642 = vmatprep.mubr.bf16.mxu1 %v7882_v0  ;;  %v6532_v11 = vcombine.low %v815_v58, %v819_v59  ;;  %v835_v13 = vld [vmem:[#allocation8 + $0x260] sm:$0xff]  ;;  %v768_v58 = vld [vmem:[#allocation8 + $0x48] sm:$0xff] }
  0xa4   :  { %612 = vmatprep.subr.bf16.mxu1 %v6423_v14  ;;  %2338 = vmatpush1.bf16.msra.mxu0 %v6476_v17  ;;  %v6541_v14 = vcombine.high %v823_v3, %v827_v4  ;;  %v158_v17 = vld [vmem:[#allocation5 + $0xb8] sm:$0xff]  ;;  %v839_v20 = vld [vmem:[#allocation8 + $0x280] sm:$0xff]  ;;  %v6548_v27 = vcombine.low %v831_v12, %v835_v13  ;;  %v772_v59 = vld [vmem:[#allocation8 + $0x68] sm:$0xff] }
  0xa5   :  { %2339 = vmatprep.subr.bf16.mxu0 %v6485_v18  ;;  %v6427_v18 = vcombine.high %v146_v7, %v150_v8  ;;  %v843_v21 = vld [vmem:[#allocation8 + $0x2a0] sm:$0xff]  ;;  %v6434_v31 = vcombine.low %v154_v16, %v158_v17  ;;  %v780_v63 = vld [vmem:[#allocation8 + $0xa8] sm:$0xff] }
  0xa6   :  { %v847_v28 = vld [vmem:[#allocation8 + $0x2c0] sm:$0xff]  ;;  %v6557_v30 = vcombine.high %v839_v20, %v843_v21  ;;  %v6556_v35 = vcombine.low %v839_v20, %v843_v21  ;;  %v792_v7 = vld [vmem:[#allocation8 + $0x108] sm:$0xff] }
  0xa7   :  { %613 = vmatpush1.bf16.msra.mxu1 %v6422_v19  ;;  %v6540_v19 = vcombine.low %v823_v3, %v827_v4  ;;  %v784_v3 = vld [vmem:[#allocation8 + $0xc8] sm:$0xff]  ;;  %v867_v20 = vld [vmem:[#allocation8 + $0x360] sm:$0xff] }
  0xa8   :  { %614 = vmatprep.subr.bf16.mxu1 %v6431_v22  ;;  %2340 = vmatpush1.bf16.msra.mxu0 %v6484_v25  ;;  %v6549_v22 = vcombine.high %v831_v12, %v835_v13  ;;  %v166_v25 = vld [vmem:[#allocation5 + $0xf8] sm:$0xff]  ;;  %v788_v4 = vld [vmem:[#allocation8 + $0xe8] sm:$0xff] }
  0xa9   :  { %2341 = vmatprep.subr.bf16.mxu0 %v6493_v26  ;;  %v6435_v26 = vcombine.high %v154_v16, %v158_v17  ;;  %v6443_v34 = vcombine.high %v162_v24, %v166_v25  ;;  %v6442_v38 = vcombine.low %v162_v24, %v166_v25  ;;  %v796_v8 = vld [vmem:[#allocation8 + $0x128] sm:$0xff] }
  0xaa   :  { %v800_v12 = vld [vmem:[#allocation8 + $0x148] sm:$0xff] }
  0xab   :  { %615 = vmatpush1.bf16.msra.mxu1 %v6430_v29  ;;  %v851_v29 = vld [vmem:[#allocation8 + $0x2e0] sm:$0xff]  ;;  %v804_v13 = vld [vmem:[#allocation8 + $0x168] sm:$0xff] }
  0xac   :  { %616 = vmatprep.subr.bf16.mxu1 %v6439_v32  ;;  %2342 = vmatpush1.bf16.msra.mxu0 %v6492_v33  ;;  %v170_v32 = vld [vmem:[#allocation5 + $0x118] sm:$0xff]  ;;  %v6564_v42 = vcombine.low %v847_v28, %v851_v29  ;;  %v812_v16 = vld [vmem:[#allocation8 + $0x1a8] sm:$0xff]  ;;  %v6519_v17 = vcombine.high %v800_v12, %v804_v13 }
  0xad   :  { %2343 = vmatprep.subr.bf16.mxu0 %v6501_v36  ;;  %v174_v33 = vld [vmem:[#allocation5 + $0x138] sm:$0xff]  ;;  %v855_v36 = vld [vmem:[#allocation8 + $0x300] sm:$0xff] }
  0xaf   :  { %617 = vmatpush1.bf16.msra.mxu1 %v6438_v37  ;;  %v859_v37 = vld [vmem:[#allocation8 + $0x320] sm:$0xff] }
  0xb0   :  { %618 = vmatprep.subr.bf16.mxu1 %v6447_v40  ;;  %2344 = vmatpush1.bf16.msra.mxu0 %v6500_v41  ;;  %v182_v40 = vld [vmem:[#allocation5 + $0x178] sm:$0xff]  ;;  %v6451_v41 = vcombine.high %v170_v32, %v174_v33  ;;  %v6573_v43 = vcombine.high %v855_v36, %v859_v37 }
  0xb1   :  { %2345 = vmatprep.subr.bf16.mxu0 %v6509_v44  ;;  %v6450_v44 = vcombine.low %v170_v32, %v174_v33  ;;  %v6459_v47 = vcombine.high %v178_v39, %v182_v40 }
  0xb3   :  { %619 = vmatpush1.bf16.msra.mxu1 %v6446_v45  ;;  %v186_v45 = vld [vmem:[#allocation5 + $0x198] sm:$0xff] }
  0xb4   :  { %620 = vmatprep.subr.bf16.mxu1 %v6455_v48  ;;  %2346 = vmatpush1.bf16.msra.mxu0 %v6508_v49  ;;  %v6572_v48 = vcombine.low %v855_v36, %v859_v37  ;;  %v6458_v49 = vcombine.low %v178_v39, %v182_v40  ;;  %v883_v36 = vld [vmem:[#allocation8 + $0x3e0] sm:$0xff]  ;;  %v836_v39 = vld [vmem:[#allocation8 + $0x268] sm:$0xff] }
  0xb5   :  { %2347 = vmatprep.subr.bf16.mxu0 %v6517_v52  ;;  %v6467_v52 = vcombine.high %v186_v45, %v190_v46 }
  0xb7   :  { %621 = vmatpush1.bf16.msra.mxu1 %v6454_v53  ;;  %v6466_v53 = vcombine.low %v186_v45, %v190_v46 }
  0xb8   :  { %622 = vmatprep.subr.bf16.mxu1 %v6463_v56  ;;  %2348 = vmatpush1.bf16.msra.mxu0 %v6516_v57  ;;  %v6475_v56 = vcombine.high %v194_v50, %v198_v51  ;;  %v6474_v57 = vcombine.low %v194_v50, %v198_v51 }
  0xb9   :  { %2349 = vmatprep.subr.bf16.mxu0 %v6525_v60  ;;  %v6479_v60 = vcombine.high %v760_v54, %v764_v55 }
  0xbb   :  { %623 = vmatpush1.bf16.msra.mxu1 %v6462_v61  ;;  %v6478_v61 = vcombine.low %v760_v54, %v764_v55  ;;  %v848_v54 = vld [vmem:[#allocation8 + $0x2c8] sm:$0xff] }
  0xbc   :  { %624 = vmatprep.subr.bf16.mxu1 %v6471_v1  ;;  %2350 = vmatpush1.bf16.msra.mxu0 %v6524_v2  ;;  %v6487_v1 = vcombine.high %v768_v58, %v772_v59  ;;  %v6486_v2 = vcombine.low %v768_v58, %v772_v59  ;;  %v852_v55 = vld [vmem:[#allocation8 + $0x2e8] sm:$0xff] }
  0xbd   :  { %2351 = vmatprep.subr.bf16.mxu0 %v6533_v5  ;;  %v6495_v5 = vcombine.high %v776_v62, %v780_v63  ;;  %v856_v58 = vld [vmem:[#allocation8 + $0x308] sm:$0xff] }
  0xbe   :  { %v860_v59 = vld [vmem:[#allocation8 + $0x328] sm:$0xff] }
  0xbf   :  { %625 = vmatpush1.bf16.msra.mxu1 %v6470_v6  ;;  %v6494_v6 = vcombine.low %v776_v62, %v780_v63  ;;  %v864_v62 = vld [vmem:[#allocation8 + $0x348] sm:$0xff] }
  0xc0   :  { %696 = vmatprep.subr.bf16.mxu1 %v6419_v9  ;;  %2352 = vmatpush1.bf16.msra.mxu0 %v6532_v11  ;;  %v6503_v9 = vcombine.high %v784_v3, %v788_v4  ;;  %v6502_v11 = vcombine.low %v784_v3, %v788_v4  ;;  %v868_v63 = vld [vmem:[#allocation8 + $0x368] sm:$0xff] }
  0xc1   :  { %2353 = vmatprep.subr.bf16.mxu0 %v6541_v14  ;;  %v6511_v14 = vcombine.high %v792_v7, %v796_v8  ;;  %v872_v3 = vld [vmem:[#allocation8 + $0x388] sm:$0xff] }
  0xc2   :  { %643 = vmatmul.mubr.bf16.vlgmr.msra.gmra.mrb[4].mxu1 %v8054_v10  ;;  %v876_v4 = vld [vmem:[#allocation8 + $0x3a8] sm:$0xff] }
  0xc3   :  { %697 = vmatpush1.bf16.msra.mxu1 %v6418_v15  ;;  %728 = vmatprep.mubr.bf16.mxu1 %v7882_v0  ;;  %v6565_v0 = vcombine.high %v847_v28, %v851_v29  ;;  %v808_v15 = vld [vmem:[#allocation8 + $0x188] sm:$0xff]  ;;  %v871_v28 = vld [vmem:[#allocation8 + $0x380] sm:$0xff] }
  0xc4   :  { %698 = vmatprep.subr.bf16.mxu1 %v6427_v18  ;;  %2354 = vmatpush1.bf16.msra.mxu0 %v6540_v19  ;;  %v6518_v18 = vcombine.low %v800_v12, %v804_v13  ;;  %v863_v19 = vld [vmem:[#allocation8 + $0x340] sm:$0xff]  ;;  %v6527_v21 = vcombine.high %v808_v15, %v812_v16 }
  0xc5   :  { %2355 = vmatprep.subr.bf16.mxu0 %v6549_v22  ;;  %v816_v22 = vld [vmem:[#allocation8 + $0x1c8] sm:$0xff]  ;;  %v6581_v24 = vcombine.high %v863_v19, %v867_v20  ;;  %v6580_v25 = vcombine.low %v863_v19, %v867_v20  ;;  %v875_v29 = vld [vmem:[#allocation8 + $0x3a0] sm:$0xff] }
  0xc6   :  { %v6589_v32 = vcombine.high %v871_v28, %v875_v29  ;;  %v6588_v33 = vcombine.low %v871_v28, %v875_v29 }
  0xc7   :  { %699 = vmatpush1.bf16.msra.mxu1 %v6426_v23  ;;  %v820_v23 = vld [vmem:[#allocation8 + $0x1e8] sm:$0xff] }
  0xc8   :  { %700 = vmatprep.subr.bf16.mxu1 %v6435_v26  ;;  %2356 = vmatpush1.bf16.msra.mxu0 %v6548_v27  ;;  %v6526_v26 = vcombine.low %v808_v15, %v812_v16  ;;  %v824_v27 = vld [vmem:[#allocation8 + $0x208] sm:$0xff]  ;;  %v8083_v16 = vld [vmem:[#allocation7] sm:$0xff] }
  0xc9   :  { %2357 = vmatprep.subr.bf16.mxu0 %v6557_v30  ;;  %v6535_v30 = vcombine.high %v816_v22, %v820_v23 }
  0xcb   :  { %701 = vmatpush1.bf16.msra.mxu1 %v6434_v31  ;;  %v828_v31 = vld [vmem:[#allocation8 + $0x228] sm:$0xff] }
  0xcc   :  { %702 = vmatprep.subr.bf16.mxu1 %v6443_v34  ;;  %2358 = vmatpush1.bf16.msra.mxu0 %v6556_v35  ;;  %v6534_v34 = vcombine.low %v816_v22, %v820_v23  ;;  %v879_v35 = vld [vmem:[#allocation8 + $0x3c0] sm:$0xff]  ;;  %v6543_v37 = vcombine.high %v824_v27, %v828_v31 }
  0xcd   :  { %2359 = vmatprep.subr.bf16.mxu0 %v6565_v0  ;;  %v6597_v0 = vcombine.high %v879_v35, %v883_v36  ;;  %v6596_v40 = vcombine.low %v879_v35, %v883_v36 }
  0xcf   :  { %703 = vmatpush1.bf16.msra.mxu1 %v6442_v38  ;;  %v832_v38 = vld [vmem:[#allocation8 + $0x248] sm:$0xff] }
  0xd0   :  { %704 = vmatprep.subr.bf16.mxu1 %v6451_v41  ;;  %2360 = vmatpush1.bf16.msra.mxu0 %v6564_v42  ;;  %v6542_v41 = vcombine.low %v824_v27, %v828_v31  ;;  %v8062_v42 = vld [vmem:[#allocation8 + $0x400] sm:$0xff]  ;;  %v6551_v45 = vcombine.high %v832_v38, %v836_v39 }
  0xd1   :  { %2361 = vmatprep.subr.bf16.mxu0 %v6573_v43  ;;  %v8064_v43 = vld [vmem:[#allocation8 + $0x420] sm:$0xff] }
  0xd2   :  { %v6605_v46 = vcombine.high %v8062_v42, %v8064_v43  ;;  %v6604_v50 = vcombine.low %v8062_v42, %v8064_v43 }
  0xd3   :  { %705 = vmatpush1.bf16.msra.mxu1 %v6450_v44  ;;  %v8066_v44 = vld [vmem:[#allocation8 + $0x408] sm:$0xff] }
  0xd4   :  { %706 = vmatprep.subr.bf16.mxu1 %v6459_v47  ;;  %2362 = vmatpush1.bf16.msra.mxu0 %v6572_v48  ;;  %v8070_v47 = vld [vmem:[#allocation8 + $0x428] sm:$0xff] }
  0xd5   :  { %2363 = vmatprep.subr.bf16.mxu0 %v6581_v24  ;;  %v840_v48 = vld [vmem:[#allocation8 + $0x288] sm:$0xff]  ;;  %v6606_v51 = vcombine.low %v8066_v44, %v8070_v47  ;;  %v6607_v13 = vcombine.high %v8066_v44, %v8070_v47  ;;  %v919_v44 = vld [vmem:[#allocation8 + $0x500] sm:$0xff] }
  0xd6   :  { %v923_v47 = vld [vmem:[#allocation8 + $0x520] sm:$0xff] }
  0xd7   :  { %707 = vmatpush1.bf16.msra.mxu1 %v6458_v49  ;;  %v844_v49 = vld [vmem:[#allocation8 + $0x2a8] sm:$0xff] }
  0xd8   :  { %708 = vmatprep.subr.bf16.mxu1 %v6467_v52  ;;  %2364 = vmatpush1.bf16.msra.mxu0 %v6580_v25  ;;  %v6550_v52 = vcombine.low %v832_v38, %v836_v39 }
  0xd9   :  { %2365 = vmatprep.subr.bf16.mxu0 %v6589_v32 }
  0xdb   :  { %709 = vmatpush1.bf16.msra.mxu1 %v6466_v53  ;;  %v6559_v53 = vcombine.high %v840_v48, %v844_v49 }
  0xdc   :  { %710 = vmatprep.subr.bf16.mxu1 %v6475_v56  ;;  %2366 = vmatpush1.bf16.msra.mxu0 %v6588_v33  ;;  %v6558_v56 = vcombine.low %v840_v48, %v844_v49  ;;  %v895_v49 = vld [vmem:[#allocation8 + $0x440] sm:$0xff] }
  0xdd   :  { %2367 = vmatprep.subr.bf16.mxu0 %v6597_v0 }
  0xdf   :  { %711 = vmatpush1.bf16.msra.mxu1 %v6474_v57  ;;  %v6567_v57 = vcombine.high %v848_v54, %v852_v55 }
  0xe0   :  { %2423 = vmatprep.subr.bf16.mxu1 %v6479_v60  ;;  %2368 = vmatpush1.bf16.msra.mxu0 %v6596_v40  ;;  %v6566_v60 = vcombine.low %v848_v54, %v852_v55  ;;  %v899_v54 = vld [vmem:[#allocation8 + $0x460] sm:$0xff]  ;;  %v896_v55 = vld [vmem:[#allocation8 + $0x448] sm:$0xff] }
  0xe1   :  { %2380 = vmatprep.subr.bf16.mxu0 %v6605_v46 }
  0xe2   :  { %729 = vmatmul.mubr.bf16.vlgmr.msra.gmra.mrb[8].mxu1 %v8054_v10  ;;  %v6510_v10 = vcombine.low %v792_v7, %v796_v8  ;;  %v880_v7 = vld [vmem:[#allocation8 + $0x3c8] sm:$0xff] }
  0xe3   :  { %2424 = vmatpush1.bf16.msra.mxu1 %v6478_v61  ;;  %v6575_v61 = vcombine.high %v856_v58, %v860_v59  ;;  %v884_v8 = vld [vmem:[#allocation8 + $0x3e8] sm:$0xff] }
  0xe4   :  { %2425 = vmatprep.subr.bf16.mxu1 %v6487_v1  ;;  %v6574_v1 = vcombine.low %v856_v58, %v860_v59  ;;  %v6598_v12 = vcombine.low %v880_v7, %v884_v8  ;;  %v6613_v59 = vcombine.high %v895_v49, %v899_v54 }
  0xe7   :  { %2426 = vmatpush1.bf16.msra.mxu1 %v6486_v2  ;;  %v6583_v2 = vcombine.high %v864_v62, %v868_v63 }
  0xe8   :  { %2427 = vmatprep.subr.bf16.mxu1 %v6495_v5  ;;  %v6582_v5 = vcombine.low %v864_v62, %v868_v63  ;;  %v907_v62 = vld [vmem:[#allocation8 + $0x4a0] sm:$0xff]  ;;  %v904_v63 = vld [vmem:[#allocation8 + $0x488] sm:$0xff] }
  0xeb   :  { %2428 = vmatpush1.bf16.msra.mxu1 %v6494_v6  ;;  %v6591_v6 = vcombine.high %v872_v3, %v876_v4 }
  0xec   :  { %2429 = vmatprep.subr.bf16.mxu1 %v6503_v9  ;;  %v6590_v9 = vcombine.low %v872_v3, %v876_v4 }
  0xef   :  { %2430 = vmatpush1.bf16.msra.mxu1 %v6502_v11  ;;  %v6599_v11 = vcombine.high %v880_v7, %v884_v8  ;;  %v915_v7 = vld [vmem:[#allocation8 + $0x4e0] sm:$0xff]  ;;  %v912_v8 = vld [vmem:[#allocation8 + $0x4c8] sm:$0xff] }
  0xf0   :  { %2431 = vmatprep.subr.bf16.mxu1 %v6511_v14  ;;  %v201_v14 = vlaneseq }
  0xf3   :  { %2432 = vmatpush1.bf16.msra.mxu1 %v6510_v10  ;;  %v8078_v10 = vshrl.u32 %v201_v14, 7 }
  0xf4   :  { %2433 = vmatprep.subr.bf16.mxu1 %v6519_v17 }
  0xf5   :  { %v8081_v15 = vsub.s32 0, %v8078_v10  ;;  %v8086_v17 = vsub.s32 4, %v8078_v10  ;;  %v8092_v19 = vsub.s32 5, %v8078_v10 }
  0xf7   :  { %2434 = vmatpush1.bf16.msra.mxu1 %v6518_v18  ;;  %v8089_v18 = vsub.s32 1, %v8078_v10  ;;  %v204_v20 = vrot.slane %v8083_v16, %v8081_v15  ;;  %v224_v23 = vrot.slane %v8083_v16, %v8092_v19 }
  0xf8   :  { %2435 = vmatprep.subr.bf16.mxu1 %v6527_v21  ;;  %v220_v21 = vrot.slane %v8083_v16, %v8086_v17 }
  0xf9   :  { %v208_v22 = vrot.slane %v8083_v16, %v8089_v18 }
  0xfb   :  { %2436 = vmatpush1.bf16.msra.mxu1 %v6526_v26 }
  0xfc   :  { %2437 = vmatprep.subr.bf16.mxu1 %v6535_v30 }
  0xff   :  { %2438 = vmatpush1.bf16.msra.mxu1 %v6534_v34 }
 0x100   :  { %2439 = vmatprep.subr.bf16.mxu1 %v6543_v37 }
 0x103   :  { %2440 = vmatpush1.bf16.msra.mxu1 %v6542_v41 }
 0x104   :  { %2441 = vmatprep.subr.bf16.mxu1 %v6551_v45 }
 0x107   :  { %2442 = vmatpush1.bf16.msra.mxu1 %v6550_v52 }
 0x108   :  { %2443 = vmatprep.subr.bf16.mxu1 %v6559_v53 }
 0x10b   :  { %2444 = vmatpush1.bf16.msra.mxu1 %v6558_v56  ;;  %v900_v56 = vld [vmem:[#allocation8 + $0x468] sm:$0xff] }
 0x10c   :  { %2445 = vmatprep.subr.bf16.mxu1 %v6567_v57  ;;  %v6614_v3 = vcombine.low %v896_v55, %v900_v56 }
 0x10f   :  { %2446 = vmatpush1.bf16.msra.mxu1 %v6566_v60  ;;  %v6615_v60 = vcombine.high %v896_v55, %v900_v56  ;;  %v951_v55 = vld [vmem:[#allocation8 + $0x600] sm:$0xff] }
 0x110   :  { %2447 = vmatprep.subr.bf16.mxu1 %v6575_v61  ;;  %v903_v61 = vld [vmem:[#allocation8 + $0x480] sm:$0xff] }
 0x111   :  { %v6621_v4 = vcombine.high %v903_v61, %v907_v62  ;;  %v955_v56 = vld [vmem:[#allocation8 + $0x620] sm:$0xff] }
 0x113   :  { %2448 = vmatpush1.bf16.msra.mxu1 %v6574_v1  ;;  %v908_v1 = vld [vmem:[#allocation8 + $0x4a8] sm:$0xff] }
 0x114   :  { %2449 = vmatprep.subr.bf16.mxu1 %v6583_v2  ;;  %v6612_v2 = vcombine.low %v895_v49, %v899_v54 }
 0x117   :  { %2450 = vmatpush1.bf16.msra.mxu1 %v6582_v5  ;;  %v6623_v5 = vcombine.high %v904_v63, %v908_v1 }
 0x118   :  { %2451 = vmatprep.subr.bf16.mxu1 %v6591_v6  ;;  %v911_v6 = vld [vmem:[#allocation8 + $0x4c0] sm:$0xff] }
 0x119   :  { %v6629_v42 = vcombine.high %v911_v6, %v915_v7 }
 0x11b   :  { %2452 = vmatpush1.bf16.msra.mxu1 %v6590_v9  ;;  %v916_v9 = vld [vmem:[#allocation8 + $0x4e8] sm:$0xff] }
 0x11c   :  { %2453 = vmatprep.subr.bf16.mxu1 %v6599_v11  ;;  %v6620_v11 = vcombine.low %v903_v61, %v907_v62  ;;  %v6631_v43 = vcombine.high %v912_v8, %v916_v9  ;;  %v6630_v14 = vcombine.low %v912_v8, %v916_v9 }
 0x11f   :  { %2454 = vmatpush1.bf16.msra.mxu1 %v6598_v12  ;;  %v6622_v12 = vcombine.low %v904_v63, %v908_v1  ;;  %v6669_v63 = vcombine.high %v951_v55, %v955_v56 }
 0x120   :  { %2466 = vmatprep.subr.bf16.mxu1 %v6607_v13  ;;  %v6628_v13 = vcombine.low %v911_v6, %v915_v7  ;;  %v6668_v6 = vcombine.low %v951_v55, %v955_v56  ;;  %v999_v55 = vld [vmem:[#allocation8 + $0x780] sm:$0xff] }
 0x175   :  { %v601_v24 = vpop.f32.mrb[0].mxu1  ;;  %v687_v26 = vpop.f32.mrb[0].mxu0 }
 0x176   :  { %v602_v25 = vadd.f32 %v601_v24, %v204_v20  ;;  %v603_v27 = vpop.f32.mrb[1].mxu1  ;;  %v688_v28 = vadd.f32 %v687_v26, %v220_v21  ;;  %v689_v30 = vpop.f32.mrb[1].mxu0  ;;  %v928_v24 = vld [vmem:[#allocation8 + $0x548] sm:$0xff]  ;;  %v6636_v26 = vcombine.low %v919_v44, %v923_v47 }
 0x177   :  { %v604_v29 = vadd.f32 %v603_v27, %v208_v22  ;;  %v605_v31 = vpop.f32.mrb[2].mxu1  ;;  %v690_v32 = vadd.f32 %v689_v30, %v224_v23  ;;  %v691_v34 = vpop.f32.mrb[2].mxu0  ;;  %v935_v30 = vld [vmem:[#allocation8 + $0x580] sm:$0xff] }
 0x178   :  { %v606_v33 = vadd.f32 %v605_v31, %v204_v20  ;;  %v607_v35 = vpop.f32.mrb[3].mxu1  ;;  %v739_v36 = vmax.f32 %v602_v25, %v688_v28  ;;  %v692_v37 = vadd.f32 %v691_v34, %v220_v21  ;;  %v693_v38 = vpop.f32.mrb[3].mxu0  ;;  %v6637_v20 = vcombine.high %v919_v44, %v923_v47  ;;  %v932_v25 = vld [vmem:[#allocation8 + $0x568] sm:$0xff]  ;;  %v939_v31 = vld [vmem:[#allocation8 + $0x5a0] sm:$0xff] }
 0x179   :  { %v608_v0 = vadd.f32 %v607_v35, %v208_v22  ;;  %v740_v39 = vmax.f32 %v604_v29, %v690_v32  ;;  %v694_v40 = vadd.f32 %v693_v38, %v224_v23  ;;  %v927_v22 = vld [vmem:[#allocation8 + $0x540] sm:$0xff]  ;;  %v6647_v29 = vcombine.high %v928_v24, %v932_v25  ;;  %v936_v32 = vld [vmem:[#allocation8 + $0x588] sm:$0xff] }
 0x17a   :  { %v743_v41 = vmax.f32 %v606_v33, %v692_v37  ;;  %v747_v46 = vmax.f32 %v739_v36, 0.0  ;;  %v931_v23 = vld [vmem:[#allocation8 + $0x560] sm:$0xff]  ;;  %v940_v33 = vld [vmem:[#allocation8 + $0x5a8] sm:$0xff]  ;;  %v6646_v35 = vcombine.low %v928_v24, %v932_v25  ;;  %v6653_v37 = vcombine.high %v935_v30, %v939_v31 }
 0x17b   :  { %v744_v45 = vmax.f32 %v608_v0, %v694_v40  ;;  %v748_v52 = vmax.f32 %v740_v39, 0.0  ;;  %v6645_v28 = vcombine.high %v927_v22, %v931_v23  ;;  %v6644_v34 = vcombine.low %v927_v22, %v931_v23  ;;  %v943_v38 = vld [vmem:[#allocation8 + $0x5c0] sm:$0xff] }
 0x17c   :  { %v751_v48 = vmax.f32 %v743_v41, 0.0  ;;  %v6655_v0 = vcombine.high %v936_v32, %v940_v33  ;;  %v947_v40 = vld [vmem:[#allocation8 + $0x5e0] sm:$0xff]  ;;  %v944_v41 = vld [vmem:[#allocation8 + $0x5c8] sm:$0xff]  ;;  %v6652_v49 = vcombine.low %v935_v30, %v939_v31 }
 0x17d   :  { %v752_v53 = vmax.f32 %v744_v45, 0.0  ;;  %v948_v45 = vld [vmem:[#allocation8 + $0x5e8] sm:$0xff]  ;;  %v6660_v61 = vcombine.low %v943_v38, %v947_v40 }
 0x17e   :  { %v8102_v57 = vpack.c.bf16 %v751_v48, %v747_v46  ;;  %v6663_v54 = vcombine.high %v944_v41, %v948_v45  ;;  %v6662_v62 = vcombine.low %v944_v41, %v948_v45  ;;  %v8131_v41 = vsub.s32 3, %v8078_v10 }
 0x17f   :  { %v8104_v58 = vpack.c.bf16 %v752_v53, %v748_v52  ;;  %v6654_v52 = vcombine.low %v936_v32, %v940_v33  ;;  %v6661_v53 = vcombine.high %v943_v38, %v947_v40  ;;  %v992_v38 = vld [vmem:[#allocation8 + $0x748] sm:$0xff]  ;;  %v8134_v45 = vsub.s32 7, %v8078_v10 }
 0x180   :  { %v996_v40 = vld [vmem:[#allocation8 + $0x768] sm:$0xff] }
 0x181   :  { %2369 = vmatprep.mubr.bf16.mxu0 %v8104_v58  ;;  %2455 = vmatprep.mubr.bf16.mxu1 %v8104_v58 }
 0x182   :  { %2370 = vmatmul.mubr.bf16.vlgmr.msra.gmra.mrb[4].mxu0 %v8102_v57  ;;  %2456 = vmatmul.mubr.bf16.vlgmr.msra.gmra.mrb[12].mxu1 %v8102_v57 }
 0x183   :  { %2381 = vmatpush1.bf16.msra.mxu0 %v6604_v50  ;;  %2467 = vmatpush1.bf16.msra.mxu1 %v6606_v51  ;;  %v920_v50 = vld [vmem:[#allocation8 + $0x508] sm:$0xff] }
 0x184   :  { %2382 = vmatprep.subr.bf16.mxu0 %v6613_v59  ;;  %2468 = vmatprep.subr.bf16.mxu1 %v6615_v60  ;;  %v924_v51 = vld [vmem:[#allocation8 + $0x528] sm:$0xff] }
 0x185   :  { %v6639_v21 = vcombine.high %v920_v50, %v924_v51  ;;  %v6638_v27 = vcombine.low %v920_v50, %v924_v51  ;;  %v952_v59 = vld [vmem:[#allocation8 + $0x608] sm:$0xff] }
 0x186   :  { %v956_v60 = vld [vmem:[#allocation8 + $0x628] sm:$0xff] }
 0x187   :  { %2383 = vmatpush1.bf16.msra.mxu0 %v6612_v2  ;;  %2469 = vmatpush1.bf16.msra.mxu1 %v6614_v3  ;;  %v6671_v1 = vcombine.high %v952_v59, %v956_v60  ;;  %v959_v2 = vld [vmem:[#allocation8 + $0x640] sm:$0xff]  ;;  %v6670_v7 = vcombine.low %v952_v59, %v956_v60 }
 0x188   :  { %2384 = vmatprep.subr.bf16.mxu0 %v6621_v4  ;;  %2470 = vmatprep.subr.bf16.mxu1 %v6623_v5  ;;  %v963_v3 = vld [vmem:[#allocation8 + $0x660] sm:$0xff]  ;;  %v960_v4 = vld [vmem:[#allocation8 + $0x648] sm:$0xff] }
 0x189   :  { %v964_v5 = vld [vmem:[#allocation8 + $0x668] sm:$0xff]  ;;  %v6677_v8 = vcombine.high %v959_v2, %v963_v3  ;;  %v6676_v44 = vcombine.low %v959_v2, %v963_v3  ;;  %v1003_v60 = vld [vmem:[#allocation8 + $0x7a0] sm:$0xff]  ;;  %v6710_v3 = vcombine.low %v992_v38, %v996_v40 }
 0x18a   :  { %v6679_v9 = vcombine.high %v960_v4, %v964_v5  ;;  %v6678_v47 = vcombine.low %v960_v4, %v964_v5  ;;  %v1011_v4 = vld [vmem:[#allocation8 + $0x7e0] sm:$0xff]  ;;  %v1008_v5 = vld [vmem:[#allocation8 + $0x7c8] sm:$0xff] }
 0x18b   :  { %2385 = vmatpush1.bf16.msra.mxu0 %v6620_v11  ;;  %2471 = vmatpush1.bf16.msra.mxu1 %v6622_v12  ;;  %v967_v11 = vld [vmem:[#allocation8 + $0x680] sm:$0xff] }
 0x18c   :  { %2386 = vmatprep.subr.bf16.mxu0 %v6629_v42  ;;  %2472 = vmatprep.subr.bf16.mxu1 %v6631_v43  ;;  %v971_v12 = vld [vmem:[#allocation8 + $0x6a0] sm:$0xff]  ;;  %v968_v42 = vld [vmem:[#allocation8 + $0x688] sm:$0xff] }
 0x18d   :  { %v972_v43 = vld [vmem:[#allocation8 + $0x6a8] sm:$0xff]  ;;  %v6685_v50 = vcombine.high %v967_v11, %v971_v12  ;;  %v6684_v22 = vcombine.low %v967_v11, %v971_v12 }
 0x18e   :  { %v6687_v51 = vcombine.high %v968_v42, %v972_v43  ;;  %v6686_v23 = vcombine.low %v968_v42, %v972_v43  ;;  %v6716_v43 = vcombine.low %v999_v55, %v1003_v60 }
 0x18f   :  { %2387 = vmatpush1.bf16.msra.mxu0 %v6628_v13  ;;  %2473 = vmatpush1.bf16.msra.mxu1 %v6630_v14  ;;  %v975_v13 = vld [vmem:[#allocation8 + $0x6c0] sm:$0xff] }
 0x190   :  { %2388 = vmatprep.subr.bf16.mxu0 %v6637_v20  ;;  %2474 = vmatprep.subr.bf16.mxu1 %v6639_v21  ;;  %v979_v14 = vld [vmem:[#allocation8 + $0x6e0] sm:$0xff]  ;;  %v976_v20 = vld [vmem:[#allocation8 + $0x6c8] sm:$0xff] }
 0x191   :  { %v980_v21 = vld [vmem:[#allocation8 + $0x6e8] sm:$0xff]  ;;  %v6693_v24 = vcombine.high %v975_v13, %v979_v14  ;;  %v6692_v30 = vcombine.low %v975_v13, %v979_v14 }
 0x192   :  { %v6695_v25 = vcombine.high %v976_v20, %v980_v21  ;;  %v6694_v31 = vcombine.low %v976_v20, %v980_v21 }
 0x193   :  { %2389 = vmatpush1.bf16.msra.mxu0 %v6636_v26  ;;  %2475 = vmatpush1.bf16.msra.mxu1 %v6638_v27  ;;  %v983_v26 = vld [vmem:[#allocation8 + $0x700] sm:$0xff] }
 0x194   :  { %2390 = vmatprep.subr.bf16.mxu0 %v6645_v28  ;;  %2476 = vmatprep.subr.bf16.mxu1 %v6647_v29  ;;  %v987_v27 = vld [vmem:[#allocation8 + $0x720] sm:$0xff]  ;;  %v984_v28 = vld [vmem:[#allocation8 + $0x708] sm:$0xff] }
 0x195   :  { %v8116_v36 = vpop.f32.mrb[4].mxu1  ;;  %v988_v29 = vld [vmem:[#allocation8 + $0x728] sm:$0xff]  ;;  %v6701_v32 = vcombine.high %v983_v26, %v987_v27 }
 0x196   :  { %v8118_v39 = vpop.f32.mrb[5].mxu1  ;;  %v6703_v33 = vcombine.high %v984_v28, %v988_v29 }
 0x197   :  { %v8120_v46 = vpop.f32.mrb[6].mxu1  ;;  %2391 = vmatpush1.bf16.msra.mxu0 %v6644_v34  ;;  %2477 = vmatpush1.bf16.msra.mxu1 %v6646_v35  ;;  %v991_v34 = vld [vmem:[#allocation8 + $0x740] sm:$0xff]  ;;  %v8125_v35 = vsub.s32 2, %v8078_v10 }
 0x198   :  { %v8122_v48 = vpop.f32.mrb[7].mxu1  ;;  %2392 = vmatprep.subr.bf16.mxu0 %v6653_v37  ;;  %2478 = vmatprep.subr.bf16.mxu1 %v6655_v0  ;;  %v8128_v37 = vsub.s32 6, %v8078_v10  ;;  %v995_v0 = vld [vmem:[#allocation8 + $0x760] sm:$0xff]  ;;  %v216_v10 = vrot.slane %v8083_v16, %v8131_v41 }
 0x199   :  { %v212_v56 = vrot.slane %v8083_v16, %v8125_v35  ;;  %v6708_v2 = vcombine.low %v991_v34, %v995_v0 }
 0x19a   :  { %v228_v59 = vrot.slane %v8083_v16, %v8128_v37 }
 0x19b   :  { %2393 = vmatpush1.bf16.msra.mxu0 %v6652_v49  ;;  %2479 = vmatpush1.bf16.msra.mxu1 %v6654_v52  ;;  %v6700_v49 = vcombine.low %v983_v26, %v987_v27  ;;  %v6702_v52 = vcombine.low %v984_v28, %v988_v29  ;;  %v645_v11 = vadd.f32 %v8116_v36, %v212_v56  ;;  %v761_v26 = vld [vmem:[#allocation8 + $0x10] sm:$0xff]  ;;  %v762_v28 = vld [vmem:[#allocation8 + $0x18] sm:$0xff] }
 0x19c   :  { %2394 = vmatprep.subr.bf16.mxu0 %v6661_v53  ;;  %2480 = vmatprep.subr.bf16.mxu1 %v6663_v54  ;;  %v6709_v53 = vcombine.high %v991_v34, %v995_v0  ;;  %v6711_v54 = vcombine.high %v992_v38, %v996_v40  ;;  %v649_v14 = vadd.f32 %v8120_v46, %v212_v56  ;;  %v765_v27 = vld [vmem:[#allocation8 + $0x30] sm:$0xff]  ;;  %v766_v29 = vld [vmem:[#allocation8 + $0x38] sm:$0xff] }
 0x19d   :  { %v6481_v0 = vcombine.high %v761_v26, %v765_v27  ;;  %v6483_v38 = vcombine.high %v762_v28, %v766_v29  ;;  %v769_v40 = vld [vmem:[#allocation8 + $0x50] sm:$0xff]  ;;  %v6482_v56 = vcombine.low %v762_v28, %v766_v29  ;;  %v814_v28 = vld [vmem:[#allocation8 + $0x1b8] sm:$0xff] }
 0x19f   :  { %2395 = vmatpush1.bf16.msra.mxu0 %v6660_v61  ;;  %2481 = vmatpush1.bf16.msra.mxu1 %v6662_v62  ;;  %v1000_v61 = vld [vmem:[#allocation8 + $0x788] sm:$0xff] }
 0x1a0   :  { %2396 = vmatprep.subr.bf16.mxu0 %v6669_v63  ;;  %2482 = vmatprep.subr.bf16.mxu1 %v6671_v1  ;;  %v1004_v62 = vld [vmem:[#allocation8 + $0x7a8] sm:$0xff]  ;;  %v232_v63 = vrot.slane %v8083_v16, %v8134_v45  ;;  %v1007_v1 = vld [vmem:[#allocation8 + $0x7c0] sm:$0xff]  ;;  %v647_v16 = vadd.f32 %v8118_v39, %v216_v10 }
 0x1a1   :  { %v6724_v46 = vcombine.low %v1007_v1, %v1011_v4 }
 0x1a3   :  { %2397 = vmatpush1.bf16.msra.mxu0 %v6668_v6  ;;  %2483 = vmatpush1.bf16.msra.mxu1 %v6670_v7  ;;  %v1012_v6 = vld [vmem:[#allocation8 + $0x7e8] sm:$0xff] }
 0x1a4   :  { %2398 = vmatprep.subr.bf16.mxu0 %v6677_v8  ;;  %2484 = vmatprep.subr.bf16.mxu1 %v6679_v9  ;;  %v6717_v8 = vcombine.high %v999_v55, %v1003_v60  ;;  %v6719_v9 = vcombine.high %v1000_v61, %v1004_v62  ;;  %v6727_v13 = vcombine.high %v1008_v5, %v1012_v6 }
 0x1a5   :  { %v6480_v55 = vcombine.low %v761_v26, %v765_v27  ;;  %v809_v26 = vld [vmem:[#allocation8 + $0x190] sm:$0xff]  ;;  %v810_v27 = vld [vmem:[#allocation8 + $0x198] sm:$0xff] }
 0x1a7   :  { %2399 = vmatpush1.bf16.msra.mxu0 %v6676_v44  ;;  %2485 = vmatpush1.bf16.msra.mxu1 %v6678_v47  ;;  %v6718_v44 = vcombine.low %v1000_v61, %v1004_v62  ;;  %v781_v62 = vld [vmem:[#allocation8 + $0xb0] sm:$0xff] }
 0x1a8   :  { %2400 = vmatprep.subr.bf16.mxu0 %v6685_v50  ;;  %2486 = vmatprep.subr.bf16.mxu1 %v6687_v51  ;;  %v6725_v51 = vcombine.high %v1007_v1, %v1011_v4 }
 0x1ab   :  { %2401 = vmatpush1.bf16.msra.mxu0 %v6684_v22  ;;  %2487 = vmatpush1.bf16.msra.mxu1 %v6686_v23  ;;  %v651_v23 = vadd.f32 %v8122_v48, %v216_v10  ;;  %v778_v10 = vld [vmem:[#allocation8 + $0x98] sm:$0xff] }
 0x1ac   :  { %2402 = vmatprep.subr.bf16.mxu0 %v6693_v24  ;;  %2488 = vmatprep.subr.bf16.mxu1 %v6695_v25 }
 0x1af   :  { %2403 = vmatpush1.bf16.msra.mxu0 %v6692_v30  ;;  %2489 = vmatpush1.bf16.msra.mxu1 %v6694_v31 }
 0x1b0   :  { %2404 = vmatprep.subr.bf16.mxu0 %v6701_v32  ;;  %2490 = vmatprep.subr.bf16.mxu1 %v6703_v33  ;;  %v6726_v32 = vcombine.low %v1008_v5, %v1012_v6  ;;  %v785_v5 = vld [vmem:[#allocation8 + $0xd0] sm:$0xff] }
 0x1b1   :  { %v789_v6 = vld [vmem:[#allocation8 + $0xf0] sm:$0xff] }
 0x1b3   :  { %2405 = vmatpush1.bf16.msra.mxu0 %v6700_v49  ;;  %2491 = vmatpush1.bf16.msra.mxu1 %v6702_v52  ;;  %v773_v52 = vld [vmem:[#allocation8 + $0x70] sm:$0xff] }
 0x1b4   :  { %2406 = vmatprep.subr.bf16.mxu0 %v6709_v53  ;;  %2492 = vmatprep.subr.bf16.mxu1 %v6711_v54  ;;  %v770_v53 = vld [vmem:[#allocation8 + $0x58] sm:$0xff]  ;;  %v6489_v60 = vcombine.high %v769_v40, %v773_v52  ;;  %v6488_v1 = vcombine.low %v769_v40, %v773_v52  ;;  %v6530_v40 = vcombine.low %v810_v27, %v814_v28 }
 0x1b5   :  { %v730_v7 = vpop.f32.mrb[8].mxu1  ;;  %v774_v54 = vld [vmem:[#allocation8 + $0x78] sm:$0xff] }
 0x1b6   :  { %v731_v12 = vadd.f32 %v730_v7, %v228_v59  ;;  %v732_v42 = vpop.f32.mrb[9].mxu1  ;;  %v6491_v61 = vcombine.high %v770_v53, %v774_v54  ;;  %v786_v7 = vld [vmem:[#allocation8 + $0xd8] sm:$0xff] }
 0x1b7   :  { %v733_v47 = vadd.f32 %v732_v42, %v232_v63  ;;  %v734_v50 = vpop.f32.mrb[10].mxu1  ;;  %2407 = vmatpush1.bf16.msra.mxu0 %v6708_v2  ;;  %2493 = vmatpush1.bf16.msra.mxu1 %v6710_v3  ;;  %v6490_v2 = vcombine.low %v770_v53, %v774_v54  ;;  %v825_v54 = vld [vmem:[#allocation8 + $0x210] sm:$0xff] }
 0x1b8   :  { %v741_v20 = vmax.f32 %v645_v11, %v731_v12  ;;  %v735_v21 = vadd.f32 %v734_v50, %v228_v59  ;;  %v736_v22 = vpop.f32.mrb[11].mxu1  ;;  %2408 = vmatprep.subr.bf16.mxu0 %v6717_v8  ;;  %2494 = vmatprep.subr.bf16.mxu1 %v6719_v9  ;;  %v777_v59 = vld [vmem:[#allocation8 + $0x90] sm:$0xff]  ;;  %v790_v8 = vld [vmem:[#allocation8 + $0xf8] sm:$0xff]  ;;  %v6505_v12 = vcombine.high %v785_v5, %v789_v6 }
 0x1b9   :  { %v742_v36 = vmax.f32 %v647_v16, %v733_v47  ;;  %v737_v24 = vadd.f32 %v736_v22, %v232_v63  ;;  %v782_v63 = vld [vmem:[#allocation8 + $0xb8] sm:$0xff]  ;;  %v6497_v3 = vcombine.high %v777_v59, %v781_v62  ;;  %v6496_v9 = vcombine.low %v777_v59, %v781_v62 }
 0x1ba   :  { %v745_v25 = vmax.f32 %v649_v14, %v735_v21  ;;  %v749_v30 = vmax.f32 %v741_v20, 0.0  ;;  %v6499_v4 = vcombine.high %v778_v10, %v782_v63  ;;  %v6498_v11 = vcombine.low %v778_v10, %v782_v63  ;;  %v794_v16 = vld [vmem:[#allocation8 + $0x118] sm:$0xff]  ;;  %v801_v14 = vld [vmem:[#allocation8 + $0x150] sm:$0xff] }
 0x1bb   :  { %v746_v39 = vmax.f32 %v651_v23, %v737_v24  ;;  %2409 = vmatpush1.bf16.msra.mxu0 %v6716_v43  ;;  %2495 = vmatpush1.bf16.msra.mxu1 %v6718_v44  ;;  %v750_v33 = vmax.f32 %v742_v36, 0.0  ;;  %v6507_v42 = vcombine.high %v786_v7, %v790_v8  ;;  %v793_v43 = vld [vmem:[#allocation8 + $0x110] sm:$0xff]  ;;  %v6504_v47 = vcombine.low %v785_v5, %v789_v6  ;;  %v802_v21 = vld [vmem:[#allocation8 + $0x158] sm:$0xff] }
 0x1bc   :  { %v753_v31 = vmax.f32 %v745_v25, 0.0  ;;  %2410 = vmatprep.subr.bf16.mxu0 %v6725_v51  ;;  %2496 = vmatprep.subr.bf16.mxu1 %v6727_v13  ;;  %v797_v44 = vld [vmem:[#allocation8 + $0x130] sm:$0xff]  ;;  %v6506_v50 = vcombine.low %v786_v7, %v790_v8  ;;  %v806_v22 = vld [vmem:[#allocation8 + $0x178] sm:$0xff] }
 0x1bd   :  { %v754_v34 = vmax.f32 %v746_v39, 0.0  ;;  %v6513_v51 = vcombine.high %v793_v43, %v797_v44  ;;  %v805_v20 = vld [vmem:[#allocation8 + $0x170] sm:$0xff]  ;;  %v6512_v23 = vcombine.low %v793_v43, %v797_v44  ;;  %v6523_v25 = vcombine.high %v802_v21, %v806_v22  ;;  %v830_v59 = vld [vmem:[#allocation8 + $0x238] sm:$0xff] }
 0x1be   :  { %v8148_v48 = vpack.c.bf16 %v753_v31, %v749_v30  ;;  %v6521_v24 = vcombine.high %v801_v14, %v805_v20  ;;  %v813_v39 = vld [vmem:[#allocation8 + $0x1b0] sm:$0xff]  ;;  %v6520_v29 = vcombine.low %v801_v14, %v805_v20  ;;  %v6522_v30 = vcombine.low %v802_v21, %v806_v22 }
 0x1bf   :  { %v8150_v49 = vpack.c.bf16 %v754_v34, %v750_v33  ;;  %2411 = vmatpush1.bf16.msra.mxu0 %v6724_v46  ;;  %2497 = vmatpush1.bf16.msra.mxu1 %v6726_v32  ;;  %v6529_v31 = vcombine.high %v809_v26, %v813_v39  ;;  %v6531_v46 = vcombine.high %v810_v27, %v814_v28  ;;  %v817_v32 = vld [vmem:[#allocation8 + $0x1d0] sm:$0xff]  ;;  %v818_v34 = vld [vmem:[#allocation8 + $0x1d8] sm:$0xff] }
 0x1c0   :  { %2509 = vmatprep.subr.bf16.mxu0 %v6481_v0  ;;  %2595 = vmatprep.subr.bf16.mxu1 %v6483_v38  ;;  %v821_v33 = vld [vmem:[#allocation8 + $0x1f0] sm:$0xff]  ;;  %v822_v0 = vld [vmem:[#allocation8 + $0x1f8] sm:$0xff]  ;;  %v6528_v38 = vcombine.low %v809_v26, %v813_v39 }
 0x1c1   :  { %2412 = vmatprep.mubr.bf16.mxu0 %v8150_v49  ;;  %2498 = vmatprep.mubr.bf16.mxu1 %v8150_v49  ;;  %v6537_v52 = vcombine.high %v817_v32, %v821_v33  ;;  %v6539_v53 = vcombine.high %v818_v34, %v822_v0  ;;  %v833_v63 = vld [vmem:[#allocation8 + $0x250] sm:$0xff] }
 0x1c2   :  { %2413 = vmatmul.mubr.bf16.vlgmr.msra.gmra.mrb[4].mxu0 %v8148_v48  ;;  %2499 = vmatmul.mubr.bf16.vlgmr.msra.gmra.mrb[12].mxu1 %v8148_v48  ;;  %v841_v8 = vld [vmem:[#allocation8 + $0x290] sm:$0xff] }
 0x1c3   :  { %2510 = vmatpush1.bf16.msra.mxu0 %v6480_v55  ;;  %2596 = vmatpush1.bf16.msra.mxu1 %v6482_v56  ;;  %v829_v55 = vld [vmem:[#allocation8 + $0x230] sm:$0xff]  ;;  %v826_v56 = vld [vmem:[#allocation8 + $0x218] sm:$0xff] }
 0x1c4   :  { %2541 = vmatprep.mubr.bf16.mxu0 %v8104_v58  ;;  %2627 = vmatprep.mubr.bf16.mxu1 %v8104_v58  ;;  %v798_v58 = vld [vmem:[#allocation8 + $0x138] sm:$0xff]  ;;  %v6545_v62 = vcombine.high %v825_v54, %v829_v55  ;;  %v6547_v10 = vcombine.high %v826_v56, %v830_v59  ;;  %v6546_v5 = vcombine.low %v826_v56, %v830_v59  ;;  %v857_v22 = vld [vmem:[#allocation8 + $0x310] sm:$0xff] }
 0x1c5   :  { %2511 = vmatprep.subr.bf16.mxu0 %v6489_v60  ;;  %2597 = vmatprep.subr.bf16.mxu1 %v6491_v61  ;;  %v6515_v13 = vcombine.high %v794_v16, %v798_v58  ;;  %v6514_v36 = vcombine.low %v794_v16, %v798_v58  ;;  %v6536_v60 = vcombine.low %v817_v32, %v821_v33  ;;  %v849_v58 = vld [vmem:[#allocation8 + $0x2d0] sm:$0xff] }
 0x1c6   :  { %v6538_v61 = vcombine.low %v818_v34, %v822_v0  ;;  %v865_v28 = vld [vmem:[#allocation8 + $0x350] sm:$0xff] }
 0x1c7   :  { %2512 = vmatpush1.bf16.msra.mxu0 %v6488_v1  ;;  %2598 = vmatpush1.bf16.msra.mxu1 %v6490_v2  ;;  %v837_v1 = vld [vmem:[#allocation8 + $0x270] sm:$0xff]  ;;  %v834_v2 = vld [vmem:[#allocation8 + $0x258] sm:$0xff] }
 0x1c8   :  { %2513 = vmatprep.subr.bf16.mxu0 %v6497_v3  ;;  %2599 = vmatprep.subr.bf16.mxu1 %v6499_v4  ;;  %v838_v3 = vld [vmem:[#allocation8 + $0x278] sm:$0xff]  ;;  %v6544_v4 = vcombine.low %v825_v54, %v829_v55  ;;  %v6553_v6 = vcombine.high %v833_v63, %v837_v1  ;;  %v873_v0 = vld [vmem:[#allocation8 + $0x390] sm:$0xff] }
 0x1c9   :  { %v6555_v7 = vcombine.high %v834_v2, %v838_v3  ;;  %v6554_v43 = vcombine.low %v834_v2, %v838_v3  ;;  %v881_v59 = vld [vmem:[#allocation8 + $0x3d0] sm:$0xff] }
 0x1ca   :  { %v889_v3 = vld [vmem:[#allocation8 + $0x410] sm:$0xff] }
 0x1cb   :  { %2514 = vmatpush1.bf16.msra.mxu0 %v6496_v9  ;;  %2600 = vmatpush1.bf16.msra.mxu1 %v6498_v11  ;;  %v845_v9 = vld [vmem:[#allocation8 + $0x2b0] sm:$0xff]  ;;  %v842_v11 = vld [vmem:[#allocation8 + $0x298] sm:$0xff] }
 0x1cc   :  { %2515 = vmatprep.subr.bf16.mxu0 %v6505_v12  ;;  %2601 = vmatprep.subr.bf16.mxu1 %v6507_v42  ;;  %v846_v12 = vld [vmem:[#allocation8 + $0x2b8] sm:$0xff]  ;;  %v6552_v42 = vcombine.low %v833_v63, %v837_v1  ;;  %v6561_v44 = vcombine.high %v841_v8, %v845_v9 }
 0x1cd   :  { %v6563_v16 = vcombine.high %v842_v11, %v846_v12  ;;  %v6562_v14 = vcombine.low %v842_v11, %v846_v12  ;;  %v897_v12 = vld [vmem:[#allocation8 + $0x450] sm:$0xff] }
 0x1cf   :  { %2516 = vmatpush1.bf16.msra.mxu0 %v6504_v47  ;;  %2602 = vmatpush1.bf16.msra.mxu1 %v6506_v50  ;;  %v853_v47 = vld [vmem:[#allocation8 + $0x2f0] sm:$0xff]  ;;  %v850_v50 = vld [vmem:[#allocation8 + $0x2d8] sm:$0xff] }
 0x1d0   :  { %2517 = vmatprep.subr.bf16.mxu0 %v6513_v51  ;;  %2603 = vmatprep.subr.bf16.mxu1 %v6515_v13  ;;  %v854_v51 = vld [vmem:[#allocation8 + $0x2f8] sm:$0xff]  ;;  %v6560_v13 = vcombine.low %v841_v8, %v845_v9  ;;  %v6569_v20 = vcombine.high %v849_v58, %v853_v47 }
 0x1d1   :  { %v6571_v21 = vcombine.high %v850_v50, %v854_v51  ;;  %v6570_v26 = vcombine.low %v850_v50, %v854_v51  ;;  %v905_v51 = vld [vmem:[#allocation8 + $0x490] sm:$0xff] }
 0x1d3   :  { %2518 = vmatpush1.bf16.msra.mxu0 %v6512_v23  ;;  %2604 = vmatpush1.bf16.msra.mxu1 %v6514_v36  ;;  %v861_v23 = vld [vmem:[#allocation8 + $0x330] sm:$0xff]  ;;  %v858_v36 = vld [vmem:[#allocation8 + $0x318] sm:$0xff] }
 0x1d4   :  { %2519 = vmatprep.subr.bf16.mxu0 %v6521_v24  ;;  %2605 = vmatprep.subr.bf16.mxu1 %v6523_v25  ;;  %v862_v24 = vld [vmem:[#allocation8 + $0x338] sm:$0xff]  ;;  %v6568_v25 = vcombine.low %v849_v58, %v853_v47  ;;  %v6577_v39 = vcombine.high %v857_v22, %v861_v23 }
 0x1d5   :  { %v6579_v27 = vcombine.high %v858_v36, %v862_v24  ;;  %v6578_v32 = vcombine.low %v858_v36, %v862_v24  ;;  %v913_v24 = vld [vmem:[#allocation8 + $0x4d0] sm:$0xff] }
 0x1d7   :  { %2520 = vmatpush1.bf16.msra.mxu0 %v6520_v29  ;;  %2606 = vmatpush1.bf16.msra.mxu1 %v6522_v30  ;;  %v869_v29 = vld [vmem:[#allocation8 + $0x370] sm:$0xff]  ;;  %v866_v30 = vld [vmem:[#allocation8 + $0x358] sm:$0xff] }
 0x1d8   :  { %2521 = vmatprep.subr.bf16.mxu0 %v6529_v31  ;;  %2607 = vmatprep.subr.bf16.mxu1 %v6531_v46  ;;  %v870_v31 = vld [vmem:[#allocation8 + $0x378] sm:$0xff]  ;;  %v6576_v46 = vcombine.low %v857_v22, %v861_v23  ;;  %v6585_v33 = vcombine.high %v865_v28, %v869_v29 }
 0x1d9   :  { %v6587_v34 = vcombine.high %v866_v30, %v870_v31  ;;  %v6586_v54 = vcombine.low %v866_v30, %v870_v31  ;;  %v921_v30 = vld [vmem:[#allocation8 + $0x510] sm:$0xff] }
 0x1da   :  { %v925_v31 = vld [vmem:[#allocation8 + $0x530] sm:$0xff] }
 0x1db   :  { %2522 = vmatpush1.bf16.msra.mxu0 %v6528_v38  ;;  %2608 = vmatpush1.bf16.msra.mxu1 %v6530_v40  ;;  %v877_v38 = vld [vmem:[#allocation8 + $0x3b0] sm:$0xff]  ;;  %v874_v40 = vld [vmem:[#allocation8 + $0x398] sm:$0xff] }
 0x1dc   :  { %2523 = vmatprep.subr.bf16.mxu0 %v6537_v52  ;;  %2609 = vmatprep.subr.bf16.mxu1 %v6539_v53  ;;  %v878_v52 = vld [vmem:[#allocation8 + $0x3b8] sm:$0xff]  ;;  %v6584_v53 = vcombine.low %v865_v28, %v869_v29  ;;  %v6593_v55 = vcombine.high %v873_v0, %v877_v38 }
 0x1dd   :  { %v6595_v56 = vcombine.high %v874_v40, %v878_v52  ;;  %v6594_v63 = vcombine.low %v874_v40, %v878_v52  ;;  %v933_v40 = vld [vmem:[#allocation8 + $0x570] sm:$0xff]  ;;  %v930_v52 = vld [vmem:[#allocation8 + $0x558] sm:$0xff] }
 0x1df   :  { %2524 = vmatpush1.bf16.msra.mxu0 %v6536_v60  ;;  %2610 = vmatpush1.bf16.msra.mxu1 %v6538_v61  ;;  %v885_v60 = vld [vmem:[#allocation8 + $0x3f0] sm:$0xff]  ;;  %v882_v61 = vld [vmem:[#allocation8 + $0x3d8] sm:$0xff] }
 0x1e0   :  { %2525 = vmatprep.subr.bf16.mxu0 %v6545_v62  ;;  %2611 = vmatprep.subr.bf16.mxu1 %v6547_v10  ;;  %v886_v62 = vld [vmem:[#allocation8 + $0x3f8] sm:$0xff]  ;;  %v6592_v10 = vcombine.low %v873_v0, %v877_v38  ;;  %v6601_v1 = vcombine.high %v881_v59, %v885_v60  ;;  %v929_v38 = vld [vmem:[#allocation8 + $0x550] sm:$0xff] }
 0x1e1   :  { %v6603_v2 = vcombine.high %v882_v61, %v886_v62  ;;  %v6602_v8 = vcombine.low %v882_v61, %v886_v62  ;;  %v941_v61 = vld [vmem:[#allocation8 + $0x5b0] sm:$0xff]  ;;  %v938_v62 = vld [vmem:[#allocation8 + $0x598] sm:$0xff] }
 0x1e3   :  { %2526 = vmatpush1.bf16.msra.mxu0 %v6544_v4  ;;  %2612 = vmatpush1.bf16.msra.mxu1 %v6546_v5  ;;  %v893_v4 = vld [vmem:[#allocation8 + $0x430] sm:$0xff]  ;;  %v890_v5 = vld [vmem:[#allocation8 + $0x418] sm:$0xff] }
 0x1e4   :  { %2527 = vmatprep.subr.bf16.mxu0 %v6553_v6  ;;  %2613 = vmatprep.subr.bf16.mxu1 %v6555_v7  ;;  %v894_v6 = vld [vmem:[#allocation8 + $0x438] sm:$0xff]  ;;  %v6600_v7 = vcombine.low %v881_v59, %v885_v60  ;;  %v6609_v9 = vcombine.high %v889_v3, %v893_v4  ;;  %v937_v60 = vld [vmem:[#allocation8 + $0x590] sm:$0xff] }
 0x1e5   :  { %v6611_v11 = vcombine.high %v890_v5, %v894_v6  ;;  %v6610_v58 = vcombine.low %v890_v5, %v894_v6  ;;  %v949_v5 = vld [vmem:[#allocation8 + $0x5f0] sm:$0xff]  ;;  %v946_v6 = vld [vmem:[#allocation8 + $0x5d8] sm:$0xff] }
 0x1e7   :  { %2528 = vmatpush1.bf16.msra.mxu0 %v6552_v42  ;;  %2614 = vmatpush1.bf16.msra.mxu1 %v6554_v43  ;;  %v901_v42 = vld [vmem:[#allocation8 + $0x470] sm:$0xff]  ;;  %v898_v43 = vld [vmem:[#allocation8 + $0x458] sm:$0xff] }
 0x1e8   :  { %2529 = vmatprep.subr.bf16.mxu0 %v6561_v44  ;;  %2615 = vmatprep.subr.bf16.mxu1 %v6563_v16  ;;  %v902_v44 = vld [vmem:[#allocation8 + $0x478] sm:$0xff]  ;;  %v6608_v16 = vcombine.low %v889_v3, %v893_v4  ;;  %v6617_v47 = vcombine.high %v897_v12, %v901_v42  ;;  %v945_v4 = vld [vmem:[#allocation8 + $0x5d0] sm:$0xff] }
 0x1e9   :  { %v6619_v50 = vcombine.high %v898_v43, %v902_v44  ;;  %v6618_v22 = vcombine.low %v898_v43, %v902_v44  ;;  %v957_v43 = vld [vmem:[#allocation8 + $0x630] sm:$0xff]  ;;  %v954_v44 = vld [vmem:[#allocation8 + $0x618] sm:$0xff] }
 0x1eb   :  { %2530 = vmatpush1.bf16.msra.mxu0 %v6560_v13  ;;  %2616 = vmatpush1.bf16.msra.mxu1 %v6562_v14  ;;  %v909_v13 = vld [vmem:[#allocation8 + $0x4b0] sm:$0xff]  ;;  %v906_v14 = vld [vmem:[#allocation8 + $0x498] sm:$0xff] }
 0x1ec   :  { %2531 = vmatprep.subr.bf16.mxu0 %v6569_v20  ;;  %2617 = vmatprep.subr.bf16.mxu1 %v6571_v21  ;;  %v910_v20 = vld [vmem:[#allocation8 + $0x4b8] sm:$0xff]  ;;  %v6616_v21 = vcombine.low %v897_v12, %v901_v42  ;;  %v6625_v23 = vcombine.high %v905_v51, %v909_v13  ;;  %v953_v42 = vld [vmem:[#allocation8 + $0x610] sm:$0xff] }
 0x1ed   :  { %v6627_v36 = vcombine.high %v906_v14, %v910_v20 }
 0x1ef   :  { %2532 = vmatpush1.bf16.msra.mxu0 %v6568_v25  ;;  %2618 = vmatpush1.bf16.msra.mxu1 %v6570_v26  ;;  %v917_v25 = vld [vmem:[#allocation8 + $0x4f0] sm:$0xff]  ;;  %v914_v26 = vld [vmem:[#allocation8 + $0x4d8] sm:$0xff] }
 0x1f0   :  { %2533 = vmatprep.subr.bf16.mxu0 %v6577_v39  ;;  %2619 = vmatprep.subr.bf16.mxu1 %v6579_v27  ;;  %v918_v39 = vld [vmem:[#allocation8 + $0x4f8] sm:$0xff]  ;;  %v6626_v27 = vcombine.low %v906_v14, %v910_v20  ;;  %v6633_v28 = vcombine.high %v913_v24, %v917_v25  ;;  %v965_v14 = vld [vmem:[#allocation8 + $0x670] sm:$0xff] }
 0x1f1   :  { %v6635_v29 = vcombine.high %v914_v26, %v918_v39  ;;  %v962_v20 = vld [vmem:[#allocation8 + $0x658] sm:$0xff] }
 0x1f3   :  { %2534 = vmatpush1.bf16.msra.mxu0 %v6576_v46  ;;  %2620 = vmatpush1.bf16.msra.mxu1 %v6578_v32  ;;  %v926_v46 = vld [vmem:[#allocation8 + $0x538] sm:$0xff]  ;;  %v6632_v32 = vcombine.low %v913_v24, %v917_v25  ;;  %v969_v25 = vld [vmem:[#allocation8 + $0x690] sm:$0xff] }
 0x1f4   :  { %2535 = vmatprep.subr.bf16.mxu0 %v6585_v33  ;;  %2621 = vmatprep.subr.bf16.mxu1 %v6587_v34  ;;  %v6634_v33 = vcombine.low %v914_v26, %v918_v39  ;;  %v6641_v34 = vcombine.high %v921_v30, %v925_v31  ;;  %v973_v26 = vld [vmem:[#allocation8 + $0x6b0] sm:$0xff]  ;;  %v970_v39 = vld [vmem:[#allocation8 + $0x698] sm:$0xff] }
 0x1f7   :  { %2536 = vmatpush1.bf16.msra.mxu0 %v6584_v53  ;;  %2622 = vmatpush1.bf16.msra.mxu1 %v6586_v54  ;;  %v934_v53 = vld [vmem:[#allocation8 + $0x578] sm:$0xff]  ;;  %v6640_v54 = vcombine.low %v921_v30, %v925_v31  ;;  %v977_v31 = vld [vmem:[#allocation8 + $0x6d0] sm:$0xff] }
 0x1f8   :  { %2537 = vmatprep.subr.bf16.mxu0 %v6593_v55  ;;  %2623 = vmatprep.subr.bf16.mxu1 %v6595_v56  ;;  %v6649_v56 = vcombine.high %v929_v38, %v933_v40  ;;  %v6651_v59 = vcombine.high %v930_v52, %v934_v53 }
 0x1fb   :  { %2538 = vmatpush1.bf16.msra.mxu0 %v6592_v10  ;;  %2624 = vmatpush1.bf16.msra.mxu1 %v6594_v63  ;;  %v942_v10 = vld [vmem:[#allocation8 + $0x5b8] sm:$0xff]  ;;  %v6648_v63 = vcombine.low %v929_v38, %v933_v40  ;;  %v985_v40 = vld [vmem:[#allocation8 + $0x710] sm:$0xff] }
 0x1fc   :  { %2539 = vmatprep.subr.bf16.mxu0 %v6601_v1  ;;  %2625 = vmatprep.subr.bf16.mxu1 %v6603_v2  ;;  %v6650_v1 = vcombine.low %v930_v52, %v934_v53  ;;  %v6657_v2 = vcombine.high %v937_v60, %v941_v61  ;;  %v6659_v3 = vcombine.high %v938_v62, %v942_v10  ;;  %v989_v52 = vld [vmem:[#allocation8 + $0x730] sm:$0xff]  ;;  %v986_v53 = vld [vmem:[#allocation8 + $0x718] sm:$0xff] }
 0x1ff   :  { %2540 = vmatpush1.bf16.msra.mxu0 %v6600_v7  ;;  %2626 = vmatpush1.bf16.msra.mxu1 %v6602_v8  ;;  %v950_v7 = vld [vmem:[#allocation8 + $0x5f8] sm:$0xff]  ;;  %v6656_v8 = vcombine.low %v937_v60, %v941_v61  ;;  %v993_v61 = vld [vmem:[#allocation8 + $0x750] sm:$0xff] }
 0x200   :  { %2552 = vmatprep.subr.bf16.mxu0 %v6609_v9  ;;  %2638 = vmatprep.subr.bf16.mxu1 %v6611_v11  ;;  %v6658_v9 = vcombine.low %v938_v62, %v942_v10  ;;  %v6665_v11 = vcombine.high %v945_v4, %v949_v5  ;;  %v6667_v12 = vcombine.high %v946_v6, %v950_v7  ;;  %v997_v62 = vld [vmem:[#allocation8 + $0x770] sm:$0xff]  ;;  %v994_v10 = vld [vmem:[#allocation8 + $0x758] sm:$0xff] }
 0x202   :  { %2542 = vmatmul.mubr.bf16.vlgmr.msra.gmra.mrb[8].mxu0 %v8102_v57  ;;  %2628 = vmatmul.mubr.bf16.vlgmr.msra.gmra.mrb[16].mxu1 %v8102_v57  ;;  %v6624_v57 = vcombine.low %v905_v51, %v909_v13  ;;  %v961_v13 = vld [vmem:[#allocation8 + $0x650] sm:$0xff] }
 0x203   :  { %2553 = vmatpush1.bf16.msra.mxu0 %v6608_v16  ;;  %2584 = vmatprep.mubr.bf16.mxu0 %v8150_v49  ;;  %v958_v16 = vld [vmem:[#allocation8 + $0x638] sm:$0xff] }
 0x204   :  { %2639 = vmatpush1.bf16.msra.mxu1 %v6610_v58  ;;  %2670 = vmatprep.mubr.bf16.mxu1 %v8150_v49  ;;  %v922_v49 = vld [vmem:[#allocation8 + $0x518] sm:$0xff]  ;;  %v6664_v58 = vcombine.low %v945_v4, %v949_v5  ;;  %v6675_v51 = vcombine.high %v954_v44, %v958_v16  ;;  %v1001_v5 = vld [vmem:[#allocation8 + $0x790] sm:$0xff] }
 0x205   :  { %2554 = vmatprep.subr.bf16.mxu0 %v6617_v47  ;;  %2640 = vmatprep.subr.bf16.mxu1 %v6619_v50  ;;  %v6643_v0 = vcombine.high %v922_v49, %v926_v46  ;;  %v6642_v55 = vcombine.low %v922_v49, %v926_v46  ;;  %v6666_v47 = vcombine.low %v946_v6, %v950_v7  ;;  %v981_v49 = vld [vmem:[#allocation8 + $0x6f0] sm:$0xff]  ;;  %v978_v46 = vld [vmem:[#allocation8 + $0x6d8] sm:$0xff] }
 0x206   :  { %v6673_v50 = vcombine.high %v953_v42, %v957_v43  ;;  %v1005_v6 = vld [vmem:[#allocation8 + $0x7b0] sm:$0xff]  ;;  %v1002_v7 = vld [vmem:[#allocation8 + $0x798] sm:$0xff] }
 0x207   :  { %2555 = vmatpush1.bf16.msra.mxu0 %v6616_v21  ;;  %v966_v21 = vld [vmem:[#allocation8 + $0x678] sm:$0xff] }
 0x208   :  { %2641 = vmatpush1.bf16.msra.mxu1 %v6618_v22  ;;  %2556 = vmatprep.subr.bf16.mxu0 %v6625_v23  ;;  %v6672_v22 = vcombine.low %v953_v42, %v957_v43  ;;  %v6674_v23 = vcombine.low %v954_v44, %v958_v16  ;;  %v6683_v24 = vcombine.high %v962_v20, %v966_v21  ;;  %v1009_v43 = vld [vmem:[#allocation8 + $0x7d0] sm:$0xff]  ;;  %v1010_v16 = vld [vmem:[#allocation8 + $0x7d8] sm:$0xff] }
 0x209   :  { %2642 = vmatprep.subr.bf16.mxu1 %v6627_v36  ;;  %v6681_v36 = vcombine.high %v961_v13, %v965_v14  ;;  %v1013_v44 = vld [vmem:[#allocation8 + $0x7f0] sm:$0xff] }
 0x20b   :  { %2557 = vmatpush1.bf16.msra.mxu0 %v6624_v57  ;;  %v974_v57 = vld [vmem:[#allocation8 + $0x6b8] sm:$0xff] }
 0x20c   :  { %2643 = vmatpush1.bf16.msra.mxu1 %v6626_v27  ;;  %2558 = vmatprep.subr.bf16.mxu0 %v6633_v28  ;;  %v6680_v27 = vcombine.low %v961_v13, %v965_v14  ;;  %v6682_v28 = vcombine.low %v962_v20, %v966_v21  ;;  %v6691_v30 = vcombine.high %v970_v39, %v974_v57  ;;  %v2701_v14 = vld [vmem:[#allocation10] sm:$0xff]  ;;  %v2702_v21 = vld [vmem:[#allocation10 + $0x8] sm:$0xff] }
 0x20d   :  { %2644 = vmatprep.subr.bf16.mxu1 %v6635_v29  ;;  %v6689_v29 = vcombine.high %v969_v25, %v973_v26  ;;  %v2705_v20 = vld [vmem:[#allocation10 + $0x20] sm:$0xff] }
 0x20f   :  { %2559 = vmatpush1.bf16.msra.mxu0 %v6632_v32  ;;  %v982_v32 = vld [vmem:[#allocation8 + $0x6f8] sm:$0xff] }
 0x210   :  { %2645 = vmatpush1.bf16.msra.mxu1 %v6634_v33  ;;  %2560 = vmatprep.subr.bf16.mxu0 %v6641_v34  ;;  %v6688_v33 = vcombine.low %v969_v25, %v973_v26  ;;  %v6690_v34 = vcombine.low %v970_v39, %v974_v57  ;;  %v6699_v38 = vcombine.high %v978_v46, %v982_v32  ;;  %v2709_v26 = vld [vmem:[#allocation10 + $0x40] sm:$0xff]  ;;  %v2710_v57 = vld [vmem:[#allocation10 + $0x48] sm:$0xff] }
 0x211   :  { %2646 = vmatprep.subr.bf16.mxu1 %v6643_v0  ;;  %v6697_v0 = vcombine.high %v977_v31, %v981_v49  ;;  %v2713_v39 = vld [vmem:[#allocation10 + $0x60] sm:$0xff] }
 0x213   :  { %2561 = vmatpush1.bf16.msra.mxu0 %v6640_v54  ;;  %v990_v54 = vld [vmem:[#allocation8 + $0x738] sm:$0xff] }
 0x214   :  { %2647 = vmatpush1.bf16.msra.mxu1 %v6642_v55  ;;  %2562 = vmatprep.subr.bf16.mxu0 %v6649_v56  ;;  %v6696_v55 = vcombine.low %v977_v31, %v981_v49  ;;  %v6698_v56 = vcombine.low %v978_v46, %v982_v32  ;;  %v6707_v60 = vcombine.high %v986_v53, %v990_v54  ;;  %v2717_v49 = vld [vmem:[#allocation10 + $0x80] sm:$0xff]  ;;  %v2718_v32 = vld [vmem:[#allocation10 + $0x88] sm:$0xff] }
 0x215   :  { %2648 = vmatprep.subr.bf16.mxu1 %v6651_v59  ;;  %v6705_v59 = vcombine.high %v985_v40, %v989_v52  ;;  %v2721_v46 = vld [vmem:[#allocation10 + $0xa0] sm:$0xff] }
 0x217   :  { %2563 = vmatpush1.bf16.msra.mxu0 %v6648_v63  ;;  %v998_v63 = vld [vmem:[#allocation8 + $0x778] sm:$0xff] }
 0x218   :  { %2649 = vmatpush1.bf16.msra.mxu1 %v6650_v1  ;;  %2564 = vmatprep.subr.bf16.mxu0 %v6657_v2  ;;  %v6704_v1 = vcombine.low %v985_v40, %v989_v52  ;;  %v6706_v2 = vcombine.low %v986_v53, %v990_v54  ;;  %v6715_v4 = vcombine.high %v994_v10, %v998_v63  ;;  %v2725_v52 = vld [vmem:[#allocation10 + $0xc0] sm:$0xff]  ;;  %v2726_v54 = vld [vmem:[#allocation10 + $0xc8] sm:$0xff] }
 0x219   :  { %2650 = vmatprep.subr.bf16.mxu1 %v6659_v3  ;;  %v6713_v3 = vcombine.high %v993_v61, %v997_v62  ;;  %v2729_v53 = vld [vmem:[#allocation10 + $0xe0] sm:$0xff] }
 0x21b   :  { %2565 = vmatpush1.bf16.msra.mxu0 %v6656_v8  ;;  %v1006_v8 = vld [vmem:[#allocation8 + $0x7b8] sm:$0xff] }
 0x21c   :  { %2651 = vmatpush1.bf16.msra.mxu1 %v6658_v9  ;;  %2566 = vmatprep.subr.bf16.mxu0 %v6665_v11  ;;  %v6712_v9 = vcombine.low %v993_v61, %v997_v62  ;;  %v6714_v11 = vcombine.low %v994_v10, %v998_v63  ;;  %v6723_v42 = vcombine.high %v1002_v7, %v1006_v8  ;;  %v2733_v61 = vld [vmem:[#allocation10 + $0x100] sm:$0xff]  ;;  %v2734_v10 = vld [vmem:[#allocation10 + $0x108] sm:$0xff] }
 0x21d   :  { %2652 = vmatprep.subr.bf16.mxu1 %v6667_v12  ;;  %v6721_v12 = vcombine.high %v1001_v5, %v1005_v6  ;;  %v2737_v62 = vld [vmem:[#allocation10 + $0x120] sm:$0xff]  ;;  %v2738_v63 = vld [vmem:[#allocation10 + $0x128] sm:$0xff] }
 0x21f   :  { %2567 = vmatpush1.bf16.msra.mxu0 %v6664_v58  ;;  %v1014_v58 = vld [vmem:[#allocation8 + $0x7f8] sm:$0xff] }
 0x220   :  { %2653 = vmatpush1.bf16.msra.mxu1 %v6666_v47  ;;  %2568 = vmatprep.subr.bf16.mxu0 %v6673_v50  ;;  %v6720_v47 = vcombine.low %v1001_v5, %v1005_v6  ;;  %v6722_v50 = vcombine.low %v1002_v7, %v1006_v8  ;;  %v6731_v13 = vcombine.high %v1010_v16, %v1014_v58  ;;  %v2741_v5 = vld [vmem:[#allocation10 + $0x140] sm:$0xff]  ;;  %v2742_v7 = vld [vmem:[#allocation10 + $0x148] sm:$0xff] }
 0x221   :  { %2654 = vmatprep.subr.bf16.mxu1 %v6675_v51  ;;  %v6729_v51 = vcombine.high %v1009_v43, %v1013_v44  ;;  %v2745_v6 = vld [vmem:[#allocation10 + $0x160] sm:$0xff]  ;;  %v2746_v8 = vld [vmem:[#allocation10 + $0x168] sm:$0xff] }
 0x223   :  { %2569 = vmatpush1.bf16.msra.mxu0 %v6672_v22  ;;  %v2706_v22 = vld [vmem:[#allocation10 + $0x28] sm:$0xff] }
 0x224   :  { %2655 = vmatpush1.bf16.msra.mxu1 %v6674_v23  ;;  %2570 = vmatprep.subr.bf16.mxu0 %v6681_v36  ;;  %v6728_v23 = vcombine.low %v1009_v43, %v1013_v44  ;;  %v6730_v36 = vcombine.low %v1010_v16, %v1014_v58  ;;  %v6735_v25 = vcombine.high %v2702_v21, %v2706_v22  ;;  %v2749_v43 = vld [vmem:[#allocation10 + $0x180] sm:$0xff]  ;;  %v2750_v16 = vld [vmem:[#allocation10 + $0x188] sm:$0xff] }
 0x225   :  { %2656 = vmatprep.subr.bf16.mxu1 %v6683_v24  ;;  %v6733_v24 = vcombine.high %v2701_v14, %v2705_v20  ;;  %v2753_v44 = vld [vmem:[#allocation10 + $0x1a0] sm:$0xff]  ;;  %v2754_v58 = vld [vmem:[#allocation10 + $0x1a8] sm:$0xff] }
 0x227   :  { %2571 = vmatpush1.bf16.msra.mxu0 %v6680_v27  ;;  %v2714_v27 = vld [vmem:[#allocation10 + $0x68] sm:$0xff] }
 0x228   :  { %2657 = vmatpush1.bf16.msra.mxu1 %v6682_v28  ;;  %2572 = vmatprep.subr.bf16.mxu0 %v6689_v29  ;;  %v6732_v28 = vcombine.low %v2701_v14, %v2705_v20  ;;  %v6734_v29 = vcombine.low %v2702_v21, %v2706_v22  ;;  %v6743_v31 = vcombine.high %v2710_v57, %v2714_v27  ;;  %v2757_v14 = vld [vmem:[#allocation10 + $0x1c0] sm:$0xff]  ;;  %v2758_v21 = vld [vmem:[#allocation10 + $0x1c8] sm:$0xff] }
 0x229   :  { %2658 = vmatprep.subr.bf16.mxu1 %v6691_v30  ;;  %v6741_v30 = vcombine.high %v2709_v26, %v2713_v39  ;;  %v2761_v20 = vld [vmem:[#allocation10 + $0x1e0] sm:$0xff]  ;;  %v2762_v22 = vld [vmem:[#allocation10 + $0x1e8] sm:$0xff] }
 0x22b   :  { %2573 = vmatpush1.bf16.msra.mxu0 %v6688_v33  ;;  %v2722_v33 = vld [vmem:[#allocation10 + $0xa8] sm:$0xff] }
 0x22c   :  { %2659 = vmatpush1.bf16.msra.mxu1 %v6690_v34  ;;  %2574 = vmatprep.subr.bf16.mxu0 %v6697_v0  ;;  %v6740_v34 = vcombine.low %v2709_v26, %v2713_v39  ;;  %v6742_v0 = vcombine.low %v2710_v57, %v2714_v27  ;;  %v6751_v40 = vcombine.high %v2718_v32, %v2722_v33  ;;  %v2765_v26 = vld [vmem:[#allocation10 + $0x200] sm:$0xff]  ;;  %v2766_v57 = vld [vmem:[#allocation10 + $0x208] sm:$0xff] }
 0x22d   :  { %2660 = vmatprep.subr.bf16.mxu1 %v6699_v38  ;;  %v6749_v38 = vcombine.high %v2717_v49, %v2721_v46  ;;  %v2769_v39 = vld [vmem:[#allocation10 + $0x220] sm:$0xff]  ;;  %v2770_v27 = vld [vmem:[#allocation10 + $0x228] sm:$0xff] }
 0x22f   :  { %2575 = vmatpush1.bf16.msra.mxu0 %v6696_v55  ;;  %v2730_v55 = vld [vmem:[#allocation10 + $0xe8] sm:$0xff] }
 0x230   :  { %2661 = vmatpush1.bf16.msra.mxu1 %v6698_v56  ;;  %2576 = vmatprep.subr.bf16.mxu0 %v6705_v59  ;;  %v6748_v56 = vcombine.low %v2717_v49, %v2721_v46  ;;  %v6750_v59 = vcombine.low %v2718_v32, %v2722_v33  ;;  %v2773_v49 = vld [vmem:[#allocation10 + $0x240] sm:$0xff]  ;;  %v2774_v32 = vld [vmem:[#allocation10 + $0x248] sm:$0xff] }
 0x231   :  { %2662 = vmatprep.subr.bf16.mxu1 %v6707_v60  ;;  %v6757_v60 = vcombine.high %v2725_v52, %v2729_v53  ;;  %v2777_v46 = vld [vmem:[#allocation10 + $0x260] sm:$0xff]  ;;  %v2778_v33 = vld [vmem:[#allocation10 + $0x268] sm:$0xff] }
 0x233   :  { %2577 = vmatpush1.bf16.msra.mxu0 %v6704_v1  ;;  %v6756_v1 = vcombine.low %v2725_v52, %v2729_v53  ;;  %v2781_v52 = vld [vmem:[#allocation10 + $0x280] sm:$0xff] }
 0x234   :  { %2663 = vmatpush1.bf16.msra.mxu1 %v6706_v2  ;;  %2578 = vmatprep.subr.bf16.mxu0 %v6713_v3  ;;  %v6758_v2 = vcombine.low %v2726_v54, %v2730_v55  ;;  %v6765_v3 = vcombine.high %v2733_v61, %v2737_v62  ;;  %v2785_v53 = vld [vmem:[#allocation10 + $0x2a0] sm:$0xff] }
 0x235   :  { %2664 = vmatprep.subr.bf16.mxu1 %v6715_v4  ;;  %v6767_v4 = vcombine.high %v2734_v10, %v2738_v63 }
 0x237   :  { %2579 = vmatpush1.bf16.msra.mxu0 %v6712_v9  ;;  %v6764_v9 = vcombine.low %v2733_v61, %v2737_v62  ;;  %v2789_v61 = vld [vmem:[#allocation10 + $0x2c0] sm:$0xff] }
 0x238   :  { %2665 = vmatpush1.bf16.msra.mxu1 %v6714_v11  ;;  %2580 = vmatprep.subr.bf16.mxu0 %v6721_v12  ;;  %v6766_v11 = vcombine.low %v2734_v10, %v2738_v63  ;;  %v6773_v12 = vcombine.high %v2741_v5, %v2745_v6  ;;  %v2793_v62 = vld [vmem:[#allocation10 + $0x2e0] sm:$0xff]  ;;  %v2790_v10 = vld [vmem:[#allocation10 + $0x2c8] sm:$0xff] }
 0x239   :  { %2666 = vmatprep.subr.bf16.mxu1 %v6723_v42  ;;  %v6775_v42 = vcombine.high %v2742_v7, %v2746_v8  ;;  %v2794_v63 = vld [vmem:[#allocation10 + $0x2e8] sm:$0xff] }
 0x23b   :  { %2581 = vmatpush1.bf16.msra.mxu0 %v6720_v47  ;;  %v6772_v47 = vcombine.low %v2741_v5, %v2745_v6  ;;  %v2797_v5 = vld [vmem:[#allocation10 + $0x300] sm:$0xff] }
 0x23c   :  { %2667 = vmatpush1.bf16.msra.mxu1 %v6722_v50  ;;  %2582 = vmatprep.subr.bf16.mxu0 %v6729_v51  ;;  %v6774_v50 = vcombine.low %v2742_v7, %v2746_v8  ;;  %v6781_v51 = vcombine.high %v2749_v43, %v2753_v44  ;;  %v2801_v6 = vld [vmem:[#allocation10 + $0x320] sm:$0xff]  ;;  %v2798_v7 = vld [vmem:[#allocation10 + $0x308] sm:$0xff] }
 0x23d   :  { %2668 = vmatprep.subr.bf16.mxu1 %v6731_v13  ;;  %v6783_v13 = vcombine.high %v2750_v16, %v2754_v58  ;;  %v2802_v8 = vld [vmem:[#allocation10 + $0x328] sm:$0xff] }
 0x23f   :  { %2583 = vmatpush1.bf16.msra.mxu0 %v6728_v23  ;;  %v6780_v23 = vcombine.low %v2749_v43, %v2753_v44  ;;  %v6828_v43 = vcombine.low %v2797_v5, %v2801_v6  ;;  %v6830_v44 = vcombine.low %v2798_v7, %v2802_v8 }
 0x240   :  { %2669 = vmatpush1.bf16.msra.mxu1 %v6730_v36  ;;  %4279 = vmatprep.subr.bf16.mxu0 %v6733_v24  ;;  %v6782_v36 = vcombine.low %v2750_v16, %v2754_v58  ;;  %v6789_v24 = vcombine.high %v2757_v14, %v2761_v20  ;;  %v2805_v16 = vld [vmem:[#allocation10 + $0x340] sm:$0xff] }
 0x241   :  { %4365 = vmatprep.subr.bf16.mxu1 %v6735_v25  ;;  %v6791_v25 = vcombine.high %v2758_v21, %v2762_v22  ;;  %v2809_v58 = vld [vmem:[#allocation10 + $0x360] sm:$0xff] }
 0x242   :  { %2585 = vmatmul.mubr.bf16.vlgmr.msra.gmra.mrb[8].mxu0 %v8148_v48 }
 0x243   :  { %2671 = vmatmul.mubr.bf16.vlgmr.msra.gmra.mrb[16].mxu1 %v8148_v48  ;;  %4280 = vmatpush1.bf16.msra.mxu0 %v6732_v28  ;;  %v6759_v48 = vcombine.high %v2726_v54, %v2730_v55  ;;  %v6788_v28 = vcombine.low %v2757_v14, %v2761_v20  ;;  %v2782_v54 = vld [vmem:[#allocation10 + $0x288] sm:$0xff]  ;;  %v6836_v20 = vcombine.low %v2805_v16, %v2809_v58 }
 0x244   :  { %4366 = vmatpush1.bf16.msra.mxu1 %v6734_v29  ;;  %4281 = vmatprep.subr.bf16.mxu0 %v6741_v30  ;;  %v6790_v29 = vcombine.low %v2758_v21, %v2762_v22  ;;  %v6797_v30 = vcombine.high %v2765_v26, %v2769_v39  ;;  %v2786_v55 = vld [vmem:[#allocation10 + $0x2a8] sm:$0xff] }
 0x245   :  { %4367 = vmatprep.subr.bf16.mxu1 %v6743_v31  ;;  %v6799_v31 = vcombine.high %v2766_v57, %v2770_v27 }
 0x247   :  { %4282 = vmatpush1.bf16.msra.mxu0 %v6740_v34  ;;  %v6796_v34 = vcombine.low %v2765_v26, %v2769_v39  ;;  %v2813_v26 = vld [vmem:[#allocation10 + $0x380] sm:$0xff] }
 0x248   :  { %4368 = vmatpush1.bf16.msra.mxu1 %v6742_v0  ;;  %4283 = vmatprep.subr.bf16.mxu0 %v6749_v38  ;;  %v6798_v0 = vcombine.low %v2766_v57, %v2770_v27  ;;  %v6805_v38 = vcombine.high %v2773_v49, %v2777_v46  ;;  %v2817_v39 = vld [vmem:[#allocation10 + $0x3a0] sm:$0xff]  ;;  %v2814_v57 = vld [vmem:[#allocation10 + $0x388] sm:$0xff] }
 0x249   :  { %4369 = vmatprep.subr.bf16.mxu1 %v6751_v40  ;;  %v6807_v40 = vcombine.high %v2774_v32, %v2778_v33 }
 0x24b   :  { %4284 = vmatpush1.bf16.msra.mxu0 %v6748_v56  ;;  %v6804_v56 = vcombine.low %v2773_v49, %v2777_v46 }
 0x24c   :  { %4370 = vmatpush1.bf16.msra.mxu1 %v6750_v59  ;;  %4285 = vmatprep.subr.bf16.mxu0 %v6757_v60  ;;  %v6806_v59 = vcombine.low %v2774_v32, %v2778_v33  ;;  %v6813_v60 = vcombine.high %v2781_v52, %v2785_v53  ;;  %v2821_v32 = vld [vmem:[#allocation10 + $0x3c0] sm:$0xff] }
 0x24d   :  { %4371 = vmatprep.subr.bf16.mxu1 %v6759_v48  ;;  %v6815_v48 = vcombine.high %v2782_v54, %v2786_v55  ;;  %v2825_v33 = vld [vmem:[#allocation10 + $0x3e0] sm:$0xff] }
 0x24f   :  { %4286 = vmatpush1.bf16.msra.mxu0 %v6756_v1  ;;  %v6812_v1 = vcombine.low %v2781_v52, %v2785_v53 }
 0x250   :  { %4372 = vmatpush1.bf16.msra.mxu1 %v6758_v2  ;;  %4287 = vmatprep.subr.bf16.mxu0 %v6765_v3  ;;  %v6814_v2 = vcombine.low %v2782_v54, %v2786_v55  ;;  %v6821_v3 = vcombine.high %v2789_v61, %v2793_v62  ;;  %v8166_v54 = vld [vmem:[#allocation10 + $0x400] sm:$0xff] }
 0x251   :  { %4373 = vmatprep.subr.bf16.mxu1 %v6767_v4  ;;  %v6823_v4 = vcombine.high %v2790_v10, %v2794_v63  ;;  %v8168_v55 = vld [vmem:[#allocation10 + $0x420] sm:$0xff] }
 0x253   :  { %4288 = vmatpush1.bf16.msra.mxu0 %v6764_v9  ;;  %v6820_v9 = vcombine.low %v2789_v61, %v2793_v62 }
 0x254   :  { %4374 = vmatpush1.bf16.msra.mxu1 %v6766_v11  ;;  %4289 = vmatprep.subr.bf16.mxu0 %v6773_v12  ;;  %v6822_v11 = vcombine.low %v2790_v10, %v2794_v63  ;;  %v6829_v12 = vcombine.high %v2797_v5, %v2801_v6  ;;  %v1015_v10 = vld [vmem:[%s8286_s4] sm:$0xff] }
 0x255   :  { %4375 = vmatprep.subr.bf16.mxu1 %v6775_v42  ;;  %v6831_v42 = vcombine.high %v2798_v7, %v2802_v8  ;;  %v1020_v63 = vrot.slane %v1015_v10, %v8081_v15  ;;  %v1044_v5 = vrot.slane %v1015_v10, %v8128_v37  ;;  %v1040_v6 = vrot.slane %v1015_v10, %v8092_v19 }
 0x256   :  { %v1048_v7 = vrot.slane %v1015_v10, %v8134_v45 }
 0x257   :  { %4290 = vmatpush1.bf16.msra.mxu0 %v6772_v47  ;;  %v2806_v47 = vld [vmem:[#allocation10 + $0x348] sm:$0xff] }
 0x258   :  { %4376 = vmatpush1.bf16.msra.mxu1 %v6774_v50  ;;  %4291 = vmatprep.subr.bf16.mxu0 %v6781_v51  ;;  %v6837_v50 = vcombine.high %v2805_v16, %v2809_v58  ;;  %v2810_v51 = vld [vmem:[#allocation10 + $0x368] sm:$0xff] }
 0x259   :  { %4377 = vmatprep.subr.bf16.mxu1 %v6783_v13  ;;  %v6838_v21 = vcombine.low %v2806_v47, %v2810_v51  ;;  %v6839_v22 = vcombine.high %v2806_v47, %v2810_v51 }
 0x25b   :  { %4292 = vmatpush1.bf16.msra.mxu0 %v6780_v23 }
 0x25c   :  { %4378 = vmatpush1.bf16.msra.mxu1 %v6782_v36  ;;  %4293 = vmatprep.subr.bf16.mxu0 %v6789_v24 }
 0x25d   :  { %4379 = vmatprep.subr.bf16.mxu1 %v6791_v25 }
 0x25f   :  { %4294 = vmatpush1.bf16.msra.mxu0 %v6788_v28 }
 0x260   :  { %4380 = vmatpush1.bf16.msra.mxu1 %v6790_v29  ;;  %4295 = vmatprep.subr.bf16.mxu0 %v6797_v30  ;;  %v6845_v29 = vcombine.high %v2813_v26, %v2817_v39  ;;  %v2818_v30 = vld [vmem:[#allocation10 + $0x3a8] sm:$0xff] }
 0x261   :  { %4381 = vmatprep.subr.bf16.mxu1 %v6799_v31  ;;  %v6844_v31 = vcombine.low %v2813_v26, %v2817_v39  ;;  %v6846_v49 = vcombine.low %v2814_v57, %v2818_v30  ;;  %v6847_v46 = vcombine.high %v2814_v57, %v2818_v30 }
 0x263   :  { %4296 = vmatpush1.bf16.msra.mxu0 %v6796_v34  ;;  %v2822_v34 = vld [vmem:[#allocation10 + $0x3c8] sm:$0xff] }
 0x264   :  { %4382 = vmatpush1.bf16.msra.mxu1 %v6798_v0  ;;  %4297 = vmatprep.subr.bf16.mxu0 %v6805_v38  ;;  %v6853_v0 = vcombine.high %v2821_v32, %v2825_v33  ;;  %v2826_v38 = vld [vmem:[#allocation10 + $0x3e8] sm:$0xff] }
 0x265   :  { %4383 = vmatprep.subr.bf16.mxu1 %v6807_v40  ;;  %v6852_v40 = vcombine.low %v2821_v32, %v2825_v33  ;;  %v6854_v52 = vcombine.low %v2822_v34, %v2826_v38  ;;  %v6855_v53 = vcombine.high %v2822_v34, %v2826_v38 }
 0x267   :  { %4298 = vmatpush1.bf16.msra.mxu0 %v6804_v56  ;;  %v8170_v56 = vld [vmem:[#allocation10 + $0x408] sm:$0xff] }
 0x268   :  { %4384 = vmatpush1.bf16.msra.mxu1 %v6806_v59  ;;  %4299 = vmatprep.subr.bf16.mxu0 %v6813_v60  ;;  %v6861_v59 = vcombine.high %v8166_v54, %v8168_v55  ;;  %v8174_v60 = vld [vmem:[#allocation10 + $0x428] sm:$0xff] }
 0x269   :  { %4385 = vmatprep.subr.bf16.mxu1 %v6815_v48  ;;  %v6860_v48 = vcombine.low %v8166_v54, %v8168_v55  ;;  %v6862_v61 = vcombine.low %v8170_v56, %v8174_v60  ;;  %v6863_v62 = vcombine.high %v8170_v56, %v8174_v60 }
 0x26b   :  { %4300 = vmatpush1.bf16.msra.mxu0 %v6812_v1  ;;  %v1028_v1 = vrot.slane %v1015_v10, %v8125_v35 }
 0x26c   :  { %4386 = vmatpush1.bf16.msra.mxu1 %v6814_v2  ;;  %4301 = vmatprep.subr.bf16.mxu0 %v6821_v3  ;;  %v1024_v2 = vrot.slane %v1015_v10, %v8089_v18  ;;  %v1032_v3 = vrot.slane %v1015_v10, %v8131_v41 }
 0x26d   :  { %4387 = vmatprep.subr.bf16.mxu1 %v6823_v4  ;;  %v1036_v4 = vrot.slane %v1015_v10, %v8086_v17 }
 0x26f   :  { %4302 = vmatpush1.bf16.msra.mxu0 %v6820_v9 }
 0x270   :  { %4388 = vmatpush1.bf16.msra.mxu1 %v6822_v11  ;;  %4303 = vmatprep.subr.bf16.mxu0 %v6829_v12 }
 0x271   :  { %4389 = vmatprep.subr.bf16.mxu1 %v6831_v42 }
 0x273   :  { %4304 = vmatpush1.bf16.msra.mxu0 %v6828_v43 }
 0x274   :  { %4390 = vmatpush1.bf16.msra.mxu1 %v6830_v44  ;;  %4305 = vmatprep.subr.bf16.mxu0 %v6837_v50 }
 0x275   :  { %4391 = vmatprep.subr.bf16.mxu1 %v6839_v22 }
 0x277   :  { %4306 = vmatpush1.bf16.msra.mxu0 %v6836_v20 }
 0x278   :  { %4392 = vmatpush1.bf16.msra.mxu1 %v6838_v21  ;;  %4307 = vmatprep.subr.bf16.mxu0 %v6845_v29 }
 0x279   :  { %4393 = vmatprep.subr.bf16.mxu1 %v6847_v46 }
 0x27b   :  { %4308 = vmatpush1.bf16.msra.mxu0 %v6844_v31 }
 0x27c   :  { %4394 = vmatpush1.bf16.msra.mxu1 %v6846_v49  ;;  %4309 = vmatprep.subr.bf16.mxu0 %v6853_v0 }
 0x27d   :  { %4395 = vmatprep.subr.bf16.mxu1 %v6855_v53 }
 0x27f   :  { %4310 = vmatpush1.bf16.msra.mxu0 %v6852_v40 }
 0x280   :  { %4396 = vmatpush1.bf16.msra.mxu1 %v6854_v52  ;;  %4322 = vmatprep.subr.bf16.mxu0 %v6861_v59  ;;  %v2837_v59 = vld [vmem:[#allocation10 + $0x440] sm:$0xff] }
 0x281   :  { %4408 = vmatprep.subr.bf16.mxu1 %v6863_v62 }
 0x295   :  { %v2414_v13 = vpop.f32.mrb[4].mxu0  ;;  %v2500_v14 = vpop.f32.mrb[12].mxu1 }
 0x296   :  { %v2416_v23 = vpop.f32.mrb[5].mxu0  ;;  %v2502_v36 = vpop.f32.mrb[13].mxu1  ;;  %v7265_v8 = vadd.f32 %v2414_v13, %v1020_v63  ;;  %v7269_v11 = vadd.f32 %v2500_v14, %v1028_v1 }
 0x297   :  { %v2418_v24 = vpop.f32.mrb[6].mxu0  ;;  %v2504_v25 = vpop.f32.mrb[14].mxu1  ;;  %v7266_v12 = vadd.f32 %v2416_v23, %v1024_v2  ;;  %v7270_v42 = vadd.f32 %v2502_v36, %v1032_v3 }
 0x298   :  { %v2420_v27 = vpop.f32.mrb[7].mxu0  ;;  %v8164_v28 = vpop.f32.mrb[15].mxu1  ;;  %v7267_v58 = vadd.f32 %v2418_v24, %v1020_v63  ;;  %v7271_v47 = vadd.f32 %v2504_v25, %v1028_v1  ;;  %v2841_v1 = vld [vmem:[#allocation10 + $0x460] sm:$0xff] }
 0x299   :  { %v7268_v22 = vadd.f32 %v2420_v27, %v1024_v2  ;;  %v7272_v49 = vadd.f32 %v8164_v28, %v1032_v3  ;;  %v2838_v2 = vld [vmem:[#allocation10 + $0x448] sm:$0xff] }
 0x29a   :  { %v2842_v28 = vld [vmem:[#allocation10 + $0x468] sm:$0xff] }
 0x315   :  { %v2586_v9 = vpop.f32.mrb[8].mxu0 }
 0x316   :  { %v7273_v43 = vadd.f32 %v2586_v9, %v1036_v4  ;;  %v2672_v44 = vpop.f32.mrb[16].mxu1  ;;  %v2588_v16 = vpop.f32.mrb[9].mxu0  ;;  %v2849_v9 = vld [vmem:[#allocation10 + $0x4a0] sm:$0xff] }
 0x317   :  { %v7277_v50 = vadd.f32 %v2672_v44, %v1044_v5  ;;  %v7274_v51 = vadd.f32 %v2588_v16, %v1040_v6  ;;  %v2674_v20 = vpop.f32.mrb[17].mxu1  ;;  %v2590_v21 = vpop.f32.mrb[10].mxu0 }
 0x318   :  { %v2681_v26 = vmax.f32 %v7265_v8, %v7273_v43  ;;  %v7278_v39 = vadd.f32 %v2674_v20, %v1048_v7  ;;  %v7275_v57 = vadd.f32 %v2590_v21, %v1036_v4  ;;  %v2676_v29 = vpop.f32.mrb[18].mxu1  ;;  %v2592_v30 = vpop.f32.mrb[11].mxu0  ;;  %v6871_v8 = vcombine.high %v2838_v2, %v2842_v28  ;;  %v2862_v20 = vld [vmem:[#allocation10 + $0x508] sm:$0xff] }
 0x319   :  { %v2683_v13 = vmax.f32 %v7269_v11, %v7277_v50  ;;  %v2682_v31 = vmax.f32 %v7266_v12, %v7274_v51  ;;  %v7279_v14 = vadd.f32 %v2676_v29, %v1044_v5  ;;  %v7276_v23 = vadd.f32 %v2592_v30, %v1040_v6  ;;  %v2678_v36 = vpop.f32.mrb[19].mxu1  ;;  %v2845_v6 = vld [vmem:[#allocation10 + $0x480] sm:$0xff]  ;;  %v2846_v11 = vld [vmem:[#allocation10 + $0x488] sm:$0xff] }
 0x31a   :  { %v2684_v46 = vmax.f32 %v7270_v42, %v7278_v39  ;;  %v2685_v24 = vmax.f32 %v7267_v58, %v7275_v57  ;;  %v7280_v25 = vadd.f32 %v2678_v36, %v1048_v7  ;;  %v2689_v34 = vmax.f32 %v2681_v26, 0.0  ;;  %v2850_v12 = vld [vmem:[#allocation10 + $0x4a8] sm:$0xff]  ;;  %v2853_v58 = vld [vmem:[#allocation10 + $0x4c0] sm:$0xff] }
 0x31b   :  { %v2687_v32 = vmax.f32 %v7271_v47, %v7279_v14  ;;  %v2686_v33 = vmax.f32 %v7268_v22, %v7276_v23  ;;  %v2691_v38 = vmax.f32 %v2683_v13, 0.0  ;;  %v2690_v40 = vmax.f32 %v2682_v31, 0.0  ;;  %v2857_v47 = vld [vmem:[#allocation10 + $0x4e0] sm:$0xff]  ;;  %v2854_v50 = vld [vmem:[#allocation10 + $0x4c8] sm:$0xff] }
 0x31c   :  { %v2693_v0 = vmax.f32 %v2685_v24, 0.0  ;;  %v2688_v27 = vmax.f32 %v7272_v49, %v7280_v25  ;;  %v2692_v62 = vmax.f32 %v2684_v46, 0.0  ;;  %v6869_v7 = vcombine.high %v2837_v59, %v2841_v1  ;;  %v2858_v51 = vld [vmem:[#allocation10 + $0x4e8] sm:$0xff]  ;;  %v2869_v29 = vld [vmem:[#allocation10 + $0x540] sm:$0xff] }
 0x31d   :  { %v2695_v52 = vmax.f32 %v2687_v32, 0.0  ;;  %v2694_v53 = vmax.f32 %v2686_v33, 0.0  ;;  %v6868_v42 = vcombine.low %v2837_v59, %v2841_v1  ;;  %v6870_v43 = vcombine.low %v2838_v2, %v2842_v28  ;;  %v2866_v21 = vld [vmem:[#allocation10 + $0x528] sm:$0xff]  ;;  %v2873_v30 = vld [vmem:[#allocation10 + $0x560] sm:$0xff] }
 0x31e   :  { %v8194_v10 = vpack.c.bf16 %v2693_v0, %v2689_v34  ;;  %v2696_v63 = vmax.f32 %v2688_v27, 0.0  ;;  %v6877_v44 = vcombine.high %v2845_v6, %v2849_v9  ;;  %v6879_v16 = vcombine.high %v2846_v11, %v2850_v12  ;;  %v2870_v13 = vld [vmem:[#allocation10 + $0x548] sm:$0xff]  ;;  %v2877_v46 = vld [vmem:[#allocation10 + $0x580] sm:$0xff] }
 0x31f   :  { %v8196_v3 = vpack.c.bf16 %v2695_v52, %v2691_v38  ;;  %v8198_v4 = vpack.c.bf16 %v2694_v53, %v2690_v40  ;;  %v6876_v54 = vcombine.low %v2845_v6, %v2849_v9  ;;  %v6878_v55 = vcombine.low %v2846_v11, %v2850_v12  ;;  %v2874_v31 = vld [vmem:[#allocation10 + $0x568] sm:$0xff]  ;;  %v2881_v24 = vld [vmem:[#allocation10 + $0x5a0] sm:$0xff] }
 0x320   :  { %v8200_v5 = vpack.c.bf16 %v2696_v63, %v2692_v62  ;;  %v6885_v56 = vcombine.high %v2853_v58, %v2857_v47  ;;  %v6887_v60 = vcombine.high %v2854_v50, %v2858_v51  ;;  %v6884_v22 = vcombine.low %v2853_v58, %v2857_v47  ;;  %v2878_v25 = vld [vmem:[#allocation10 + $0x588] sm:$0xff]  ;;  %v2885_v38 = vld [vmem:[#allocation10 + $0x5c0] sm:$0xff] }
 0x321   :  { %4311 = vmatprep.mubr.bf16.mxu0 %v8198_v4  ;;  %4397 = vmatprep.mubr.bf16.mxu1 %v8198_v4  ;;  %v6886_v26 = vcombine.low %v2854_v50, %v2858_v51  ;;  %v6895_v57 = vcombine.high %v2862_v20, %v2866_v21  ;;  %v6894_v23 = vcombine.low %v2862_v20, %v2866_v21  ;;  %v2882_v32 = vld [vmem:[#allocation10 + $0x5a8] sm:$0xff]  ;;  %v2889_v40 = vld [vmem:[#allocation10 + $0x5e0] sm:$0xff] }
 0x322   :  { %4312 = vmatmul.mubr.bf16.vlgmr.msra.gmra.mrb[12].mxu0 %v8194_v10  ;;  %4398 = vmatmul.mubr.bf16.vlgmr.msra.gmra.mrb[20].mxu1 %v8194_v10  ;;  %v6901_v36 = vcombine.high %v2869_v29, %v2873_v30  ;;  %v6903_v49 = vcombine.high %v2870_v13, %v2874_v31  ;;  %v6900_v33 = vcombine.low %v2869_v29, %v2873_v30  ;;  %v2886_v52 = vld [vmem:[#allocation10 + $0x5c8] sm:$0xff]  ;;  %v2893_v2 = vld [vmem:[#allocation10 + $0x600] sm:$0xff] }
 0x323   :  { %4323 = vmatpush1.bf16.msra.mxu0 %v6860_v48  ;;  %4409 = vmatpush1.bf16.msra.mxu1 %v6862_v61  ;;  %v2861_v48 = vld [vmem:[#allocation10 + $0x500] sm:$0xff]  ;;  %v6902_v34 = vcombine.low %v2870_v13, %v2874_v31  ;;  %v6909_v0 = vcombine.high %v2877_v46, %v2881_v24  ;;  %v6911_v27 = vcombine.high %v2878_v25, %v2882_v32  ;;  %v2890_v53 = vld [vmem:[#allocation10 + $0x5e8] sm:$0xff] }
 0x324   :  { %4354 = vmatprep.mubr.bf16.mxu0 %v8200_v5  ;;  %4440 = vmatprep.mubr.bf16.mxu1 %v8200_v5  ;;  %v2865_v61 = vld [vmem:[#allocation10 + $0x520] sm:$0xff]  ;;  %v6908_v59 = vcombine.low %v2877_v46, %v2881_v24  ;;  %v6910_v62 = vcombine.low %v2878_v25, %v2882_v32  ;;  %v6917_v63 = vcombine.high %v2885_v38, %v2889_v40  ;;  %v2894_v6 = vld [vmem:[#allocation10 + $0x608] sm:$0xff] }
 0x325   :  { %4324 = vmatprep.subr.bf16.mxu0 %v6869_v7  ;;  %4410 = vmatprep.subr.bf16.mxu1 %v6871_v8  ;;  %v6893_v39 = vcombine.high %v2861_v48, %v2865_v61  ;;  %v6892_v14 = vcombine.low %v2861_v48, %v2865_v61  ;;  %v6919_v1 = vcombine.high %v2886_v52, %v2890_v53  ;;  %v2897_v28 = vld [vmem:[#allocation10 + $0x620] sm:$0xff]  ;;  %v2898_v7 = vld [vmem:[#allocation10 + $0x628] sm:$0xff] }
 0x326   :  { %v6916_v8 = vcombine.low %v2885_v38, %v2889_v40  ;;  %v6918_v9 = vcombine.low %v2886_v52, %v2890_v53  ;;  %v6925_v11 = vcombine.high %v2893_v2, %v2897_v28  ;;  %v6927_v12 = vcombine.high %v2894_v6, %v2898_v7 }
 0x327   :  { %4325 = vmatpush1.bf16.msra.mxu0 %v6868_v42  ;;  %4411 = vmatpush1.bf16.msra.mxu1 %v6870_v43  ;;  %v2901_v42 = vld [vmem:[#allocation10 + $0x640] sm:$0xff]  ;;  %v6924_v58 = vcombine.low %v2893_v2, %v2897_v28  ;;  %v6926_v47 = vcombine.low %v2894_v6, %v2898_v7 }
 0x328   :  { %4326 = vmatprep.subr.bf16.mxu0 %v6877_v44  ;;  %4412 = vmatprep.subr.bf16.mxu1 %v6879_v16  ;;  %v2905_v43 = vld [vmem:[#allocation10 + $0x660] sm:$0xff]  ;;  %v2902_v44 = vld [vmem:[#allocation10 + $0x648] sm:$0xff] }
 0x329   :  { %v2906_v16 = vld [vmem:[#allocation10 + $0x668] sm:$0xff]  ;;  %v6933_v50 = vcombine.high %v2901_v42, %v2905_v43  ;;  %v6932_v48 = vcombine.low %v2901_v42, %v2905_v43 }
 0x32a   :  { %v6935_v51 = vcombine.high %v2902_v44, %v2906_v16  ;;  %v6934_v61 = vcombine.low %v2902_v44, %v2906_v16 }
 0x32b   :  { %4327 = vmatpush1.bf16.msra.mxu0 %v6876_v54  ;;  %4413 = vmatpush1.bf16.msra.mxu1 %v6878_v55  ;;  %v2909_v54 = vld [vmem:[#allocation10 + $0x680] sm:$0xff] }
 0x32c   :  { %4328 = vmatprep.subr.bf16.mxu0 %v6885_v56  ;;  %4414 = vmatprep.subr.bf16.mxu1 %v6887_v60  ;;  %v2913_v55 = vld [vmem:[#allocation10 + $0x6a0] sm:$0xff]  ;;  %v2910_v56 = vld [vmem:[#allocation10 + $0x688] sm:$0xff] }
 0x32d   :  { %v2914_v60 = vld [vmem:[#allocation10 + $0x6a8] sm:$0xff]  ;;  %v6941_v20 = vcombine.high %v2909_v54, %v2913_v55  ;;  %v6940_v29 = vcombine.low %v2909_v54, %v2913_v55 }
 0x32e   :  { %v6943_v21 = vcombine.high %v2910_v56, %v2914_v60  ;;  %v6942_v30 = vcombine.low %v2910_v56, %v2914_v60 }
 0x32f   :  { %4329 = vmatpush1.bf16.msra.mxu0 %v6884_v22  ;;  %4415 = vmatpush1.bf16.msra.mxu1 %v6886_v26  ;;  %v2917_v22 = vld [vmem:[#allocation10 + $0x6c0] sm:$0xff] }
 0x330   :  { %4330 = vmatprep.subr.bf16.mxu0 %v6893_v39  ;;  %4416 = vmatprep.subr.bf16.mxu1 %v6895_v57  ;;  %v2921_v26 = vld [vmem:[#allocation10 + $0x6e0] sm:$0xff]  ;;  %v2918_v39 = vld [vmem:[#allocation10 + $0x6c8] sm:$0xff] }
 0x331   :  { %v2922_v57 = vld [vmem:[#allocation10 + $0x6e8] sm:$0xff]  ;;  %v6949_v13 = vcombine.high %v2917_v22, %v2921_v26  ;;  %v6948_v46 = vcombine.low %v2917_v22, %v2921_v26 }
 0x332   :  { %v6951_v31 = vcombine.high %v2918_v39, %v2922_v57  ;;  %v6950_v24 = vcombine.low %v2918_v39, %v2922_v57 }
 0x333   :  { %4331 = vmatpush1.bf16.msra.mxu0 %v6892_v14  ;;  %4417 = vmatpush1.bf16.msra.mxu1 %v6894_v23  ;;  %v2925_v14 = vld [vmem:[#allocation10 + $0x700] sm:$0xff] }
 0x334   :  { %4332 = vmatprep.subr.bf16.mxu0 %v6901_v36  ;;  %4418 = vmatprep.subr.bf16.mxu1 %v6903_v49  ;;  %v2929_v23 = vld [vmem:[#allocation10 + $0x720] sm:$0xff]  ;;  %v2926_v36 = vld [vmem:[#allocation10 + $0x708] sm:$0xff] }
 0x335   :  { %v2930_v49 = vld [vmem:[#allocation10 + $0x728] sm:$0xff]  ;;  %v6957_v25 = vcombine.high %v2925_v14, %v2929_v23  ;;  %v6956_v38 = vcombine.low %v2925_v14, %v2929_v23 }
 0x336   :  { %v6959_v32 = vcombine.high %v2926_v36, %v2930_v49  ;;  %v6958_v40 = vcombine.low %v2926_v36, %v2930_v49 }
 0x337   :  { %4333 = vmatpush1.bf16.msra.mxu0 %v6900_v33  ;;  %4419 = vmatpush1.bf16.msra.mxu1 %v6902_v34  ;;  %v2933_v33 = vld [vmem:[#allocation10 + $0x740] sm:$0xff] }
 0x338   :  { %4334 = vmatprep.subr.bf16.mxu0 %v6909_v0  ;;  %4420 = vmatprep.subr.bf16.mxu1 %v6911_v27  ;;  %v2937_v34 = vld [vmem:[#allocation10 + $0x760] sm:$0xff]  ;;  %v2934_v0 = vld [vmem:[#allocation10 + $0x748] sm:$0xff] }
 0x339   :  { %v2938_v27 = vld [vmem:[#allocation10 + $0x768] sm:$0xff]  ;;  %v6965_v52 = vcombine.high %v2933_v33, %v2937_v34  ;;  %v6964_v2 = vcombine.low %v2933_v33, %v2937_v34 }
 0x33a   :  { %v6967_v53 = vcombine.high %v2934_v0, %v2938_v27  ;;  %v6966_v28 = vcombine.low %v2934_v0, %v2938_v27 }
 0x33b   :  { %4335 = vmatpush1.bf16.msra.mxu0 %v6908_v59  ;;  %4421 = vmatpush1.bf16.msra.mxu1 %v6910_v62  ;;  %v2941_v59 = vld [vmem:[#allocation10 + $0x780] sm:$0xff] }
 0x33c   :  { %4336 = vmatprep.subr.bf16.mxu0 %v6917_v63  ;;  %4422 = vmatprep.subr.bf16.mxu1 %v6919_v1  ;;  %v2945_v62 = vld [vmem:[#allocation10 + $0x7a0] sm:$0xff]  ;;  %v2942_v63 = vld [vmem:[#allocation10 + $0x788] sm:$0xff] }
 0x33d   :  { %v2946_v1 = vld [vmem:[#allocation10 + $0x7a8] sm:$0xff]  ;;  %v6973_v6 = vcombine.high %v2941_v59, %v2945_v62  ;;  %v6972_v42 = vcombine.low %v2941_v59, %v2945_v62 }
 0x33e   :  { %v6975_v7 = vcombine.high %v2942_v63, %v2946_v1  ;;  %v6974_v43 = vcombine.low %v2942_v63, %v2946_v1  ;;  %v2743_v1 = vld [vmem:[#allocation10 + $0x150] sm:$0xff] }
 0x33f   :  { %4337 = vmatpush1.bf16.msra.mxu0 %v6916_v8  ;;  %4423 = vmatpush1.bf16.msra.mxu1 %v6918_v9  ;;  %v2949_v8 = vld [vmem:[#allocation10 + $0x7c0] sm:$0xff] }
 0x340   :  { %4338 = vmatprep.subr.bf16.mxu0 %v6925_v11  ;;  %4424 = vmatprep.subr.bf16.mxu1 %v6927_v12  ;;  %v2953_v9 = vld [vmem:[#allocation10 + $0x7e0] sm:$0xff]  ;;  %v2950_v11 = vld [vmem:[#allocation10 + $0x7c8] sm:$0xff] }
 0x341   :  { %v2954_v12 = vld [vmem:[#allocation10 + $0x7e8] sm:$0xff]  ;;  %v6981_v44 = vcombine.high %v2949_v8, %v2953_v9  ;;  %v6980_v54 = vcombine.low %v2949_v8, %v2953_v9 }
 0x342   :  { %v6983_v16 = vcombine.high %v2950_v11, %v2954_v12  ;;  %v6982_v55 = vcombine.low %v2950_v11, %v2954_v12  ;;  %v2751_v12 = vld [vmem:[#allocation10 + $0x190] sm:$0xff] }
 0x343   :  { %4339 = vmatpush1.bf16.msra.mxu0 %v6924_v58  ;;  %4425 = vmatpush1.bf16.msra.mxu1 %v6926_v47  ;;  %v2703_v58 = vld [vmem:[#allocation10 + $0x10] sm:$0xff] }
 0x344   :  { %4340 = vmatprep.subr.bf16.mxu0 %v6933_v50  ;;  %4426 = vmatprep.subr.bf16.mxu1 %v6935_v51  ;;  %v2707_v47 = vld [vmem:[#allocation10 + $0x30] sm:$0xff]  ;;  %v2704_v50 = vld [vmem:[#allocation10 + $0x18] sm:$0xff] }
 0x345   :  { %v2708_v51 = vld [vmem:[#allocation10 + $0x38] sm:$0xff]  ;;  %v6737_v56 = vcombine.high %v2703_v58, %v2707_v47  ;;  %v6736_v22 = vcombine.low %v2703_v58, %v2707_v47 }
 0x346   :  { %v6739_v60 = vcombine.high %v2704_v50, %v2708_v51  ;;  %v6738_v26 = vcombine.low %v2704_v50, %v2708_v51  ;;  %v2759_v51 = vld [vmem:[#allocation10 + $0x1d0] sm:$0xff] }
 0x347   :  { %4341 = vmatpush1.bf16.msra.mxu0 %v6932_v48  ;;  %4427 = vmatpush1.bf16.msra.mxu1 %v6934_v61  ;;  %v2711_v48 = vld [vmem:[#allocation10 + $0x50] sm:$0xff] }
 0x348   :  { %4342 = vmatprep.subr.bf16.mxu0 %v6941_v20  ;;  %4428 = vmatprep.subr.bf16.mxu1 %v6943_v21  ;;  %v2715_v61 = vld [vmem:[#allocation10 + $0x70] sm:$0xff]  ;;  %v2712_v20 = vld [vmem:[#allocation10 + $0x58] sm:$0xff] }
 0x349   :  { %v2716_v21 = vld [vmem:[#allocation10 + $0x78] sm:$0xff]  ;;  %v6745_v39 = vcombine.high %v2711_v48, %v2715_v61  ;;  %v6744_v14 = vcombine.low %v2711_v48, %v2715_v61 }
 0x34a   :  { %v6747_v57 = vcombine.high %v2712_v20, %v2716_v21  ;;  %v6746_v23 = vcombine.low %v2712_v20, %v2716_v21  ;;  %v2767_v21 = vld [vmem:[#allocation10 + $0x210] sm:$0xff] }
 0x34b   :  { %4343 = vmatpush1.bf16.msra.mxu0 %v6940_v29  ;;  %4429 = vmatpush1.bf16.msra.mxu1 %v6942_v30  ;;  %v2719_v29 = vld [vmem:[#allocation10 + $0x90] sm:$0xff] }
 0x34c   :  { %4344 = vmatprep.subr.bf16.mxu0 %v6949_v13  ;;  %4430 = vmatprep.subr.bf16.mxu1 %v6951_v31  ;;  %v2723_v30 = vld [vmem:[#allocation10 + $0xb0] sm:$0xff]  ;;  %v2720_v13 = vld [vmem:[#allocation10 + $0x98] sm:$0xff] }
 0x34d   :  { %v2724_v31 = vld [vmem:[#allocation10 + $0xb8] sm:$0xff]  ;;  %v6753_v36 = vcombine.high %v2719_v29, %v2723_v30  ;;  %v6752_v33 = vcombine.low %v2719_v29, %v2723_v30 }
 0x34e   :  { %v6755_v49 = vcombine.high %v2720_v13, %v2724_v31  ;;  %v6754_v34 = vcombine.low %v2720_v13, %v2724_v31  ;;  %v2775_v31 = vld [vmem:[#allocation10 + $0x250] sm:$0xff] }
 0x34f   :  { %4345 = vmatpush1.bf16.msra.mxu0 %v6948_v46  ;;  %4431 = vmatpush1.bf16.msra.mxu1 %v6950_v24  ;;  %v2727_v46 = vld [vmem:[#allocation10 + $0xd0] sm:$0xff] }
 0x350   :  { %4346 = vmatprep.subr.bf16.mxu0 %v6957_v25  ;;  %4432 = vmatprep.subr.bf16.mxu1 %v6959_v32  ;;  %v2731_v24 = vld [vmem:[#allocation10 + $0xf0] sm:$0xff]  ;;  %v2728_v25 = vld [vmem:[#allocation10 + $0xd8] sm:$0xff] }
 0x351   :  { %v2732_v32 = vld [vmem:[#allocation10 + $0xf8] sm:$0xff]  ;;  %v6761_v0 = vcombine.high %v2727_v46, %v2731_v24 }
 0x352   :  { %v6763_v27 = vcombine.high %v2728_v25, %v2732_v32  ;;  %v6762_v59 = vcombine.low %v2728_v25, %v2732_v32  ;;  %v2783_v32 = vld [vmem:[#allocation10 + $0x290] sm:$0xff] }
 0x353   :  { %4347 = vmatpush1.bf16.msra.mxu0 %v6956_v38  ;;  %4433 = vmatpush1.bf16.msra.mxu1 %v6958_v40  ;;  %v2735_v38 = vld [vmem:[#allocation10 + $0x110] sm:$0xff] }
 0x354   :  { %4348 = vmatprep.subr.bf16.mxu0 %v6965_v52  ;;  %4434 = vmatprep.subr.bf16.mxu1 %v6967_v53  ;;  %v2739_v40 = vld [vmem:[#allocation10 + $0x130] sm:$0xff]  ;;  %v2740_v52 = vld [vmem:[#allocation10 + $0x138] sm:$0xff]  ;;  %v6760_v53 = vcombine.low %v2727_v46, %v2731_v24 }
 0x355   :  { %v6769_v62 = vcombine.high %v2735_v38, %v2739_v40 }
 0x357   :  { %4349 = vmatpush1.bf16.msra.mxu0 %v6964_v2  ;;  %4435 = vmatpush1.bf16.msra.mxu1 %v6966_v28  ;;  %v2747_v2 = vld [vmem:[#allocation10 + $0x170] sm:$0xff]  ;;  %v2744_v28 = vld [vmem:[#allocation10 + $0x158] sm:$0xff] }
 0x358   :  { %4350 = vmatprep.subr.bf16.mxu0 %v6973_v6  ;;  %4436 = vmatprep.subr.bf16.mxu1 %v6975_v7  ;;  %v2748_v6 = vld [vmem:[#allocation10 + $0x178] sm:$0xff]  ;;  %v6768_v7 = vcombine.low %v2735_v38, %v2739_v40  ;;  %v6777_v9 = vcombine.high %v2743_v1, %v2747_v2 }
 0x359   :  { %v6779_v11 = vcombine.high %v2744_v28, %v2748_v6  ;;  %v6778_v58 = vcombine.low %v2744_v28, %v2748_v6  ;;  %v2799_v6 = vld [vmem:[#allocation10 + $0x310] sm:$0xff] }
 0x35b   :  { %4351 = vmatpush1.bf16.msra.mxu0 %v6972_v42  ;;  %4437 = vmatpush1.bf16.msra.mxu1 %v6974_v43  ;;  %v2755_v42 = vld [vmem:[#allocation10 + $0x1b0] sm:$0xff]  ;;  %v2752_v43 = vld [vmem:[#allocation10 + $0x198] sm:$0xff] }
 0x35c   :  { %4352 = vmatprep.subr.bf16.mxu0 %v6981_v44  ;;  %4438 = vmatprep.subr.bf16.mxu1 %v6983_v16  ;;  %v2756_v44 = vld [vmem:[#allocation10 + $0x1b8] sm:$0xff]  ;;  %v6776_v16 = vcombine.low %v2743_v1, %v2747_v2  ;;  %v6785_v47 = vcombine.high %v2751_v12, %v2755_v42 }
 0x35d   :  { %v6787_v50 = vcombine.high %v2752_v43, %v2756_v44  ;;  %v6786_v48 = vcombine.low %v2752_v43, %v2756_v44  ;;  %v2807_v44 = vld [vmem:[#allocation10 + $0x350] sm:$0xff] }
 0x35f   :  { %4353 = vmatpush1.bf16.msra.mxu0 %v6980_v54  ;;  %4439 = vmatpush1.bf16.msra.mxu1 %v6982_v55  ;;  %v2763_v54 = vld [vmem:[#allocation10 + $0x1f0] sm:$0xff]  ;;  %v2760_v55 = vld [vmem:[#allocation10 + $0x1d8] sm:$0xff] }
 0x360   :  { %4451 = vmatprep.subr.bf16.mxu0 %v6737_v56  ;;  %4537 = vmatprep.subr.bf16.mxu1 %v6739_v60  ;;  %v2764_v56 = vld [vmem:[#allocation10 + $0x1f8] sm:$0xff]  ;;  %v6784_v60 = vcombine.low %v2751_v12, %v2755_v42  ;;  %v6793_v61 = vcombine.high %v2759_v51, %v2763_v54 }
 0x361   :  { %v6795_v20 = vcombine.high %v2760_v55, %v2764_v56  ;;  %v6794_v29 = vcombine.low %v2760_v55, %v2764_v56  ;;  %v2815_v56 = vld [vmem:[#allocation10 + $0x390] sm:$0xff] }
 0x362   :  { %4355 = vmatmul.mubr.bf16.vlgmr.msra.gmra.mrb[12].mxu0 %v8196_v3  ;;  %4441 = vmatmul.mubr.bf16.vlgmr.msra.gmra.mrb[20].mxu1 %v8196_v3 }
 0x363   :  { %4452 = vmatpush1.bf16.msra.mxu0 %v6736_v22  ;;  %4483 = vmatprep.mubr.bf16.mxu0 %v8198_v4  ;;  %v2771_v22 = vld [vmem:[#allocation10 + $0x230] sm:$0xff] }
 0x364   :  { %4538 = vmatpush1.bf16.msra.mxu1 %v6738_v26  ;;  %4569 = vmatprep.mubr.bf16.mxu1 %v8198_v4  ;;  %v2736_v4 = vld [vmem:[#allocation10 + $0x118] sm:$0xff]  ;;  %v6801_v30 = vcombine.high %v2767_v21, %v2771_v22 }
 0x365   :  { %4453 = vmatprep.subr.bf16.mxu0 %v6745_v39  ;;  %4539 = vmatprep.subr.bf16.mxu1 %v6747_v57  ;;  %v6771_v63 = vcombine.high %v2736_v4, %v2740_v52  ;;  %v6770_v8 = vcombine.low %v2736_v4, %v2740_v52  ;;  %v2768_v26 = vld [vmem:[#allocation10 + $0x218] sm:$0xff]  ;;  %v6792_v57 = vcombine.low %v2759_v51, %v2763_v54  ;;  %v2791_v52 = vld [vmem:[#allocation10 + $0x2d0] sm:$0xff] }
 0x366   :  { %v2772_v39 = vld [vmem:[#allocation10 + $0x238] sm:$0xff] }
 0x367   :  { %4454 = vmatpush1.bf16.msra.mxu0 %v6744_v14  ;;  %v6803_v13 = vcombine.high %v2768_v26, %v2772_v39  ;;  %v2779_v14 = vld [vmem:[#allocation10 + $0x270] sm:$0xff]  ;;  %v6802_v46 = vcombine.low %v2768_v26, %v2772_v39 }
 0x368   :  { %4540 = vmatpush1.bf16.msra.mxu1 %v6746_v23  ;;  %4455 = vmatprep.subr.bf16.mxu0 %v6753_v36  ;;  %v2776_v23 = vld [vmem:[#allocation10 + $0x258] sm:$0xff]  ;;  %v6809_v24 = vcombine.high %v2775_v31, %v2779_v14  ;;  %v2823_v39 = vld [vmem:[#allocation10 + $0x3d0] sm:$0xff] }
 0x369   :  { %4541 = vmatprep.subr.bf16.mxu1 %v6755_v49  ;;  %v2780_v36 = vld [vmem:[#allocation10 + $0x278] sm:$0xff]  ;;  %v6800_v49 = vcombine.low %v2767_v21, %v2771_v22 }
 0x36a   :  { %v6811_v25 = vcombine.high %v2776_v23, %v2780_v36  ;;  %v6810_v38 = vcombine.low %v2776_v23, %v2780_v36  ;;  %v2831_v36 = vld [vmem:[#allocation10 + $0x410] sm:$0xff] }
 0x36b   :  { %4456 = vmatpush1.bf16.msra.mxu0 %v6752_v33  ;;  %v2787_v33 = vld [vmem:[#allocation10 + $0x2b0] sm:$0xff] }
 0x36c   :  { %4542 = vmatpush1.bf16.msra.mxu1 %v6754_v34  ;;  %4457 = vmatprep.subr.bf16.mxu0 %v6761_v0  ;;  %v2784_v34 = vld [vmem:[#allocation10 + $0x298] sm:$0xff]  ;;  %v6817_v40 = vcombine.high %v2783_v32, %v2787_v33 }
 0x36d   :  { %4543 = vmatprep.subr.bf16.mxu1 %v6763_v27  ;;  %v2788_v0 = vld [vmem:[#allocation10 + $0x2b8] sm:$0xff]  ;;  %v6808_v27 = vcombine.low %v2775_v31, %v2779_v14 }
 0x36e   :  { %v6819_v4 = vcombine.high %v2784_v34, %v2788_v0  ;;  %v6818_v1 = vcombine.low %v2784_v34, %v2788_v0  ;;  %v2839_v0 = vld [vmem:[#allocation10 + $0x450] sm:$0xff] }
 0x36f   :  { %4458 = vmatpush1.bf16.msra.mxu0 %v6760_v53  ;;  %v2795_v53 = vld [vmem:[#allocation10 + $0x2f0] sm:$0xff] }
 0x370   :  { %4544 = vmatpush1.bf16.msra.mxu1 %v6762_v59  ;;  %4459 = vmatprep.subr.bf16.mxu0 %v6769_v62  ;;  %v2792_v59 = vld [vmem:[#allocation10 + $0x2d8] sm:$0xff]  ;;  %v6825_v2 = vcombine.high %v2791_v52, %v2795_v53 }
 0x371   :  { %4545 = vmatprep.subr.bf16.mxu1 %v6771_v63  ;;  %v2796_v62 = vld [vmem:[#allocation10 + $0x2f8] sm:$0xff]  ;;  %v6816_v63 = vcombine.low %v2783_v32, %v2787_v33 }
 0x372   :  { %v6827_v28 = vcombine.high %v2792_v59, %v2796_v62  ;;  %v6826_v12 = vcombine.low %v2792_v59, %v2796_v62  ;;  %v2847_v59 = vld [vmem:[#allocation10 + $0x490] sm:$0xff] }
 0x373   :  { %4460 = vmatpush1.bf16.msra.mxu0 %v6768_v7  ;;  %v2803_v7 = vld [vmem:[#allocation10 + $0x330] sm:$0xff] }
 0x374   :  { %4546 = vmatpush1.bf16.msra.mxu1 %v6770_v8  ;;  %4461 = vmatprep.subr.bf16.mxu0 %v6777_v9  ;;  %v2800_v8 = vld [vmem:[#allocation10 + $0x318] sm:$0xff]  ;;  %v6833_v42 = vcombine.high %v2799_v6, %v2803_v7  ;;  %v2851_v62 = vld [vmem:[#allocation10 + $0x4b0] sm:$0xff] }
 0x375   :  { %4547 = vmatprep.subr.bf16.mxu1 %v6779_v11  ;;  %v2804_v9 = vld [vmem:[#allocation10 + $0x338] sm:$0xff]  ;;  %v6824_v11 = vcombine.low %v2791_v52, %v2795_v53 }
 0x376   :  { %v6835_v43 = vcombine.high %v2800_v8, %v2804_v9  ;;  %v6834_v51 = vcombine.low %v2800_v8, %v2804_v9  ;;  %v2855_v9 = vld [vmem:[#allocation10 + $0x4d0] sm:$0xff] }
 0x377   :  { %4462 = vmatpush1.bf16.msra.mxu0 %v6776_v16  ;;  %v2811_v16 = vld [vmem:[#allocation10 + $0x370] sm:$0xff] }
 0x378   :  { %4548 = vmatpush1.bf16.msra.mxu1 %v6778_v58  ;;  %4463 = vmatprep.subr.bf16.mxu0 %v6785_v47  ;;  %v2808_v58 = vld [vmem:[#allocation10 + $0x358] sm:$0xff]  ;;  %v6841_v54 = vcombine.high %v2807_v44, %v2811_v16 }
 0x379   :  { %4549 = vmatprep.subr.bf16.mxu1 %v6787_v50  ;;  %v2812_v47 = vld [vmem:[#allocation10 + $0x378] sm:$0xff]  ;;  %v6832_v50 = vcombine.low %v2799_v6, %v2803_v7  ;;  %v6881_v7 = vcombine.high %v2847_v59, %v2851_v62 }
 0x37a   :  { %v6843_v55 = vcombine.high %v2808_v58, %v2812_v47  ;;  %v6842_v21 = vcombine.low %v2808_v58, %v2812_v47  ;;  %v2863_v58 = vld [vmem:[#allocation10 + $0x510] sm:$0xff] }
 0x37b   :  { %4464 = vmatpush1.bf16.msra.mxu0 %v6784_v60  ;;  %v2819_v60 = vld [vmem:[#allocation10 + $0x3b0] sm:$0xff] }
 0x37c   :  { %4550 = vmatpush1.bf16.msra.mxu1 %v6786_v48  ;;  %4465 = vmatprep.subr.bf16.mxu0 %v6793_v61  ;;  %v2816_v48 = vld [vmem:[#allocation10 + $0x398] sm:$0xff]  ;;  %v6849_v22 = vcombine.high %v2815_v56, %v2819_v60  ;;  %v2867_v47 = vld [vmem:[#allocation10 + $0x530] sm:$0xff] }
 0x37d   :  { %4551 = vmatprep.subr.bf16.mxu1 %v6795_v20  ;;  %v2820_v61 = vld [vmem:[#allocation10 + $0x3b8] sm:$0xff]  ;;  %v6840_v20 = vcombine.low %v2807_v44, %v2811_v16 }
 0x37e   :  { %v6851_v26 = vcombine.high %v2816_v48, %v2820_v61  ;;  %v6850_v31 = vcombine.low %v2816_v48, %v2820_v61  ;;  %v2875_v48 = vld [vmem:[#allocation10 + $0x570] sm:$0xff]  ;;  %v2872_v61 = vld [vmem:[#allocation10 + $0x558] sm:$0xff] }
 0x37f   :  { %4466 = vmatpush1.bf16.msra.mxu0 %v6792_v57  ;;  %v2827_v57 = vld [vmem:[#allocation10 + $0x3f0] sm:$0xff] }
 0x380   :  { %4552 = vmatpush1.bf16.msra.mxu1 %v6794_v29  ;;  %4467 = vmatprep.subr.bf16.mxu0 %v6801_v30  ;;  %v2824_v29 = vld [vmem:[#allocation10 + $0x3d8] sm:$0xff]  ;;  %v6857_v14 = vcombine.high %v2823_v39, %v2827_v57 }
 0x381   :  { %4553 = vmatprep.subr.bf16.mxu1 %v6803_v13  ;;  %v2828_v30 = vld [vmem:[#allocation10 + $0x3f8] sm:$0xff]  ;;  %v6848_v13 = vcombine.low %v2815_v56, %v2819_v60  ;;  %v2871_v60 = vld [vmem:[#allocation10 + $0x550] sm:$0xff] }
 0x382   :  { %v6859_v23 = vcombine.high %v2824_v29, %v2828_v30  ;;  %v6858_v32 = vcombine.low %v2824_v29, %v2828_v30  ;;  %v2883_v29 = vld [vmem:[#allocation10 + $0x5b0] sm:$0xff]  ;;  %v2880_v30 = vld [vmem:[#allocation10 + $0x598] sm:$0xff] }
 0x383   :  { %4468 = vmatpush1.bf16.msra.mxu0 %v6800_v49  ;;  %v2835_v49 = vld [vmem:[#allocation10 + $0x430] sm:$0xff] }
 0x384   :  { %4554 = vmatpush1.bf16.msra.mxu1 %v6802_v46  ;;  %4469 = vmatprep.subr.bf16.mxu0 %v6809_v24  ;;  %v2832_v46 = vld [vmem:[#allocation10 + $0x418] sm:$0xff]  ;;  %v6865_v33 = vcombine.high %v2831_v36, %v2835_v49 }
 0x385   :  { %4555 = vmatprep.subr.bf16.mxu1 %v6811_v25  ;;  %v2836_v24 = vld [vmem:[#allocation10 + $0x438] sm:$0xff]  ;;  %v6856_v25 = vcombine.low %v2823_v39, %v2827_v57  ;;  %v2879_v57 = vld [vmem:[#allocation10 + $0x590] sm:$0xff] }
 0x386   :  { %v6867_v34 = vcombine.high %v2832_v46, %v2836_v24  ;;  %v6866_v52 = vcombine.low %v2832_v46, %v2836_v24  ;;  %v2891_v46 = vld [vmem:[#allocation10 + $0x5f0] sm:$0xff]  ;;  %v2888_v24 = vld [vmem:[#allocation10 + $0x5d8] sm:$0xff] }
 0x387   :  { %4470 = vmatpush1.bf16.msra.mxu0 %v6808_v27  ;;  %v2843_v27 = vld [vmem:[#allocation10 + $0x470] sm:$0xff] }
 0x388   :  { %4556 = vmatpush1.bf16.msra.mxu1 %v6810_v38  ;;  %4471 = vmatprep.subr.bf16.mxu0 %v6817_v40  ;;  %v6864_v38 = vcombine.low %v2831_v36, %v2835_v49  ;;  %v2840_v40 = vld [vmem:[#allocation10 + $0x458] sm:$0xff]  ;;  %v6873_v53 = vcombine.high %v2839_v0, %v2843_v27  ;;  %v2887_v49 = vld [vmem:[#allocation10 + $0x5d0] sm:$0xff] }
 0x389   :  { %4557 = vmatprep.subr.bf16.mxu1 %v6819_v4  ;;  %v2844_v4 = vld [vmem:[#allocation10 + $0x478] sm:$0xff] }
 0x38a   :  { %v6874_v6 = vcombine.low %v2840_v40, %v2844_v4 }
 0x38b   :  { %4472 = vmatpush1.bf16.msra.mxu0 %v6816_v63  ;;  %v6875_v63 = vcombine.high %v2840_v40, %v2844_v4  ;;  %v2896_v40 = vld [vmem:[#allocation10 + $0x618] sm:$0xff] }
 0x38c   :  { %4558 = vmatpush1.bf16.msra.mxu1 %v6818_v1  ;;  %4473 = vmatprep.subr.bf16.mxu0 %v6825_v2  ;;  %v2848_v1 = vld [vmem:[#allocation10 + $0x498] sm:$0xff] }
 0x38d   :  { %4559 = vmatprep.subr.bf16.mxu1 %v6827_v28  ;;  %v2852_v2 = vld [vmem:[#allocation10 + $0x4b8] sm:$0xff]  ;;  %v6872_v28 = vcombine.low %v2839_v0, %v2843_v27  ;;  %v2895_v27 = vld [vmem:[#allocation10 + $0x610] sm:$0xff] }
 0x38e   :  { %v6883_v8 = vcombine.high %v2848_v1, %v2852_v2  ;;  %v2900_v4 = vld [vmem:[#allocation10 + $0x638] sm:$0xff] }
 0x38f   :  { %4474 = vmatpush1.bf16.msra.mxu0 %v6824_v11  ;;  %v2859_v11 = vld [vmem:[#allocation10 + $0x4f0] sm:$0xff] }
 0x390   :  { %4560 = vmatpush1.bf16.msra.mxu1 %v6826_v12  ;;  %4475 = vmatprep.subr.bf16.mxu0 %v6833_v42  ;;  %v2856_v12 = vld [vmem:[#allocation10 + $0x4d8] sm:$0xff]  ;;  %v6889_v44 = vcombine.high %v2855_v9, %v2859_v11 }
 0x391   :  { %4561 = vmatprep.subr.bf16.mxu1 %v6835_v43  ;;  %v2860_v42 = vld [vmem:[#allocation10 + $0x4f8] sm:$0xff]  ;;  %v6880_v43 = vcombine.low %v2847_v59, %v2851_v62  ;;  %v6931_v62 = vcombine.high %v2896_v40, %v2900_v4 }
 0x392   :  { %v6891_v16 = vcombine.high %v2856_v12, %v2860_v42 }
 0x393   :  { %4476 = vmatpush1.bf16.msra.mxu0 %v6832_v50  ;;  %v2864_v50 = vld [vmem:[#allocation10 + $0x518] sm:$0xff] }
 0x394   :  { %4562 = vmatpush1.bf16.msra.mxu1 %v6834_v51  ;;  %4477 = vmatprep.subr.bf16.mxu0 %v6841_v54  ;;  %v2868_v51 = vld [vmem:[#allocation10 + $0x538] sm:$0xff]  ;;  %v6890_v54 = vcombine.low %v2856_v12, %v2860_v42  ;;  %v2915_v12 = vld [vmem:[#allocation10 + $0x6b0] sm:$0xff] }
 0x395   :  { %4563 = vmatprep.subr.bf16.mxu1 %v6843_v55  ;;  %v6897_v55 = vcombine.high %v2863_v58, %v2867_v47  ;;  %v6899_v56 = vcombine.high %v2864_v50, %v2868_v51  ;;  %v2912_v42 = vld [vmem:[#allocation10 + $0x698] sm:$0xff] }
 0x397   :  { %4478 = vmatpush1.bf16.msra.mxu0 %v6840_v20  ;;  %v2876_v20 = vld [vmem:[#allocation10 + $0x578] sm:$0xff] }
 0x398   :  { %4564 = vmatpush1.bf16.msra.mxu1 %v6842_v21  ;;  %4479 = vmatprep.subr.bf16.mxu0 %v6849_v22  ;;  %v6896_v21 = vcombine.low %v2863_v58, %v2867_v47  ;;  %v6898_v22 = vcombine.low %v2864_v50, %v2868_v51  ;;  %v6907_v39 = vcombine.high %v2872_v61, %v2876_v20  ;;  %v2919_v47 = vld [vmem:[#allocation10 + $0x6d0] sm:$0xff]  ;;  %v2920_v51 = vld [vmem:[#allocation10 + $0x6d8] sm:$0xff] }
 0x399   :  { %4565 = vmatprep.subr.bf16.mxu1 %v6851_v26  ;;  %v6905_v26 = vcombine.high %v2871_v60, %v2875_v48  ;;  %v2923_v50 = vld [vmem:[#allocation10 + $0x6f0] sm:$0xff] }
 0x39b   :  { %4480 = vmatpush1.bf16.msra.mxu0 %v6848_v13  ;;  %v2884_v13 = vld [vmem:[#allocation10 + $0x5b8] sm:$0xff] }
 0x39c   :  { %4566 = vmatpush1.bf16.msra.mxu1 %v6850_v31  ;;  %4481 = vmatprep.subr.bf16.mxu0 %v6857_v14  ;;  %v6904_v31 = vcombine.low %v2871_v60, %v2875_v48  ;;  %v6906_v14 = vcombine.low %v2872_v61, %v2876_v20  ;;  %v6915_v36 = vcombine.high %v2880_v30, %v2884_v13  ;;  %v2927_v48 = vld [vmem:[#allocation10 + $0x710] sm:$0xff]  ;;  %v2928_v20 = vld [vmem:[#allocation10 + $0x718] sm:$0xff] }
 0x39d   :  { %4567 = vmatprep.subr.bf16.mxu1 %v6859_v23  ;;  %v6913_v23 = vcombine.high %v2879_v57, %v2883_v29  ;;  %v2931_v61 = vld [vmem:[#allocation10 + $0x730] sm:$0xff] }
 0x39f   :  { %4482 = vmatpush1.bf16.msra.mxu0 %v6856_v25  ;;  %v2892_v25 = vld [vmem:[#allocation10 + $0x5f8] sm:$0xff] }
 0x3a0   :  { %4568 = vmatpush1.bf16.msra.mxu1 %v6858_v32  ;;  %4494 = vmatprep.subr.bf16.mxu0 %v6865_v33  ;;  %v6912_v32 = vcombine.low %v2879_v57, %v2883_v29  ;;  %v6914_v33 = vcombine.low %v2880_v30, %v2884_v13  ;;  %v6923_v0 = vcombine.high %v2888_v24, %v2892_v25  ;;  %v2935_v29 = vld [vmem:[#allocation10 + $0x750] sm:$0xff]  ;;  %v2936_v13 = vld [vmem:[#allocation10 + $0x758] sm:$0xff] }
 0x3a1   :  { %4580 = vmatprep.subr.bf16.mxu1 %v6867_v34  ;;  %v6921_v34 = vcombine.high %v2887_v49, %v2891_v46  ;;  %v2939_v30 = vld [vmem:[#allocation10 + $0x770] sm:$0xff] }
 0x3a2   :  { %4484 = vmatmul.mubr.bf16.vlgmr.msra.gmra.mrb[16].mxu0 %v8194_v10 }
 0x3a3   :  { %4570 = vmatmul.mubr.bf16.vlgmr.msra.gmra.mrb[24].mxu1 %v8194_v10  ;;  %4495 = vmatpush1.bf16.msra.mxu0 %v6864_v38  ;;  %v6882_v10 = vcombine.low %v2848_v1, %v2852_v2  ;;  %v2899_v38 = vld [vmem:[#allocation10 + $0x630] sm:$0xff]  ;;  %v2904_v2 = vld [vmem:[#allocation10 + $0x658] sm:$0xff] }
 0x3a4   :  { %4526 = vmatprep.mubr.bf16.mxu0 %v8200_v5  ;;  %4581 = vmatpush1.bf16.msra.mxu1 %v6866_v52  ;;  %v6920_v52 = vcombine.low %v2887_v49, %v2891_v46  ;;  %v6929_v59 = vcombine.high %v2895_v27, %v2899_v38  ;;  %v2907_v1 = vld [vmem:[#allocation10 + $0x670] sm:$0xff] }
 0x3a5   :  { %4612 = vmatprep.mubr.bf16.mxu1 %v8200_v5  ;;  %4496 = vmatprep.subr.bf16.mxu0 %v6873_v53  ;;  %v6888_v5 = vcombine.low %v2855_v9, %v2859_v11  ;;  %v6922_v53 = vcombine.low %v2888_v24, %v2892_v25  ;;  %v2911_v11 = vld [vmem:[#allocation10 + $0x690] sm:$0xff]  ;;  %v2944_v25 = vld [vmem:[#allocation10 + $0x798] sm:$0xff] }
 0x3a6   :  { %4582 = vmatprep.subr.bf16.mxu1 %v6875_v63  ;;  %v2903_v63 = vld [vmem:[#allocation10 + $0x650] sm:$0xff] }
 0x3a7   :  { %4497 = vmatpush1.bf16.msra.mxu0 %v6872_v28  ;;  %v2908_v28 = vld [vmem:[#allocation10 + $0x678] sm:$0xff]  ;;  %v2943_v46 = vld [vmem:[#allocation10 + $0x790] sm:$0xff] }
 0x3a8   :  { %4583 = vmatpush1.bf16.msra.mxu1 %v6874_v6  ;;  %4498 = vmatprep.subr.bf16.mxu0 %v6881_v7  ;;  %v6928_v6 = vcombine.low %v2895_v27, %v2899_v38  ;;  %v6930_v7 = vcombine.low %v2896_v40, %v2900_v4  ;;  %v6939_v9 = vcombine.high %v2904_v2, %v2908_v28  ;;  %v2947_v24 = vld [vmem:[#allocation10 + $0x7b0] sm:$0xff]  ;;  %v2952_v4 = vld [vmem:[#allocation10 + $0x7d8] sm:$0xff] }
 0x3a9   :  { %4584 = vmatprep.subr.bf16.mxu1 %v6883_v8  ;;  %v6937_v8 = vcombine.high %v2903_v63, %v2907_v1  ;;  %v2951_v38 = vld [vmem:[#allocation10 + $0x7d0] sm:$0xff] }
 0x3aa   :  { %v2955_v40 = vld [vmem:[#allocation10 + $0x7f0] sm:$0xff] }
 0x3ab   :  { %4499 = vmatpush1.bf16.msra.mxu0 %v6880_v43  ;;  %v2916_v43 = vld [vmem:[#allocation10 + $0x6b8] sm:$0xff] }
 0x3ac   :  { %4585 = vmatpush1.bf16.msra.mxu1 %v6882_v10  ;;  %4500 = vmatprep.subr.bf16.mxu0 %v6889_v44  ;;  %v6936_v10 = vcombine.low %v2903_v63, %v2907_v1  ;;  %v6938_v44 = vcombine.low %v2904_v2, %v2908_v28  ;;  %v6947_v58 = vcombine.high %v2912_v42, %v2916_v43  ;;  %v7373_v28 = vld [vmem:[#allocation11 + $0x4] ss:$24 sps:$4 sm:$0xff]  }
 0x3ad   :  { %4586 = vmatprep.subr.bf16.mxu1 %v6891_v16  ;;  %v6945_v16 = vcombine.high %v2911_v11, %v2915_v12  ;;  %v6984_v1 = vcombine.low %v2951_v38, %v2955_v40 }
 0x3af   :  { %4501 = vmatpush1.bf16.msra.mxu0 %v6888_v5  ;;  %v2924_v5 = vld [vmem:[#allocation10 + $0x6f8] sm:$0xff] }
 0x3b0   :  { %4587 = vmatpush1.bf16.msra.mxu1 %v6890_v54  ;;  %4502 = vmatprep.subr.bf16.mxu0 %v6897_v55  ;;  %v6944_v54 = vcombine.low %v2911_v11, %v2915_v12  ;;  %v6946_v55 = vcombine.low %v2912_v42, %v2916_v43  ;;  %v6955_v60 = vcombine.high %v2920_v51, %v2924_v5  ;;  %v7382_v11 = vld [vmem:[#allocation11 + $0x3c] ss:$24 sps:$4 sm:$0xff]   ;;  %v7377_v12 = vld [vmem:[#allocation11 + $0x30] ss:$24 sps:$4 sm:$0xff]  }
 0x3b1   :  { %4588 = vmatprep.subr.bf16.mxu1 %v6899_v56  ;;  %v6953_v56 = vcombine.high %v2919_v47, %v2923_v50  ;;  %v7380_v42 = vld [vmem:[#allocation11 + $0x38] ss:$24 sps:$4 sm:$0xff]   ;;  %v7385_v43 = vld [vmem:[#allocation11 + $0x64] ss:$24 sps:$4 sm:$0xff]  }
 0x3b3   :  { %4503 = vmatpush1.bf16.msra.mxu0 %v6896_v21  ;;  %v2932_v21 = vld [vmem:[#allocation10 + $0x738] sm:$0xff] }
 0x3b4   :  { %4589 = vmatpush1.bf16.msra.mxu1 %v6898_v22  ;;  %4504 = vmatprep.subr.bf16.mxu0 %v6905_v26  ;;  %v6952_v22 = vcombine.low %v2919_v47, %v2923_v50  ;;  %v6954_v26 = vcombine.low %v2920_v51, %v2924_v5  ;;  %v6963_v57 = vcombine.high %v2928_v20, %v2932_v21  ;;  %v7394_v47 = vld [vmem:[#allocation11 + $0x9c] ss:$24 sps:$4 sm:$0xff]   ;;  %v7389_v50 = vld [vmem:[#allocation11 + $0x90] ss:$24 sps:$4 sm:$0xff]   ;;  %v7400_v5 = vld [vmem:[#allocation11 + $0xcc] ss:$24 sps:$4 sm:$0xff]  }
 0x3b5   :  { %4590 = vmatprep.subr.bf16.mxu1 %v6907_v39  ;;  %v6961_v39 = vcombine.high %v2927_v48, %v2931_v61  ;;  %v7397_v51 = vld [vmem:[#allocation11 + $0xc4] ss:$24 sps:$4 sm:$0xff]  }
 0x3b7   :  { %4505 = vmatpush1.bf16.msra.mxu0 %v6904_v31  ;;  %v2940_v31 = vld [vmem:[#allocation10 + $0x778] sm:$0xff] }
 0x3b8   :  { %4591 = vmatpush1.bf16.msra.mxu1 %v6906_v14  ;;  %4506 = vmatprep.subr.bf16.mxu0 %v6913_v23  ;;  %v6960_v14 = vcombine.low %v2927_v48, %v2931_v61  ;;  %v6962_v23 = vcombine.low %v2928_v20, %v2932_v21  ;;  %v6971_v49 = vcombine.high %v2936_v13, %v2940_v31  ;;  %v7401_v48 = vld [vmem:[#allocation11 + $0xf0] ss:$24 sps:$4 sm:$0xff]   ;;  %v7409_v20 = vld [vmem:[#allocation11 + $0x124] ss:$24 sps:$4 sm:$0xff]  }
 0x3b9   :  { %4592 = vmatprep.subr.bf16.mxu1 %v6915_v36  ;;  %v6969_v36 = vcombine.high %v2935_v29, %v2939_v30  ;;  %v7404_v61 = vld [vmem:[#allocation11 + $0xf8] ss:$24 sps:$4 sm:$0xff]   ;;  %v7412_v21 = vld [vmem:[#allocation11 + $0x12c] ss:$24 sps:$4 sm:$0xff]  }
 0x3bb   :  { %4507 = vmatpush1.bf16.msra.mxu0 %v6912_v32  ;;  %v2948_v32 = vld [vmem:[#allocation10 + $0x7b8] sm:$0xff] }
 0x3bc   :  { %4593 = vmatpush1.bf16.msra.mxu1 %v6914_v33  ;;  %4508 = vmatprep.subr.bf16.mxu0 %v6921_v34  ;;  %v6968_v33 = vcombine.low %v2935_v29, %v2939_v30  ;;  %v6970_v34 = vcombine.low %v2936_v13, %v2940_v31  ;;  %v6979_v27 = vcombine.high %v2944_v25, %v2948_v32  ;;  %v7413_v29 = vld [vmem:[#allocation11 + $0x150] ss:$24 sps:$4 sm:$0xff]   ;;  %v7421_v13 = vld [vmem:[#allocation11 + $0x184] ss:$24 sps:$4 sm:$0xff]  }
 0x3bd   :  { %4594 = vmatprep.subr.bf16.mxu1 %v6923_v0  ;;  %v6977_v0 = vcombine.high %v2943_v46, %v2947_v24  ;;  %v7416_v30 = vld [vmem:[#allocation11 + $0x158] ss:$24 sps:$4 sm:$0xff]   ;;  %v7424_v31 = vld [vmem:[#allocation11 + $0x18c] ss:$24 sps:$4 sm:$0xff]  }
 0x3bf   :  { %4509 = vmatpush1.bf16.msra.mxu0 %v6920_v52  ;;  %v2956_v52 = vld [vmem:[#allocation10 + $0x7f8] sm:$0xff] }
 0x3c0   :  { %4595 = vmatpush1.bf16.msra.mxu1 %v6922_v53  ;;  %4510 = vmatprep.subr.bf16.mxu0 %v6929_v59  ;;  %v6976_v53 = vcombine.low %v2943_v46, %v2947_v24  ;;  %v6978_v59 = vcombine.low %v2944_v25, %v2948_v32  ;;  %v6987_v63 = vcombine.high %v2952_v4, %v2956_v52  ;;  %v7425_v46 = vld [vmem:[#allocation11 + $0x1b0] ss:$24 sps:$4 sm:$0xff]   ;;  %v7433_v25 = vld [vmem:[#allocation11 + $0x1e4] ss:$24 sps:$4 sm:$0xff]  }
 0x3c1   :  { %4596 = vmatprep.subr.bf16.mxu1 %v6931_v62  ;;  %v6985_v62 = vcombine.high %v2951_v38, %v2955_v40  ;;  %v6986_v2 = vcombine.low %v2952_v4, %v2956_v52  ;;  %v7428_v24 = vld [vmem:[#allocation11 + $0x1b8] ss:$24 sps:$4 sm:$0xff]   ;;  %v7436_v32 = vld [vmem:[#allocation11 + $0x1ec] ss:$24 sps:$4 sm:$0xff]  }
 0x3c2   :  { %v7437_v38 = vld [vmem:[#allocation11 + $0x210] ss:$24 sps:$4 sm:$0xff]   ;;  %v7445_v4 = vld [vmem:[#allocation11 + $0x244] ss:$24 sps:$4 sm:$0xff]  }
 0x3c3   :  { %4511 = vmatpush1.bf16.msra.mxu0 %v6928_v6  ;;  %v7376_v6 = vld [vmem:[#allocation11 + $0xc] ss:$24 sps:$4 sm:$0xff]   ;;  %v7440_v40 = vld [vmem:[#allocation11 + $0x218] ss:$24 sps:$4 sm:$0xff]  }
 0x3c4   :  { %4597 = vmatpush1.bf16.msra.mxu1 %v6930_v7  ;;  %4512 = vmatprep.subr.bf16.mxu0 %v6937_v8  ;;  %v7371_v7 = vld [vmem:[#allocation11] ss:$24 sps:$4 sm:$0xff]   ;;  %v7448_v52 = vld [vmem:[#allocation11 + $0x24c] ss:$24 sps:$4 sm:$0xff]  }
 0x3c5   :  { %4598 = vmatprep.subr.bf16.mxu1 %v6939_v9  ;;  %v7374_v8 = vld [vmem:[#allocation11 + $0x8] ss:$24 sps:$4 sm:$0xff]   ;;  %v7379_v9 = vld [vmem:[#allocation11 + $0x34] ss:$24 sps:$4 sm:$0xff]  }
 0x3c7   :  { %4513 = vmatpush1.bf16.msra.mxu0 %v6936_v10  ;;  %v7388_v10 = vld [vmem:[#allocation11 + $0x6c] ss:$24 sps:$4 sm:$0xff]  }
 0x3c8   :  { %4599 = vmatpush1.bf16.msra.mxu1 %v6938_v44  ;;  %4514 = vmatprep.subr.bf16.mxu0 %v6945_v16  ;;  %v7383_v44 = vld [vmem:[#allocation11 + $0x60] ss:$24 sps:$4 sm:$0xff]  }
 0x3c9   :  { %4600 = vmatprep.subr.bf16.mxu1 %v6947_v58  ;;  %v7386_v16 = vld [vmem:[#allocation11 + $0x68] ss:$24 sps:$4 sm:$0xff]   ;;  %v7391_v58 = vld [vmem:[#allocation11 + $0x94] ss:$24 sps:$4 sm:$0xff]  }
 0x3cb   :  { %4515 = vmatpush1.bf16.msra.mxu0 %v6944_v54  ;;  %v7395_v54 = vld [vmem:[#allocation11 + $0xc0] ss:$24 sps:$4 sm:$0xff]  }
 0x3cc   :  { %4601 = vmatpush1.bf16.msra.mxu1 %v6946_v55  ;;  %4516 = vmatprep.subr.bf16.mxu0 %v6953_v56  ;;  %v7398_v55 = vld [vmem:[#allocation11 + $0xc8] ss:$24 sps:$4 sm:$0xff]   ;;  %v7403_v56 = vld [vmem:[#allocation11 + $0xf4] ss:$24 sps:$4 sm:$0xff]  }
 0x3cd   :  { %4602 = vmatprep.subr.bf16.mxu1 %v6955_v60  ;;  %v7406_v60 = vld [vmem:[#allocation11 + $0xfc] ss:$24 sps:$4 sm:$0xff]  }
 0x3cf   :  { %4517 = vmatpush1.bf16.msra.mxu0 %v6952_v22  ;;  %v7407_v22 = vld [vmem:[#allocation11 + $0x120] ss:$24 sps:$4 sm:$0xff]  }
 0x3d0   :  { %4603 = vmatpush1.bf16.msra.mxu1 %v6954_v26  ;;  %4518 = vmatprep.subr.bf16.mxu0 %v6961_v39  ;;  %v7410_v26 = vld [vmem:[#allocation11 + $0x128] ss:$24 sps:$4 sm:$0xff]   ;;  %v7415_v39 = vld [vmem:[#allocation11 + $0x154] ss:$24 sps:$4 sm:$0xff]  }
 0x3d1   :  { %4604 = vmatprep.subr.bf16.mxu1 %v6963_v57  ;;  %v7418_v57 = vld [vmem:[#allocation11 + $0x15c] ss:$24 sps:$4 sm:$0xff]  }
 0x3d3   :  { %4519 = vmatpush1.bf16.msra.mxu0 %v6960_v14  ;;  %v7419_v14 = vld [vmem:[#allocation11 + $0x180] ss:$24 sps:$4 sm:$0xff]  }
 0x3d4   :  { %4605 = vmatpush1.bf16.msra.mxu1 %v6962_v23  ;;  %4520 = vmatprep.subr.bf16.mxu0 %v6969_v36  ;;  %v7422_v23 = vld [vmem:[#allocation11 + $0x188] ss:$24 sps:$4 sm:$0xff]   ;;  %v7427_v36 = vld [vmem:[#allocation11 + $0x1b4] ss:$24 sps:$4 sm:$0xff]  }
 0x3d5   :  { %4606 = vmatprep.subr.bf16.mxu1 %v6971_v49  ;;  %v7430_v49 = vld [vmem:[#allocation11 + $0x1bc] ss:$24 sps:$4 sm:$0xff]  }
 0x3d7   :  { %4521 = vmatpush1.bf16.msra.mxu0 %v6968_v33  ;;  %v7431_v33 = vld [vmem:[#allocation11 + $0x1e0] ss:$24 sps:$4 sm:$0xff]  }
 0x3d8   :  { %4607 = vmatpush1.bf16.msra.mxu1 %v6970_v34  ;;  %4522 = vmatprep.subr.bf16.mxu0 %v6977_v0  ;;  %v7434_v34 = vld [vmem:[#allocation11 + $0x1e8] ss:$24 sps:$4 sm:$0xff]   ;;  %v7439_v0 = vld [vmem:[#allocation11 + $0x214] ss:$24 sps:$4 sm:$0xff]  }
 0x3d9   :  { %4608 = vmatprep.subr.bf16.mxu1 %v6979_v27  ;;  %v7442_v27 = vld [vmem:[#allocation11 + $0x21c] ss:$24 sps:$4 sm:$0xff]  }
 0x3db   :  { %4523 = vmatpush1.bf16.msra.mxu0 %v6976_v53  ;;  %v7443_v53 = vld [vmem:[#allocation11 + $0x240] ss:$24 sps:$4 sm:$0xff]  }
 0x3dc   :  { %4609 = vmatpush1.bf16.msra.mxu1 %v6978_v59  ;;  %4524 = vmatprep.subr.bf16.mxu0 %v6985_v62  ;;  %v7446_v59 = vld [vmem:[#allocation11 + $0x248] ss:$24 sps:$4 sm:$0xff]  }
 0x3dd   :  { %4610 = vmatprep.subr.bf16.mxu1 %v6987_v63 }
 0x3df   :  { %4525 = vmatpush1.bf16.msra.mxu0 %v6984_v1  ;;  %v7451_v1 = vld [vmem:[#allocation11 + $0x274] ss:$24 sps:$4 sm:$0xff]  }
 0x3e0   :  { %4611 = vmatpush1.bf16.msra.mxu1 %v6986_v2  ;;  %5827 = vmatprep.subr.bf16.mxu0 %v7373_v28  ;;  %v7454_v2 = vld [vmem:[#allocation11 + $0x27c] ss:$24 sps:$4 sm:$0xff]  }
 0x3e1   :  { %5913 = vmatprep.subr.bf16.mxu1 %v7376_v6 }
 0x3e2   :  { %4527 = vmatmul.mubr.bf16.vlgmr.msra.gmra.mrb[16].mxu0 %v8196_v3 }
 0x3e3   :  { %4613 = vmatmul.mubr.bf16.vlgmr.msra.gmra.mrb[24].mxu1 %v8196_v3  ;;  %5828 = vmatpush1.bf16.msra.mxu0 %v7371_v7  ;;  %v7392_v3 = vld [vmem:[#allocation11 + $0x98] ss:$24 sps:$4 sm:$0xff]  }
 0x3e4   :  { %5914 = vmatpush1.bf16.msra.mxu1 %v7374_v8  ;;  %5829 = vmatprep.subr.bf16.mxu0 %v7379_v9  ;;  %v7449_v7 = vld [vmem:[#allocation11 + $0x270] ss:$24 sps:$4 sm:$0xff]  }
 0x3e5   :  { %5915 = vmatprep.subr.bf16.mxu1 %v7382_v11  ;;  %v7452_v8 = vld [vmem:[#allocation11 + $0x278] ss:$24 sps:$4 sm:$0xff]  }
 0x3e7   :  { %5830 = vmatpush1.bf16.msra.mxu0 %v7377_v12 }
 0x3e8   :  { %5916 = vmatpush1.bf16.msra.mxu1 %v7380_v42  ;;  %5831 = vmatprep.subr.bf16.mxu0 %v7385_v43  ;;  %v7457_v43 = vld [vmem:[#allocation11 + $0x2a4] ss:$24 sps:$4 sm:$0xff]  }
 0x3e9   :  { %5917 = vmatprep.subr.bf16.mxu1 %v7388_v10  ;;  %v7460_v10 = vld [vmem:[#allocation11 + $0x2ac] ss:$24 sps:$4 sm:$0xff]  }
 0x3eb   :  { %5832 = vmatpush1.bf16.msra.mxu0 %v7383_v44  ;;  %v7455_v44 = vld [vmem:[#allocation11 + $0x2a0] ss:$24 sps:$4 sm:$0xff]  }
 0x3ec   :  { %5918 = vmatpush1.bf16.msra.mxu1 %v7386_v16  ;;  %5833 = vmatprep.subr.bf16.mxu0 %v7391_v58  ;;  %v7458_v16 = vld [vmem:[#allocation11 + $0x2a8] ss:$24 sps:$4 sm:$0xff]   ;;  %v7463_v58 = vld [vmem:[#allocation11 + $0x2d4] ss:$24 sps:$4 sm:$0xff]  }
 0x3ed   :  { %5919 = vmatprep.subr.bf16.mxu1 %v7394_v47  ;;  %v7466_v47 = vld [vmem:[#allocation11 + $0x2dc] ss:$24 sps:$4 sm:$0xff]  }
 0x3ef   :  { %5834 = vmatpush1.bf16.msra.mxu0 %v7389_v50  ;;  %v7461_v50 = vld [vmem:[#allocation11 + $0x2d0] ss:$24 sps:$4 sm:$0xff]  }
 0x3f0   :  { %5920 = vmatpush1.bf16.msra.mxu1 %v7392_v3  ;;  %5835 = vmatprep.subr.bf16.mxu0 %v7397_v51  ;;  %v7464_v3 = vld [vmem:[#allocation11 + $0x2d8] ss:$24 sps:$4 sm:$0xff]   ;;  %v7469_v51 = vld [vmem:[#allocation11 + $0x304] ss:$24 sps:$4 sm:$0xff]  }
 0x3f1   :  { %5921 = vmatprep.subr.bf16.mxu1 %v7400_v5  ;;  %v7472_v5 = vld [vmem:[#allocation11 + $0x30c] ss:$24 sps:$4 sm:$0xff]  }
 0x3f3   :  { %5836 = vmatpush1.bf16.msra.mxu0 %v7395_v54  ;;  %v2957_v54 = vld [vmem:[%s8288_s6] sm:$0xff] }
 0x3f4   :  { %5922 = vmatpush1.bf16.msra.mxu1 %v7398_v55  ;;  %5837 = vmatprep.subr.bf16.mxu0 %v7403_v56  ;;  %v2962_v55 = vrot.slane %v2957_v54, %v8081_v15  ;;  %v2970_v56 = vrot.slane %v2957_v54, %v8125_v35 }
 0x3f5   :  { %5923 = vmatprep.subr.bf16.mxu1 %v7406_v60  ;;  %v2966_v60 = vrot.slane %v2957_v54, %v8089_v18 }
 0x3f7   :  { %5838 = vmatpush1.bf16.msra.mxu0 %v7401_v48  ;;  %v2974_v48 = vrot.slane %v2957_v54, %v8131_v41 }
 0x3f8   :  { %5924 = vmatpush1.bf16.msra.mxu1 %v7404_v61  ;;  %5839 = vmatprep.subr.bf16.mxu0 %v7409_v20  ;;  %v2978_v61 = vrot.slane %v2957_v54, %v8086_v17  ;;  %v2986_v20 = vrot.slane %v2957_v54, %v8128_v37 }
 0x3f9   :  { %5925 = vmatprep.subr.bf16.mxu1 %v7412_v21  ;;  %v2982_v21 = vrot.slane %v2957_v54, %v8092_v19 }
 0x3fb   :  { %5840 = vmatpush1.bf16.msra.mxu0 %v7407_v22  ;;  %v2990_v22 = vrot.slane %v2957_v54, %v8134_v45  ;;  %v7476_v54 = vld [vmem:[#allocation11 + $0x338] ss:$24 sps:$4 sm:$0xff]  }
 0x3fc   :  { %5926 = vmatpush1.bf16.msra.mxu1 %v7410_v26  ;;  %5841 = vmatprep.subr.bf16.mxu0 %v7415_v39 }
 0x3fd   :  { %5927 = vmatprep.subr.bf16.mxu1 %v7418_v57 }
 0x3ff   :  { %5842 = vmatpush1.bf16.msra.mxu0 %v7413_v29 }
 0x400   :  { %5928 = vmatpush1.bf16.msra.mxu1 %v7416_v30  ;;  %5843 = vmatprep.subr.bf16.mxu0 %v7421_v13 }
 0x401   :  { %5929 = vmatprep.subr.bf16.mxu1 %v7424_v31 }
 0x403   :  { %5844 = vmatpush1.bf16.msra.mxu0 %v7419_v14 }
 0x404   :  { %5930 = vmatpush1.bf16.msra.mxu1 %v7422_v23  ;;  %5845 = vmatprep.subr.bf16.mxu0 %v7427_v36 }
 0x405   :  { %5931 = vmatprep.subr.bf16.mxu1 %v7430_v49 }
 0x407   :  { %5846 = vmatpush1.bf16.msra.mxu0 %v7425_v46 }
 0x408   :  { %5932 = vmatpush1.bf16.msra.mxu1 %v7428_v24  ;;  %5847 = vmatprep.subr.bf16.mxu0 %v7433_v25 }
 0x409   :  { %5933 = vmatprep.subr.bf16.mxu1 %v7436_v32 }
 0x40b   :  { %5848 = vmatpush1.bf16.msra.mxu0 %v7431_v33 }
 0x40c   :  { %5934 = vmatpush1.bf16.msra.mxu1 %v7434_v34  ;;  %5849 = vmatprep.subr.bf16.mxu0 %v7439_v0 }
 0x40d   :  { %5935 = vmatprep.subr.bf16.mxu1 %v7442_v27 }
 0x40f   :  { %5850 = vmatpush1.bf16.msra.mxu0 %v7437_v38 }
 0x410   :  { %5936 = vmatpush1.bf16.msra.mxu1 %v7440_v40  ;;  %5851 = vmatprep.subr.bf16.mxu0 %v7445_v4 }
 0x411   :  { %5937 = vmatprep.subr.bf16.mxu1 %v7448_v52 }
 0x413   :  { %5852 = vmatpush1.bf16.msra.mxu0 %v7443_v53 }
 0x414   :  { %5938 = vmatpush1.bf16.msra.mxu1 %v7446_v59  ;;  %5853 = vmatprep.subr.bf16.mxu0 %v7451_v1 }
 0x415   :  { %5939 = vmatprep.subr.bf16.mxu1 %v7454_v2 }
 0x417   :  { %5854 = vmatpush1.bf16.msra.mxu0 %v7449_v7 }
 0x418   :  { %5940 = vmatpush1.bf16.msra.mxu1 %v7452_v8  ;;  %5855 = vmatprep.subr.bf16.mxu0 %v7457_v43 }
 0x419   :  { %5941 = vmatprep.subr.bf16.mxu1 %v7460_v10 }
 0x41b   :  { %5856 = vmatpush1.bf16.msra.mxu0 %v7455_v44 }
 0x41c   :  { %5942 = vmatpush1.bf16.msra.mxu1 %v7458_v16  ;;  %5857 = vmatprep.subr.bf16.mxu0 %v7463_v58 }
 0x41d   :  { %5943 = vmatprep.subr.bf16.mxu1 %v7466_v47  ;;  %v7470_v47 = vld [vmem:[#allocation11 + $0x308] ss:$24 sps:$4 sm:$0xff]  }
 0x41f   :  { %5858 = vmatpush1.bf16.msra.mxu0 %v7461_v50 }
 0x420   :  { %5944 = vmatpush1.bf16.msra.mxu1 %v7464_v3  ;;  %5870 = vmatprep.subr.bf16.mxu0 %v7469_v51  ;;  %v7475_v3 = vld [vmem:[#allocation11 + $0x334] ss:$24 sps:$4 sm:$0xff]  }
 0x421   :  { %5956 = vmatprep.subr.bf16.mxu1 %v7472_v5  ;;  %v7478_v51 = vld [vmem:[#allocation11 + $0x33c] ss:$24 sps:$4 sm:$0xff]   ;;  %v7473_v5 = vld [vmem:[#allocation11 + $0x330] ss:$24 sps:$4 sm:$0xff]  }
 0x435   :  { %v4356_v62 = vpop.f32.mrb[12].mxu0  ;;  %v4442_v63 = vpop.f32.mrb[20].mxu1 }
 0x436   :  { %v4358_v28 = vpop.f32.mrb[13].mxu0  ;;  %v4444_v6 = vpop.f32.mrb[21].mxu1  ;;  %v7281_v26 = vadd.f32 %v4356_v62, %v2962_v55  ;;  %v7285_v57 = vadd.f32 %v4442_v63, %v2970_v56 }
 0x437   :  { %v4360_v9 = vpop.f32.mrb[14].mxu0  ;;  %v4446_v11 = vpop.f32.mrb[22].mxu1  ;;  %v7282_v29 = vadd.f32 %v4358_v28, %v2966_v60  ;;  %v7286_v30 = vadd.f32 %v4444_v6, %v2974_v48 }
 0x438   :  { %v4362_v12 = vpop.f32.mrb[15].mxu0  ;;  %v4448_v42 = vpop.f32.mrb[23].mxu1  ;;  %v7283_v23 = vadd.f32 %v4360_v9, %v2962_v55  ;;  %v7287_v36 = vadd.f32 %v4446_v11, %v2970_v56  ;;  %v7481_v55 = vld [vmem:[#allocation11 + $0x364] ss:$24 sps:$4 sm:$0xff]  }
 0x439   :  { %v7284_v32 = vadd.f32 %v4362_v12, %v2966_v60  ;;  %v7288_v53 = vadd.f32 %v4448_v42, %v2974_v48  ;;  %v7467_v42 = vld [vmem:[#allocation11 + $0x300] ss:$24 sps:$4 sm:$0xff]   ;;  %v7484_v56 = vld [vmem:[#allocation11 + $0x36c] ss:$24 sps:$4 sm:$0xff]  }
 0x43a   :  { %v7479_v60 = vld [vmem:[#allocation11 + $0x360] ss:$24 sps:$4 sm:$0xff]  }
 0x43b   :  { %v7482_v48 = vld [vmem:[#allocation11 + $0x368] ss:$24 sps:$4 sm:$0xff]  }
 0x4b5   :  { %v4528_v39 = vpop.f32.mrb[16].mxu0 }
 0x4b6   :  { %v7289_v13 = vadd.f32 %v4528_v39, %v2978_v61  ;;  %v4614_v31 = vpop.f32.mrb[24].mxu1  ;;  %v4530_v14 = vpop.f32.mrb[17].mxu0  ;;  %v7496_v39 = vld [vmem:[#allocation11 + $0x3cc] ss:$24 sps:$4 sm:$0xff]  }
 0x4b7   :  { %v7293_v49 = vadd.f32 %v4614_v31, %v2986_v20  ;;  %v7290_v46 = vadd.f32 %v4530_v14, %v2982_v21  ;;  %v4616_v24 = vpop.f32.mrb[25].mxu1  ;;  %v4532_v25 = vpop.f32.mrb[18].mxu0  ;;  %v7497_v31 = vld [vmem:[#allocation11 + $0x3f0] ss:$24 sps:$4 sm:$0xff]  }
 0x4b8   :  { %v4623_v37 = vmax.f32 %v7281_v26, %v7289_v13  ;;  %v7294_v33 = vadd.f32 %v4616_v24, %v2990_v22  ;;  %v7291_v34 = vadd.f32 %v4532_v25, %v2978_v61  ;;  %v4618_v0 = vpop.f32.mrb[26].mxu1  ;;  %v4534_v45 = vpop.f32.mrb[19].mxu0  ;;  %v7487_v61 = vld [vmem:[#allocation11 + $0x394] ss:$24 sps:$4 sm:$0xff]   ;;  %v7493_v26 = vld [vmem:[#allocation11 + $0x3c4] ss:$24 sps:$4 sm:$0xff]  }
 0x4b9   :  { %v4625_v27 = vmax.f32 %v7285_v57, %v7293_v49  ;;  %v4624_v38 = vmax.f32 %v7282_v29, %v7290_v46  ;;  %v7295_v40 = vadd.f32 %v4618_v0, %v2986_v20  ;;  %v7292_v4 = vadd.f32 %v4534_v45, %v2982_v21  ;;  %v4620_v52 = vpop.f32.mrb[27].mxu1  ;;  %v7490_v20 = vld [vmem:[#allocation11 + $0x39c] ss:$24 sps:$4 sm:$0xff]   ;;  %v7485_v21 = vld [vmem:[#allocation11 + $0x390] ss:$24 sps:$4 sm:$0xff]  }
 0x4ba   :  { %v4626_v59 = vmax.f32 %v7286_v30, %v7294_v33  ;;  %v4627_v62 = vmax.f32 %v7283_v23, %v7291_v34  ;;  %v7296_v63 = vadd.f32 %v4620_v52, %v2990_v22  ;;  %v4631_v28 = vmax.f32 %v4623_v37, 0.0  ;;  %v7488_v22 = vld [vmem:[#allocation11 + $0x398] ss:$24 sps:$4 sm:$0xff]   ;;  %v7494_v29 = vld [vmem:[#allocation11 + $0x3c8] ss:$24 sps:$4 sm:$0xff]  }
 0x4bb   :  { %v4629_v1 = vmax.f32 %v7287_v36, %v7295_v40  ;;  %v4628_v2 = vmax.f32 %v7284_v32, %v7292_v4  ;;  %v4633_v8 = vmax.f32 %v4625_v27, 0.0  ;;  %v4632_v9 = vmax.f32 %v4624_v38, 0.0  ;;  %v7491_v57 = vld [vmem:[#allocation11 + $0x3c0] ss:$24 sps:$4 sm:$0xff]   ;;  %v7499_v30 = vld [vmem:[#allocation11 + $0x3f4] ss:$24 sps:$4 sm:$0xff]  }
 0x4bc   :  { %v4635_v6 = vmax.f32 %v4627_v62, 0.0  ;;  %v4630_v7 = vmax.f32 %v7288_v53, %v7296_v63  ;;  %v4634_v43 = vmax.f32 %v4626_v59, 0.0  ;;  %v7502_v13 = vld [vmem:[#allocation11 + $0x3fc] ss:$24 sps:$4 sm:$0xff]   ;;  %v7500_v14 = vld [vmem:[#allocation11 + $0x3f8] ss:$24 sps:$4 sm:$0xff]  }
 0x4bd   :  { %v4637_v11 = vmax.f32 %v4629_v1, 0.0  ;;  %v4636_v12 = vmax.f32 %v4628_v2, 0.0  ;;  %v7505_v23 = vld [vmem:[#allocation11 + $0x424] ss:$24 sps:$4 sm:$0xff]   ;;  %v7503_v49 = vld [vmem:[#allocation11 + $0x420] ss:$24 sps:$4 sm:$0xff]  }
 0x4be   :  { %v8235_v10 = vpack.c.bf16 %v4635_v6, %v4631_v28  ;;  %v4638_v44 = vmax.f32 %v4630_v7, 0.0  ;;  %v7508_v36 = vld [vmem:[#allocation11 + $0x42c] ss:$24 sps:$4 sm:$0xff]   ;;  %v7506_v46 = vld [vmem:[#allocation11 + $0x428] ss:$24 sps:$4 sm:$0xff]  }
 0x4bf   :  { %v8237_v16 = vpack.c.bf16 %v4637_v11, %v4633_v8  ;;  %v8239_v58 = vpack.c.bf16 %v4636_v12, %v4632_v9  ;;  %v7511_v24 = vld [vmem:[#allocation11 + $0x454] ss:$24 sps:$4 sm:$0xff]   ;;  %v7509_v32 = vld [vmem:[#allocation11 + $0x450] ss:$24 sps:$4 sm:$0xff]   ;;  %v7517_v33 = vld [vmem:[#allocation11 + $0x484] ss:$24 sps:$4 sm:$0xff]  }
 0x4c0   :  { %v8241_v50 = vpack.c.bf16 %v4638_v44, %v4634_v43  ;;  %v7514_v25 = vld [vmem:[#allocation11 + $0x45c] ss:$24 sps:$4 sm:$0xff]   ;;  %v7512_v37 = vld [vmem:[#allocation11 + $0x458] ss:$24 sps:$4 sm:$0xff]   ;;  %v7520_v34 = vld [vmem:[#allocation11 + $0x48c] ss:$24 sps:$4 sm:$0xff]  }
 0x4c1   :  { %5859 = vmatprep.mubr.bf16.mxu0 %v8239_v58  ;;  %5945 = vmatprep.mubr.bf16.mxu1 %v8239_v58  ;;  %v7515_v0 = vld [vmem:[#allocation11 + $0x480] ss:$24 sps:$4 sm:$0xff]   ;;  %v7523_v27 = vld [vmem:[#allocation11 + $0x4b4] ss:$24 sps:$4 sm:$0xff]   ;;  %v7521_v40 = vld [vmem:[#allocation11 + $0x4b0] ss:$24 sps:$4 sm:$0xff]  }
 0x4c2   :  { %5860 = vmatmul.mubr.bf16.vlgmr.msra.gmra.mrb[20].mxu0 %v8235_v10  ;;  %5946 = vmatmul.mubr.bf16.vlgmr.msra.gmra.mrb[28].mxu1 %v8235_v10  ;;  %v7518_v45 = vld [vmem:[#allocation11 + $0x488] ss:$24 sps:$4 sm:$0xff]   ;;  %v7526_v38 = vld [vmem:[#allocation11 + $0x4bc] ss:$24 sps:$4 sm:$0xff]   ;;  %v7524_v4 = vld [vmem:[#allocation11 + $0x4b8] ss:$24 sps:$4 sm:$0xff]  }
 0x4c3   :  { %5871 = vmatpush1.bf16.msra.mxu0 %v7467_v42  ;;  %5957 = vmatpush1.bf16.msra.mxu1 %v7470_v47  ;;  %v7529_v52 = vld [vmem:[#allocation11 + $0x4e4] ss:$24 sps:$4 sm:$0xff]   ;;  %v7527_v59 = vld [vmem:[#allocation11 + $0x4e0] ss:$24 sps:$4 sm:$0xff]   ;;  %v7535_v63 = vld [vmem:[#allocation11 + $0x514] ss:$24 sps:$4 sm:$0xff]  }
 0x4c4   :  { %5902 = vmatprep.mubr.bf16.mxu0 %v8241_v50  ;;  %5988 = vmatprep.mubr.bf16.mxu1 %v8241_v50  ;;  %v7532_v53 = vld [vmem:[#allocation11 + $0x4ec] ss:$24 sps:$4 sm:$0xff]   ;;  %v7530_v62 = vld [vmem:[#allocation11 + $0x4e8] ss:$24 sps:$4 sm:$0xff]   ;;  %v7538_v1 = vld [vmem:[#allocation11 + $0x51c] ss:$24 sps:$4 sm:$0xff]  }
 0x4c5   :  { %5872 = vmatprep.subr.bf16.mxu0 %v7475_v3  ;;  %5958 = vmatprep.subr.bf16.mxu1 %v7478_v51  ;;  %v7533_v2 = vld [vmem:[#allocation11 + $0x510] ss:$24 sps:$4 sm:$0xff]   ;;  %v7541_v6 = vld [vmem:[#allocation11 + $0x544] ss:$24 sps:$4 sm:$0xff]   ;;  %v7539_v8 = vld [vmem:[#allocation11 + $0x540] ss:$24 sps:$4 sm:$0xff]  }
 0x4c6   :  { %v7536_v28 = vld [vmem:[#allocation11 + $0x518] ss:$24 sps:$4 sm:$0xff]   ;;  %v7544_v7 = vld [vmem:[#allocation11 + $0x54c] ss:$24 sps:$4 sm:$0xff]   ;;  %v7542_v9 = vld [vmem:[#allocation11 + $0x548] ss:$24 sps:$4 sm:$0xff]  }
 0x4c7   :  { %5873 = vmatpush1.bf16.msra.mxu0 %v7473_v5  ;;  %5959 = vmatpush1.bf16.msra.mxu1 %v7476_v54  ;;  %v7547_v11 = vld [vmem:[#allocation11 + $0x574] ss:$24 sps:$4 sm:$0xff]   ;;  %v7545_v43 = vld [vmem:[#allocation11 + $0x570] ss:$24 sps:$4 sm:$0xff]   ;;  %v7553_v42 = vld [vmem:[#allocation11 + $0x5a4] ss:$24 sps:$4 sm:$0xff]  }
 0x4c8   :  { %5874 = vmatprep.subr.bf16.mxu0 %v7481_v55  ;;  %5960 = vmatprep.subr.bf16.mxu1 %v7484_v56  ;;  %v7550_v12 = vld [vmem:[#allocation11 + $0x57c] ss:$24 sps:$4 sm:$0xff]   ;;  %v7548_v44 = vld [vmem:[#allocation11 + $0x578] ss:$24 sps:$4 sm:$0xff]   ;;  %v7556_v47 = vld [vmem:[#allocation11 + $0x5ac] ss:$24 sps:$4 sm:$0xff]  }
 0x4c9   :  { %v7551_v3 = vld [vmem:[#allocation11 + $0x5a0] ss:$24 sps:$4 sm:$0xff]   ;;  %v7559_v5 = vld [vmem:[#allocation11 + $0x5d4] ss:$24 sps:$4 sm:$0xff]   ;;  %v7557_v55 = vld [vmem:[#allocation11 + $0x5d0] ss:$24 sps:$4 sm:$0xff]  }
 0x4ca   :  { %v7554_v51 = vld [vmem:[#allocation11 + $0x5a8] ss:$24 sps:$4 sm:$0xff]   ;;  %v7562_v54 = vld [vmem:[#allocation11 + $0x5dc] ss:$24 sps:$4 sm:$0xff]   ;;  %v7560_v56 = vld [vmem:[#allocation11 + $0x5d8] ss:$24 sps:$4 sm:$0xff]  }
 0x4cb   :  { %5875 = vmatpush1.bf16.msra.mxu0 %v7479_v60  ;;  %5961 = vmatpush1.bf16.msra.mxu1 %v7482_v48  ;;  %v7565_v60 = vld [vmem:[#allocation11 + $0x14] ss:$24 sps:$4 sm:$0xff]   ;;  %v7563_v48 = vld [vmem:[#allocation11 + $0x10] ss:$24 sps:$4 sm:$0xff]  }
 0x4cc   :  { %5876 = vmatprep.subr.bf16.mxu0 %v7487_v61  ;;  %5962 = vmatprep.subr.bf16.mxu1 %v7490_v20  ;;  %v7568_v61 = vld [vmem:[#allocation11 + $0x44] ss:$24 sps:$4 sm:$0xff]   ;;  %v7566_v20 = vld [vmem:[#allocation11 + $0x40] ss:$24 sps:$4 sm:$0xff]  }
 0x4cf   :  { %5877 = vmatpush1.bf16.msra.mxu0 %v7485_v21  ;;  %5963 = vmatpush1.bf16.msra.mxu1 %v7488_v22  ;;  %v7571_v21 = vld [vmem:[#allocation11 + $0x74] ss:$24 sps:$4 sm:$0xff]   ;;  %v7569_v22 = vld [vmem:[#allocation11 + $0x70] ss:$24 sps:$4 sm:$0xff]  }
 0x4d0   :  { %5878 = vmatprep.subr.bf16.mxu0 %v7493_v26  ;;  %5964 = vmatprep.subr.bf16.mxu1 %v7496_v39  ;;  %v7574_v26 = vld [vmem:[#allocation11 + $0xa4] ss:$24 sps:$4 sm:$0xff]   ;;  %v7572_v39 = vld [vmem:[#allocation11 + $0xa0] ss:$24 sps:$4 sm:$0xff]  }
 0x4d3   :  { %5879 = vmatpush1.bf16.msra.mxu0 %v7491_v57  ;;  %5965 = vmatpush1.bf16.msra.mxu1 %v7494_v29  ;;  %v7577_v57 = vld [vmem:[#allocation11 + $0xd4] ss:$24 sps:$4 sm:$0xff]   ;;  %v7575_v29 = vld [vmem:[#allocation11 + $0xd0] ss:$24 sps:$4 sm:$0xff]  }
 0x4d4   :  { %5880 = vmatprep.subr.bf16.mxu0 %v7499_v30  ;;  %5966 = vmatprep.subr.bf16.mxu1 %v7502_v13  ;;  %v7580_v30 = vld [vmem:[#allocation11 + $0x104] ss:$24 sps:$4 sm:$0xff]   ;;  %v7578_v13 = vld [vmem:[#allocation11 + $0x100] ss:$24 sps:$4 sm:$0xff]  }
 0x4d7   :  { %5881 = vmatpush1.bf16.msra.mxu0 %v7497_v31  ;;  %5967 = vmatpush1.bf16.msra.mxu1 %v7500_v14  ;;  %v7583_v31 = vld [vmem:[#allocation11 + $0x134] ss:$24 sps:$4 sm:$0xff]   ;;  %v7586_v14 = vld [vmem:[#allocation11 + $0x164] ss:$24 sps:$4 sm:$0xff]  }
 0x4d8   :  { %5882 = vmatprep.subr.bf16.mxu0 %v7505_v23  ;;  %5968 = vmatprep.subr.bf16.mxu1 %v7508_v36  ;;  %v7584_v23 = vld [vmem:[#allocation11 + $0x160] ss:$24 sps:$4 sm:$0xff]   ;;  %v7589_v36 = vld [vmem:[#allocation11 + $0x194] ss:$24 sps:$4 sm:$0xff]  }
 0x4db   :  { %5883 = vmatpush1.bf16.msra.mxu0 %v7503_v49  ;;  %5969 = vmatpush1.bf16.msra.mxu1 %v7506_v46  ;;  %v7587_v49 = vld [vmem:[#allocation11 + $0x190] ss:$24 sps:$4 sm:$0xff]   ;;  %v7592_v46 = vld [vmem:[#allocation11 + $0x1c4] ss:$24 sps:$4 sm:$0xff]  }
 0x4dc   :  { %5884 = vmatprep.subr.bf16.mxu0 %v7511_v24  ;;  %5970 = vmatprep.subr.bf16.mxu1 %v7514_v25  ;;  %v7590_v24 = vld [vmem:[#allocation11 + $0x1c0] ss:$24 sps:$4 sm:$0xff]   ;;  %v7595_v25 = vld [vmem:[#allocation11 + $0x1f4] ss:$24 sps:$4 sm:$0xff]  }
 0x4df   :  { %5885 = vmatpush1.bf16.msra.mxu0 %v7509_v32  ;;  %5971 = vmatpush1.bf16.msra.mxu1 %v7512_v37  ;;  %v7593_v32 = vld [vmem:[#allocation11 + $0x1f0] ss:$24 sps:$4 sm:$0xff]   ;;  %v7598_v37 = vld [vmem:[#allocation11 + $0x224] ss:$24 sps:$4 sm:$0xff]  }
 0x4e0   :  { %5886 = vmatprep.subr.bf16.mxu0 %v7517_v33  ;;  %5972 = vmatprep.subr.bf16.mxu1 %v7520_v34  ;;  %v7596_v33 = vld [vmem:[#allocation11 + $0x220] ss:$24 sps:$4 sm:$0xff]   ;;  %v7601_v34 = vld [vmem:[#allocation11 + $0x254] ss:$24 sps:$4 sm:$0xff]  }
 0x4e3   :  { %5887 = vmatpush1.bf16.msra.mxu0 %v7515_v0  ;;  %5973 = vmatpush1.bf16.msra.mxu1 %v7518_v45  ;;  %v7599_v0 = vld [vmem:[#allocation11 + $0x250] ss:$24 sps:$4 sm:$0xff]   ;;  %v7604_v45 = vld [vmem:[#allocation11 + $0x284] ss:$24 sps:$4 sm:$0xff]  }
 0x4e4   :  { %5888 = vmatprep.subr.bf16.mxu0 %v7523_v27  ;;  %5974 = vmatprep.subr.bf16.mxu1 %v7526_v38  ;;  %v7602_v27 = vld [vmem:[#allocation11 + $0x280] ss:$24 sps:$4 sm:$0xff]   ;;  %v7607_v38 = vld [vmem:[#allocation11 + $0x2b4] ss:$24 sps:$4 sm:$0xff]  }
 0x4e7   :  { %5889 = vmatpush1.bf16.msra.mxu0 %v7521_v40  ;;  %5975 = vmatpush1.bf16.msra.mxu1 %v7524_v4  ;;  %v7605_v40 = vld [vmem:[#allocation11 + $0x2b0] ss:$24 sps:$4 sm:$0xff]   ;;  %v7610_v4 = vld [vmem:[#allocation11 + $0x2e4] ss:$24 sps:$4 sm:$0xff]  }
 0x4e8   :  { %5890 = vmatprep.subr.bf16.mxu0 %v7529_v52  ;;  %5976 = vmatprep.subr.bf16.mxu1 %v7532_v53  ;;  %v7608_v52 = vld [vmem:[#allocation11 + $0x2e0] ss:$24 sps:$4 sm:$0xff]   ;;  %v7613_v53 = vld [vmem:[#allocation11 + $0x314] ss:$24 sps:$4 sm:$0xff]  }
 0x4eb   :  { %5891 = vmatpush1.bf16.msra.mxu0 %v7527_v59  ;;  %5977 = vmatpush1.bf16.msra.mxu1 %v7530_v62  ;;  %v7611_v59 = vld [vmem:[#allocation11 + $0x310] ss:$24 sps:$4 sm:$0xff]   ;;  %v7616_v62 = vld [vmem:[#allocation11 + $0x344] ss:$24 sps:$4 sm:$0xff]  }
 0x4ec   :  { %5892 = vmatprep.subr.bf16.mxu0 %v7535_v63  ;;  %5978 = vmatprep.subr.bf16.mxu1 %v7538_v1  ;;  %v7614_v63 = vld [vmem:[#allocation11 + $0x340] ss:$24 sps:$4 sm:$0xff]   ;;  %v7619_v1 = vld [vmem:[#allocation11 + $0x374] ss:$24 sps:$4 sm:$0xff]  }
 0x4ef   :  { %5893 = vmatpush1.bf16.msra.mxu0 %v7533_v2  ;;  %5979 = vmatpush1.bf16.msra.mxu1 %v7536_v28  ;;  %v7617_v2 = vld [vmem:[#allocation11 + $0x370] ss:$24 sps:$4 sm:$0xff]   ;;  %v7622_v28 = vld [vmem:[#allocation11 + $0x3a4] ss:$24 sps:$4 sm:$0xff]  }
 0x4f0   :  { %5894 = vmatprep.subr.bf16.mxu0 %v7541_v6  ;;  %5980 = vmatprep.subr.bf16.mxu1 %v7544_v7  ;;  %v7620_v6 = vld [vmem:[#allocation11 + $0x3a0] ss:$24 sps:$4 sm:$0xff]   ;;  %v7625_v7 = vld [vmem:[#allocation11 + $0x3d4] ss:$24 sps:$4 sm:$0xff]  }
 0x4f3   :  { %5895 = vmatpush1.bf16.msra.mxu0 %v7539_v8  ;;  %5981 = vmatpush1.bf16.msra.mxu1 %v7542_v9  ;;  %v7623_v8 = vld [vmem:[#allocation11 + $0x3d0] ss:$24 sps:$4 sm:$0xff]   ;;  %v7628_v9 = vld [vmem:[#allocation11 + $0x404] ss:$24 sps:$4 sm:$0xff]  }
 0x4f4   :  { %5896 = vmatprep.subr.bf16.mxu0 %v7547_v11  ;;  %5982 = vmatprep.subr.bf16.mxu1 %v7550_v12  ;;  %v7631_v11 = vld [vmem:[#allocation11 + $0x434] ss:$24 sps:$4 sm:$0xff]   ;;  %v7634_v12 = vld [vmem:[#allocation11 + $0x464] ss:$24 sps:$4 sm:$0xff]  }
 0x4f7   :  { %5897 = vmatpush1.bf16.msra.mxu0 %v7545_v43  ;;  %5983 = vmatpush1.bf16.msra.mxu1 %v7548_v44  ;;  %v7632_v43 = vld [vmem:[#allocation11 + $0x460] ss:$24 sps:$4 sm:$0xff]   ;;  %v7637_v44 = vld [vmem:[#allocation11 + $0x494] ss:$24 sps:$4 sm:$0xff]  }
 0x4f8   :  { %5898 = vmatprep.subr.bf16.mxu0 %v7553_v42  ;;  %5984 = vmatprep.subr.bf16.mxu1 %v7556_v47  ;;  %v7635_v42 = vld [vmem:[#allocation11 + $0x490] ss:$24 sps:$4 sm:$0xff]   ;;  %v7659_v47 = vld [vmem:[#allocation13 + $0x40] sm:$0xff]  }
 0x4fb   :  { %5899 = vmatpush1.bf16.msra.mxu0 %v7551_v3  ;;  %5985 = vmatpush1.bf16.msra.mxu1 %v7554_v51  ;;  %v7660_v3 = vld [vmem:[#allocation13] sm:$0xff]   ;;  %v7661_v51 = vld [vmem:[#allocation13 + $0x48] sm:$0xff]  }
 0x4fc   :  { %5900 = vmatprep.subr.bf16.mxu0 %v7559_v5  ;;  %5986 = vmatprep.subr.bf16.mxu1 %v7562_v54  ;;  %v7640_v5 = vld [vmem:[#allocation11 + $0x4c4] ss:$24 sps:$4 sm:$0xff]   ;;  %v7662_v54 = vld [vmem:[#allocation13 + $0x8] sm:$0xff]  }
 0x4ff   :  { %5901 = vmatpush1.bf16.msra.mxu0 %v7557_v55  ;;  %5987 = vmatpush1.bf16.msra.mxu1 %v7560_v56  ;;  %v7638_v55 = vld [vmem:[#allocation11 + $0x4c0] ss:$24 sps:$4 sm:$0xff]   ;;  %v7663_v56 = vld [vmem:[#allocation13 + $0x50] sm:$0xff]  }
 0x500   :  { %5999 = vmatprep.subr.bf16.mxu0 %v7565_v60  ;;  %7214 = vmatprep.subr.bf16.mxu1 %v7659_v47  ;;  %v7643_v60 = vld [vmem:[#allocation11 + $0x4f4] ss:$24 sps:$4 sm:$0xff]  }
 0x502   :  { %5903 = vmatmul.mubr.bf16.vlgmr.msra.gmra.mrb[20].mxu0 %v8237_v16  ;;  %5989 = vmatmul.mubr.bf16.vlgmr.msra.gmra.mrb[28].mxu1 %v8237_v16 }
 0x503   :  { %6000 = vmatpush1.bf16.msra.mxu0 %v7563_v48  ;;  %6031 = vmatprep.mubr.bf16.mxu0 %v8239_v58  ;;  %v7581_v58 = vld [vmem:[#allocation11 + $0x130] ss:$24 sps:$4 sm:$0xff]  }
 0x504   :  { %6001 = vmatprep.subr.bf16.mxu0 %v7568_v61  ;;  %7215 = vmatpush3.bf16.msra.mxu1 %v7660_v3  ;;  %v7664_v48 = vld [vmem:[#allocation13 + $0x10] sm:$0xff]  }
 0x505   :  { %7216 = vmatprep.subr.bf16.mxu1 %v7661_v51  ;;  %v7641_v61 = vld [vmem:[#allocation11 + $0x4f0] ss:$24 sps:$4 sm:$0xff]  }
 0x507   :  { %6002 = vmatpush1.bf16.msra.mxu0 %v7566_v20  ;;  %v7665_v20 = vld [vmem:[#allocation13 + $0x58] sm:$0xff]  }
 0x508   :  { %6003 = vmatprep.subr.bf16.mxu0 %v7571_v21  ;;  %7217 = vmatpush3.bf16.msra.mxu1 %v7662_v54  ;;  %v7646_v21 = vld [vmem:[#allocation11 + $0x524] ss:$24 sps:$4 sm:$0xff]  }
 0x509   :  { %7218 = vmatprep.subr.bf16.mxu1 %v7663_v56 }
 0x50b   :  { %6004 = vmatpush1.bf16.msra.mxu0 %v7569_v22  ;;  %v7666_v22 = vld [vmem:[#allocation13 + $0x18] sm:$0xff]  }
 0x50c   :  { %6005 = vmatprep.subr.bf16.mxu0 %v7574_v26  ;;  %7219 = vmatpush3.bf16.msra.mxu1 %v7664_v48  ;;  %v7644_v26 = vld [vmem:[#allocation11 + $0x520] ss:$24 sps:$4 sm:$0xff]  }
 0x50d   :  { %7220 = vmatprep.subr.bf16.mxu1 %v7665_v20 }
 0x50f   :  { %6006 = vmatpush1.bf16.msra.mxu0 %v7572_v39  ;;  %v7667_v39 = vld [vmem:[#allocation13 + $0x60] sm:$0xff]  }
 0x510   :  { %6007 = vmatprep.subr.bf16.mxu0 %v7577_v57  ;;  %v7649_v57 = vld [vmem:[#allocation11 + $0x554] ss:$24 sps:$4 sm:$0xff]   ;;  %7221 = vmatpush3.bf16.msra.mxu1 %v7666_v22  ;;  %v7675_v22 = vld [vmem:[#allocation13 + $0x80] sm:$0xff]  }
 0x511   :  { %7222 = vmatprep.subr.bf16.mxu1 %v7667_v39  ;;  %v7676_v39 = vld [vmem:[#allocation13 + $0x88] sm:$0xff]  }
 0x513   :  { %6008 = vmatpush1.bf16.msra.mxu0 %v7575_v29  ;;  %v7668_v29 = vld [vmem:[#allocation13 + $0x20] sm:$0xff]  }
 0x514   :  { %6009 = vmatprep.subr.bf16.mxu0 %v7580_v30  ;;  %v7647_v30 = vld [vmem:[#allocation11 + $0x550] ss:$24 sps:$4 sm:$0xff]   ;;  %7223 = vmatpush3.bf16.msra.mxu1 %v7668_v29  ;;  %v7678_v29 = vld [vmem:[#allocation13 + $0x98] sm:$0xff]  }
 0x517   :  { %6010 = vmatpush1.bf16.msra.mxu0 %v7578_v13  ;;  %v7669_v13 = vld [vmem:[#allocation13 + $0x68] sm:$0xff]  }
 0x518   :  { %6011 = vmatprep.subr.bf16.mxu0 %v7583_v31  ;;  %v7652_v31 = vld [vmem:[#allocation11 + $0x584] ss:$24 sps:$4 sm:$0xff]   ;;  %7224 = vmatprep.subr.bf16.mxu1 %v7669_v13  ;;  %v7680_v13 = vld [vmem:[#allocation13 + $0xa8] sm:$0xff]  }
 0x51b   :  { %6012 = vmatpush1.bf16.msra.mxu0 %v7581_v58  ;;  %v7650_v58 = vld [vmem:[#allocation11 + $0x580] ss:$24 sps:$4 sm:$0xff]  }
 0x51c   :  { %6013 = vmatprep.subr.bf16.mxu0 %v7586_v14  ;;  %v7655_v14 = vld [vmem:[#allocation11 + $0x5b4] ss:$24 sps:$4 sm:$0xff]  }
 0x51f   :  { %6014 = vmatpush1.bf16.msra.mxu0 %v7584_v23  ;;  %v7653_v23 = vld [vmem:[#allocation11 + $0x5b0] ss:$24 sps:$4 sm:$0xff]  }
 0x520   :  { %6015 = vmatprep.subr.bf16.mxu0 %v7589_v36  ;;  %v7658_v36 = vld [vmem:[#allocation11 + $0x5e4] ss:$24 sps:$4 sm:$0xff]  }
 0x523   :  { %6016 = vmatpush1.bf16.msra.mxu0 %v7587_v49  ;;  %v7656_v49 = vld [vmem:[#allocation11 + $0x5e0] ss:$24 sps:$4 sm:$0xff]  }
 0x524   :  { %6017 = vmatprep.subr.bf16.mxu0 %v7592_v46  ;;  %v4835_v46 = vld [vmem:[%s8290_s8] sm:$0x3f] }
 0x527   :  { %6018 = vmatpush1.bf16.msra.mxu0 %v7590_v24  ;;  %v4840_v24 = vrot.slane %v4835_v46, %v8081_v15 }
 0x528   :  { %6019 = vmatprep.subr.bf16.mxu0 %v7595_v25  ;;  %v4852_v25 = vrot.slane %v4835_v46, %v8131_v41  ;;  %v7673_v41 = vld [vmem:[#allocation13 + $0x78] sm:$0xff]  }
 0x52b   :  { %6020 = vmatpush1.bf16.msra.mxu0 %v7593_v32  ;;  %v7670_v32 = vld [vmem:[#allocation13 + $0x28] sm:$0xff]  }
 0x52c   :  { %6021 = vmatprep.subr.bf16.mxu0 %v7598_v37  ;;  %7225 = vmatpush3.bf16.msra.mxu1 %v7670_v32 }
 0x52f   :  { %6022 = vmatpush1.bf16.msra.mxu0 %v7596_v33 }
 0x530   :  { %6023 = vmatprep.subr.bf16.mxu0 %v7601_v34 }
 0x533   :  { %6024 = vmatpush1.bf16.msra.mxu0 %v7599_v0 }
 0x534   :  { %6025 = vmatprep.subr.bf16.mxu0 %v7604_v45 }
 0x537   :  { %6026 = vmatpush1.bf16.msra.mxu0 %v7602_v27 }
 0x538   :  { %6027 = vmatprep.subr.bf16.mxu0 %v7607_v38 }
 0x53b   :  { %6028 = vmatpush1.bf16.msra.mxu0 %v7605_v40 }
 0x53c   :  { %6029 = vmatprep.subr.bf16.mxu0 %v7610_v4  ;;  %v7671_v4 = vld [vmem:[#allocation13 + $0x70] sm:$0xff]  }
 0x53d   :  { %7226 = vmatprep.subr.bf16.mxu1 %v7671_v4 }
 0x53f   :  { %6030 = vmatpush1.bf16.msra.mxu0 %v7608_v52 }
 0x540   :  { %6042 = vmatprep.subr.bf16.mxu0 %v7613_v53 }
 0x542   :  { %6032 = vmatmul.mubr.bf16.vlgmr.msra.gmra.mrb[24].mxu0 %v8235_v10  ;;  %v7626_v10 = vld [vmem:[#allocation11 + $0x400] ss:$24 sps:$4 sm:$0xff]  }
 0x543   :  { %6043 = vmatpush1.bf16.msra.mxu0 %v7611_v59  ;;  %6074 = vmatprep.mubr.bf16.mxu0 %v8241_v50  ;;  %v7629_v50 = vld [vmem:[#allocation11 + $0x430] ss:$24 sps:$4 sm:$0xff]  }
 0x544   :  { %6044 = vmatprep.subr.bf16.mxu0 %v7616_v62  ;;  %v7672_v59 = vld [vmem:[#allocation13 + $0x30] sm:$0xff]  }
 0x545   :  { %7227 = vmatpush3.bf16.msra.mxu1 %v7672_v59 }
 0x546   :  { %7228 = vmatprep.subr.bf16.mxu1 %v7673_v41 }
 0x547   :  { %6045 = vmatpush1.bf16.msra.mxu0 %v7614_v63 }
 0x548   :  { %6046 = vmatprep.subr.bf16.mxu0 %v7619_v1  ;;  %v7674_v1 = vld [vmem:[#allocation13 + $0x38] sm:$0xff]  }
 0x549   :  { %7229 = vmatpush3.bf16.msra.mxu1 %v7674_v1 }
 0x54b   :  { %6047 = vmatpush1.bf16.msra.mxu0 %v7617_v2 }
 0x54c   :  { %6048 = vmatprep.subr.bf16.mxu0 %v7622_v28 }
 0x54f   :  { %6049 = vmatpush1.bf16.msra.mxu0 %v7620_v6 }
 0x550   :  { %6050 = vmatprep.subr.bf16.mxu0 %v7625_v7  ;;  %v7883_v7 = vmov 0.0  }
 0x551   :  { %7245 = vmatprep.subr.bf16.mxu1 %v7883_v7 }
 0x553   :  { %6051 = vmatpush1.bf16.msra.mxu0 %v7623_v8  ;;  %v4844_v8 = vrot.slane %v4835_v46, %v8089_v18 }
 0x554   :  { %6052 = vmatprep.subr.bf16.mxu0 %v7628_v9  ;;  %v4856_v9 = vrot.slane %v4835_v46, %v8086_v17 }
 0x557   :  { %6053 = vmatpush1.bf16.msra.mxu0 %v7626_v10  ;;  %v4848_v10 = vrot.slane %v4835_v46, %v8125_v35 }
 0x558   :  { %6054 = vmatprep.subr.bf16.mxu0 %v7631_v11  ;;  %v4860_v11 = vrot.slane %v4835_v46, %v8092_v19 }
 0x55b   :  { %6055 = vmatpush1.bf16.msra.mxu0 %v7629_v50 }
 0x55c   :  { %6056 = vmatprep.subr.bf16.mxu0 %v7634_v12 }
 0x55f   :  { %6057 = vmatpush1.bf16.msra.mxu0 %v7632_v43 }
 0x560   :  { %6058 = vmatprep.subr.bf16.mxu0 %v7637_v44 }
 0x563   :  { %6059 = vmatpush1.bf16.msra.mxu0 %v7635_v42 }
 0x564   :  { %6060 = vmatprep.subr.bf16.mxu0 %v7640_v5 }
 0x567   :  { %6061 = vmatpush1.bf16.msra.mxu0 %v7638_v55 }
 0x568   :  { %6062 = vmatprep.subr.bf16.mxu0 %v7643_v60 }
 0x56b   :  { %6063 = vmatpush1.bf16.msra.mxu0 %v7641_v61 }
 0x56c   :  { %6064 = vmatprep.subr.bf16.mxu0 %v7646_v21 }
 0x56f   :  { %6065 = vmatpush1.bf16.msra.mxu0 %v7644_v26 }
 0x570   :  { %6066 = vmatprep.subr.bf16.mxu0 %v7649_v57  ;;  %v7677_v57 = vld [vmem:[#allocation13 + $0x90] sm:$0xff]  }
 0x573   :  { %6067 = vmatpush1.bf16.msra.mxu0 %v7647_v30  ;;  %v7679_v30 = vld [vmem:[#allocation13 + $0xa0] sm:$0xff]  }
 0x574   :  { %6068 = vmatprep.subr.bf16.mxu0 %v7652_v31  ;;  %v7681_v31 = vld [vmem:[#allocation13 + $0xb0] sm:$0xff]  }
 0x577   :  { %6069 = vmatpush1.bf16.msra.mxu0 %v7650_v58  ;;  %v7682_v58 = vld [vmem:[#allocation13 + $0xb8] sm:$0xff]  }
 0x578   :  { %6070 = vmatprep.subr.bf16.mxu0 %v7655_v14 }
 0x57b   :  { %6071 = vmatpush1.bf16.msra.mxu0 %v7653_v23 }
 0x57c   :  { %6072 = vmatprep.subr.bf16.mxu0 %v7658_v36 }
 0x57f   :  { %6073 = vmatpush1.bf16.msra.mxu0 %v7656_v49 }
 0x582   :  { %6075 = vmatmul.mubr.bf16.vlgmr.msra.gmra.mrb[24].mxu0 %v8237_v16 }
 0x5d5   :  { %v5904_v37 = vpop.f32.mrb[20].mxu0  ;;  %v5990_v33 = vpop.f32.mrb[28].mxu1 }
 0x5d6   :  { %v7297_v34 = vadd.f32 %v5904_v37, %v4840_v24  ;;  %v5906_v0 = vpop.f32.mrb[21].mxu0  ;;  %v5992_v45 = vpop.f32.mrb[29].mxu1  ;;  %v7301_v42 = vadd.f32 %v5990_v33, %v4848_v10 }
 0x5d7   :  { %v7302_v27 = vadd.f32 %v5992_v45, %v4852_v25  ;;  %v5908_v38 = vpop.f32.mrb[22].mxu0  ;;  %v5994_v40 = vpop.f32.mrb[30].mxu1  ;;  %v7298_v12 = vadd.f32 %v5906_v0, %v4844_v8 }
 0x5d8   :  { %v7299_v16 = vadd.f32 %v5908_v38, %v4840_v24  ;;  %v5910_v52 = vpop.f32.mrb[23].mxu0  ;;  %v5996_v53 = vpop.f32.mrb[31].mxu1  ;;  %v7303_v56 = vadd.f32 %v5994_v40, %v4848_v10 }
 0x5d9   :  { %v6085_v62 = vmax.f32 %v7297_v34, %v7302_v27  ;;  %v7304_v63 = vadd.f32 %v5996_v53, %v4852_v25  ;;  %v7300_v51 = vadd.f32 %v5910_v52, %v4844_v8  ;;  %v7180_v25 = vld [vmem:[%s8292_s10] ss:$0 sm:$0xff] }
 0x5db   :  { %v6088_v15 = vmax.f32 %v7299_v16, %v7304_v63  ;;  %v6091_v2 = vmax.f32 %v6085_v62, 0.0 }
 0x5dd   :  { %v6094_v28 = vmax.f32 %v6088_v15, 0.0 }
 0x5df   :  { %v6097_v6 = vpack.c.bf16 %v6094_v28, %v6091_v2 }
 0x655   :  { %v6076_v50 = vpop.f32.mrb[24].mxu0 }
 0x656   :  { %v7305_v43 = vadd.f32 %v6076_v50, %v4856_v9  ;;  %v6078_v44 = vpop.f32.mrb[25].mxu0 }
 0x657   :  { %v7306_v47 = vadd.f32 %v6078_v44, %v4860_v11  ;;  %v6080_v3 = vpop.f32.mrb[26].mxu0 }
 0x658   :  { %v6086_v5 = vmax.f32 %v7298_v12, %v7305_v43  ;;  %v7307_v54 = vadd.f32 %v6080_v3, %v4856_v9  ;;  %v6082_v55 = vpop.f32.mrb[27].mxu0 }
 0x659   :  { %v6087_v60 = vmax.f32 %v7301_v42, %v7306_v47  ;;  %v7308_v18 = vadd.f32 %v6082_v55, %v4860_v11 }
 0x65a   :  { %v6089_v48 = vmax.f32 %v7300_v51, %v7307_v54  ;;  %v6092_v61 = vmax.f32 %v6086_v5, 0.0 }
 0x65b   :  { %v6090_v17 = vmax.f32 %v7303_v56, %v7308_v18  ;;  %v6093_v20 = vmax.f32 %v6087_v60, 0.0 }
 0x65c   :  { %v6095_v35 = vmax.f32 %v6089_v48, 0.0 }
 0x65d   :  { %v6096_v19 = vmax.f32 %v6090_v17, 0.0 }
 0x65e   :  { %v6098_v21 = vpack.c.bf16 %v6095_v35, %v6092_v61 }
 0x65f   :  { %v6099_v26 = vpack.c.bf16 %v6096_v19, %v6093_v20 }
 0x660   :  { %6331 = vmatprep.mubr.bf16.mxu1 %v6098_v21 }
 0x661   :  { %6332 = vmatmul.mubr.bf16.vlgmr.msra.gmra.mrb[32].mxu1 %v6097_v6 }
 0x662   :  { %7246 = vmatpush3.bf16.msra.mxu1 %v7675_v22  ;;  %7261 = vmatprep.mubr.msk.bf16.mxu1 %vm7884_vm0, %v7883_v7 }
 0x663   :  { %7247 = vmatprep.subr.bf16.mxu1 %v7883_v7 }
 0x666   :  { %7248 = vmatpush3.bf16.msra.mxu1 %v7676_v39 }
 0x667   :  { %7249 = vmatprep.subr.bf16.mxu1 %v7883_v7 }
 0x66a   :  { %7250 = vmatpush3.bf16.msra.mxu1 %v7677_v57 }
 0x66b   :  { %7251 = vmatprep.subr.bf16.mxu1 %v7883_v7 }
 0x66e   :  { %7252 = vmatpush3.bf16.msra.mxu1 %v7678_v29 }
 0x66f   :  { %7253 = vmatprep.subr.bf16.mxu1 %v7883_v7 }
 0x672   :  { %7254 = vmatpush3.bf16.msra.mxu1 %v7679_v30 }
 0x673   :  { %7255 = vmatprep.subr.bf16.mxu1 %v7883_v7 }
 0x676   :  { %7256 = vmatpush3.bf16.msra.mxu1 %v7680_v13 }
 0x677   :  { %7257 = vmatprep.subr.bf16.mxu1 %v7883_v7 }
 0x67a   :  { %7258 = vmatpush3.bf16.msra.mxu1 %v7681_v31 }
 0x67b   :  { %7259 = vmatprep.subr.bf16.mxu1 %v7883_v7 }
 0x67e   :  { %7260 = vmatpush3.bf16.msra.mxu1 %v7682_v58 }
 0x681   :  { %7262 = vmatmul.mubr.bf16.vlgmr.msra.gmra.mrb[36].mxu1 %v6099_v26 }
 0x734   :  { %v7230_v14 = vpop.f32.mrb[32].mxu1 }
 0x735   :  { %v7231_v23 = vpop.f32.mrb[33].mxu1 }
 0x736   :  { %v7232_v36 = vadd.f32 %v7231_v23, %v7230_v14  ;;  %v7233_v49 = vpop.f32.mrb[34].mxu1 }
 0x737   :  { %v7234_v46 = vpop.f32.mrb[35].mxu1 }
 0x738   :  { %v7235_v24 = vadd.f32 %v7234_v46, %v7233_v49  ;;  %v6334_v32 = vadd.f32 %v7232_v36, %v7180_v25 }
 0x73a   :  { %v6337_v0 = vadd.f32 %v7235_v24, %v7180_v25 }
 0x754   :  { %v6374_v37 = vpop.f32.mrb[36].mxu1 }
 0x755   :  { %v6375_v33 = vadd.f32 %v6374_v37, %v6334_v32  ;;  %v7263_v34 = vpop.f32.mrb[37].mxu1 }
 0x756   :  { %v6377_v45 = vpop.f32.mrb[38].mxu1 }
 0x757   :  { %v6378_v27 = vadd.f32 %v6377_v45, %v6337_v0  ;;  %v7264_v38 = vpop.f32.mrb[39].mxu1 }
 0x759   :  { %v7212_v40 = vpack.c.bf16 %v6378_v27, %v6375_v33 }
 0x75b   :  { %7213 = vst [vmem:[#allocation14] sm:$0xff] %v7212_v40  }
 0x75c   :  { %7848 = shalt.err (!%p7845_p4)
}
 0x75d   :  { %s7849_s19 = scalar_lea.hbm %s8293_s11, 128 }
 0x75e   :  { %p7850_p5 = scmp.ne.s32.totalorder %s8293_s11, %s7849_s19  ;;  %p7853_p6 = scmp.lt.u32.totalorder %s7849_s19, %s8293_s11 }
 0x760   :  { %p7855_p7 = pnand %p7853_p6, %p7850_p5 }
 0x762   :  { %7858 = shalt.err (!%p7855_p7)
}
 0x763   :  { %6402 = dma.vmem_to_hbm [thread:$0]  %s6397_s14, 128, %s8293_s11, [#allocation4], %s7877_s7, %s7877_s7, %s7878_s15  }
 0x764   :  { %7867 = dma.done.wait [#allocation4], 128  }
 0x765   :  { %7868 = vsyncadd [#allocation4], 4294967168 }
 0x766   :  { %6406 = vsyncpa [#allocation3], 1 }
 0x767   :  { %6407 = vsyncpa [#allocation6], 1 }
 0x768   :  { %6408 = vsyncpa [#allocation9], 1 }
 0x769   :  { %6409 = vsyncpa [#allocation12], 1 }
 0x76a   :  { %6410 = vsyncpa [#allocation4], 1 }

// kernel: tpu_custom_call.1
= control target key start
LH: loop header
LB: loop body
LE: loop exit
PB: predicated region body
PF: predicated region fallthrough
CT: control target
= control target key end

     0   :  { %16 = vsyncpa [#allocation3], 0  ;;  %s8282_s0 = inlined_call_operand.hbm [shape: bf16[16,128], index: 0, kind: input, shape index: {}]   ;;  %s8283_s1 = inlined_call_operand.hbm [shape: bf16[128,1024], index: 1, kind: input, shape index: {}]   ;;  %s8284_s2 = inlined_call_operand.hbm [shape: f32[1,1024], index: 2, kind: input, shape index: {}]   ;;  %s8285_s3 = inlined_call_operand.hbm [shape: bf16[512,1024], index: 3, kind: input, shape index: {}]   ;;  %s8286_s4 = inlined_call_operand.vmem [shape: f32[1,1024], index: 4, kind: input, shape index: {}]   ;;  %s8287_s5 = inlined_call_operand.hbm [shape: bf16[512,1024], index: 5, kind: input, shape index: {}]   ;;  %s8288_s6 = inlined_call_operand.vmem [shape: f32[1,1024], index: 6, kind: input, shape index: {}]   ;;  %s8289_s7 = inlined_call_operand.hbm [shape: bf16[512,768], index: 7, kind: input, shape index: {}]   ;;  %s8290_s8 = inlined_call_operand.vmem [shape: f32[1,768], index: 8, kind: input, shape index: {}]   ;;  %s8291_s9 = inlined_call_operand.hbm [shape: bf16[384,128], index: 9, kind: input, shape index: {}]   ;;  %s8292_s10 = inlined_call_operand.vmem [shape: f32[1,128], index: 10, kind: input, shape index: {}]   ;;  %s8293_s11 = inlined_call_operand.hbm [shape: bf16[16,128], index: 11, kind: output, shape index: {}]  }
   0x1   :  { %17 = vsyncpa [#allocation6], 0 }
   0x2   :  { %18 = vsyncpa [#allocation9], 0 }
   0x3   :  { %19 = vsyncpa [#allocation12], 0 }
   0x4   :  { %20 = vsyncpa [#allocation4], 0  ;;  %s7869_s17 = smov [#allocation5]   ;;  %s7683_s21 = scalar_lea.hbm %s8283_s1, 8192 }
   0x5   :  { %s38_s18 = sshll.u32 %s7869_s17, 4  ;;  %p7684_p0 = scmp.ne.s32.totalorder %s8283_s1, %s7683_s21  ;;  %s39_s18 = int_to_ptr.vmem [resolvable:$true] %s38_s18 }
   0x6   :  { %p7687_p1 = scmp.lt.u32.totalorder %s7683_s21, %s8283_s1 }
   0x8   :  { %p7689_p2 = pnand %p7687_p1, %p7684_p0 }
   0xa   :  { %7692 = shalt.err (!%p7689_p2)
}
   0xb   :  { %s7693_s26 = scalar_lea.vmem %s39_s18, 8192  ;;  %p7698_p4 = scmp.lt.s32.totalorder %s39_s18, %s39_s18 }
   0xc   :  { %p7694_p3 = scmp.ne.s32.totalorder %s39_s18, %s7693_s26  ;;  %p7699_p5 = scmp.lt.s32.totalorder %s7693_s26, %s7693_s26 }
   0xe   :  { %p7700_p6 = por %p7699_p5, %p7698_p4 }
  0x10   :  { %p7701_p7 = pnand %p7700_p6, %p7694_p3 }
  0x12   :  { %7704 = shalt.err (!%p7701_p7)
}
  0x13   :  { %s7870_s27 = smov 512   ;;  %s7871_s28 = smov 32  }
  0x14   :  { %44 = dma.hbm_to_vmem [thread:$0]  %s8283_s1, 8192, %s39_s18, [#allocation6], %s7870_s27, %s7870_s27, %s7871_s28  }
  0x15   :  { %s7872_s12 = smov [#allocation8]   ;;  %s7873_s14 = smov [#allocation11]  }
  0x16   :  { %s60_s13 = sshll.u32 %s7872_s12, 4  ;;  %s88_s15 = sshll.u32 %s7873_s14, 4  ;;  %s61_s13 = int_to_ptr.vmem [resolvable:$true] %s60_s13  ;;  %s89_s15 = int_to_ptr.vmem [resolvable:$true] %s88_s15 }
  0x17   :  { %s7705_s19 = scalar_lea.hbm %s8285_s3, 32768 }
  0x18   :  { %p7706_p8 = scmp.ne.s32.totalorder %s8285_s3, %s7705_s19  ;;  %p7709_p9 = scmp.lt.u32.totalorder %s7705_s19, %s8285_s3 }
  0x1a   :  { %p7711_p10 = pnand %p7709_p9, %p7706_p8 }
  0x1c   :  { %7714 = shalt.err (!%p7711_p10)
}
  0x1d   :  { %s7715_s1 = scalar_lea.vmem %s61_s13, 32768  ;;  %p7720_p12 = scmp.lt.s32.totalorder %s61_s13, %s61_s13 }
  0x1e   :  { %p7716_p11 = scmp.ne.s32.totalorder %s61_s13, %s7715_s1  ;;  %p7721_p13 = scmp.lt.s32.totalorder %s7715_s1, %s7715_s1 }
  0x20   :  { %p7722_p0 = por %p7721_p13, %p7720_p12 }
  0x22   :  { %p7723_p1 = pnand %p7722_p0, %p7716_p11 }
  0x24   :  { %7726 = shalt.err (!%p7723_p1)
}
  0x25   :  { %66 = dma.hbm_to_vmem [thread:$0]  %s8285_s3, 32768, %s61_s13, [#allocation9], %s7870_s27, %s7870_s27, %s7871_s28  }
  0x26   :  { %s7727_s29 = scalar_lea.hbm %s8289_s7, 24576 }
  0x27   :  { %p7728_p2 = scmp.ne.s32.totalorder %s8289_s7, %s7727_s29  ;;  %p7731_p3 = scmp.lt.u32.totalorder %s7727_s29, %s8289_s7 }
  0x29   :  { %p7733_p4 = pnand %p7731_p3, %p7728_p2 }
  0x2b   :  { %7736 = shalt.err (!%p7733_p4)
}
  0x2c   :  { %s7737_s17 = scalar_lea.vmem %s89_s15, 24576  ;;  %p7742_p6 = scmp.lt.s32.totalorder %s89_s15, %s89_s15 }
  0x2d   :  { %p7738_p5 = scmp.ne.s32.totalorder %s89_s15, %s7737_s17  ;;  %p7743_p7 = scmp.lt.s32.totalorder %s7737_s17, %s7737_s17 }
  0x2f   :  { %p7744_p8 = por %p7743_p7, %p7742_p6 }
  0x31   :  { %p7745_p9 = pnand %p7744_p8, %p7738_p5 }
  0x33   :  { %7748 = shalt.err (!%p7745_p9)
}
  0x34   :  { %s7874_s3 = smov 384   ;;  %s7875_s13 = smov 24  }
  0x35   :  { %94 = dma.hbm_to_vmem [thread:$0]  %s8289_s7, 24576, %s89_s15, [#allocation12], %s7874_s3, %s7874_s3, %s7875_s13  }
  0x36   :  { %s7876_s21 = smov [#allocation2]   ;;  %s7749_s18 = scalar_lea.hbm %s8282_s0, 128 }
  0x37   :  { %s26_s22 = sshll.u32 %s7876_s21, 4  ;;  %p7750_p10 = scmp.ne.s32.totalorder %s8282_s0, %s7749_s18  ;;  %s27_s22 = int_to_ptr.vmem [resolvable:$true] %s26_s22 }
  0x38   :  { %p7753_p11 = scmp.lt.u32.totalorder %s7749_s18, %s8282_s0 }
  0x3a   :  { %p7755_p12 = pnand %p7753_p11, %p7750_p10 }
  0x3c   :  { %7758 = shalt.err (!%p7755_p12)
}
  0x3d   :  { %s7759_s30 = scalar_lea.vmem %s27_s22, 128  ;;  %p7764_p0 = scmp.lt.s32.totalorder %s27_s22, %s27_s22 }
  0x3e   :  { %p7760_p13 = scmp.ne.s32.totalorder %s27_s22, %s7759_s30  ;;  %p7765_p1 = scmp.lt.s32.totalorder %s7759_s30, %s7759_s30 }
  0x40   :  { %p7766_p2 = por %p7765_p1, %p7764_p0 }
  0x42   :  { %p7767_p3 = pnand %p7766_p2, %p7760_p13 }
  0x44   :  { %7770 = shalt.err (!%p7767_p3)
}
  0x45   :  { %s7877_s7 = smov 64   ;;  %s7878_s15 = smov 4  }
  0x46   :  { %32 = dma.hbm_to_vmem [thread:$0]  %s8282_s0, 128, %s27_s22, [#allocation3], %s7877_s7, %s7877_s7, %s7878_s15  }
  0x47   :  { %s7879_s16 = smov [#allocation7]   ;;  %s7880_s3 = smov [#allocation10]  }
  0x48   :  { %s51_s17 = sshll.u32 %s7879_s16, 4  ;;  %s74_s13 = sshll.u32 %s7880_s3, 4  ;;  %s52_s17 = int_to_ptr.vmem [resolvable:$true] %s51_s17  ;;  %s8003_s13 = int_to_ptr.vmem [resolvable:$true] %s74_s13 }
  0x49   :  { %s7771_s21 = scalar_lea.hbm %s8284_s2, 128 }
  0x4a   :  { %p7772_p4 = scmp.ne.s32.totalorder %s8284_s2, %s7771_s21  ;;  %p7775_p5 = scmp.lt.u32.totalorder %s7771_s21, %s8284_s2 }
  0x4c   :  { %p7777_p6 = pnand %p7775_p5, %p7772_p4 }
  0x4e   :  { %7780 = shalt.err (!%p7777_p6)
}
  0x4f   :  { %s7781_s0 = scalar_lea.vmem %s52_s17, 128  ;;  %p7786_p8 = scmp.lt.s32.totalorder %s52_s17, %s52_s17 }
  0x50   :  { %p7782_p7 = scmp.ne.s32.totalorder %s52_s17, %s7781_s0  ;;  %p7787_p9 = scmp.lt.s32.totalorder %s7781_s0, %s7781_s0 }
  0x52   :  { %p7788_p10 = por %p7787_p9, %p7786_p8 }
  0x54   :  { %p7789_p11 = pnand %p7788_p10, %p7782_p7 }
  0x56   :  { %7792 = shalt.err (!%p7789_p11)
}
  0x57   :  { %54 = dma.hbm_to_vmem [thread:$0]  %s8284_s2, 128, %s52_s17, [#allocation6]  }
  0x58   :  { %s7793_s30 = scalar_lea.hbm %s8287_s5, 32768 }
  0x59   :  { %p7794_p12 = scmp.ne.s32.totalorder %s8287_s5, %s7793_s30  ;;  %p7797_p13 = scmp.lt.u32.totalorder %s7793_s30, %s8287_s5 }
  0x5b   :  { %p7799_p0 = pnand %p7797_p13, %p7794_p12 }
  0x5d   :  { %7802 = shalt.err (!%p7799_p0)
}
  0x5e   :  { %s7803_s19 = scalar_lea.vmem %s8003_s13, 32768  ;;  %p7808_p2 = scmp.lt.s32.totalorder %s8003_s13, %s8003_s13 }
  0x5f   :  { %p7804_p1 = scmp.ne.s32.totalorder %s8003_s13, %s7803_s19  ;;  %p7809_p3 = scmp.lt.s32.totalorder %s7803_s19, %s7803_s19 }
  0x61   :  { %p7810_p4 = por %p7809_p3, %p7808_p2 }
  0x63   :  { %p7811_p5 = pnand %p7810_p4, %p7804_p1 }
  0x65   :  { %7814 = shalt.err (!%p7811_p5)
}
  0x66   :  { %80 = dma.hbm_to_vmem [thread:$0]  %s8287_s5, 32768, %s8003_s13, [#allocation9], %s7870_s27, %s7870_s27, %s7871_s28  }
  0x67   :  { %s7881_s20 = smov [#allocation13]   ;;  %s7815_s18 = scalar_lea.hbm %s8291_s9, 3072 }
  0x68   :  { %s102_s21 = sshll.u32 %s7881_s20, 4  ;;  %p7816_p6 = scmp.ne.s32.totalorder %s8291_s9, %s7815_s18  ;;  %s103_s21 = int_to_ptr.vmem [resolvable:$true] %s102_s21 }
  0x69   :  { %p7819_p7 = scmp.lt.u32.totalorder %s7815_s18, %s8291_s9 }
  0x6b   :  { %p7821_p8 = pnand %p7819_p7, %p7816_p6 }
  0x6d   :  { %7824 = shalt.err (!%p7821_p8)
}
  0x6e   :  { %s7825_s26 = scalar_lea.vmem %s103_s21, 3072  ;;  %p7830_p10 = scmp.lt.s32.totalorder %s103_s21, %s103_s21 }
  0x6f   :  { %p7826_p9 = scmp.ne.s32.totalorder %s103_s21, %s7825_s26  ;;  %p7831_p11 = scmp.lt.s32.totalorder %s7825_s26, %s7825_s26 }
  0x71   :  { %p7832_p12 = por %p7831_p11, %p7830_p10 }
  0x73   :  { %p7833_p13 = pnand %p7832_p12, %p7826_p9 }
  0x75   :  { %7836 = shalt.err (!%p7833_p13)
}
  0x76   :  { %108 = dma.hbm_to_vmem [thread:$0]  %s8291_s9, 3072, %s103_s21, [#allocation12], %s7877_s7, %s7877_s7, %s7878_s15  }
  0x77   :  { %7859 = dma.done.wait [#allocation3], 128  }
  0x78   :  { %7860 = vsyncadd [#allocation3], 4294967168 }
  0x79   :  { %7861 = dma.done.wait [#allocation6], 8320  }
  0x7a   :  { %7862 = vsyncadd [#allocation6], 4294958976 }
  0x7b   :  { %7863 = dma.done.wait [#allocation9], 65536  }
  0x7c   :  { %7864 = vsyncadd [#allocation9], 4294901760 }
  0x7d   :  { %7865 = dma.done.wait [#allocation12], 27648  }
  0x7e   :  { %7866 = vsyncadd [#allocation12], 4294939648  ;;  %v7882_v0 = vmov 0   ;;  %v135_v1 = vld [vmem:[#allocation5] sm:$0xff]  ;;  %v137_v3 = vld [vmem:[#allocation5 + $0x10] sm:$0xff]  ;;  %vm7884_vm0 = vmmov 0  }
  0x7f   :  { %599 = vmatprep.mubr.bf16.mxu1 %v7882_v0  ;;  %685 = vmatprep.mubr.bf16.mxu0 %v7882_v0  ;;  %v139_v2 = vld [vmem:[#allocation5 + $0x20] sm:$0xff]  ;;  %v141_v5 = vld [vmem:[#allocation5 + $0x30] sm:$0xff]  ;;  %v136_v63 = vld [vmem:[#allocation5 + $0x8] sm:$0xff]  ;;  %s7885_s12 = smov [#allocation14]  }
  0x80   :  { %v6413_v4 = vcombine.high %v135_v1, %v139_v2  ;;  %v6412_v6 = vcombine.low %v135_v1, %v139_v2  ;;  %v143_v7 = vld [vmem:[#allocation5 + $0x40] sm:$0xff]  ;;  %v6417_v9 = vcombine.high %v137_v3, %v141_v5  ;;  %v6416_v10 = vcombine.low %v137_v3, %v141_v5  ;;  %v145_v12 = vld [vmem:[#allocation5 + $0x50] sm:$0xff]  ;;  %v140_v1 = vld [vmem:[#allocation5 + $0x28] sm:$0xff]  ;;  %s6396_s14 = sshll.u32 %s7885_s12, 4  ;;  %s6397_s14 = int_to_ptr.vmem [resolvable:$true] %s6396_s14 }
  0x81   :  { %v147_v8 = vld [vmem:[#allocation5 + $0x60] sm:$0xff]  ;;  %v149_v13 = vld [vmem:[#allocation5 + $0x70] sm:$0xff]  ;;  %v759_v2 = vld [vmem:[#allocation8] sm:$0xff]  ;;  %s7837_s16 = scalar_lea.vmem %s6397_s14, 128  ;;  %p7842_p1 = scmp.lt.s32.totalorder %s6397_s14, %s6397_s14 }
  0x82   :  { %v6421_v11 = vcombine.high %v143_v7, %v147_v8  ;;  %v151_v14 = vld [vmem:[#allocation5 + $0x80] sm:$0xff]  ;;  %567 = vmatprep.subr.bf16.mxu1 %v6413_v4  ;;  %v6425_v15 = vcombine.high %v145_v12, %v149_v13  ;;  %v153_v17 = vld [vmem:[#allocation5 + $0x90] sm:$0xff]  ;;  %653 = vmatprep.subr.bf16.mxu0 %v6417_v9  ;;  %v6420_v19 = vcombine.low %v143_v7, %v147_v8  ;;  %v763_v3 = vld [vmem:[#allocation8 + $0x20] sm:$0xff]  ;;  %p7838_p0 = scmp.ne.s32.totalorder %s6397_s14, %s7837_s16  ;;  %p7843_p2 = scmp.lt.s32.totalorder %s7837_s16, %s7837_s16 }
  0x83   :  { %v155_v16 = vld [vmem:[#allocation5 + $0xa0] sm:$0xff]  ;;  %v157_v18 = vld [vmem:[#allocation5 + $0xb0] sm:$0xff]  ;;  %568 = vmatpush1.bf16.msra.mxu1 %v6412_v6  ;;  %654 = vmatpush1.bf16.msra.mxu0 %v6416_v10  ;;  %v6424_v20 = vcombine.low %v145_v12, %v149_v13  ;;  %v6415_v6 = vcombine.high %v136_v63, %v140_v1  ;;  %v144_v7 = vld [vmem:[#allocation5 + $0x48] sm:$0xff]  ;;  %v6477_v9 = vcombine.high %v759_v2, %v763_v3 }
  0x84   :  { %569 = vmatprep.subr.bf16.mxu1 %v6421_v11  ;;  %v6429_v21 = vcombine.high %v151_v14, %v155_v16  ;;  %655 = vmatprep.subr.bf16.mxu0 %v6425_v15  ;;  %v6433_v22 = vcombine.high %v153_v17, %v157_v18  ;;  %v159_v23 = vld [vmem:[#allocation5 + $0xc0] sm:$0xff]  ;;  %v161_v25 = vld [vmem:[#allocation5 + $0xd0] sm:$0xff]  ;;  %v6428_v27 = vcombine.low %v151_v14, %v155_v16  ;;  %v148_v8 = vld [vmem:[#allocation5 + $0x68] sm:$0xff]  ;;  %p7844_p3 = por %p7843_p2, %p7842_p1 }
  0x85   :  { %v163_v24 = vld [vmem:[#allocation5 + $0xe0] sm:$0xff]  ;;  %v165_v26 = vld [vmem:[#allocation5 + $0xf0] sm:$0xff]  ;;  %v6432_v28 = vcombine.low %v153_v17, %v157_v18  ;;  %v8054_v10 = vld [vmem:[#allocation2] sm:$0xff]   ;;  %v6414_v11 = vcombine.low %v136_v63, %v140_v1  ;;  %v6423_v14 = vcombine.high %v144_v7, %v148_v8  ;;  %v6476_v17 = vcombine.low %v759_v2, %v763_v3 }
  0x86   :  { %v6437_v29 = vcombine.high %v159_v23, %v163_v24  ;;  %v6441_v30 = vcombine.high %v161_v25, %v165_v26  ;;  %v167_v31 = vld [vmem:[#allocation5 + $0x100] sm:$0xff]  ;;  %v169_v33 = vld [vmem:[#allocation5 + $0x110] sm:$0xff]  ;;  %v6436_v35 = vcombine.low %v159_v23, %v163_v24  ;;  %v6440_v36 = vcombine.low %v161_v25, %v165_v26  ;;  %v767_v12 = vld [vmem:[#allocation8 + $0x40] sm:$0xff]  ;;  %p7845_p4 = pnand %p7844_p3, %p7838_p0 }
  0x87   :  { %570 = vmatpush1.bf16.msra.mxu1 %v6420_v19  ;;  %656 = vmatpush1.bf16.msra.mxu0 %v6424_v20  ;;  %v171_v32 = vld [vmem:[#allocation5 + $0x120] sm:$0xff]  ;;  %v173_v34 = vld [vmem:[#allocation5 + $0x130] sm:$0xff]  ;;  %v771_v13 = vld [vmem:[#allocation8 + $0x60] sm:$0xff]  ;;  %v6422_v19 = vcombine.low %v144_v7, %v148_v8 }
  0x88   :  { %571 = vmatprep.subr.bf16.mxu1 %v6429_v21  ;;  %657 = vmatprep.subr.bf16.mxu0 %v6433_v22  ;;  %v6445_v37 = vcombine.high %v167_v31, %v171_v32  ;;  %v6449_v38 = vcombine.high %v169_v33, %v173_v34  ;;  %v175_v39 = vld [vmem:[#allocation5 + $0x140] sm:$0xff]  ;;  %v177_v41 = vld [vmem:[#allocation5 + $0x150] sm:$0xff]  ;;  %v6444_v43 = vcombine.low %v167_v31, %v171_v32  ;;  %v152_v15 = vld [vmem:[#allocation5 + $0x88] sm:$0xff] }
  0x89   :  { %v179_v40 = vld [vmem:[#allocation5 + $0x160] sm:$0xff]  ;;  %v181_v42 = vld [vmem:[#allocation5 + $0x170] sm:$0xff]  ;;  %v6448_v44 = vcombine.low %v169_v33, %v173_v34  ;;  %v156_v16 = vld [vmem:[#allocation5 + $0xa8] sm:$0xff]  ;;  %v6485_v18 = vcombine.high %v767_v12, %v771_v13  ;;  %v6484_v25 = vcombine.low %v767_v12, %v771_v13 }
  0x8a   :  { %v6453_v45 = vcombine.high %v175_v39, %v179_v40  ;;  %v6457_v46 = vcombine.high %v177_v41, %v181_v42  ;;  %v183_v47 = vld [vmem:[#allocation5 + $0x180] sm:$0xff]  ;;  %v185_v49 = vld [vmem:[#allocation5 + $0x190] sm:$0xff]  ;;  %v6452_v51 = vcombine.low %v175_v39, %v179_v40  ;;  %v6456_v52 = vcombine.low %v177_v41, %v181_v42  ;;  %v775_v20 = vld [vmem:[#allocation8 + $0x80] sm:$0xff] }
  0x8b   :  { %572 = vmatpush1.bf16.msra.mxu1 %v6428_v27  ;;  %658 = vmatpush1.bf16.msra.mxu0 %v6432_v28  ;;  %v187_v48 = vld [vmem:[#allocation5 + $0x1a0] sm:$0xff]  ;;  %v189_v50 = vld [vmem:[#allocation5 + $0x1b0] sm:$0xff]  ;;  %v779_v21 = vld [vmem:[#allocation8 + $0xa0] sm:$0xff]  ;;  %v6431_v22 = vcombine.high %v152_v15, %v156_v16 }
  0x8c   :  { %573 = vmatprep.subr.bf16.mxu1 %v6437_v29  ;;  %659 = vmatprep.subr.bf16.mxu0 %v6441_v30  ;;  %v6461_v53 = vcombine.high %v183_v47, %v187_v48  ;;  %v6465_v54 = vcombine.high %v185_v49, %v189_v50  ;;  %v191_v55 = vld [vmem:[#allocation5 + $0x1c0] sm:$0xff]  ;;  %v193_v57 = vld [vmem:[#allocation5 + $0x1d0] sm:$0xff]  ;;  %v6460_v59 = vcombine.low %v183_v47, %v187_v48  ;;  %v160_v23 = vld [vmem:[#allocation5 + $0xc8] sm:$0xff] }
  0x8d   :  { %v195_v56 = vld [vmem:[#allocation5 + $0x1e0] sm:$0xff]  ;;  %v197_v58 = vld [vmem:[#allocation5 + $0x1f0] sm:$0xff]  ;;  %v6464_v60 = vcombine.low %v185_v49, %v189_v50  ;;  %v164_v24 = vld [vmem:[#allocation5 + $0xe8] sm:$0xff]  ;;  %v6493_v26 = vcombine.high %v775_v20, %v779_v21  ;;  %v6430_v29 = vcombine.low %v152_v15, %v156_v16  ;;  %v6492_v33 = vcombine.low %v775_v20, %v779_v21 }
  0x8e   :  { %v6469_v61 = vcombine.high %v191_v55, %v195_v56  ;;  %v6473_v62 = vcombine.high %v193_v57, %v197_v58  ;;  %v6468_v4 = vcombine.low %v191_v55, %v195_v56  ;;  %v6472_v5 = vcombine.low %v193_v57, %v197_v58  ;;  %v783_v27 = vld [vmem:[#allocation8 + $0xc0] sm:$0xff]  ;;  %v142_v63 = vld [vmem:[#allocation5 + $0x38] sm:$0xff] }
  0x8f   :  { %574 = vmatpush1.bf16.msra.mxu1 %v6436_v35  ;;  %660 = vmatpush1.bf16.msra.mxu0 %v6440_v36  ;;  %v787_v28 = vld [vmem:[#allocation8 + $0xe0] sm:$0xff]  ;;  %v6439_v32 = vcombine.high %v160_v23, %v164_v24  ;;  %v146_v7 = vld [vmem:[#allocation5 + $0x58] sm:$0xff] }
  0x90   :  { %575 = vmatprep.subr.bf16.mxu1 %v6445_v37  ;;  %661 = vmatprep.subr.bf16.mxu0 %v6449_v38  ;;  %v168_v30 = vld [vmem:[#allocation5 + $0x108] sm:$0xff]  ;;  %v6501_v36 = vcombine.high %v783_v27, %v787_v28  ;;  %v6438_v37 = vcombine.low %v160_v23, %v164_v24  ;;  %v6500_v41 = vcombine.low %v783_v27, %v787_v28  ;;  %v150_v8 = vld [vmem:[#allocation5 + $0x78] sm:$0xff] }
  0x91   :  { %v172_v31 = vld [vmem:[#allocation5 + $0x128] sm:$0xff]  ;;  %v154_v16 = vld [vmem:[#allocation5 + $0x98] sm:$0xff]  ;;  %v6426_v23 = vcombine.low %v146_v7, %v150_v8 }
  0x92   :  { %v791_v34 = vld [vmem:[#allocation8 + $0x100] sm:$0xff]  ;;  %v6447_v40 = vcombine.high %v168_v30, %v172_v31  ;;  %v162_v24 = vld [vmem:[#allocation5 + $0xd8] sm:$0xff] }
  0x93   :  { %576 = vmatpush1.bf16.msra.mxu1 %v6444_v43  ;;  %662 = vmatpush1.bf16.msra.mxu0 %v6448_v44  ;;  %v795_v35 = vld [vmem:[#allocation8 + $0x120] sm:$0xff] }
  0x94   :  { %577 = vmatprep.subr.bf16.mxu1 %v6453_v45  ;;  %663 = vmatprep.subr.bf16.mxu0 %v6457_v46  ;;  %v176_v38 = vld [vmem:[#allocation5 + $0x148] sm:$0xff]  ;;  %v6509_v44 = vcombine.high %v791_v34, %v795_v35  ;;  %v6446_v45 = vcombine.low %v168_v30, %v172_v31  ;;  %v6508_v49 = vcombine.low %v791_v34, %v795_v35 }
  0x95   :  { %v180_v39 = vld [vmem:[#allocation5 + $0x168] sm:$0xff] }
  0x96   :  { %v799_v42 = vld [vmem:[#allocation8 + $0x140] sm:$0xff]  ;;  %v6455_v48 = vcombine.high %v176_v38, %v180_v39 }
  0x97   :  { %578 = vmatpush1.bf16.msra.mxu1 %v6452_v51  ;;  %664 = vmatpush1.bf16.msra.mxu0 %v6456_v52  ;;  %v803_v43 = vld [vmem:[#allocation8 + $0x160] sm:$0xff] }
  0x98   :  { %579 = vmatprep.subr.bf16.mxu1 %v6461_v53  ;;  %665 = vmatprep.subr.bf16.mxu0 %v6465_v54  ;;  %v184_v46 = vld [vmem:[#allocation5 + $0x188] sm:$0xff]  ;;  %v6517_v52 = vcombine.high %v799_v42, %v803_v43  ;;  %v6454_v53 = vcombine.low %v176_v38, %v180_v39  ;;  %v6516_v57 = vcombine.low %v799_v42, %v803_v43  ;;  %v178_v39 = vld [vmem:[#allocation5 + $0x158] sm:$0xff] }
  0x99   :  { %v188_v47 = vld [vmem:[#allocation5 + $0x1a8] sm:$0xff] }
  0x9a   :  { %v807_v50 = vld [vmem:[#allocation8 + $0x180] sm:$0xff]  ;;  %v6463_v56 = vcombine.high %v184_v46, %v188_v47 }
  0x9b   :  { %580 = vmatpush1.bf16.msra.mxu1 %v6460_v59  ;;  %666 = vmatpush1.bf16.msra.mxu0 %v6464_v60  ;;  %v811_v51 = vld [vmem:[#allocation8 + $0x1a0] sm:$0xff] }
  0x9c   :  { %581 = vmatprep.subr.bf16.mxu1 %v6469_v61  ;;  %667 = vmatprep.subr.bf16.mxu0 %v6473_v62  ;;  %v192_v54 = vld [vmem:[#allocation5 + $0x1c8] sm:$0xff]  ;;  %v6525_v60 = vcombine.high %v807_v50, %v811_v51  ;;  %v6462_v61 = vcombine.low %v184_v46, %v188_v47  ;;  %v138_v62 = vld [vmem:[#allocation5 + $0x18] sm:$0xff]  ;;  %v6524_v2 = vcombine.low %v807_v50, %v811_v51 }
  0x9d   :  { %v196_v55 = vld [vmem:[#allocation5 + $0x1e8] sm:$0xff]  ;;  %v6418_v15 = vcombine.low %v138_v62, %v142_v63  ;;  %v190_v46 = vld [vmem:[#allocation5 + $0x1b8] sm:$0xff] }
  0x9e   :  { %v815_v58 = vld [vmem:[#allocation8 + $0x1c0] sm:$0xff]  ;;  %v6471_v1 = vcombine.high %v192_v54, %v196_v55  ;;  %v194_v50 = vld [vmem:[#allocation5 + $0x1d8] sm:$0xff] }
  0x9f   :  { %582 = vmatpush1.bf16.msra.mxu1 %v6468_v4  ;;  %668 = vmatpush1.bf16.msra.mxu0 %v6472_v5  ;;  %v819_v59 = vld [vmem:[#allocation8 + $0x1e0] sm:$0xff]  ;;  %v198_v51 = vld [vmem:[#allocation5 + $0x1f8] sm:$0xff] }
  0xa0   :  { %610 = vmatprep.subr.bf16.mxu1 %v6415_v6  ;;  %2337 = vmatprep.subr.bf16.mxu0 %v6477_v9  ;;  %v823_v3 = vld [vmem:[#allocation8 + $0x200] sm:$0xff]  ;;  %v6533_v5 = vcombine.high %v815_v58, %v819_v59  ;;  %v6470_v6 = vcombine.low %v192_v54, %v196_v55  ;;  %v6419_v9 = vcombine.high %v138_v62, %v142_v63  ;;  %v760_v54 = vld [vmem:[#allocation8 + $0x8] sm:$0xff] }
  0xa1   :  { %v827_v4 = vld [vmem:[#allocation8 + $0x220] sm:$0xff]  ;;  %v764_v55 = vld [vmem:[#allocation8 + $0x28] sm:$0xff] }
  0xa2   :  { %600 = vmatmul.mubr.bf16.vlgmr.msra.gmra.mrb[0].mxu1 %v8054_v10  ;;  %686 = vmatmul.mubr.bf16.vlgmr.msra.gmra.mrb[0].mxu0 %v8054_v10  ;;  %v831_v12 = vld [vmem:[#allocation8 + $0x240] sm:$0xff]  ;;  %v776_v62 = vld [vmem:[#allocation8 + $0x88] sm:$0xff] }
  0xa3   :  { %611 = vmatpush1.bf16.msra.mxu1 %v6414_v11  ;;  %642 = vmatprep.mubr.bf16.mxu1 %v7882_v0  ;;  %v6532_v11 = vcombine.low %v815_v58, %v819_v59  ;;  %v835_v13 = vld [vmem:[#allocation8 + $0x260] sm:$0xff]  ;;  %v768_v58 = vld [vmem:[#allocation8 + $0x48] sm:$0xff] }
  0xa4   :  { %612 = vmatprep.subr.bf16.mxu1 %v6423_v14  ;;  %2338 = vmatpush1.bf16.msra.mxu0 %v6476_v17  ;;  %v6541_v14 = vcombine.high %v823_v3, %v827_v4  ;;  %v158_v17 = vld [vmem:[#allocation5 + $0xb8] sm:$0xff]  ;;  %v839_v20 = vld [vmem:[#allocation8 + $0x280] sm:$0xff]  ;;  %v6548_v27 = vcombine.low %v831_v12, %v835_v13  ;;  %v772_v59 = vld [vmem:[#allocation8 + $0x68] sm:$0xff] }
  0xa5   :  { %2339 = vmatprep.subr.bf16.mxu0 %v6485_v18  ;;  %v6427_v18 = vcombine.high %v146_v7, %v150_v8  ;;  %v843_v21 = vld [vmem:[#allocation8 + $0x2a0] sm:$0xff]  ;;  %v6434_v31 = vcombine.low %v154_v16, %v158_v17  ;;  %v780_v63 = vld [vmem:[#allocation8 + $0xa8] sm:$0xff] }
  0xa6   :  { %v847_v28 = vld [vmem:[#allocation8 + $0x2c0] sm:$0xff]  ;;  %v6557_v30 = vcombine.high %v839_v20, %v843_v21  ;;  %v6556_v35 = vcombine.low %v839_v20, %v843_v21  ;;  %v792_v7 = vld [vmem:[#allocation8 + $0x108] sm:$0xff] }
  0xa7   :  { %613 = vmatpush1.bf16.msra.mxu1 %v6422_v19  ;;  %v6540_v19 = vcombine.low %v823_v3, %v827_v4  ;;  %v784_v3 = vld [vmem:[#allocation8 + $0xc8] sm:$0xff]  ;;  %v867_v20 = vld [vmem:[#allocation8 + $0x360] sm:$0xff] }
  0xa8   :  { %614 = vmatprep.subr.bf16.mxu1 %v6431_v22  ;;  %2340 = vmatpush1.bf16.msra.mxu0 %v6484_v25  ;;  %v6549_v22 = vcombine.high %v831_v12, %v835_v13  ;;  %v166_v25 = vld [vmem:[#allocation5 + $0xf8] sm:$0xff]  ;;  %v788_v4 = vld [vmem:[#allocation8 + $0xe8] sm:$0xff] }
  0xa9   :  { %2341 = vmatprep.subr.bf16.mxu0 %v6493_v26  ;;  %v6435_v26 = vcombine.high %v154_v16, %v158_v17  ;;  %v6443_v34 = vcombine.high %v162_v24, %v166_v25  ;;  %v6442_v38 = vcombine.low %v162_v24, %v166_v25  ;;  %v796_v8 = vld [vmem:[#allocation8 + $0x128] sm:$0xff] }
  0xaa   :  { %v800_v12 = vld [vmem:[#allocation8 + $0x148] sm:$0xff] }
  0xab   :  { %615 = vmatpush1.bf16.msra.mxu1 %v6430_v29  ;;  %v851_v29 = vld [vmem:[#allocation8 + $0x2e0] sm:$0xff]  ;;  %v804_v13 = vld [vmem:[#allocation8 + $0x168] sm:$0xff] }
  0xac   :  { %616 = vmatprep.subr.bf16.mxu1 %v6439_v32  ;;  %2342 = vmatpush1.bf16.msra.mxu0 %v6492_v33  ;;  %v170_v32 = vld [vmem:[#allocation5 + $0x118] sm:$0xff]  ;;  %v6564_v42 = vcombine.low %v847_v28, %v851_v29  ;;  %v812_v16 = vld [vmem:[#allocation8 + $0x1a8] sm:$0xff]  ;;  %v6519_v17 = vcombine.high %v800_v12, %v804_v13 }
  0xad   :  { %2343 = vmatprep.subr.bf16.mxu0 %v6501_v36  ;;  %v174_v33 = vld [vmem:[#allocation5 + $0x138] sm:$0xff]  ;;  %v855_v36 = vld [vmem:[#allocation8 + $0x300] sm:$0xff] }
  0xaf   :  { %617 = vmatpush1.bf16.msra.mxu1 %v6438_v37  ;;  %v859_v37 = vld [vmem:[#allocation8 + $0x320] sm:$0xff] }
  0xb0   :  { %618 = vmatprep.subr.bf16.mxu1 %v6447_v40  ;;  %2344 = vmatpush1.bf16.msra.mxu0 %v6500_v41  ;;  %v182_v40 = vld [vmem:[#allocation5 + $0x178] sm:$0xff]  ;;  %v6451_v41 = vcombine.high %v170_v32, %v174_v33  ;;  %v6573_v43 = vcombine.high %v855_v36, %v859_v37 }
  0xb1   :  { %2345 = vmatprep.subr.bf16.mxu0 %v6509_v44  ;;  %v6450_v44 = vcombine.low %v170_v32, %v174_v33  ;;  %v6459_v47 = vcombine.high %v178_v39, %v182_v40 }
  0xb3   :  { %619 = vmatpush1.bf16.msra.mxu1 %v6446_v45  ;;  %v186_v45 = vld [vmem:[#allocation5 + $0x198] sm:$0xff] }
  0xb4   :  { %620 = vmatprep.subr.bf16.mxu1 %v6455_v48  ;;  %2346 = vmatpush1.bf16.msra.mxu0 %v6508_v49  ;;  %v6572_v48 = vcombine.low %v855_v36, %v859_v37  ;;  %v6458_v49 = vcombine.low %v178_v39, %v182_v40  ;;  %v883_v36 = vld [vmem:[#allocation8 + $0x3e0] sm:$0xff]  ;;  %v836_v39 = vld [vmem:[#allocation8 + $0x268] sm:$0xff] }
  0xb5   :  { %2347 = vmatprep.subr.bf16.mxu0 %v6517_v52  ;;  %v6467_v52 = vcombine.high %v186_v45, %v190_v46 }
  0xb7   :  { %621 = vmatpush1.bf16.msra.mxu1 %v6454_v53  ;;  %v6466_v53 = vcombine.low %v186_v45, %v190_v46 }
  0xb8   :  { %622 = vmatprep.subr.bf16.mxu1 %v6463_v56  ;;  %2348 = vmatpush1.bf16.msra.mxu0 %v6516_v57  ;;  %v6475_v56 = vcombine.high %v194_v50, %v198_v51  ;;  %v6474_v57 = vcombine.low %v194_v50, %v198_v51 }
  0xb9   :  { %2349 = vmatprep.subr.bf16.mxu0 %v6525_v60  ;;  %v6479_v60 = vcombine.high %v760_v54, %v764_v55 }
  0xbb   :  { %623 = vmatpush1.bf16.msra.mxu1 %v6462_v61  ;;  %v6478_v61 = vcombine.low %v760_v54, %v764_v55  ;;  %v848_v54 = vld [vmem:[#allocation8 + $0x2c8] sm:$0xff] }
  0xbc   :  { %624 = vmatprep.subr.bf16.mxu1 %v6471_v1  ;;  %2350 = vmatpush1.bf16.msra.mxu0 %v6524_v2  ;;  %v6487_v1 = vcombine.high %v768_v58, %v772_v59  ;;  %v6486_v2 = vcombine.low %v768_v58, %v772_v59  ;;  %v852_v55 = vld [vmem:[#allocation8 + $0x2e8] sm:$0xff] }
  0xbd   :  { %2351 = vmatprep.subr.bf16.mxu0 %v6533_v5  ;;  %v6495_v5 = vcombine.high %v776_v62, %v780_v63  ;;  %v856_v58 = vld [vmem:[#allocation8 + $0x308] sm:$0xff] }
  0xbe   :  { %v860_v59 = vld [vmem:[#allocation8 + $0x328] sm:$0xff] }
  0xbf   :  { %625 = vmatpush1.bf16.msra.mxu1 %v6470_v6  ;;  %v6494_v6 = vcombine.low %v776_v62, %v780_v63  ;;  %v864_v62 = vld [vmem:[#allocation8 + $0x348] sm:$0xff] }
  0xc0   :  { %696 = vmatprep.subr.bf16.mxu1 %v6419_v9  ;;  %2352 = vmatpush1.bf16.msra.mxu0 %v6532_v11  ;;  %v6503_v9 = vcombine.high %v784_v3, %v788_v4  ;;  %v6502_v11 = vcombine.low %v784_v3, %v788_v4  ;;  %v868_v63 = vld [vmem:[#allocation8 + $0x368] sm:$0xff] }
  0xc1   :  { %2353 = vmatprep.subr.bf16.mxu0 %v6541_v14  ;;  %v6511_v14 = vcombine.high %v792_v7, %v796_v8  ;;  %v872_v3 = vld [vmem:[#allocation8 + $0x388] sm:$0xff] }
  0xc2   :  { %643 = vmatmul.mubr.bf16.vlgmr.msra.gmra.mrb[4].mxu1 %v8054_v10  ;;  %v876_v4 = vld [vmem:[#allocation8 + $0x3a8] sm:$0xff] }
  0xc3   :  { %697 = vmatpush1.bf16.msra.mxu1 %v6418_v15  ;;  %728 = vmatprep.mubr.bf16.mxu1 %v7882_v0  ;;  %v6565_v0 = vcombine.high %v847_v28, %v851_v29  ;;  %v808_v15 = vld [vmem:[#allocation8 + $0x188] sm:$0xff]  ;;  %v871_v28 = vld [vmem:[#allocation8 + $0x380] sm:$0xff] }
  0xc4   :  { %698 = vmatprep.subr.bf16.mxu1 %v6427_v18  ;;  %2354 = vmatpush1.bf16.msra.mxu0 %v6540_v19  ;;  %v6518_v18 = vcombine.low %v800_v12, %v804_v13  ;;  %v863_v19 = vld [vmem:[#allocation8 + $0x340] sm:$0xff]  ;;  %v6527_v21 = vcombine.high %v808_v15, %v812_v16 }
  0xc5   :  { %2355 = vmatprep.subr.bf16.mxu0 %v6549_v22  ;;  %v816_v22 = vld [vmem:[#allocation8 + $0x1c8] sm:$0xff]  ;;  %v6581_v24 = vcombine.high %v863_v19, %v867_v20  ;;  %v6580_v25 = vcombine.low %v863_v19, %v867_v20  ;;  %v875_v29 = vld [vmem:[#allocation8 + $0x3a0] sm:$0xff] }
  0xc6   :  { %v6589_v32 = vcombine.high %v871_v28, %v875_v29  ;;  %v6588_v33 = vcombine.low %v871_v28, %v875_v29 }
  0xc7   :  { %699 = vmatpush1.bf16.msra.mxu1 %v6426_v23  ;;  %v820_v23 = vld [vmem:[#allocation8 + $0x1e8] sm:$0xff] }
  0xc8   :  { %700 = vmatprep.subr.bf16.mxu1 %v6435_v26  ;;  %2356 = vmatpush1.bf16.msra.mxu0 %v6548_v27  ;;  %v6526_v26 = vcombine.low %v808_v15, %v812_v16  ;;  %v824_v27 = vld [vmem:[#allocation8 + $0x208] sm:$0xff]  ;;  %v8083_v16 = vld [vmem:[#allocation7] sm:$0xff] }
  0xc9   :  { %2357 = vmatprep.subr.bf16.mxu0 %v6557_v30  ;;  %v6535_v30 = vcombine.high %v816_v22, %v820_v23 }
  0xcb   :  { %701 = vmatpush1.bf16.msra.mxu1 %v6434_v31  ;;  %v828_v31 = vld [vmem:[#allocation8 + $0x228] sm:$0xff] }
  0xcc   :  { %702 = vmatprep.subr.bf16.mxu1 %v6443_v34  ;;  %2358 = vmatpush1.bf16.msra.mxu0 %v6556_v35  ;;  %v6534_v34 = vcombine.low %v816_v22, %v820_v23  ;;  %v879_v35 = vld [vmem:[#allocation8 + $0x3c0] sm:$0xff]  ;;  %v6543_v37 = vcombine.high %v824_v27, %v828_v31 }
  0xcd   :  { %2359 = vmatprep.subr.bf16.mxu0 %v6565_v0  ;;  %v6597_v0 = vcombine.high %v879_v35, %v883_v36  ;;  %v6596_v40 = vcombine.low %v879_v35, %v883_v36 }
  0xcf   :  { %703 = vmatpush1.bf16.msra.mxu1 %v6442_v38  ;;  %v832_v38 = vld [vmem:[#allocation8 + $0x248] sm:$0xff] }
  0xd0   :  { %704 = vmatprep.subr.bf16.mxu1 %v6451_v41  ;;  %2360 = vmatpush1.bf16.msra.mxu0 %v6564_v42  ;;  %v6542_v41 = vcombine.low %v824_v27, %v828_v31  ;;  %v8062_v42 = vld [vmem:[#allocation8 + $0x400] sm:$0xff]  ;;  %v6551_v45 = vcombine.high %v832_v38, %v836_v39 }
  0xd1   :  { %2361 = vmatprep.subr.bf16.mxu0 %v6573_v43  ;;  %v8064_v43 = vld [vmem:[#allocation8 + $0x420] sm:$0xff] }
  0xd2   :  { %v6605_v46 = vcombine.high %v8062_v42, %v8064_v43  ;;  %v6604_v50 = vcombine.low %v8062_v42, %v8064_v43 }
  0xd3   :  { %705 = vmatpush1.bf16.msra.mxu1 %v6450_v44  ;;  %v8066_v44 = vld [vmem:[#allocation8 + $0x408] sm:$0xff] }
  0xd4   :  { %706 = vmatprep.subr.bf16.mxu1 %v6459_v47  ;;  %2362 = vmatpush1.bf16.msra.mxu0 %v6572_v48  ;;  %v8070_v47 = vld [vmem:[#allocation8 + $0x428] sm:$0xff] }
  0xd5   :  { %2363 = vmatprep.subr.bf16.mxu0 %v6581_v24  ;;  %v840_v48 = vld [vmem:[#allocation8 + $0x288] sm:$0xff]  ;;  %v6606_v51 = vcombine.low %v8066_v44, %v8070_v47  ;;  %v6607_v13 = vcombine.high %v8066_v44, %v8070_v47  ;;  %v919_v44 = vld [vmem:[#allocation8 + $0x500] sm:$0xff] }
  0xd6   :  { %v923_v47 = vld [vmem:[#allocation8 + $0x520] sm:$0xff] }
  0xd7   :  { %707 = vmatpush1.bf16.msra.mxu1 %v6458_v49  ;;  %v844_v49 = vld [vmem:[#allocation8 + $0x2a8] sm:$0xff] }
  0xd8   :  { %708 = vmatprep.subr.bf16.mxu1 %v6467_v52  ;;  %2364 = vmatpush1.bf16.msra.mxu0 %v6580_v25  ;;  %v6550_v52 = vcombine.low %v832_v38, %v836_v39 }
  0xd9   :  { %2365 = vmatprep.subr.bf16.mxu0 %v6589_v32 }
  0xdb   :  { %709 = vmatpush1.bf16.msra.mxu1 %v6466_v53  ;;  %v6559_v53 = vcombine.high %v840_v48, %v844_v49 }
  0xdc   :  { %710 = vmatprep.subr.bf16.mxu1 %v6475_v56  ;;  %2366 = vmatpush1.bf16.msra.mxu0 %v6588_v33  ;;  %v6558_v56 = vcombine.low %v840_v48, %v844_v49  ;;  %v895_v49 = vld [vmem:[#allocation8 + $0x440] sm:$0xff] }
  0xdd   :  { %2367 = vmatprep.subr.bf16.mxu0 %v6597_v0 }
  0xdf   :  { %711 = vmatpush1.bf16.msra.mxu1 %v6474_v57  ;;  %v6567_v57 = vcombine.high %v848_v54, %v852_v55 }
  0xe0   :  { %2423 = vmatprep.subr.bf16.mxu1 %v6479_v60  ;;  %2368 = vmatpush1.bf16.msra.mxu0 %v6596_v40  ;;  %v6566_v60 = vcombine.low %v848_v54, %v852_v55  ;;  %v899_v54 = vld [vmem:[#allocation8 + $0x460] sm:$0xff]  ;;  %v896_v55 = vld [vmem:[#allocation8 + $0x448] sm:$0xff] }
  0xe1   :  { %2380 = vmatprep.subr.bf16.mxu0 %v6605_v46 }
  0xe2   :  { %729 = vmatmul.mubr.bf16.vlgmr.msra.gmra.mrb[8].mxu1 %v8054_v10  ;;  %v6510_v10 = vcombine.low %v792_v7, %v796_v8  ;;  %v880_v7 = vld [vmem:[#allocation8 + $0x3c8] sm:$0xff] }
  0xe3   :  { %2424 = vmatpush1.bf16.msra.mxu1 %v6478_v61  ;;  %v6575_v61 = vcombine.high %v856_v58, %v860_v59  ;;  %v884_v8 = vld [vmem:[#allocation8 + $0x3e8] sm:$0xff] }
  0xe4   :  { %2425 = vmatprep.subr.bf16.mxu1 %v6487_v1  ;;  %v6574_v1 = vcombine.low %v856_v58, %v860_v59  ;;  %v6598_v12 = vcombine.low %v880_v7, %v884_v8  ;;  %v6613_v59 = vcombine.high %v895_v49, %v899_v54 }
  0xe7   :  { %2426 = vmatpush1.bf16.msra.mxu1 %v6486_v2  ;;  %v6583_v2 = vcombine.high %v864_v62, %v868_v63 }
  0xe8   :  { %2427 = vmatprep.subr.bf16.mxu1 %v6495_v5  ;;  %v6582_v5 = vcombine.low %v864_v62, %v868_v63  ;;  %v907_v62 = vld [vmem:[#allocation8 + $0x4a0] sm:$0xff]  ;;  %v904_v63 = vld [vmem:[#allocation8 + $0x488] sm:$0xff] }
  0xeb   :  { %2428 = vmatpush1.bf16.msra.mxu1 %v6494_v6  ;;  %v6591_v6 = vcombine.high %v872_v3, %v876_v4 }
  0xec   :  { %2429 = vmatprep.subr.bf16.mxu1 %v6503_v9  ;;  %v6590_v9 = vcombine.low %v872_v3, %v876_v4 }
  0xef   :  { %2430 = vmatpush1.bf16.msra.mxu1 %v6502_v11  ;;  %v6599_v11 = vcombine.high %v880_v7, %v884_v8  ;;  %v915_v7 = vld [vmem:[#allocation8 + $0x4e0] sm:$0xff]  ;;  %v912_v8 = vld [vmem:[#allocation8 + $0x4c8] sm:$0xff] }
  0xf0   :  { %2431 = vmatprep.subr.bf16.mxu1 %v6511_v14  ;;  %v201_v14 = vlaneseq }
  0xf3   :  { %2432 = vmatpush1.bf16.msra.mxu1 %v6510_v10  ;;  %v8078_v10 = vshrl.u32 %v201_v14, 7 }
  0xf4   :  { %2433 = vmatprep.subr.bf16.mxu1 %v6519_v17 }
  0xf5   :  { %v8081_v15 = vsub.s32 0, %v8078_v10  ;;  %v8086_v17 = vsub.s32 4, %v8078_v10  ;;  %v8092_v19 = vsub.s32 5, %v8078_v10 }
  0xf7   :  { %2434 = vmatpush1.bf16.msra.mxu1 %v6518_v18  ;;  %v8089_v18 = vsub.s32 1, %v8078_v10  ;;  %v204_v20 = vrot.slane %v8083_v16, %v8081_v15  ;;  %v224_v23 = vrot.slane %v8083_v16, %v8092_v19 }
  0xf8   :  { %2435 = vmatprep.subr.bf16.mxu1 %v6527_v21  ;;  %v220_v21 = vrot.slane %v8083_v16, %v8086_v17 }
  0xf9   :  { %v208_v22 = vrot.slane %v8083_v16, %v8089_v18 }
  0xfb   :  { %2436 = vmatpush1.bf16.msra.mxu1 %v6526_v26 }
  0xfc   :  { %2437 = vmatprep.subr.bf16.mxu1 %v6535_v30 }
  0xff   :  { %2438 = vmatpush1.bf16.msra.mxu1 %v6534_v34 }
 0x100   :  { %2439 = vmatprep.subr.bf16.mxu1 %v6543_v37 }
 0x103   :  { %2440 = vmatpush1.bf16.msra.mxu1 %v6542_v41 }
 0x104   :  { %2441 = vmatprep.subr.bf16.mxu1 %v6551_v45 }
 0x107   :  { %2442 = vmatpush1.bf16.msra.mxu1 %v6550_v52 }
 0x108   :  { %2443 = vmatprep.subr.bf16.mxu1 %v6559_v53 }
 0x10b   :  { %2444 = vmatpush1.bf16.msra.mxu1 %v6558_v56  ;;  %v900_v56 = vld [vmem:[#allocation8 + $0x468] sm:$0xff] }
 0x10c   :  { %2445 = vmatprep.subr.bf16.mxu1 %v6567_v57  ;;  %v6614_v3 = vcombine.low %v896_v55, %v900_v56 }
 0x10f   :  { %2446 = vmatpush1.bf16.msra.mxu1 %v6566_v60  ;;  %v6615_v60 = vcombine.high %v896_v55, %v900_v56  ;;  %v951_v55 = vld [vmem:[#allocation8 + $0x600] sm:$0xff] }
 0x110   :  { %2447 = vmatprep.subr.bf16.mxu1 %v6575_v61  ;;  %v903_v61 = vld [vmem:[#allocation8 + $0x480] sm:$0xff] }
 0x111   :  { %v6621_v4 = vcombine.high %v903_v61, %v907_v62  ;;  %v955_v56 = vld [vmem:[#allocation8 + $0x620] sm:$0xff] }
 0x113   :  { %2448 = vmatpush1.bf16.msra.mxu1 %v6574_v1  ;;  %v908_v1 = vld [vmem:[#allocation8 + $0x4a8] sm:$0xff] }
 0x114   :  { %2449 = vmatprep.subr.bf16.mxu1 %v6583_v2  ;;  %v6612_v2 = vcombine.low %v895_v49, %v899_v54 }
 0x117   :  { %2450 = vmatpush1.bf16.msra.mxu1 %v6582_v5  ;;  %v6623_v5 = vcombine.high %v904_v63, %v908_v1 }
 0x118   :  { %2451 = vmatprep.subr.bf16.mxu1 %v6591_v6  ;;  %v911_v6 = vld [vmem:[#allocation8 + $0x4c0] sm:$0xff] }
 0x119   :  { %v6629_v42 = vcombine.high %v911_v6, %v915_v7 }
 0x11b   :  { %2452 = vmatpush1.bf16.msra.mxu1 %v6590_v9  ;;  %v916_v9 = vld [vmem:[#allocation8 + $0x4e8] sm:$0xff] }
 0x11c   :  { %2453 = vmatprep.subr.bf16.mxu1 %v6599_v11  ;;  %v6620_v11 = vcombine.low %v903_v61, %v907_v62  ;;  %v6631_v43 = vcombine.high %v912_v8, %v916_v9  ;;  %v6630_v14 = vcombine.low %v912_v8, %v916_v9 }
 0x11f   :  { %2454 = vmatpush1.bf16.msra.mxu1 %v6598_v12  ;;  %v6622_v12 = vcombine.low %v904_v63, %v908_v1  ;;  %v6669_v63 = vcombine.high %v951_v55, %v955_v56 }
 0x120   :  { %2466 = vmatprep.subr.bf16.mxu1 %v6607_v13  ;;  %v6628_v13 = vcombine.low %v911_v6, %v915_v7  ;;  %v6668_v6 = vcombine.low %v951_v55, %v955_v56  ;;  %v999_v55 = vld [vmem:[#allocation8 + $0x780] sm:$0xff] }
 0x175   :  { %v601_v24 = vpop.f32.mrb[0].mxu1  ;;  %v687_v26 = vpop.f32.mrb[0].mxu0 }
 0x176   :  { %v602_v25 = vadd.f32 %v601_v24, %v204_v20  ;;  %v603_v27 = vpop.f32.mrb[1].mxu1  ;;  %v688_v28 = vadd.f32 %v687_v26, %v220_v21  ;;  %v689_v30 = vpop.f32.mrb[1].mxu0  ;;  %v928_v24 = vld [vmem:[#allocation8 + $0x548] sm:$0xff]  ;;  %v6636_v26 = vcombine.low %v919_v44, %v923_v47 }
 0x177   :  { %v604_v29 = vadd.f32 %v603_v27, %v208_v22  ;;  %v605_v31 = vpop.f32.mrb[2].mxu1  ;;  %v690_v32 = vadd.f32 %v689_v30, %v224_v23  ;;  %v691_v34 = vpop.f32.mrb[2].mxu0  ;;  %v935_v30 = vld [vmem:[#allocation8 + $0x580] sm:$0xff] }
 0x178   :  { %v606_v33 = vadd.f32 %v605_v31, %v204_v20  ;;  %v607_v35 = vpop.f32.mrb[3].mxu1  ;;  %v739_v36 = vmax.f32 %v602_v25, %v688_v28  ;;  %v692_v37 = vadd.f32 %v691_v34, %v220_v21  ;;  %v693_v38 = vpop.f32.mrb[3].mxu0  ;;  %v6637_v20 = vcombine.high %v919_v44, %v923_v47  ;;  %v932_v25 = vld [vmem:[#allocation8 + $0x568] sm:$0xff]  ;;  %v939_v31 = vld [vmem:[#allocation8 + $0x5a0] sm:$0xff] }
 0x179   :  { %v608_v0 = vadd.f32 %v607_v35, %v208_v22  ;;  %v740_v39 = vmax.f32 %v604_v29, %v690_v32  ;;  %v694_v40 = vadd.f32 %v693_v38, %v224_v23  ;;  %v927_v22 = vld [vmem:[#allocation8 + $0x540] sm:$0xff]  ;;  %v6647_v29 = vcombine.high %v928_v24, %v932_v25  ;;  %v936_v32 = vld [vmem:[#allocation8 + $0x588] sm:$0xff] }
 0x17a   :  { %v743_v41 = vmax.f32 %v606_v33, %v692_v37  ;;  %v747_v46 = vmax.f32 %v739_v36, 0.0  ;;  %v931_v23 = vld [vmem:[#allocation8 + $0x560] sm:$0xff]  ;;  %v940_v33 = vld [vmem:[#allocation8 + $0x5a8] sm:$0xff]  ;;  %v6646_v35 = vcombine.low %v928_v24, %v932_v25  ;;  %v6653_v37 = vcombine.high %v935_v30, %v939_v31 }
 0x17b   :  { %v744_v45 = vmax.f32 %v608_v0, %v694_v40  ;;  %v748_v52 = vmax.f32 %v740_v39, 0.0  ;;  %v6645_v28 = vcombine.high %v927_v22, %v931_v23  ;;  %v6644_v34 = vcombine.low %v927_v22, %v931_v23  ;;  %v943_v38 = vld [vmem:[#allocation8 + $0x5c0] sm:$0xff] }
 0x17c   :  { %v751_v48 = vmax.f32 %v743_v41, 0.0  ;;  %v6655_v0 = vcombine.high %v936_v32, %v940_v33  ;;  %v947_v40 = vld [vmem:[#allocation8 + $0x5e0] sm:$0xff]  ;;  %v944_v41 = vld [vmem:[#allocation8 + $0x5c8] sm:$0xff]  ;;  %v6652_v49 = vcombine.low %v935_v30, %v939_v31 }
 0x17d   :  { %v752_v53 = vmax.f32 %v744_v45, 0.0  ;;  %v948_v45 = vld [vmem:[#allocation8 + $0x5e8] sm:$0xff]  ;;  %v6660_v61 = vcombine.low %v943_v38, %v947_v40 }
 0x17e   :  { %v8102_v57 = vpack.c.bf16 %v751_v48, %v747_v46  ;;  %v6663_v54 = vcombine.high %v944_v41, %v948_v45  ;;  %v6662_v62 = vcombine.low %v944_v41, %v948_v45  ;;  %v8131_v41 = vsub.s32 3, %v8078_v10 }
 0x17f   :  { %v8104_v58 = vpack.c.bf16 %v752_v53, %v748_v52  ;;  %v6654_v52 = vcombine.low %v936_v32, %v940_v33  ;;  %v6661_v53 = vcombine.high %v943_v38, %v947_v40  ;;  %v992_v38 = vld [vmem:[#allocation8 + $0x748] sm:$0xff]  ;;  %v8134_v45 = vsub.s32 7, %v8078_v10 }
 0x180   :  { %v996_v40 = vld [vmem:[#allocation8 + $0x768] sm:$0xff] }
 0x181   :  { %2369 = vmatprep.mubr.bf16.mxu0 %v8104_v58  ;;  %2455 = vmatprep.mubr.bf16.mxu1 %v8104_v58 }
 0x182   :  { %2370 = vmatmul.mubr.bf16.vlgmr.msra.gmra.mrb[4].mxu0 %v8102_v57  ;;  %2456 = vmatmul.mubr.bf16.vlgmr.msra.gmra.mrb[12].mxu1 %v8102_v57 }
 0x183   :  { %2381 = vmatpush1.bf16.msra.mxu0 %v6604_v50  ;;  %2467 = vmatpush1.bf16.msra.mxu1 %v6606_v51  ;;  %v920_v50 = vld [vmem:[#allocation8 + $0x508] sm:$0xff] }
 0x184   :  { %2382 = vmatprep.subr.bf16.mxu0 %v6613_v59  ;;  %2468 = vmatprep.subr.bf16.mxu1 %v6615_v60  ;;  %v924_v51 = vld [vmem:[#allocation8 + $0x528] sm:$0xff] }
 0x185   :  { %v6639_v21 = vcombine.high %v920_v50, %v924_v51  ;;  %v6638_v27 = vcombine.low %v920_v50, %v924_v51  ;;  %v952_v59 = vld [vmem:[#allocation8 + $0x608] sm:$0xff] }
 0x186   :  { %v956_v60 = vld [vmem:[#allocation8 + $0x628] sm:$0xff] }
 0x187   :  { %2383 = vmatpush1.bf16.msra.mxu0 %v6612_v2  ;;  %2469 = vmatpush1.bf16.msra.mxu1 %v6614_v3  ;;  %v6671_v1 = vcombine.high %v952_v59, %v956_v60  ;;  %v959_v2 = vld [vmem:[#allocation8 + $0x640] sm:$0xff]  ;;  %v6670_v7 = vcombine.low %v952_v59, %v956_v60 }
 0x188   :  { %2384 = vmatprep.subr.bf16.mxu0 %v6621_v4  ;;  %2470 = vmatprep.subr.bf16.mxu1 %v6623_v5  ;;  %v963_v3 = vld [vmem:[#allocation8 + $0x660] sm:$0xff]  ;;  %v960_v4 = vld [vmem:[#allocation8 + $0x648] sm:$0xff] }
 0x189   :  { %v964_v5 = vld [vmem:[#allocation8 + $0x668] sm:$0xff]  ;;  %v6677_v8 = vcombine.high %v959_v2, %v963_v3  ;;  %v6676_v44 = vcombine.low %v959_v2, %v963_v3  ;;  %v1003_v60 = vld [vmem:[#allocation8 + $0x7a0] sm:$0xff]  ;;  %v6710_v3 = vcombine.low %v992_v38, %v996_v40 }
 0x18a   :  { %v6679_v9 = vcombine.high %v960_v4, %v964_v5  ;;  %v6678_v47 = vcombine.low %v960_v4, %v964_v5  ;;  %v1011_v4 = vld [vmem:[#allocation8 + $0x7e0] sm:$0xff]  ;;  %v1008_v5 = vld [vmem:[#allocation8 + $0x7c8] sm:$0xff] }
 0x18b   :  { %2385 = vmatpush1.bf16.msra.mxu0 %v6620_v11  ;;  %2471 = vmatpush1.bf16.msra.mxu1 %v6622_v12  ;;  %v967_v11 = vld [vmem:[#allocation8 + $0x680] sm:$0xff] }
 0x18c   :  { %2386 = vmatprep.subr.bf16.mxu0 %v6629_v42  ;;  %2472 = vmatprep.subr.bf16.mxu1 %v6631_v43  ;;  %v971_v12 = vld [vmem:[#allocation8 + $0x6a0] sm:$0xff]  ;;  %v968_v42 = vld [vmem:[#allocation8 + $0x688] sm:$0xff] }
 0x18d   :  { %v972_v43 = vld [vmem:[#allocation8 + $0x6a8] sm:$0xff]  ;;  %v6685_v50 = vcombine.high %v967_v11, %v971_v12  ;;  %v6684_v22 = vcombine.low %v967_v11, %v971_v12 }
 0x18e   :  { %v6687_v51 = vcombine.high %v968_v42, %v972_v43  ;;  %v6686_v23 = vcombine.low %v968_v42, %v972_v43  ;;  %v6716_v43 = vcombine.low %v999_v55, %v1003_v60 }
 0x18f   :  { %2387 = vmatpush1.bf16.msra.mxu0 %v6628_v13  ;;  %2473 = vmatpush1.bf16.msra.mxu1 %v6630_v14  ;;  %v975_v13 = vld [vmem:[#allocation8 + $0x6c0] sm:$0xff] }
 0x190   :  { %2388 = vmatprep.subr.bf16.mxu0 %v6637_v20  ;;  %2474 = vmatprep.subr.bf16.mxu1 %v6639_v21  ;;  %v979_v14 = vld [vmem:[#allocation8 + $0x6e0] sm:$0xff]  ;;  %v976_v20 = vld [vmem:[#allocation8 + $0x6c8] sm:$0xff] }
 0x191   :  { %v980_v21 = vld [vmem:[#allocation8 + $0x6e8] sm:$0xff]  ;;  %v6693_v24 = vcombine.high %v975_v13, %v979_v14  ;;  %v6692_v30 = vcombine.low %v975_v13, %v979_v14 }
 0x192   :  { %v6695_v25 = vcombine.high %v976_v20, %v980_v21  ;;  %v6694_v31 = vcombine.low %v976_v20, %v980_v21 }
 0x193   :  { %2389 = vmatpush1.bf16.msra.mxu0 %v6636_v26  ;;  %2475 = vmatpush1.bf16.msra.mxu1 %v6638_v27  ;;  %v983_v26 = vld [vmem:[#allocation8 + $0x700] sm:$0xff] }
 0x194   :  { %2390 = vmatprep.subr.bf16.mxu0 %v6645_v28  ;;  %2476 = vmatprep.subr.bf16.mxu1 %v6647_v29  ;;  %v987_v27 = vld [vmem:[#allocation8 + $0x720] sm:$0xff]  ;;  %v984_v28 = vld [vmem:[#allocation8 + $0x708] sm:$0xff] }
 0x195   :  { %v8116_v36 = vpop.f32.mrb[4].mxu1  ;;  %v988_v29 = vld [vmem:[#allocation8 + $0x728] sm:$0xff]  ;;  %v6701_v32 = vcombine.high %v983_v26, %v987_v27 }
 0x196   :  { %v8118_v39 = vpop.f32.mrb[5].mxu1  ;;  %v6703_v33 = vcombine.high %v984_v28, %v988_v29 }
 0x197   :  { %v8120_v46 = vpop.f32.mrb[6].mxu1  ;;  %2391 = vmatpush1.bf16.msra.mxu0 %v6644_v34  ;;  %2477 = vmatpush1.bf16.msra.mxu1 %v6646_v35  ;;  %v991_v34 = vld [vmem:[#allocation8 + $0x740] sm:$0xff]  ;;  %v8125_v35 = vsub.s32 2, %v8078_v10 }
 0x198   :  { %v8122_v48 = vpop.f32.mrb[7].mxu1  ;;  %2392 = vmatprep.subr.bf16.mxu0 %v6653_v37  ;;  %2478 = vmatprep.subr.bf16.mxu1 %v6655_v0  ;;  %v8128_v37 = vsub.s32 6, %v8078_v10  ;;  %v995_v0 = vld [vmem:[#allocation8 + $0x760] sm:$0xff]  ;;  %v216_v10 = vrot.slane %v8083_v16, %v8131_v41 }
 0x199   :  { %v212_v56 = vrot.slane %v8083_v16, %v8125_v35  ;;  %v6708_v2 = vcombine.low %v991_v34, %v995_v0 }
 0x19a   :  { %v228_v59 = vrot.slane %v8083_v16, %v8128_v37 }
 0x19b   :  { %2393 = vmatpush1.bf16.msra.mxu0 %v6652_v49  ;;  %2479 = vmatpush1.bf16.msra.mxu1 %v6654_v52  ;;  %v6700_v49 = vcombine.low %v983_v26, %v987_v27  ;;  %v6702_v52 = vcombine.low %v984_v28, %v988_v29  ;;  %v645_v11 = vadd.f32 %v8116_v36, %v212_v56  ;;  %v761_v26 = vld [vmem:[#allocation8 + $0x10] sm:$0xff]  ;;  %v762_v28 = vld [vmem:[#allocation8 + $0x18] sm:$0xff] }
 0x19c   :  { %2394 = vmatprep.subr.bf16.mxu0 %v6661_v53  ;;  %2480 = vmatprep.subr.bf16.mxu1 %v6663_v54  ;;  %v6709_v53 = vcombine.high %v991_v34, %v995_v0  ;;  %v6711_v54 = vcombine.high %v992_v38, %v996_v40  ;;  %v649_v14 = vadd.f32 %v8120_v46, %v212_v56  ;;  %v765_v27 = vld [vmem:[#allocation8 + $0x30] sm:$0xff]  ;;  %v766_v29 = vld [vmem:[#allocation8 + $0x38] sm:$0xff] }
 0x19d   :  { %v6481_v0 = vcombine.high %v761_v26, %v765_v27  ;;  %v6483_v38 = vcombine.high %v762_v28, %v766_v29  ;;  %v769_v40 = vld [vmem:[#allocation8 + $0x50] sm:$0xff]  ;;  %v6482_v56 = vcombine.low %v762_v28, %v766_v29  ;;  %v814_v28 = vld [vmem:[#allocation8 + $0x1b8] sm:$0xff] }
 0x19f   :  { %2395 = vmatpush1.bf16.msra.mxu0 %v6660_v61  ;;  %2481 = vmatpush1.bf16.msra.mxu1 %v6662_v62  ;;  %v1000_v61 = vld [vmem:[#allocation8 + $0x788] sm:$0xff] }
 0x1a0   :  { %2396 = vmatprep.subr.bf16.mxu0 %v6669_v63  ;;  %2482 = vmatprep.subr.bf16.mxu1 %v6671_v1  ;;  %v1004_v62 = vld [vmem:[#allocation8 + $0x7a8] sm:$0xff]  ;;  %v232_v63 = vrot.slane %v8083_v16, %v8134_v45  ;;  %v1007_v1 = vld [vmem:[#allocation8 + $0x7c0] sm:$0xff]  ;;  %v647_v16 = vadd.f32 %v8118_v39, %v216_v10 }
 0x1a1   :  { %v6724_v46 = vcombine.low %v1007_v1, %v1011_v4 }
 0x1a3   :  { %2397 = vmatpush1.bf16.msra.mxu0 %v6668_v6  ;;  %2483 = vmatpush1.bf16.msra.mxu1 %v6670_v7  ;;  %v1012_v6 = vld [vmem:[#allocation8 + $0x7e8] sm:$0xff] }
 0x1a4   :  { %2398 = vmatprep.subr.bf16.mxu0 %v6677_v8  ;;  %2484 = vmatprep.subr.bf16.mxu1 %v6679_v9  ;;  %v6717_v8 = vcombine.high %v999_v55, %v1003_v60  ;;  %v6719_v9 = vcombine.high %v1000_v61, %v1004_v62  ;;  %v6727_v13 = vcombine.high %v1008_v5, %v1012_v6 }
 0x1a5   :  { %v6480_v55 = vcombine.low %v761_v26, %v765_v27  ;;  %v809_v26 = vld [vmem:[#allocation8 + $0x190] sm:$0xff]  ;;  %v810_v27 = vld [vmem:[#allocation8 + $0x198] sm:$0xff] }
 0x1a7   :  { %2399 = vmatpush1.bf16.msra.mxu0 %v6676_v44  ;;  %2485 = vmatpush1.bf16.msra.mxu1 %v6678_v47  ;;  %v6718_v44 = vcombine.low %v1000_v61, %v1004_v62  ;;  %v781_v62 = vld [vmem:[#allocation8 + $0xb0] sm:$0xff] }
 0x1a8   :  { %2400 = vmatprep.subr.bf16.mxu0 %v6685_v50  ;;  %2486 = vmatprep.subr.bf16.mxu1 %v6687_v51  ;;  %v6725_v51 = vcombine.high %v1007_v1, %v1011_v4 }
 0x1ab   :  { %2401 = vmatpush1.bf16.msra.mxu0 %v6684_v22  ;;  %2487 = vmatpush1.bf16.msra.mxu1 %v6686_v23  ;;  %v651_v23 = vadd.f32 %v8122_v48, %v216_v10  ;;  %v778_v10 = vld [vmem:[#allocation8 + $0x98] sm:$0xff] }
 0x1ac   :  { %2402 = vmatprep.subr.bf16.mxu0 %v6693_v24  ;;  %2488 = vmatprep.subr.bf16.mxu1 %v6695_v25 }
 0x1af   :  { %2403 = vmatpush1.bf16.msra.mxu0 %v6692_v30  ;;  %2489 = vmatpush1.bf16.msra.mxu1 %v6694_v31 }
 0x1b0   :  { %2404 = vmatprep.subr.bf16.mxu0 %v6701_v32  ;;  %2490 = vmatprep.subr.bf16.mxu1 %v6703_v33  ;;  %v6726_v32 = vcombine.low %v1008_v5, %v1012_v6  ;;  %v785_v5 = vld [vmem:[#allocation8 + $0xd0] sm:$0xff] }
 0x1b1   :  { %v789_v6 = vld [vmem:[#allocation8 + $0xf0] sm:$0xff] }
 0x1b3   :  { %2405 = vmatpush1.bf16.msra.mxu0 %v6700_v49  ;;  %2491 = vmatpush1.bf16.msra.mxu1 %v6702_v52  ;;  %v773_v52 = vld [vmem:[#allocation8 + $0x70] sm:$0xff] }
 0x1b4   :  { %2406 = vmatprep.subr.bf16.mxu0 %v6709_v53  ;;  %2492 = vmatprep.subr.bf16.mxu1 %v6711_v54  ;;  %v770_v53 = vld [vmem:[#allocation8 + $0x58] sm:$0xff]  ;;  %v6489_v60 = vcombine.high %v769_v40, %v773_v52  ;;  %v6488_v1 = vcombine.low %v769_v40, %v773_v52  ;;  %v6530_v40 = vcombine.low %v810_v27, %v814_v28 }
 0x1b5   :  { %v730_v7 = vpop.f32.mrb[8].mxu1  ;;  %v774_v54 = vld [vmem:[#allocation8 + $0x78] sm:$0xff] }
 0x1b6   :  { %v731_v12 = vadd.f32 %v730_v7, %v228_v59  ;;  %v732_v42 = vpop.f32.mrb[9].mxu1  ;;  %v6491_v61 = vcombine.high %v770_v53, %v774_v54  ;;  %v786_v7 = vld [vmem:[#allocation8 + $0xd8] sm:$0xff] }
 0x1b7   :  { %v733_v47 = vadd.f32 %v732_v42, %v232_v63  ;;  %v734_v50 = vpop.f32.mrb[10].mxu1  ;;  %2407 = vmatpush1.bf16.msra.mxu0 %v6708_v2  ;;  %2493 = vmatpush1.bf16.msra.mxu1 %v6710_v3  ;;  %v6490_v2 = vcombine.low %v770_v53, %v774_v54  ;;  %v825_v54 = vld [vmem:[#allocation8 + $0x210] sm:$0xff] }
 0x1b8   :  { %v741_v20 = vmax.f32 %v645_v11, %v731_v12  ;;  %v735_v21 = vadd.f32 %v734_v50, %v228_v59  ;;  %v736_v22 = vpop.f32.mrb[11].mxu1  ;;  %2408 = vmatprep.subr.bf16.mxu0 %v6717_v8  ;;  %2494 = vmatprep.subr.bf16.mxu1 %v6719_v9  ;;  %v777_v59 = vld [vmem:[#allocation8 + $0x90] sm:$0xff]  ;;  %v790_v8 = vld [vmem:[#allocation8 + $0xf8] sm:$0xff]  ;;  %v6505_v12 = vcombine.high %v785_v5, %v789_v6 }
 0x1b9   :  { %v742_v36 = vmax.f32 %v647_v16, %v733_v47  ;;  %v737_v24 = vadd.f32 %v736_v22, %v232_v63  ;;  %v782_v63 = vld [vmem:[#allocation8 + $0xb8] sm:$0xff]  ;;  %v6497_v3 = vcombine.high %v777_v59, %v781_v62  ;;  %v6496_v9 = vcombine.low %v777_v59, %v781_v62 }
 0x1ba   :  { %v745_v25 = vmax.f32 %v649_v14, %v735_v21  ;;  %v749_v30 = vmax.f32 %v741_v20, 0.0  ;;  %v6499_v4 = vcombine.high %v778_v10, %v782_v63  ;;  %v6498_v11 = vcombine.low %v778_v10, %v782_v63  ;;  %v794_v16 = vld [vmem:[#allocation8 + $0x118] sm:$0xff]  ;;  %v801_v14 = vld [vmem:[#allocation8 + $0x150] sm:$0xff] }
 0x1bb   :  { %v746_v39 = vmax.f32 %v651_v23, %v737_v24  ;;  %2409 = vmatpush1.bf16.msra.mxu0 %v6716_v43  ;;  %2495 = vmatpush1.bf16.msra.mxu1 %v6718_v44  ;;  %v750_v33 = vmax.f32 %v742_v36, 0.0  ;;  %v6507_v42 = vcombine.high %v786_v7, %v790_v8  ;;  %v793_v43 = vld [vmem:[#allocation8 + $0x110] sm:$0xff]  ;;  %v6504_v47 = vcombine.low %v785_v5, %v789_v6  ;;  %v802_v21 = vld [vmem:[#allocation8 + $0x158] sm:$0xff] }
 0x1bc   :  { %v753_v31 = vmax.f32 %v745_v25, 0.0  ;;  %2410 = vmatprep.subr.bf16.mxu0 %v6725_v51  ;;  %2496 = vmatprep.subr.bf16.mxu1 %v6727_v13  ;;  %v797_v44 = vld [vmem:[#allocation8 + $0x130] sm:$0xff]  ;;  %v6506_v50 = vcombine.low %v786_v7, %v790_v8  ;;  %v806_v22 = vld [vmem:[#allocation8 + $0x178] sm:$0xff] }
 0x1bd   :  { %v754_v34 = vmax.f32 %v746_v39, 0.0  ;;  %v6513_v51 = vcombine.high %v793_v43, %v797_v44  ;;  %v805_v20 = vld [vmem:[#allocation8 + $0x170] sm:$0xff]  ;;  %v6512_v23 = vcombine.low %v793_v43, %v797_v44  ;;  %v6523_v25 = vcombine.high %v802_v21, %v806_v22  ;;  %v830_v59 = vld [vmem:[#allocation8 + $0x238] sm:$0xff] }
 0x1be   :  { %v8148_v48 = vpack.c.bf16 %v753_v31, %v749_v30  ;;  %v6521_v24 = vcombine.high %v801_v14, %v805_v20  ;;  %v813_v39 = vld [vmem:[#allocation8 + $0x1b0] sm:$0xff]  ;;  %v6520_v29 = vcombine.low %v801_v14, %v805_v20  ;;  %v6522_v30 = vcombine.low %v802_v21, %v806_v22 }
 0x1bf   :  { %v8150_v49 = vpack.c.bf16 %v754_v34, %v750_v33  ;;  %2411 = vmatpush1.bf16.msra.mxu0 %v6724_v46  ;;  %2497 = vmatpush1.bf16.msra.mxu1 %v6726_v32  ;;  %v6529_v31 = vcombine.high %v809_v26, %v813_v39  ;;  %v6531_v46 = vcombine.high %v810_v27, %v814_v28  ;;  %v817_v32 = vld [vmem:[#allocation8 + $0x1d0] sm:$0xff]  ;;  %v818_v34 = vld [vmem:[#allocation8 + $0x1d8] sm:$0xff] }
 0x1c0   :  { %2509 = vmatprep.subr.bf16.mxu0 %v6481_v0  ;;  %2595 = vmatprep.subr.bf16.mxu1 %v6483_v38  ;;  %v821_v33 = vld [vmem:[#allocation8 + $0x1f0] sm:$0xff]  ;;  %v822_v0 = vld [vmem:[#allocation8 + $0x1f8] sm:$0xff]  ;;  %v6528_v38 = vcombine.low %v809_v26, %v813_v39 }
 0x1c1   :  { %2412 = vmatprep.mubr.bf16.mxu0 %v8150_v49  ;;  %2498 = vmatprep.mubr.bf16.mxu1 %v8150_v49  ;;  %v6537_v52 = vcombine.high %v817_v32, %v821_v33  ;;  %v6539_v53 = vcombine.high %v818_v34, %v822_v0  ;;  %v833_v63 = vld [vmem:[#allocation8 + $0x250] sm:$0xff] }
 0x1c2   :  { %2413 = vmatmul.mubr.bf16.vlgmr.msra.gmra.mrb[4].mxu0 %v8148_v48  ;;  %2499 = vmatmul.mubr.bf16.vlgmr.msra.gmra.mrb[12].mxu1 %v8148_v48  ;;  %v841_v8 = vld [vmem:[#allocation8 + $0x290] sm:$0xff] }
 0x1c3   :  { %2510 = vmatpush1.bf16.msra.mxu0 %v6480_v55  ;;  %2596 = vmatpush1.bf16.msra.mxu1 %v6482_v56  ;;  %v829_v55 = vld [vmem:[#allocation8 + $0x230] sm:$0xff]  ;;  %v826_v56 = vld [vmem:[#allocation8 + $0x218] sm:$0xff] }
 0x1c4   :  { %2541 = vmatprep.mubr.bf16.mxu0 %v8104_v58  ;;  %2627 = vmatprep.mubr.bf16.mxu1 %v8104_v58  ;;  %v798_v58 = vld [vmem:[#allocation8 + $0x138] sm:$0xff]  ;;  %v6545_v62 = vcombine.high %v825_v54, %v829_v55  ;;  %v6547_v10 = vcombine.high %v826_v56, %v830_v59  ;;  %v6546_v5 = vcombine.low %v826_v56, %v830_v59  ;;  %v857_v22 = vld [vmem:[#allocation8 + $0x310] sm:$0xff] }
 0x1c5   :  { %2511 = vmatprep.subr.bf16.mxu0 %v6489_v60  ;;  %2597 = vmatprep.subr.bf16.mxu1 %v6491_v61  ;;  %v6515_v13 = vcombine.high %v794_v16, %v798_v58  ;;  %v6514_v36 = vcombine.low %v794_v16, %v798_v58  ;;  %v6536_v60 = vcombine.low %v817_v32, %v821_v33  ;;  %v849_v58 = vld [vmem:[#allocation8 + $0x2d0] sm:$0xff] }
 0x1c6   :  { %v6538_v61 = vcombine.low %v818_v34, %v822_v0  ;;  %v865_v28 = vld [vmem:[#allocation8 + $0x350] sm:$0xff] }
 0x1c7   :  { %2512 = vmatpush1.bf16.msra.mxu0 %v6488_v1  ;;  %2598 = vmatpush1.bf16.msra.mxu1 %v6490_v2  ;;  %v837_v1 = vld [vmem:[#allocation8 + $0x270] sm:$0xff]  ;;  %v834_v2 = vld [vmem:[#allocation8 + $0x258] sm:$0xff] }
 0x1c8   :  { %2513 = vmatprep.subr.bf16.mxu0 %v6497_v3  ;;  %2599 = vmatprep.subr.bf16.mxu1 %v6499_v4  ;;  %v838_v3 = vld [vmem:[#allocation8 + $0x278] sm:$0xff]  ;;  %v6544_v4 = vcombine.low %v825_v54, %v829_v55  ;;  %v6553_v6 = vcombine.high %v833_v63, %v837_v1  ;;  %v873_v0 = vld [vmem:[#allocation8 + $0x390] sm:$0xff] }
 0x1c9   :  { %v6555_v7 = vcombine.high %v834_v2, %v838_v3  ;;  %v6554_v43 = vcombine.low %v834_v2, %v838_v3  ;;  %v881_v59 = vld [vmem:[#allocation8 + $0x3d0] sm:$0xff] }
 0x1ca   :  { %v889_v3 = vld [vmem:[#allocation8 + $0x410] sm:$0xff] }
 0x1cb   :  { %2514 = vmatpush1.bf16.msra.mxu0 %v6496_v9  ;;  %2600 = vmatpush1.bf16.msra.mxu1 %v6498_v11  ;;  %v845_v9 = vld [vmem:[#allocation8 + $0x2b0] sm:$0xff]  ;;  %v842_v11 = vld [vmem:[#allocation8 + $0x298] sm:$0xff] }
 0x1cc   :  { %2515 = vmatprep.subr.bf16.mxu0 %v6505_v12  ;;  %2601 = vmatprep.subr.bf16.mxu1 %v6507_v42  ;;  %v846_v12 = vld [vmem:[#allocation8 + $0x2b8] sm:$0xff]  ;;  %v6552_v42 = vcombine.low %v833_v63, %v837_v1  ;;  %v6561_v44 = vcombine.high %v841_v8, %v845_v9 }
 0x1cd   :  { %v6563_v16 = vcombine.high %v842_v11, %v846_v12  ;;  %v6562_v14 = vcombine.low %v842_v11, %v846_v12  ;;  %v897_v12 = vld [vmem:[#allocation8 + $0x450] sm:$0xff] }
 0x1cf   :  { %2516 = vmatpush1.bf16.msra.mxu0 %v6504_v47  ;;  %2602 = vmatpush1.bf16.msra.mxu1 %v6506_v50  ;;  %v853_v47 = vld [vmem:[#allocation8 + $0x2f0] sm:$0xff]  ;;  %v850_v50 = vld [vmem:[#allocation8 + $0x2d8] sm:$0xff] }
 0x1d0   :  { %2517 = vmatprep.subr.bf16.mxu0 %v6513_v51  ;;  %2603 = vmatprep.subr.bf16.mxu1 %v6515_v13  ;;  %v854_v51 = vld [vmem:[#allocation8 + $0x2f8] sm:$0xff]  ;;  %v6560_v13 = vcombine.low %v841_v8, %v845_v9  ;;  %v6569_v20 = vcombine.high %v849_v58, %v853_v47 }
 0x1d1   :  { %v6571_v21 = vcombine.high %v850_v50, %v854_v51  ;;  %v6570_v26 = vcombine.low %v850_v50, %v854_v51  ;;  %v905_v51 = vld [vmem:[#allocation8 + $0x490] sm:$0xff] }
 0x1d3   :  { %2518 = vmatpush1.bf16.msra.mxu0 %v6512_v23  ;;  %2604 = vmatpush1.bf16.msra.mxu1 %v6514_v36  ;;  %v861_v23 = vld [vmem:[#allocation8 + $0x330] sm:$0xff]  ;;  %v858_v36 = vld [vmem:[#allocation8 + $0x318] sm:$0xff] }
 0x1d4   :  { %2519 = vmatprep.subr.bf16.mxu0 %v6521_v24  ;;  %2605 = vmatprep.subr.bf16.mxu1 %v6523_v25  ;;  %v862_v24 = vld [vmem:[#allocation8 + $0x338] sm:$0xff]  ;;  %v6568_v25 = vcombine.low %v849_v58, %v853_v47  ;;  %v6577_v39 = vcombine.high %v857_v22, %v861_v23 }
 0x1d5   :  { %v6579_v27 = vcombine.high %v858_v36, %v862_v24  ;;  %v6578_v32 = vcombine.low %v858_v36, %v862_v24  ;;  %v913_v24 = vld [vmem:[#allocation8 + $0x4d0] sm:$0xff] }
 0x1d7   :  { %2520 = vmatpush1.bf16.msra.mxu0 %v6520_v29  ;;  %2606 = vmatpush1.bf16.msra.mxu1 %v6522_v30  ;;  %v869_v29 = vld [vmem:[#allocation8 + $0x370] sm:$0xff]  ;;  %v866_v30 = vld [vmem:[#allocation8 + $0x358] sm:$0xff] }
 0x1d8   :  { %2521 = vmatprep.subr.bf16.mxu0 %v6529_v31  ;;  %2607 = vmatprep.subr.bf16.mxu1 %v6531_v46  ;;  %v870_v31 = vld [vmem:[#allocation8 + $0x378] sm:$0xff]  ;;  %v6576_v46 = vcombine.low %v857_v22, %v861_v23  ;;  %v6585_v33 = vcombine.high %v865_v28, %v869_v29 }
 0x1d9   :  { %v6587_v34 = vcombine.high %v866_v30, %v870_v31  ;;  %v6586_v54 = vcombine.low %v866_v30, %v870_v31  ;;  %v921_v30 = vld [vmem:[#allocation8 + $0x510] sm:$0xff] }
 0x1da   :  { %v925_v31 = vld [vmem:[#allocation8 + $0x530] sm:$0xff] }
 0x1db   :  { %2522 = vmatpush1.bf16.msra.mxu0 %v6528_v38  ;;  %2608 = vmatpush1.bf16.msra.mxu1 %v6530_v40  ;;  %v877_v38 = vld [vmem:[#allocation8 + $0x3b0] sm:$0xff]  ;;  %v874_v40 = vld [vmem:[#allocation8 + $0x398] sm:$0xff] }
 0x1dc   :  { %2523 = vmatprep.subr.bf16.mxu0 %v6537_v52  ;;  %2609 = vmatprep.subr.bf16.mxu1 %v6539_v53  ;;  %v878_v52 = vld [vmem:[#allocation8 + $0x3b8] sm:$0xff]  ;;  %v6584_v53 = vcombine.low %v865_v28, %v869_v29  ;;  %v6593_v55 = vcombine.high %v873_v0, %v877_v38 }
 0x1dd   :  { %v6595_v56 = vcombine.high %v874_v40, %v878_v52  ;;  %v6594_v63 = vcombine.low %v874_v40, %v878_v52  ;;  %v933_v40 = vld [vmem:[#allocation8 + $0x570] sm:$0xff]  ;;  %v930_v52 = vld [vmem:[#allocation8 + $0x558] sm:$0xff] }
 0x1df   :  { %2524 = vmatpush1.bf16.msra.mxu0 %v6536_v60  ;;  %2610 = vmatpush1.bf16.msra.mxu1 %v6538_v61  ;;  %v885_v60 = vld [vmem:[#allocation8 + $0x3f0] sm:$0xff]  ;;  %v882_v61 = vld [vmem:[#allocation8 + $0x3d8] sm:$0xff] }
 0x1e0   :  { %2525 = vmatprep.subr.bf16.mxu0 %v6545_v62  ;;  %2611 = vmatprep.subr.bf16.mxu1 %v6547_v10  ;;  %v886_v62 = vld [vmem:[#allocation8 + $0x3f8] sm:$0xff]  ;;  %v6592_v10 = vcombine.low %v873_v0, %v877_v38  ;;  %v6601_v1 = vcombine.high %v881_v59, %v885_v60  ;;  %v929_v38 = vld [vmem:[#allocation8 + $0x550] sm:$0xff] }
 0x1e1   :  { %v6603_v2 = vcombine.high %v882_v61, %v886_v62  ;;  %v6602_v8 = vcombine.low %v882_v61, %v886_v62  ;;  %v941_v61 = vld [vmem:[#allocation8 + $0x5b0] sm:$0xff]  ;;  %v938_v62 = vld [vmem:[#allocation8 + $0x598] sm:$0xff] }
 0x1e3   :  { %2526 = vmatpush1.bf16.msra.mxu0 %v6544_v4  ;;  %2612 = vmatpush1.bf16.msra.mxu1 %v6546_v5  ;;  %v893_v4 = vld [vmem:[#allocation8 + $0x430] sm:$0xff]  ;;  %v890_v5 = vld [vmem:[#allocation8 + $0x418] sm:$0xff] }
 0x1e4   :  { %2527 = vmatprep.subr.bf16.mxu0 %v6553_v6  ;;  %2613 = vmatprep.subr.bf16.mxu1 %v6555_v7  ;;  %v894_v6 = vld [vmem:[#allocation8 + $0x438] sm:$0xff]  ;;  %v6600_v7 = vcombine.low %v881_v59, %v885_v60  ;;  %v6609_v9 = vcombine.high %v889_v3, %v893_v4  ;;  %v937_v60 = vld [vmem:[#allocation8 + $0x590] sm:$0xff] }
 0x1e5   :  { %v6611_v11 = vcombine.high %v890_v5, %v894_v6  ;;  %v6610_v58 = vcombine.low %v890_v5, %v894_v6  ;;  %v949_v5 = vld [vmem:[#allocation8 + $0x5f0] sm:$0xff]  ;;  %v946_v6 = vld [vmem:[#allocation8 + $0x5d8] sm:$0xff] }
 0x1e7   :  { %2528 = vmatpush1.bf16.msra.mxu0 %v6552_v42  ;;  %2614 = vmatpush1.bf16.msra.mxu1 %v6554_v43  ;;  %v901_v42 = vld [vmem:[#allocation8 + $0x470] sm:$0xff]  ;;  %v898_v43 = vld [vmem:[#allocation8 + $0x458] sm:$0xff] }
 0x1e8   :  { %2529 = vmatprep.subr.bf16.mxu0 %v6561_v44  ;;  %2615 = vmatprep.subr.bf16.mxu1 %v6563_v16  ;;  %v902_v44 = vld [vmem:[#allocation8 + $0x478] sm:$0xff]  ;;  %v6608_v16 = vcombine.low %v889_v3, %v893_v4  ;;  %v6617_v47 = vcombine.high %v897_v12, %v901_v42  ;;  %v945_v4 = vld [vmem:[#allocation8 + $0x5d0] sm:$0xff] }
 0x1e9   :  { %v6619_v50 = vcombine.high %v898_v43, %v902_v44  ;;  %v6618_v22 = vcombine.low %v898_v43, %v902_v44  ;;  %v957_v43 = vld [vmem:[#allocation8 + $0x630] sm:$0xff]  ;;  %v954_v44 = vld [vmem:[#allocation8 + $0x618] sm:$0xff] }
 0x1eb   :  { %2530 = vmatpush1.bf16.msra.mxu0 %v6560_v13  ;;  %2616 = vmatpush1.bf16.msra.mxu1 %v6562_v14  ;;  %v909_v13 = vld [vmem:[#allocation8 + $0x4b0] sm:$0xff]  ;;  %v906_v14 = vld [vmem:[#allocation8 + $0x498] sm:$0xff] }
 0x1ec   :  { %2531 = vmatprep.subr.bf16.mxu0 %v6569_v20  ;;  %2617 = vmatprep.subr.bf16.mxu1 %v6571_v21  ;;  %v910_v20 = vld [vmem:[#allocation8 + $0x4b8] sm:$0xff]  ;;  %v6616_v21 = vcombine.low %v897_v12, %v901_v42  ;;  %v6625_v23 = vcombine.high %v905_v51, %v909_v13  ;;  %v953_v42 = vld [vmem:[#allocation8 + $0x610] sm:$0xff] }
 0x1ed   :  { %v6627_v36 = vcombine.high %v906_v14, %v910_v20 }
 0x1ef   :  { %2532 = vmatpush1.bf16.msra.mxu0 %v6568_v25  ;;  %2618 = vmatpush1.bf16.msra.mxu1 %v6570_v26  ;;  %v917_v25 = vld [vmem:[#allocation8 + $0x4f0] sm:$0xff]  ;;  %v914_v26 = vld [vmem:[#allocation8 + $0x4d8] sm:$0xff] }
 0x1f0   :  { %2533 = vmatprep.subr.bf16.mxu0 %v6577_v39  ;;  %2619 = vmatprep.subr.bf16.mxu1 %v6579_v27  ;;  %v918_v39 = vld [vmem:[#allocation8 + $0x4f8] sm:$0xff]  ;;  %v6626_v27 = vcombine.low %v906_v14, %v910_v20  ;;  %v6633_v28 = vcombine.high %v913_v24, %v917_v25  ;;  %v965_v14 = vld [vmem:[#allocation8 + $0x670] sm:$0xff] }
 0x1f1   :  { %v6635_v29 = vcombine.high %v914_v26, %v918_v39  ;;  %v962_v20 = vld [vmem:[#allocation8 + $0x658] sm:$0xff] }
 0x1f3   :  { %2534 = vmatpush1.bf16.msra.mxu0 %v6576_v46  ;;  %2620 = vmatpush1.bf16.msra.mxu1 %v6578_v32  ;;  %v926_v46 = vld [vmem:[#allocation8 + $0x538] sm:$0xff]  ;;  %v6632_v32 = vcombine.low %v913_v24, %v917_v25  ;;  %v969_v25 = vld [vmem:[#allocation8 + $0x690] sm:$0xff] }
 0x1f4   :  { %2535 = vmatprep.subr.bf16.mxu0 %v6585_v33  ;;  %2621 = vmatprep.subr.bf16.mxu1 %v6587_v34  ;;  %v6634_v33 = vcombine.low %v914_v26, %v918_v39  ;;  %v6641_v34 = vcombine.high %v921_v30, %v925_v31  ;;  %v973_v26 = vld [vmem:[#allocation8 + $0x6b0] sm:$0xff]  ;;  %v970_v39 = vld [vmem:[#allocation8 + $0x698] sm:$0xff] }
 0x1f7   :  { %2536 = vmatpush1.bf16.msra.mxu0 %v6584_v53  ;;  %2622 = vmatpush1.bf16.msra.mxu1 %v6586_v54  ;;  %v934_v53 = vld [vmem:[#allocation8 + $0x578] sm:$0xff]  ;;  %v6640_v54 = vcombine.low %v921_v30, %v925_v31  ;;  %v977_v31 = vld [vmem:[#allocation8 + $0x6d0] sm:$0xff] }
 0x1f8   :  { %2537 = vmatprep.subr.bf16.mxu0 %v6593_v55  ;;  %2623 = vmatprep.subr.bf16.mxu1 %v6595_v56  ;;  %v6649_v56 = vcombine.high %v929_v38, %v933_v40  ;;  %v6651_v59 = vcombine.high %v930_v52, %v934_v53 }
 0x1fb   :  { %2538 = vmatpush1.bf16.msra.mxu0 %v6592_v10  ;;  %2624 = vmatpush1.bf16.msra.mxu1 %v6594_v63  ;;  %v942_v10 = vld [vmem:[#allocation8 + $0x5b8] sm:$0xff]  ;;  %v6648_v63 = vcombine.low %v929_v38, %v933_v40  ;;  %v985_v40 = vld [vmem:[#allocation8 + $0x710] sm:$0xff] }
 0x1fc   :  { %2539 = vmatprep.subr.bf16.mxu0 %v6601_v1  ;;  %2625 = vmatprep.subr.bf16.mxu1 %v6603_v2  ;;  %v6650_v1 = vcombine.low %v930_v52, %v934_v53  ;;  %v6657_v2 = vcombine.high %v937_v60, %v941_v61  ;;  %v6659_v3 = vcombine.high %v938_v62, %v942_v10  ;;  %v989_v52 = vld [vmem:[#allocation8 + $0x730] sm:$0xff]  ;;  %v986_v53 = vld [vmem:[#allocation8 + $0x718] sm:$0xff] }
 0x1ff   :  { %2540 = vmatpush1.bf16.msra.mxu0 %v6600_v7  ;;  %2626 = vmatpush1.bf16.msra.mxu1 %v6602_v8  ;;  %v950_v7 = vld [vmem:[#allocation8 + $0x5f8] sm:$0xff]  ;;  %v6656_v8 = vcombine.low %v937_v60, %v941_v61  ;;  %v993_v61 = vld [vmem:[#allocation8 + $0x750] sm:$0xff] }
 0x200   :  { %2552 = vmatprep.subr.bf16.mxu0 %v6609_v9  ;;  %2638 = vmatprep.subr.bf16.mxu1 %v6611_v11  ;;  %v6658_v9 = vcombine.low %v938_v62, %v942_v10  ;;  %v6665_v11 = vcombine.high %v945_v4, %v949_v5  ;;  %v6667_v12 = vcombine.high %v946_v6, %v950_v7  ;;  %v997_v62 = vld [vmem:[#allocation8 + $0x770] sm:$0xff]  ;;  %v994_v10 = vld [vmem:[#allocation8 + $0x758] sm:$0xff] }
 0x202   :  { %2542 = vmatmul.mubr.bf16.vlgmr.msra.gmra.mrb[8].mxu0 %v8102_v57  ;;  %2628 = vmatmul.mubr.bf16.vlgmr.msra.gmra.mrb[16].mxu1 %v8102_v57  ;;  %v6624_v57 = vcombine.low %v905_v51, %v909_v13  ;;  %v961_v13 = vld [vmem:[#allocation8 + $0x650] sm:$0xff] }
 0x203   :  { %2553 = vmatpush1.bf16.msra.mxu0 %v6608_v16  ;;  %2584 = vmatprep.mubr.bf16.mxu0 %v8150_v49  ;;  %v958_v16 = vld [vmem:[#allocation8 + $0x638] sm:$0xff] }
 0x204   :  { %2639 = vmatpush1.bf16.msra.mxu1 %v6610_v58  ;;  %2670 = vmatprep.mubr.bf16.mxu1 %v8150_v49  ;;  %v922_v49 = vld [vmem:[#allocation8 + $0x518] sm:$0xff]  ;;  %v6664_v58 = vcombine.low %v945_v4, %v949_v5  ;;  %v6675_v51 = vcombine.high %v954_v44, %v958_v16  ;;  %v1001_v5 = vld [vmem:[#allocation8 + $0x790] sm:$0xff] }
 0x205   :  { %2554 = vmatprep.subr.bf16.mxu0 %v6617_v47  ;;  %2640 = vmatprep.subr.bf16.mxu1 %v6619_v50  ;;  %v6643_v0 = vcombine.high %v922_v49, %v926_v46  ;;  %v6642_v55 = vcombine.low %v922_v49, %v926_v46  ;;  %v6666_v47 = vcombine.low %v946_v6, %v950_v7  ;;  %v981_v49 = vld [vmem:[#allocation8 + $0x6f0] sm:$0xff]  ;;  %v978_v46 = vld [vmem:[#allocation8 + $0x6d8] sm:$0xff] }
 0x206   :  { %v6673_v50 = vcombine.high %v953_v42, %v957_v43  ;;  %v1005_v6 = vld [vmem:[#allocation8 + $0x7b0] sm:$0xff]  ;;  %v1002_v7 = vld [vmem:[#allocation8 + $0x798] sm:$0xff] }
 0x207   :  { %2555 = vmatpush1.bf16.msra.mxu0 %v6616_v21  ;;  %v966_v21 = vld [vmem:[#allocation8 + $0x678] sm:$0xff] }
 0x208   :  { %2641 = vmatpush1.bf16.msra.mxu1 %v6618_v22  ;;  %2556 = vmatprep.subr.bf16.mxu0 %v6625_v23  ;;  %v6672_v22 = vcombine.low %v953_v42, %v957_v43  ;;  %v6674_v23 = vcombine.low %v954_v44, %v958_v16  ;;  %v6683_v24 = vcombine.high %v962_v20, %v966_v21  ;;  %v1009_v43 = vld [vmem:[#allocation8 + $0x7d0] sm:$0xff]  ;;  %v1010_v16 = vld [vmem:[#allocation8 + $0x7d8] sm:$0xff] }
 0x209   :  { %2642 = vmatprep.subr.bf16.mxu1 %v6627_v36  ;;  %v6681_v36 = vcombine.high %v961_v13, %v965_v14  ;;  %v1013_v44 = vld [vmem:[#allocation8 + $0x7f0] sm:$0xff] }
 0x20b   :  { %2557 = vmatpush1.bf16.msra.mxu0 %v6624_v57  ;;  %v974_v57 = vld [vmem:[#allocation8 + $0x6b8] sm:$0xff] }
 0x20c   :  { %2643 = vmatpush1.bf16.msra.mxu1 %v6626_v27  ;;  %2558 = vmatprep.subr.bf16.mxu0 %v6633_v28  ;;  %v6680_v27 = vcombine.low %v961_v13, %v965_v14  ;;  %v6682_v28 = vcombine.low %v962_v20, %v966_v21  ;;  %v6691_v30 = vcombine.high %v970_v39, %v974_v57  ;;  %v2701_v14 = vld [vmem:[#allocation10] sm:$0xff]  ;;  %v2702_v21 = vld [vmem:[#allocation10 + $0x8] sm:$0xff] }
 0x20d   :  { %2644 = vmatprep.subr.bf16.mxu1 %v6635_v29  ;;  %v6689_v29 = vcombine.high %v969_v25, %v973_v26  ;;  %v2705_v20 = vld [vmem:[#allocation10 + $0x20] sm:$0xff] }
 0x20f   :  { %2559 = vmatpush1.bf16.msra.mxu0 %v6632_v32  ;;  %v982_v32 = vld [vmem:[#allocation8 + $0x6f8] sm:$0xff] }
 0x210   :  { %2645 = vmatpush1.bf16.msra.mxu1 %v6634_v33  ;;  %2560 = vmatprep.subr.bf16.mxu0 %v6641_v34  ;;  %v6688_v33 = vcombine.low %v969_v25, %v973_v26  ;;  %v6690_v34 = vcombine.low %v970_v39, %v974_v57  ;;  %v6699_v38 = vcombine.high %v978_v46, %v982_v32  ;;  %v2709_v26 = vld [vmem:[#allocation10 + $0x40] sm:$0xff]  ;;  %v2710_v57 = vld [vmem:[#allocation10 + $0x48] sm:$0xff] }
 0x211   :  { %2646 = vmatprep.subr.bf16.mxu1 %v6643_v0  ;;  %v6697_v0 = vcombine.high %v977_v31, %v981_v49  ;;  %v2713_v39 = vld [vmem:[#allocation10 + $0x60] sm:$0xff] }
 0x213   :  { %2561 = vmatpush1.bf16.msra.mxu0 %v6640_v54  ;;  %v990_v54 = vld [vmem:[#allocation8 + $0x738] sm:$0xff] }
 0x214   :  { %2647 = vmatpush1.bf16.msra.mxu1 %v6642_v55  ;;  %2562 = vmatprep.subr.bf16.mxu0 %v6649_v56  ;;  %v6696_v55 = vcombine.low %v977_v31, %v981_v49  ;;  %v6698_v56 = vcombine.low %v978_v46, %v982_v32  ;;  %v6707_v60 = vcombine.high %v986_v53, %v990_v54  ;;  %v2717_v49 = vld [vmem:[#allocation10 + $0x80] sm:$0xff]  ;;  %v2718_v32 = vld [vmem:[#allocation10 + $0x88] sm:$0xff] }
 0x215   :  { %2648 = vmatprep.subr.bf16.mxu1 %v6651_v59  ;;  %v6705_v59 = vcombine.high %v985_v40, %v989_v52  ;;  %v2721_v46 = vld [vmem:[#allocation10 + $0xa0] sm:$0xff] }
 0x217   :  { %2563 = vmatpush1.bf16.msra.mxu0 %v6648_v63  ;;  %v998_v63 = vld [vmem:[#allocation8 + $0x778] sm:$0xff] }
 0x218   :  { %2649 = vmatpush1.bf16.msra.mxu1 %v6650_v1  ;;  %2564 = vmatprep.subr.bf16.mxu0 %v6657_v2  ;;  %v6704_v1 = vcombine.low %v985_v40, %v989_v52  ;;  %v6706_v2 = vcombine.low %v986_v53, %v990_v54  ;;  %v6715_v4 = vcombine.high %v994_v10, %v998_v63  ;;  %v2725_v52 = vld [vmem:[#allocation10 + $0xc0] sm:$0xff]  ;;  %v2726_v54 = vld [vmem:[#allocation10 + $0xc8] sm:$0xff] }
 0x219   :  { %2650 = vmatprep.subr.bf16.mxu1 %v6659_v3  ;;  %v6713_v3 = vcombine.high %v993_v61, %v997_v62  ;;  %v2729_v53 = vld [vmem:[#allocation10 + $0xe0] sm:$0xff] }
 0x21b   :  { %2565 = vmatpush1.bf16.msra.mxu0 %v6656_v8  ;;  %v1006_v8 = vld [vmem:[#allocation8 + $0x7b8] sm:$0xff] }
 0x21c   :  { %2651 = vmatpush1.bf16.msra.mxu1 %v6658_v9  ;;  %2566 = vmatprep.subr.bf16.mxu0 %v6665_v11  ;;  %v6712_v9 = vcombine.low %v993_v61, %v997_v62  ;;  %v6714_v11 = vcombine.low %v994_v10, %v998_v63  ;;  %v6723_v42 = vcombine.high %v1002_v7, %v1006_v8  ;;  %v2733_v61 = vld [vmem:[#allocation10 + $0x100] sm:$0xff]  ;;  %v2734_v10 = vld [vmem:[#allocation10 + $0x108] sm:$0xff] }
 0x21d   :  { %2652 = vmatprep.subr.bf16.mxu1 %v6667_v12  ;;  %v6721_v12 = vcombine.high %v1001_v5, %v1005_v6  ;;  %v2737_v62 = vld [vmem:[#allocation10 + $0x120] sm:$0xff]  ;;  %v2738_v63 = vld [vmem:[#allocation10 + $0x128] sm:$0xff] }
 0x21f   :  { %2567 = vmatpush1.bf16.msra.mxu0 %v6664_v58  ;;  %v1014_v58 = vld [vmem:[#allocation8 + $0x7f8] sm:$0xff] }
 0x220   :  { %2653 = vmatpush1.bf16.msra.mxu1 %v6666_v47  ;;  %2568 = vmatprep.subr.bf16.mxu0 %v6673_v50  ;;  %v6720_v47 = vcombine.low %v1001_v5, %v1005_v6  ;;  %v6722_v50 = vcombine.low %v1002_v7, %v1006_v8  ;;  %v6731_v13 = vcombine.high %v1010_v16, %v1014_v58  ;;  %v2741_v5 = vld [vmem:[#allocation10 + $0x140] sm:$0xff]  ;;  %v2742_v7 = vld [vmem:[#allocation10 + $0x148] sm:$0xff] }
 0x221   :  { %2654 = vmatprep.subr.bf16.mxu1 %v6675_v51  ;;  %v6729_v51 = vcombine.high %v1009_v43, %v1013_v44  ;;  %v2745_v6 = vld [vmem:[#allocation10 + $0x160] sm:$0xff]  ;;  %v2746_v8 = vld [vmem:[#allocation10 + $0x168] sm:$0xff] }
 0x223   :  { %2569 = vmatpush1.bf16.msra.mxu0 %v6672_v22  ;;  %v2706_v22 = vld [vmem:[#allocation10 + $0x28] sm:$0xff] }
 0x224   :  { %2655 = vmatpush1.bf16.msra.mxu1 %v6674_v23  ;;  %2570 = vmatprep.subr.bf16.mxu0 %v6681_v36  ;;  %v6728_v23 = vcombine.low %v1009_v43, %v1013_v44  ;;  %v6730_v36 = vcombine.low %v1010_v16, %v1014_v58  ;;  %v6735_v25 = vcombine.high %v2702_v21, %v2706_v22  ;;  %v2749_v43 = vld [vmem:[#allocation10 + $0x180] sm:$0xff]  ;;  %v2750_v16 = vld [vmem:[#allocation10 + $0x188] sm:$0xff] }
 0x225   :  { %2656 = vmatprep.subr.bf16.mxu1 %v6683_v24  ;;  %v6733_v24 = vcombine.high %v2701_v14, %v2705_v20  ;;  %v2753_v44 = vld [vmem:[#allocation10 + $0x1a0] sm:$0xff]  ;;  %v2754_v58 = vld [vmem:[#allocation10 + $0x1a8] sm:$0xff] }
 0x227   :  { %2571 = vmatpush1.bf16.msra.mxu0 %v6680_v27  ;;  %v2714_v27 = vld [vmem:[#allocation10 + $0x68] sm:$0xff] }
 0x228   :  { %2657 = vmatpush1.bf16.msra.mxu1 %v6682_v28  ;;  %2572 = vmatprep.subr.bf16.mxu0 %v6689_v29  ;;  %v6732_v28 = vcombine.low %v2701_v14, %v2705_v20  ;;  %v6734_v29 = vcombine.low %v2702_v21, %v2706_v22  ;;  %v6743_v31 = vcombine.high %v2710_v57, %v2714_v27  ;;  %v2757_v14 = vld [vmem:[#allocation10 + $0x1c0] sm:$0xff]  ;;  %v2758_v21 = vld [vmem:[#allocation10 + $0x1c8] sm:$0xff] }
 0x229   :  { %2658 = vmatprep.subr.bf16.mxu1 %v6691_v30  ;;  %v6741_v30 = vcombine.high %v2709_v26, %v2713_v39  ;;  %v2761_v20 = vld [vmem:[#allocation10 + $0x1e0] sm:$0xff]  ;;  %v2762_v22 = vld [vmem:[#allocation10 + $0x1e8] sm:$0xff] }
 0x22b   :  { %2573 = vmatpush1.bf16.msra.mxu0 %v6688_v33  ;;  %v2722_v33 = vld [vmem:[#allocation10 + $0xa8] sm:$0xff] }
 0x22c   :  { %2659 = vmatpush1.bf16.msra.mxu1 %v6690_v34  ;;  %2574 = vmatprep.subr.bf16.mxu0 %v6697_v0  ;;  %v6740_v34 = vcombine.low %v2709_v26, %v2713_v39  ;;  %v6742_v0 = vcombine.low %v2710_v57, %v2714_v27  ;;  %v6751_v40 = vcombine.high %v2718_v32, %v2722_v33  ;;  %v2765_v26 = vld [vmem:[#allocation10 + $0x200] sm:$0xff]  ;;  %v2766_v57 = vld [vmem:[#allocation10 + $0x208] sm:$0xff] }
 0x22d   :  { %2660 = vmatprep.subr.bf16.mxu1 %v6699_v38  ;;  %v6749_v38 = vcombine.high %v2717_v49, %v2721_v46  ;;  %v2769_v39 = vld [vmem:[#allocation10 + $0x220] sm:$0xff]  ;;  %v2770_v27 = vld [vmem:[#allocation10 + $0x228] sm:$0xff] }
 0x22f   :  { %2575 = vmatpush1.bf16.msra.mxu0 %v6696_v55  ;;  %v2730_v55 = vld [vmem:[#allocation10 + $0xe8] sm:$0xff] }
 0x230   :  { %2661 = vmatpush1.bf16.msra.mxu1 %v6698_v56  ;;  %2576 = vmatprep.subr.bf16.mxu0 %v6705_v59  ;;  %v6748_v56 = vcombine.low %v2717_v49, %v2721_v46  ;;  %v6750_v59 = vcombine.low %v2718_v32, %v2722_v33  ;;  %v2773_v49 = vld [vmem:[#allocation10 + $0x240] sm:$0xff]  ;;  %v2774_v32 = vld [vmem:[#allocation10 + $0x248] sm:$0xff] }
 0x231   :  { %2662 = vmatprep.subr.bf16.mxu1 %v6707_v60  ;;  %v6757_v60 = vcombine.high %v2725_v52, %v2729_v53  ;;  %v2777_v46 = vld [vmem:[#allocation10 + $0x260] sm:$0xff]  ;;  %v2778_v33 = vld [vmem:[#allocation10 + $0x268] sm:$0xff] }
 0x233   :  { %2577 = vmatpush1.bf16.msra.mxu0 %v6704_v1  ;;  %v6756_v1 = vcombine.low %v2725_v52, %v2729_v53  ;;  %v2781_v52 = vld [vmem:[#allocation10 + $0x280] sm:$0xff] }
 0x234   :  { %2663 = vmatpush1.bf16.msra.mxu1 %v6706_v2  ;;  %2578 = vmatprep.subr.bf16.mxu0 %v6713_v3  ;;  %v6758_v2 = vcombine.low %v2726_v54, %v2730_v55  ;;  %v6765_v3 = vcombine.high %v2733_v61, %v2737_v62  ;;  %v2785_v53 = vld [vmem:[#allocation10 + $0x2a0] sm:$0xff] }
 0x235   :  { %2664 = vmatprep.subr.bf16.mxu1 %v6715_v4  ;;  %v6767_v4 = vcombine.high %v2734_v10, %v2738_v63 }
 0x237   :  { %2579 = vmatpush1.bf16.msra.mxu0 %v6712_v9  ;;  %v6764_v9 = vcombine.low %v2733_v61, %v2737_v62  ;;  %v2789_v61 = vld [vmem:[#allocation10 + $0x2c0] sm:$0xff] }
 0x238   :  { %2665 = vmatpush1.bf16.msra.mxu1 %v6714_v11  ;;  %2580 = vmatprep.subr.bf16.mxu0 %v6721_v12  ;;  %v6766_v11 = vcombine.low %v2734_v10, %v2738_v63  ;;  %v6773_v12 = vcombine.high %v2741_v5, %v2745_v6  ;;  %v2793_v62 = vld [vmem:[#allocation10 + $0x2e0] sm:$0xff]  ;;  %v2790_v10 = vld [vmem:[#allocation10 + $0x2c8] sm:$0xff] }
 0x239   :  { %2666 = vmatprep.subr.bf16.mxu1 %v6723_v42  ;;  %v6775_v42 = vcombine.high %v2742_v7, %v2746_v8  ;;  %v2794_v63 = vld [vmem:[#allocation10 + $0x2e8] sm:$0xff] }
 0x23b   :  { %2581 = vmatpush1.bf16.msra.mxu0 %v6720_v47  ;;  %v6772_v47 = vcombine.low %v2741_v5, %v2745_v6  ;;  %v2797_v5 = vld [vmem:[#allocation10 + $0x300] sm:$0xff] }
 0x23c   :  { %2667 = vmatpush1.bf16.msra.mxu1 %v6722_v50  ;;  %2582 = vmatprep.subr.bf16.mxu0 %v6729_v51  ;;  %v6774_v50 = vcombine.low %v2742_v7, %v2746_v8  ;;  %v6781_v51 = vcombine.high %v2749_v43, %v2753_v44  ;;  %v2801_v6 = vld [vmem:[#allocation10 + $0x320] sm:$0xff]  ;;  %v2798_v7 = vld [vmem:[#allocation10 + $0x308] sm:$0xff] }
 0x23d   :  { %2668 = vmatprep.subr.bf16.mxu1 %v6731_v13  ;;  %v6783_v13 = vcombine.high %v2750_v16, %v2754_v58  ;;  %v2802_v8 = vld [vmem:[#allocation10 + $0x328] sm:$0xff] }
 0x23f   :  { %2583 = vmatpush1.bf16.msra.mxu0 %v6728_v23  ;;  %v6780_v23 = vcombine.low %v2749_v43, %v2753_v44  ;;  %v6828_v43 = vcombine.low %v2797_v5, %v2801_v6  ;;  %v6830_v44 = vcombine.low %v2798_v7, %v2802_v8 }
 0x240   :  { %2669 = vmatpush1.bf16.msra.mxu1 %v6730_v36  ;;  %4279 = vmatprep.subr.bf16.mxu0 %v6733_v24  ;;  %v6782_v36 = vcombine.low %v2750_v16, %v2754_v58  ;;  %v6789_v24 = vcombine.high %v2757_v14, %v2761_v20  ;;  %v2805_v16 = vld [vmem:[#allocation10 + $0x340] sm:$0xff] }
 0x241   :  { %4365 = vmatprep.subr.bf16.mxu1 %v6735_v25  ;;  %v6791_v25 = vcombine.high %v2758_v21, %v2762_v22  ;;  %v2809_v58 = vld [vmem:[#allocation10 + $0x360] sm:$0xff] }
 0x242   :  { %2585 = vmatmul.mubr.bf16.vlgmr.msra.gmra.mrb[8].mxu0 %v8148_v48 }
 0x243   :  { %2671 = vmatmul.mubr.bf16.vlgmr.msra.gmra.mrb[16].mxu1 %v8148_v48  ;;  %4280 = vmatpush1.bf16.msra.mxu0 %v6732_v28  ;;  %v6759_v48 = vcombine.high %v2726_v54, %v2730_v55  ;;  %v6788_v28 = vcombine.low %v2757_v14, %v2761_v20  ;;  %v2782_v54 = vld [vmem:[#allocation10 + $0x288] sm:$0xff]  ;;  %v6836_v20 = vcombine.low %v2805_v16, %v2809_v58 }
 0x244   :  { %4366 = vmatpush1.bf16.msra.mxu1 %v6734_v29  ;;  %4281 = vmatprep.subr.bf16.mxu0 %v6741_v30  ;;  %v6790_v29 = vcombine.low %v2758_v21, %v2762_v22  ;;  %v6797_v30 = vcombine.high %v2765_v26, %v2769_v39  ;;  %v2786_v55 = vld [vmem:[#allocation10 + $0x2a8] sm:$0xff] }
 0x245   :  { %4367 = vmatprep.subr.bf16.mxu1 %v6743_v31  ;;  %v6799_v31 = vcombine.high %v2766_v57, %v2770_v27 }
 0x247   :  { %4282 = vmatpush1.bf16.msra.mxu0 %v6740_v34  ;;  %v6796_v34 = vcombine.low %v2765_v26, %v2769_v39  ;;  %v2813_v26 = vld [vmem:[#allocation10 + $0x380] sm:$0xff] }
 0x248   :  { %4368 = vmatpush1.bf16.msra.mxu1 %v6742_v0  ;;  %4283 = vmatprep.subr.bf16.mxu0 %v6749_v38  ;;  %v6798_v0 = vcombine.low %v2766_v57, %v2770_v27  ;;  %v6805_v38 = vcombine.high %v2773_v49, %v2777_v46  ;;  %v2817_v39 = vld [vmem:[#allocation10 + $0x3a0] sm:$0xff]  ;;  %v2814_v57 = vld [vmem:[#allocation10 + $0x388] sm:$0xff] }
 0x249   :  { %4369 = vmatprep.subr.bf16.mxu1 %v6751_v40  ;;  %v6807_v40 = vcombine.high %v2774_v32, %v2778_v33 }
 0x24b   :  { %4284 = vmatpush1.bf16.msra.mxu0 %v6748_v56  ;;  %v6804_v56 = vcombine.low %v2773_v49, %v2777_v46 }
 0x24c   :  { %4370 = vmatpush1.bf16.msra.mxu1 %v6750_v59  ;;  %4285 = vmatprep.subr.bf16.mxu0 %v6757_v60  ;;  %v6806_v59 = vcombine.low %v2774_v32, %v2778_v33  ;;  %v6813_v60 = vcombine.high %v2781_v52, %v2785_v53  ;;  %v2821_v32 = vld [vmem:[#allocation10 + $0x3c0] sm:$0xff] }
 0x24d   :  { %4371 = vmatprep.subr.bf16.mxu1 %v6759_v48  ;;  %v6815_v48 = vcombine.high %v2782_v54, %v2786_v55  ;;  %v2825_v33 = vld [vmem:[#allocation10 + $0x3e0] sm:$0xff] }
 0x24f   :  { %4286 = vmatpush1.bf16.msra.mxu0 %v6756_v1  ;;  %v6812_v1 = vcombine.low %v2781_v52, %v2785_v53 }
 0x250   :  { %4372 = vmatpush1.bf16.msra.mxu1 %v6758_v2  ;;  %4287 = vmatprep.subr.bf16.mxu0 %v6765_v3  ;;  %v6814_v2 = vcombine.low %v2782_v54, %v2786_v55  ;;  %v6821_v3 = vcombine.high %v2789_v61, %v2793_v62  ;;  %v8166_v54 = vld [vmem:[#allocation10 + $0x400] sm:$0xff] }
 0x251   :  { %4373 = vmatprep.subr.bf16.mxu1 %v6767_v4  ;;  %v6823_v4 = vcombine.high %v2790_v10, %v2794_v63  ;;  %v8168_v55 = vld [vmem:[#allocation10 + $0x420] sm:$0xff] }
 0x253   :  { %4288 = vmatpush1.bf16.msra.mxu0 %v6764_v9  ;;  %v6820_v9 = vcombine.low %v2789_v61, %v2793_v62 }
 0x254   :  { %4374 = vmatpush1.bf16.msra.mxu1 %v6766_v11  ;;  %4289 = vmatprep.subr.bf16.mxu0 %v6773_v12  ;;  %v6822_v11 = vcombine.low %v2790_v10, %v2794_v63  ;;  %v6829_v12 = vcombine.high %v2797_v5, %v2801_v6  ;;  %v1015_v10 = vld [vmem:[%s8286_s4] sm:$0xff] }
 0x255   :  { %4375 = vmatprep.subr.bf16.mxu1 %v6775_v42  ;;  %v6831_v42 = vcombine.high %v2798_v7, %v2802_v8  ;;  %v1020_v63 = vrot.slane %v1015_v10, %v8081_v15  ;;  %v1044_v5 = vrot.slane %v1015_v10, %v8128_v37  ;;  %v1040_v6 = vrot.slane %v1015_v10, %v8092_v19 }
 0x256   :  { %v1048_v7 = vrot.slane %v1015_v10, %v8134_v45 }
 0x257   :  { %4290 = vmatpush1.bf16.msra.mxu0 %v6772_v47  ;;  %v2806_v47 = vld [vmem:[#allocation10 + $0x348] sm:$0xff] }
 0x258   :  { %4376 = vmatpush1.bf16.msra.mxu1 %v6774_v50  ;;  %4291 = vmatprep.subr.bf16.mxu0 %v6781_v51  ;;  %v6837_v50 = vcombine.high %v2805_v16, %v2809_v58  ;;  %v2810_v51 = vld [vmem:[#allocation10 + $0x368] sm:$0xff] }
 0x259   :  { %4377 = vmatprep.subr.bf16.mxu1 %v6783_v13  ;;  %v6838_v21 = vcombine.low %v2806_v47, %v2810_v51  ;;  %v6839_v22 = vcombine.high %v2806_v47, %v2810_v51 }
 0x25b   :  { %4292 = vmatpush1.bf16.msra.mxu0 %v6780_v23 }
 0x25c   :  { %4378 = vmatpush1.bf16.msra.mxu1 %v6782_v36  ;;  %4293 = vmatprep.subr.bf16.mxu0 %v6789_v24 }
 0x25d   :  { %4379 = vmatprep.subr.bf16.mxu1 %v6791_v25 }
 0x25f   :  { %4294 = vmatpush1.bf16.msra.mxu0 %v6788_v28 }
 0x260   :  { %4380 = vmatpush1.bf16.msra.mxu1 %v6790_v29  ;;  %4295 = vmatprep.subr.bf16.mxu0 %v6797_v30  ;;  %v6845_v29 = vcombine.high %v2813_v26, %v2817_v39  ;;  %v2818_v30 = vld [vmem:[#allocation10 + $0x3a8] sm:$0xff] }
 0x261   :  { %4381 = vmatprep.subr.bf16.mxu1 %v6799_v31  ;;  %v6844_v31 = vcombine.low %v2813_v26, %v2817_v39  ;;  %v6846_v49 = vcombine.low %v2814_v57, %v2818_v30  ;;  %v6847_v46 = vcombine.high %v2814_v57, %v2818_v30 }
 0x263   :  { %4296 = vmatpush1.bf16.msra.mxu0 %v6796_v34  ;;  %v2822_v34 = vld [vmem:[#allocation10 + $0x3c8] sm:$0xff] }
 0x264   :  { %4382 = vmatpush1.bf16.msra.mxu1 %v6798_v0  ;;  %4297 = vmatprep.subr.bf16.mxu0 %v6805_v38  ;;  %v6853_v0 = vcombine.high %v2821_v32, %v2825_v33  ;;  %v2826_v38 = vld [vmem:[#allocation10 + $0x3e8] sm:$0xff] }
 0x265   :  { %4383 = vmatprep.subr.bf16.mxu1 %v6807_v40  ;;  %v6852_v40 = vcombine.low %v2821_v32, %v2825_v33  ;;  %v6854_v52 = vcombine.low %v2822_v34, %v2826_v38  ;;  %v6855_v53 = vcombine.high %v2822_v34, %v2826_v38 }
 0x267   :  { %4298 = vmatpush1.bf16.msra.mxu0 %v6804_v56  ;;  %v8170_v56 = vld [vmem:[#allocation10 + $0x408] sm:$0xff] }
 0x268   :  { %4384 = vmatpush1.bf16.msra.mxu1 %v6806_v59  ;;  %4299 = vmatprep.subr.bf16.mxu0 %v6813_v60  ;;  %v6861_v59 = vcombine.high %v8166_v54, %v8168_v55  ;;  %v8174_v60 = vld [vmem:[#allocation10 + $0x428] sm:$0xff] }
 0x269   :  { %4385 = vmatprep.subr.bf16.mxu1 %v6815_v48  ;;  %v6860_v48 = vcombine.low %v8166_v54, %v8168_v55  ;;  %v6862_v61 = vcombine.low %v8170_v56, %v8174_v60  ;;  %v6863_v62 = vcombine.high %v8170_v56, %v8174_v60 }
 0x26b   :  { %4300 = vmatpush1.bf16.msra.mxu0 %v6812_v1  ;;  %v1028_v1 = vrot.slane %v1015_v10, %v8125_v35 }
 0x26c   :  { %4386 = vmatpush1.bf16.msra.mxu1 %v6814_v2  ;;  %4301 = vmatprep.subr.bf16.mxu0 %v6821_v3  ;;  %v1024_v2 = vrot.slane %v1015_v10, %v8089_v18  ;;  %v1032_v3 = vrot.slane %v1015_v10, %v8131_v41 }
 0x26d   :  { %4387 = vmatprep.subr.bf16.mxu1 %v6823_v4  ;;  %v1036_v4 = vrot.slane %v1015_v10, %v8086_v17 }
 0x26f   :  { %4302 = vmatpush1.bf16.msra.mxu0 %v6820_v9 }
 0x270   :  { %4388 = vmatpush1.bf16.msra.mxu1 %v6822_v11  ;;  %4303 = vmatprep.subr.bf16.mxu0 %v6829_v12 }
 0x271   :  { %4389 = vmatprep.subr.bf16.mxu1 %v6831_v42 }
 0x273   :  { %4304 = vmatpush1.bf16.msra.mxu0 %v6828_v43 }
 0x274   :  { %4390 = vmatpush1.bf16.msra.mxu1 %v6830_v44  ;;  %4305 = vmatprep.subr.bf16.mxu0 %v6837_v50 }
 0x275   :  { %4391 = vmatprep.subr.bf16.mxu1 %v6839_v22 }
 0x277   :  { %4306 = vmatpush1.bf16.msra.mxu0 %v6836_v20 }
 0x278   :  { %4392 = vmatpush1.bf16.msra.mxu1 %v6838_v21  ;;  %4307 = vmatprep.subr.bf16.mxu0 %v6845_v29 }
 0x279   :  { %4393 = vmatprep.subr.bf16.mxu1 %v6847_v46 }
 0x27b   :  { %4308 = vmatpush1.bf16.msra.mxu0 %v6844_v31 }
 0x27c   :  { %4394 = vmatpush1.bf16.msra.mxu1 %v6846_v49  ;;  %4309 = vmatprep.subr.bf16.mxu0 %v6853_v0 }
 0x27d   :  { %4395 = vmatprep.subr.bf16.mxu1 %v6855_v53 }
 0x27f   :  { %4310 = vmatpush1.bf16.msra.mxu0 %v6852_v40 }
 0x280   :  { %4396 = vmatpush1.bf16.msra.mxu1 %v6854_v52  ;;  %4322 = vmatprep.subr.bf16.mxu0 %v6861_v59  ;;  %v2837_v59 = vld [vmem:[#allocation10 + $0x440] sm:$0xff] }
 0x281   :  { %4408 = vmatprep.subr.bf16.mxu1 %v6863_v62 }
 0x295   :  { %v2414_v13 = vpop.f32.mrb[4].mxu0  ;;  %v2500_v14 = vpop.f32.mrb[12].mxu1 }
 0x296   :  { %v2416_v23 = vpop.f32.mrb[5].mxu0  ;;  %v2502_v36 = vpop.f32.mrb[13].mxu1  ;;  %v7265_v8 = vadd.f32 %v2414_v13, %v1020_v63  ;;  %v7269_v11 = vadd.f32 %v2500_v14, %v1028_v1 }
 0x297   :  { %v2418_v24 = vpop.f32.mrb[6].mxu0  ;;  %v2504_v25 = vpop.f32.mrb[14].mxu1  ;;  %v7266_v12 = vadd.f32 %v2416_v23, %v1024_v2  ;;  %v7270_v42 = vadd.f32 %v2502_v36, %v1032_v3 }
 0x298   :  { %v2420_v27 = vpop.f32.mrb[7].mxu0  ;;  %v8164_v28 = vpop.f32.mrb[15].mxu1  ;;  %v7267_v58 = vadd.f32 %v2418_v24, %v1020_v63  ;;  %v7271_v47 = vadd.f32 %v2504_v25, %v1028_v1  ;;  %v2841_v1 = vld [vmem:[#allocation10 + $0x460] sm:$0xff] }
 0x299   :  { %v7268_v22 = vadd.f32 %v2420_v27, %v1024_v2  ;;  %v7272_v49 = vadd.f32 %v8164_v28, %v1032_v3  ;;  %v2838_v2 = vld [vmem:[#allocation10 + $0x448] sm:$0xff] }
 0x29a   :  { %v2842_v28 = vld [vmem:[#allocation10 + $0x468] sm:$0xff] }
 0x315   :  { %v2586_v9 = vpop.f32.mrb[8].mxu0 }
 0x316   :  { %v7273_v43 = vadd.f32 %v2586_v9, %v1036_v4  ;;  %v2672_v44 = vpop.f32.mrb[16].mxu1  ;;  %v2588_v16 = vpop.f32.mrb[9].mxu0  ;;  %v2849_v9 = vld [vmem:[#allocation10 + $0x4a0] sm:$0xff] }
 0x317   :  { %v7277_v50 = vadd.f32 %v2672_v44, %v1044_v5  ;;  %v7274_v51 = vadd.f32 %v2588_v16, %v1040_v6  ;;  %v2674_v20 = vpop.f32.mrb[17].mxu1  ;;  %v2590_v21 = vpop.f32.mrb[10].mxu0 }
 0x318   :  { %v2681_v26 = vmax.f32 %v7265_v8, %v7273_v43  ;;  %v7278_v39 = vadd.f32 %v2674_v20, %v1048_v7  ;;  %v7275_v57 = vadd.f32 %v2590_v21, %v1036_v4  ;;  %v2676_v29 = vpop.f32.mrb[18].mxu1  ;;  %v2592_v30 = vpop.f32.mrb[11].mxu0  ;;  %v6871_v8 = vcombine.high %v2838_v2, %v2842_v28  ;;  %v2862_v20 = vld [vmem:[#allocation10 + $0x508] sm:$0xff] }
 0x319   :  { %v2683_v13 = vmax.f32 %v7269_v11, %v7277_v50  ;;  %v2682_v31 = vmax.f32 %v7266_v12, %v7274_v51  ;;  %v7279_v14 = vadd.f32 %v2676_v29, %v1044_v5  ;;  %v7276_v23 = vadd.f32 %v2592_v30, %v1040_v6  ;;  %v2678_v36 = vpop.f32.mrb[19].mxu1  ;;  %v2845_v6 = vld [vmem:[#allocation10 + $0x480] sm:$0xff]  ;;  %v2846_v11 = vld [vmem:[#allocation10 + $0x488] sm:$0xff] }
 0x31a   :  { %v2684_v46 = vmax.f32 %v7270_v42, %v7278_v39  ;;  %v2685_v24 = vmax.f32 %v7267_v58, %v7275_v57  ;;  %v7280_v25 = vadd.f32 %v2678_v36, %v1048_v7  ;;  %v2689_v34 = vmax.f32 %v2681_v26, 0.0  ;;  %v2850_v12 = vld [vmem:[#allocation10 + $0x4a8] sm:$0xff]  ;;  %v2853_v58 = vld [vmem:[#allocation10 + $0x4c0] sm:$0xff] }
 0x31b   :  { %v2687_v32 = vmax.f32 %v7271_v47, %v7279_v14  ;;  %v2686_v33 = vmax.f32 %v7268_v22, %v7276_v23  ;;  %v2691_v38 = vmax.f32 %v2683_v13, 0.0  ;;  %v2690_v40 = vmax.f32 %v2682_v31, 0.0  ;;  %v2857_v47 = vld [vmem:[#allocation10 + $0x4e0] sm:$0xff]  ;;  %v2854_v50 = vld [vmem:[#allocation10 + $0x4c8] sm:$0xff] }
 0x31c   :  { %v2693_v0 = vmax.f32 %v2685_v24, 0.0  ;;  %v2688_v27 = vmax.f32 %v7272_v49, %v7280_v25  ;;  %v2692_v62 = vmax.f32 %v2684_v46, 0.0  ;;  %v6869_v7 = vcombine.high %v2837_v59, %v2841_v1  ;;  %v2858_v51 = vld [vmem:[#allocation10 + $0x4e8] sm:$0xff]  ;;  %v2869_v29 = vld [vmem:[#allocation10 + $0x540] sm:$0xff] }
 0x31d   :  { %v2695_v52 = vmax.f32 %v2687_v32, 0.0  ;;  %v2694_v53 = vmax.f32 %v2686_v33, 0.0  ;;  %v6868_v42 = vcombine.low %v2837_v59, %v2841_v1  ;;  %v6870_v43 = vcombine.low %v2838_v2, %v2842_v28  ;;  %v2866_v21 = vld [vmem:[#allocation10 + $0x528] sm:$0xff]  ;;  %v2873_v30 = vld [vmem:[#allocation10 + $0x560] sm:$0xff] }
 0x31e   :  { %v8194_v10 = vpack.c.bf16 %v2693_v0, %v2689_v34  ;;  %v2696_v63 = vmax.f32 %v2688_v27, 0.0  ;;  %v6877_v44 = vcombine.high %v2845_v6, %v2849_v9  ;;  %v6879_v16 = vcombine.high %v2846_v11, %v2850_v12  ;;  %v2870_v13 = vld [vmem:[#allocation10 + $0x548] sm:$0xff]  ;;  %v2877_v46 = vld [vmem:[#allocation10 + $0x580] sm:$0xff] }
 0x31f   :  { %v8196_v3 = vpack.c.bf16 %v2695_v52, %v2691_v38  ;;  %v8198_v4 = vpack.c.bf16 %v2694_v53, %v2690_v40  ;;  %v6876_v54 = vcombine.low %v2845_v6, %v2849_v9  ;;  %v6878_v55 = vcombine.low %v2846_v11, %v2850_v12  ;;  %v2874_v31 = vld [vmem:[#allocation10 + $0x568] sm:$0xff]  ;;  %v2881_v24 = vld [vmem:[#allocation10 + $0x5a0] sm:$0xff] }
 0x320   :  { %v8200_v5 = vpack.c.bf16 %v2696_v63, %v2692_v62  ;;  %v6885_v56 = vcombine.high %v2853_v58, %v2857_v47  ;;  %v6887_v60 = vcombine.high %v2854_v50, %v2858_v51  ;;  %v6884_v22 = vcombine.low %v2853_v58, %v2857_v47  ;;  %v2878_v25 = vld [vmem:[#allocation10 + $0x588] sm:$0xff]  ;;  %v2885_v38 = vld [vmem:[#allocation10 + $0x5c0] sm:$0xff] }
 0x321   :  { %4311 = vmatprep.mubr.bf16.mxu0 %v8198_v4  ;;  %4397 = vmatprep.mubr.bf16.mxu1 %v8198_v4  ;;  %v6886_v26 = vcombine.low %v2854_v50, %v2858_v51  ;;  %v6895_v57 = vcombine.high %v2862_v20, %v2866_v21  ;;  %v6894_v23 = vcombine.low %v2862_v20, %v2866_v21  ;;  %v2882_v32 = vld [vmem:[#allocation10 + $0x5a8] sm:$0xff]  ;;  %v2889_v40 = vld [vmem:[#allocation10 + $0x5e0] sm:$0xff] }
 0x322   :  { %4312 = vmatmul.mubr.bf16.vlgmr.msra.gmra.mrb[12].mxu0 %v8194_v10  ;;  %4398 = vmatmul.mubr.bf16.vlgmr.msra.gmra.mrb[20].mxu1 %v8194_v10  ;;  %v6901_v36 = vcombine.high %v2869_v29, %v2873_v30  ;;  %v6903_v49 = vcombine.high %v2870_v13, %v2874_v31  ;;  %v6900_v33 = vcombine.low %v2869_v29, %v2873_v30  ;;  %v2886_v52 = vld [vmem:[#allocation10 + $0x5c8] sm:$0xff]  ;;  %v2893_v2 = vld [vmem:[#allocation10 + $0x600] sm:$0xff] }
 0x323   :  { %4323 = vmatpush1.bf16.msra.mxu0 %v6860_v48  ;;  %4409 = vmatpush1.bf16.msra.mxu1 %v6862_v61  ;;  %v2861_v48 = vld [vmem:[#allocation10 + $0x500] sm:$0xff]  ;;  %v6902_v34 = vcombine.low %v2870_v13, %v2874_v31  ;;  %v6909_v0 = vcombine.high %v2877_v46, %v2881_v24  ;;  %v6911_v27 = vcombine.high %v2878_v25, %v2882_v32  ;;  %v2890_v53 = vld [vmem:[#allocation10 + $0x5e8] sm:$0xff] }
 0x324   :  { %4354 = vmatprep.mubr.bf16.mxu0 %v8200_v5  ;;  %4440 = vmatprep.mubr.bf16.mxu1 %v8200_v5  ;;  %v2865_v61 = vld [vmem:[#allocation10 + $0x520] sm:$0xff]  ;;  %v6908_v59 = vcombine.low %v2877_v46, %v2881_v24  ;;  %v6910_v62 = vcombine.low %v2878_v25, %v2882_v32  ;;  %v6917_v63 = vcombine.high %v2885_v38, %v2889_v40  ;;  %v2894_v6 = vld [vmem:[#allocation10 + $0x608] sm:$0xff] }
 0x325   :  { %4324 = vmatprep.subr.bf16.mxu0 %v6869_v7  ;;  %4410 = vmatprep.subr.bf16.mxu1 %v6871_v8  ;;  %v6893_v39 = vcombine.high %v2861_v48, %v2865_v61  ;;  %v6892_v14 = vcombine.low %v2861_v48, %v2865_v61  ;;  %v6919_v1 = vcombine.high %v2886_v52, %v2890_v53  ;;  %v2897_v28 = vld [vmem:[#allocation10 + $0x620] sm:$0xff]  ;;  %v2898_v7 = vld [vmem:[#allocation10 + $0x628] sm:$0xff] }
 0x326   :  { %v6916_v8 = vcombine.low %v2885_v38, %v2889_v40  ;;  %v6918_v9 = vcombine.low %v2886_v52, %v2890_v53  ;;  %v6925_v11 = vcombine.high %v2893_v2, %v2897_v28  ;;  %v6927_v12 = vcombine.high %v2894_v6, %v2898_v7 }
 0x327   :  { %4325 = vmatpush1.bf16.msra.mxu0 %v6868_v42  ;;  %4411 = vmatpush1.bf16.msra.mxu1 %v6870_v43  ;;  %v2901_v42 = vld [vmem:[#allocation10 + $0x640] sm:$0xff]  ;;  %v6924_v58 = vcombine.low %v2893_v2, %v2897_v28  ;;  %v6926_v47 = vcombine.low %v2894_v6, %v2898_v7 }
 0x328   :  { %4326 = vmatprep.subr.bf16.mxu0 %v6877_v44  ;;  %4412 = vmatprep.subr.bf16.mxu1 %v6879_v16  ;;  %v2905_v43 = vld [vmem:[#allocation10 + $0x660] sm:$0xff]  ;;  %v2902_v44 = vld [vmem:[#allocation10 + $0x648] sm:$0xff] }
 0x329   :  { %v2906_v16 = vld [vmem:[#allocation10 + $0x668] sm:$0xff]  ;;  %v6933_v50 = vcombine.high %v2901_v42, %v2905_v43  ;;  %v6932_v48 = vcombine.low %v2901_v42, %v2905_v43 }
 0x32a   :  { %v6935_v51 = vcombine.high %v2902_v44, %v2906_v16  ;;  %v6934_v61 = vcombine.low %v2902_v44, %v2906_v16 }
 0x32b   :  { %4327 = vmatpush1.bf16.msra.mxu0 %v6876_v54  ;;  %4413 = vmatpush1.bf16.msra.mxu1 %v6878_v55  ;;  %v2909_v54 = vld [vmem:[#allocation10 + $0x680] sm:$0xff] }
 0x32c   :  { %4328 = vmatprep.subr.bf16.mxu0 %v6885_v56  ;;  %4414 = vmatprep.subr.bf16.mxu1 %v6887_v60  ;;  %v2913_v55 = vld [vmem:[#allocation10 + $0x6a0] sm:$0xff]  ;;  %v2910_v56 = vld [vmem:[#allocation10 + $0x688] sm:$0xff] }
 0x32d   :  { %v2914_v60 = vld [vmem:[#allocation10 + $0x6a8] sm:$0xff]  ;;  %v6941_v20 = vcombine.high %v2909_v54, %v2913_v55  ;;  %v6940_v29 = vcombine.low %v2909_v54, %v2913_v55 }
 0x32e   :  { %v6943_v21 = vcombine.high %v2910_v56, %v2914_v60  ;;  %v6942_v30 = vcombine.low %v2910_v56, %v2914_v60 }
 0x32f   :  { %4329 = vmatpush1.bf16.msra.mxu0 %v6884_v22  ;;  %4415 = vmatpush1.bf16.msra.mxu1 %v6886_v26  ;;  %v2917_v22 = vld [vmem:[#allocation10 + $0x6c0] sm:$0xff] }
 0x330   :  { %4330 = vmatprep.subr.bf16.mxu0 %v6893_v39  ;;  %4416 = vmatprep.subr.bf16.mxu1 %v6895_v57  ;;  %v2921_v26 = vld [vmem:[#allocation10 + $0x6e0] sm:$0xff]  ;;  %v2918_v39 = vld [vmem:[#allocation10 + $0x6c8] sm:$0xff] }
 0x331   :  { %v2922_v57 = vld [vmem:[#allocation10 + $0x6e8] sm:$0xff]  ;;  %v6949_v13 = vcombine.high %v2917_v22, %v2921_v26  ;;  %v6948_v46 = vcombine.low %v2917_v22, %v2921_v26 }
 0x332   :  { %v6951_v31 = vcombine.high %v2918_v39, %v2922_v57  ;;  %v6950_v24 = vcombine.low %v2918_v39, %v2922_v57 }
 0x333   :  { %4331 = vmatpush1.bf16.msra.mxu0 %v6892_v14  ;;  %4417 = vmatpush1.bf16.msra.mxu1 %v6894_v23  ;;  %v2925_v14 = vld [vmem:[#allocation10 + $0x700] sm:$0xff] }
 0x334   :  { %4332 = vmatprep.subr.bf16.mxu0 %v6901_v36  ;;  %4418 = vmatprep.subr.bf16.mxu1 %v6903_v49  ;;  %v2929_v23 = vld [vmem:[#allocation10 + $0x720] sm:$0xff]  ;;  %v2926_v36 = vld [vmem:[#allocation10 + $0x708] sm:$0xff] }
 0x335   :  { %v2930_v49 = vld [vmem:[#allocation10 + $0x728] sm:$0xff]  ;;  %v6957_v25 = vcombine.high %v2925_v14, %v2929_v23  ;;  %v6956_v38 = vcombine.low %v2925_v14, %v2929_v23 }
 0x336   :  { %v6959_v32 = vcombine.high %v2926_v36, %v2930_v49  ;;  %v6958_v40 = vcombine.low %v2926_v36, %v2930_v49 }
 0x337   :  { %4333 = vmatpush1.bf16.msra.mxu0 %v6900_v33  ;;  %4419 = vmatpush1.bf16.msra.mxu1 %v6902_v34  ;;  %v2933_v33 = vld [vmem:[#allocation10 + $0x740] sm:$0xff] }
 0x338   :  { %4334 = vmatprep.subr.bf16.mxu0 %v6909_v0  ;;  %4420 = vmatprep.subr.bf16.mxu1 %v6911_v27  ;;  %v2937_v34 = vld [vmem:[#allocation10 + $0x760] sm:$0xff]  ;;  %v2934_v0 = vld [vmem:[#allocation10 + $0x748] sm:$0xff] }
 0x339   :  { %v2938_v27 = vld [vmem:[#allocation10 + $0x768] sm:$0xff]  ;;  %v6965_v52 = vcombine.high %v2933_v33, %v2937_v34  ;;  %v6964_v2 = vcombine.low %v2933_v33, %v2937_v34 }
 0x33a   :  { %v6967_v53 = vcombine.high %v2934_v0, %v2938_v27  ;;  %v6966_v28 = vcombine.low %v2934_v0, %v2938_v27 }
 0x33b   :  { %4335 = vmatpush1.bf16.msra.mxu0 %v6908_v59  ;;  %4421 = vmatpush1.bf16.msra.mxu1 %v6910_v62  ;;  %v2941_v59 = vld [vmem:[#allocation10 + $0x780] sm:$0xff] }
 0x33c   :  { %4336 = vmatprep.subr.bf16.mxu0 %v6917_v63  ;;  %4422 = vmatprep.subr.bf16.mxu1 %v6919_v1  ;;  %v2945_v62 = vld [vmem:[#allocation10 + $0x7a0] sm:$0xff]  ;;  %v2942_v63 = vld [vmem:[#allocation10 + $0x788] sm:$0xff] }
 0x33d   :  { %v2946_v1 = vld [vmem:[#allocation10 + $0x7a8] sm:$0xff]  ;;  %v6973_v6 = vcombine.high %v2941_v59, %v2945_v62  ;;  %v6972_v42 = vcombine.low %v2941_v59, %v2945_v62 }
 0x33e   :  { %v6975_v7 = vcombine.high %v2942_v63, %v2946_v1  ;;  %v6974_v43 = vcombine.low %v2942_v63, %v2946_v1  ;;  %v2743_v1 = vld [vmem:[#allocation10 + $0x150] sm:$0xff] }
 0x33f   :  { %4337 = vmatpush1.bf16.msra.mxu0 %v6916_v8  ;;  %4423 = vmatpush1.bf16.msra.mxu1 %v6918_v9  ;;  %v2949_v8 = vld [vmem:[#allocation10 + $0x7c0] sm:$0xff] }
 0x340   :  { %4338 = vmatprep.subr.bf16.mxu0 %v6925_v11  ;;  %4424 = vmatprep.subr.bf16.mxu1 %v6927_v12  ;;  %v2953_v9 = vld [vmem:[#allocation10 + $0x7e0] sm:$0xff]  ;;  %v2950_v11 = vld [vmem:[#allocation10 + $0x7c8] sm:$0xff] }
 0x341   :  { %v2954_v12 = vld [vmem:[#allocation10 + $0x7e8] sm:$0xff]  ;;  %v6981_v44 = vcombine.high %v2949_v8, %v2953_v9  ;;  %v6980_v54 = vcombine.low %v2949_v8, %v2953_v9 }
 0x342   :  { %v6983_v16 = vcombine.high %v2950_v11, %v2954_v12  ;;  %v6982_v55 = vcombine.low %v2950_v11, %v2954_v12  ;;  %v2751_v12 = vld [vmem:[#allocation10 + $0x190] sm:$0xff] }
 0x343   :  { %4339 = vmatpush1.bf16.msra.mxu0 %v6924_v58  ;;  %4425 = vmatpush1.bf16.msra.mxu1 %v6926_v47  ;;  %v2703_v58 = vld [vmem:[#allocation10 + $0x10] sm:$0xff] }
 0x344   :  { %4340 = vmatprep.subr.bf16.mxu0 %v6933_v50  ;;  %4426 = vmatprep.subr.bf16.mxu1 %v6935_v51  ;;  %v2707_v47 = vld [vmem:[#allocation10 + $0x30] sm:$0xff]  ;;  %v2704_v50 = vld [vmem:[#allocation10 + $0x18] sm:$0xff] }
 0x345   :  { %v2708_v51 = vld [vmem:[#allocation10 + $0x38] sm:$0xff]  ;;  %v6737_v56 = vcombine.high %v2703_v58, %v2707_v47  ;;  %v6736_v22 = vcombine.low %v2703_v58, %v2707_v47 }
 0x346   :  { %v6739_v60 = vcombine.high %v2704_v50, %v2708_v51  ;;  %v6738_v26 = vcombine.low %v2704_v50, %v2708_v51  ;;  %v2759_v51 = vld [vmem:[#allocation10 + $0x1d0] sm:$0xff] }
 0x347   :  { %4341 = vmatpush1.bf16.msra.mxu0 %v6932_v48  ;;  %4427 = vmatpush1.bf16.msra.mxu1 %v6934_v61  ;;  %v2711_v48 = vld [vmem:[#allocation10 + $0x50] sm:$0xff] }
 0x348   :  { %4342 = vmatprep.subr.bf16.mxu0 %v6941_v20  ;;  %4428 = vmatprep.subr.bf16.mxu1 %v6943_v21  ;;  %v2715_v61 = vld [vmem:[#allocation10 + $0x70] sm:$0xff]  ;;  %v2712_v20 = vld [vmem:[#allocation10 + $0x58] sm:$0xff] }
 0x349   :  { %v2716_v21 = vld [vmem:[#allocation10 + $0x78] sm:$0xff]  ;;  %v6745_v39 = vcombine.high %v2711_v48, %v2715_v61  ;;  %v6744_v14 = vcombine.low %v2711_v48, %v2715_v61 }
 0x34a   :  { %v6747_v57 = vcombine.high %v2712_v20, %v2716_v21  ;;  %v6746_v23 = vcombine.low %v2712_v20, %v2716_v21  ;;  %v2767_v21 = vld [vmem:[#allocation10 + $0x210] sm:$0xff] }
 0x34b   :  { %4343 = vmatpush1.bf16.msra.mxu0 %v6940_v29  ;;  %4429 = vmatpush1.bf16.msra.mxu1 %v6942_v30  ;;  %v2719_v29 = vld [vmem:[#allocation10 + $0x90] sm:$0xff] }
 0x34c   :  { %4344 = vmatprep.subr.bf16.mxu0 %v6949_v13  ;;  %4430 = vmatprep.subr.bf16.mxu1 %v6951_v31  ;;  %v2723_v30 = vld [vmem:[#allocation10 + $0xb0] sm:$0xff]  ;;  %v2720_v13 = vld [vmem:[#allocation10 + $0x98] sm:$0xff] }
 0x34d   :  { %v2724_v31 = vld [vmem:[#allocation10 + $0xb8] sm:$0xff]  ;;  %v6753_v36 = vcombine.high %v2719_v29, %v2723_v30  ;;  %v6752_v33 = vcombine.low %v2719_v29, %v2723_v30 }
 0x34e   :  { %v6755_v49 = vcombine.high %v2720_v13, %v2724_v31  ;;  %v6754_v34 = vcombine.low %v2720_v13, %v2724_v31  ;;  %v2775_v31 = vld [vmem:[#allocation10 + $0x250] sm:$0xff] }
 0x34f   :  { %4345 = vmatpush1.bf16.msra.mxu0 %v6948_v46  ;;  %4431 = vmatpush1.bf16.msra.mxu1 %v6950_v24  ;;  %v2727_v46 = vld [vmem:[#allocation10 + $0xd0] sm:$0xff] }
 0x350   :  { %4346 = vmatprep.subr.bf16.mxu0 %v6957_v25  ;;  %4432 = vmatprep.subr.bf16.mxu1 %v6959_v32  ;;  %v2731_v24 = vld [vmem:[#allocation10 + $0xf0] sm:$0xff]  ;;  %v2728_v25 = vld [vmem:[#allocation10 + $0xd8] sm:$0xff] }
 0x351   :  { %v2732_v32 = vld [vmem:[#allocation10 + $0xf8] sm:$0xff]  ;;  %v6761_v0 = vcombine.high %v2727_v46, %v2731_v24 }
 0x352   :  { %v6763_v27 = vcombine.high %v2728_v25, %v2732_v32  ;;  %v6762_v59 = vcombine.low %v2728_v25, %v2732_v32  ;;  %v2783_v32 = vld [vmem:[#allocation10 + $0x290] sm:$0xff] }
 0x353   :  { %4347 = vmatpush1.bf16.msra.mxu0 %v6956_v38  ;;  %4433 = vmatpush1.bf16.msra.mxu1 %v6958_v40  ;;  %v2735_v38 = vld [vmem:[#allocation10 + $0x110] sm:$0xff] }
 0x354   :  { %4348 = vmatprep.subr.bf16.mxu0 %v6965_v52  ;;  %4434 = vmatprep.subr.bf16.mxu1 %v6967_v53  ;;  %v2739_v40 = vld [vmem:[#allocation10 + $0x130] sm:$0xff]  ;;  %v2740_v52 = vld [vmem:[#allocation10 + $0x138] sm:$0xff]  ;;  %v6760_v53 = vcombine.low %v2727_v46, %v2731_v24 }
 0x355   :  { %v6769_v62 = vcombine.high %v2735_v38, %v2739_v40 }
 0x357   :  { %4349 = vmatpush1.bf16.msra.mxu0 %v6964_v2  ;;  %4435 = vmatpush1.bf16.msra.mxu1 %v6966_v28  ;;  %v2747_v2 = vld [vmem:[#allocation10 + $0x170] sm:$0xff]  ;;  %v2744_v28 = vld [vmem:[#allocation10 + $0x158] sm:$0xff] }
 0x358   :  { %4350 = vmatprep.subr.bf16.mxu0 %v6973_v6  ;;  %4436 = vmatprep.subr.bf16.mxu1 %v6975_v7  ;;  %v2748_v6 = vld [vmem:[#allocation10 + $0x178] sm:$0xff]  ;;  %v6768_v7 = vcombine.low %v2735_v38, %v2739_v40  ;;  %v6777_v9 = vcombine.high %v2743_v1, %v2747_v2 }
 0x359   :  { %v6779_v11 = vcombine.high %v2744_v28, %v2748_v6  ;;  %v6778_v58 = vcombine.low %v2744_v28, %v2748_v6  ;;  %v2799_v6 = vld [vmem:[#allocation10 + $0x310] sm:$0xff] }
 0x35b   :  { %4351 = vmatpush1.bf16.msra.mxu0 %v6972_v42  ;;  %4437 = vmatpush1.bf16.msra.mxu1 %v6974_v43  ;;  %v2755_v42 = vld [vmem:[#allocation10 + $0x1b0] sm:$0xff]  ;;  %v2752_v43 = vld [vmem:[#allocation10 + $0x198] sm:$0xff] }
 0x35c   :  { %4352 = vmatprep.subr.bf16.mxu0 %v6981_v44  ;;  %4438 = vmatprep.subr.bf16.mxu1 %v6983_v16  ;;  %v2756_v44 = vld [vmem:[#allocation10 + $0x1b8] sm:$0xff]  ;;  %v6776_v16 = vcombine.low %v2743_v1, %v2747_v2  ;;  %v6785_v47 = vcombine.high %v2751_v12, %v2755_v42 }
 0x35d   :  { %v6787_v50 = vcombine.high %v2752_v43, %v2756_v44  ;;  %v6786_v48 = vcombine.low %v2752_v43, %v2756_v44  ;;  %v2807_v44 = vld [vmem:[#allocation10 + $0x350] sm:$0xff] }
 0x35f   :  { %4353 = vmatpush1.bf16.msra.mxu0 %v6980_v54  ;;  %4439 = vmatpush1.bf16.msra.mxu1 %v6982_v55  ;;  %v2763_v54 = vld [vmem:[#allocation10 + $0x1f0] sm:$0xff]  ;;  %v2760_v55 = vld [vmem:[#allocation10 + $0x1d8] sm:$0xff] }
 0x360   :  { %4451 = vmatprep.subr.bf16.mxu0 %v6737_v56  ;;  %4537 = vmatprep.subr.bf16.mxu1 %v6739_v60  ;;  %v2764_v56 = vld [vmem:[#allocation10 + $0x1f8] sm:$0xff]  ;;  %v6784_v60 = vcombine.low %v2751_v12, %v2755_v42  ;;  %v6793_v61 = vcombine.high %v2759_v51, %v2763_v54 }
 0x361   :  { %v6795_v20 = vcombine.high %v2760_v55, %v2764_v56  ;;  %v6794_v29 = vcombine.low %v2760_v55, %v2764_v56  ;;  %v2815_v56 = vld [vmem:[#allocation10 + $0x390] sm:$0xff] }
 0x362   :  { %4355 = vmatmul.mubr.bf16.vlgmr.msra.gmra.mrb[12].mxu0 %v8196_v3  ;;  %4441 = vmatmul.mubr.bf16.vlgmr.msra.gmra.mrb[20].mxu1 %v8196_v3 }
 0x363   :  { %4452 = vmatpush1.bf16.msra.mxu0 %v6736_v22  ;;  %4483 = vmatprep.mubr.bf16.mxu0 %v8198_v4  ;;  %v2771_v22 = vld [vmem:[#allocation10 + $0x230] sm:$0xff] }
 0x364   :  { %4538 = vmatpush1.bf16.msra.mxu1 %v6738_v26  ;;  %4569 = vmatprep.mubr.bf16.mxu1 %v8198_v4  ;;  %v2736_v4 = vld [vmem:[#allocation10 + $0x118] sm:$0xff]  ;;  %v6801_v30 = vcombine.high %v2767_v21, %v2771_v22 }
 0x365   :  { %4453 = vmatprep.subr.bf16.mxu0 %v6745_v39  ;;  %4539 = vmatprep.subr.bf16.mxu1 %v6747_v57  ;;  %v6771_v63 = vcombine.high %v2736_v4, %v2740_v52  ;;  %v6770_v8 = vcombine.low %v2736_v4, %v2740_v52  ;;  %v2768_v26 = vld [vmem:[#allocation10 + $0x218] sm:$0xff]  ;;  %v6792_v57 = vcombine.low %v2759_v51, %v2763_v54  ;;  %v2791_v52 = vld [vmem:[#allocation10 + $0x2d0] sm:$0xff] }
 0x366   :  { %v2772_v39 = vld [vmem:[#allocation10 + $0x238] sm:$0xff] }
 0x367   :  { %4454 = vmatpush1.bf16.msra.mxu0 %v6744_v14  ;;  %v6803_v13 = vcombine.high %v2768_v26, %v2772_v39  ;;  %v2779_v14 = vld [vmem:[#allocation10 + $0x270] sm:$0xff]  ;;  %v6802_v46 = vcombine.low %v2768_v26, %v2772_v39 }
 0x368   :  { %4540 = vmatpush1.bf16.msra.mxu1 %v6746_v23  ;;  %4455 = vmatprep.subr.bf16.mxu0 %v6753_v36  ;;  %v2776_v23 = vld [vmem:[#allocation10 + $0x258] sm:$0xff]  ;;  %v6809_v24 = vcombine.high %v2775_v31, %v2779_v14  ;;  %v2823_v39 = vld [vmem:[#allocation10 + $0x3d0] sm:$0xff] }
 0x369   :  { %4541 = vmatprep.subr.bf16.mxu1 %v6755_v49  ;;  %v2780_v36 = vld [vmem:[#allocation10 + $0x278] sm:$0xff]  ;;  %v6800_v49 = vcombine.low %v2767_v21, %v2771_v22 }
 0x36a   :  { %v6811_v25 = vcombine.high %v2776_v23, %v2780_v36  ;;  %v6810_v38 = vcombine.low %v2776_v23, %v2780_v36  ;;  %v2831_v36 = vld [vmem:[#allocation10 + $0x410] sm:$0xff] }
 0x36b   :  { %4456 = vmatpush1.bf16.msra.mxu0 %v6752_v33  ;;  %v2787_v33 = vld [vmem:[#allocation10 + $0x2b0] sm:$0xff] }
 0x36c   :  { %4542 = vmatpush1.bf16.msra.mxu1 %v6754_v34  ;;  %4457 = vmatprep.subr.bf16.mxu0 %v6761_v0  ;;  %v2784_v34 = vld [vmem:[#allocation10 + $0x298] sm:$0xff]  ;;  %v6817_v40 = vcombine.high %v2783_v32, %v2787_v33 }
 0x36d   :  { %4543 = vmatprep.subr.bf16.mxu1 %v6763_v27  ;;  %v2788_v0 = vld [vmem:[#allocation10 + $0x2b8] sm:$0xff]  ;;  %v6808_v27 = vcombine.low %v2775_v31, %v2779_v14 }
 0x36e   :  { %v6819_v4 = vcombine.high %v2784_v34, %v2788_v0  ;;  %v6818_v1 = vcombine.low %v2784_v34, %v2788_v0  ;;  %v2839_v0 = vld [vmem:[#allocation10 + $0x450] sm:$0xff] }
 0x36f   :  { %4458 = vmatpush1.bf16.msra.mxu0 %v6760_v53  ;;  %v2795_v53 = vld [vmem:[#allocation10 + $0x2f0] sm:$0xff] }
 0x370   :  { %4544 = vmatpush1.bf16.msra.mxu1 %v6762_v59  ;;  %4459 = vmatprep.subr.bf16.mxu0 %v6769_v62  ;;  %v2792_v59 = vld [vmem:[#allocation10 + $0x2d8] sm:$0xff]  ;;  %v6825_v2 = vcombine.high %v2791_v52, %v2795_v53 }
 0x371   :  { %4545 = vmatprep.subr.bf16.mxu1 %v6771_v63  ;;  %v2796_v62 = vld [vmem:[#allocation10 + $0x2f8] sm:$0xff]  ;;  %v6816_v63 = vcombine.low %v2783_v32, %v2787_v33 }
 0x372   :  { %v6827_v28 = vcombine.high %v2792_v59, %v2796_v62  ;;  %v6826_v12 = vcombine.low %v2792_v59, %v2796_v62  ;;  %v2847_v59 = vld [vmem:[#allocation10 + $0x490] sm:$0xff] }
 0x373   :  { %4460 = vmatpush1.bf16.msra.mxu0 %v6768_v7  ;;  %v2803_v7 = vld [vmem:[#allocation10 + $0x330] sm:$0xff] }
 0x374   :  { %4546 = vmatpush1.bf16.msra.mxu1 %v6770_v8  ;;  %4461 = vmatprep.subr.bf16.mxu0 %v6777_v9  ;;  %v2800_v8 = vld [vmem:[#allocation10 + $0x318] sm:$0xff]  ;;  %v6833_v42 = vcombine.high %v2799_v6, %v2803_v7  ;;  %v2851_v62 = vld [vmem:[#allocation10 + $0x4b0] sm:$0xff] }
 0x375   :  { %4547 = vmatprep.subr.bf16.mxu1 %v6779_v11  ;;  %v2804_v9 = vld [vmem:[#allocation10 + $0x338] sm:$0xff]  ;;  %v6824_v11 = vcombine.low %v2791_v52, %v2795_v53 }
 0x376   :  { %v6835_v43 = vcombine.high %v2800_v8, %v2804_v9  ;;  %v6834_v51 = vcombine.low %v2800_v8, %v2804_v9  ;;  %v2855_v9 = vld [vmem:[#allocation10 + $0x4d0] sm:$0xff] }
 0x377   :  { %4462 = vmatpush1.bf16.msra.mxu0 %v6776_v16  ;;  %v2811_v16 = vld [vmem:[#allocation10 + $0x370] sm:$0xff] }
 0x378   :  { %4548 = vmatpush1.bf16.msra.mxu1 %v6778_v58  ;;  %4463 = vmatprep.subr.bf16.mxu0 %v6785_v47  ;;  %v2808_v58 = vld [vmem:[#allocation10 + $0x358] sm:$0xff]  ;;  %v6841_v54 = vcombine.high %v2807_v44, %v2811_v16 }
 0x379   :  { %4549 = vmatprep.subr.bf16.mxu1 %v6787_v50  ;;  %v2812_v47 = vld [vmem:[#allocation10 + $0x378] sm:$0xff]  ;;  %v6832_v50 = vcombine.low %v2799_v6, %v2803_v7  ;;  %v6881_v7 = vcombine.high %v2847_v59, %v2851_v62 }
 0x37a   :  { %v6843_v55 = vcombine.high %v2808_v58, %v2812_v47  ;;  %v6842_v21 = vcombine.low %v2808_v58, %v2812_v47  ;;  %v2863_v58 = vld [vmem:[#allocation10 + $0x510] sm:$0xff] }
 0x37b   :  { %4464 = vmatpush1.bf16.msra.mxu0 %v6784_v60  ;;  %v2819_v60 = vld [vmem:[#allocation10 + $0x3b0] sm:$0xff] }
 0x37c   :  { %4550 = vmatpush1.bf16.msra.mxu1 %v6786_v48  ;;  %4465 = vmatprep.subr.bf16.mxu0 %v6793_v61  ;;  %v2816_v48 = vld [vmem:[#allocation10 + $0x398] sm:$0xff]  ;;  %v6849_v22 = vcombine.high %v2815_v56, %v2819_v60  ;;  %v2867_v47 = vld [vmem:[#allocation10 + $0x530] sm:$0xff] }
 0x37d   :  { %4551 = vmatprep.subr.bf16.mxu1 %v6795_v20  ;;  %v2820_v61 = vld [vmem:[#allocation10 + $0x3b8] sm:$0xff]  ;;  %v6840_v20 = vcombine.low %v2807_v44, %v2811_v16 }
 0x37e   :  { %v6851_v26 = vcombine.high %v2816_v48, %v2820_v61  ;;  %v6850_v31 = vcombine.low %v2816_v48, %v2820_v61  ;;  %v2875_v48 = vld [vmem:[#allocation10 + $0x570] sm:$0xff]  ;;  %v2872_v61 = vld [vmem:[#allocation10 + $0x558] sm:$0xff] }
 0x37f   :  { %4466 = vmatpush1.bf16.msra.mxu0 %v6792_v57  ;;  %v2827_v57 = vld [vmem:[#allocation10 + $0x3f0] sm:$0xff] }
 0x380   :  { %4552 = vmatpush1.bf16.msra.mxu1 %v6794_v29  ;;  %4467 = vmatprep.subr.bf16.mxu0 %v6801_v30  ;;  %v2824_v29 = vld [vmem:[#allocation10 + $0x3d8] sm:$0xff]  ;;  %v6857_v14 = vcombine.high %v2823_v39, %v2827_v57 }
 0x381   :  { %4553 = vmatprep.subr.bf16.mxu1 %v6803_v13  ;;  %v2828_v30 = vld [vmem:[#allocation10 + $0x3f8] sm:$0xff]  ;;  %v6848_v13 = vcombine.low %v2815_v56, %v2819_v60  ;;  %v2871_v60 = vld [vmem:[#allocation10 + $0x550] sm:$0xff] }
 0x382   :  { %v6859_v23 = vcombine.high %v2824_v29, %v2828_v30  ;;  %v6858_v32 = vcombine.low %v2824_v29, %v2828_v30  ;;  %v2883_v29 = vld [vmem:[#allocation10 + $0x5b0] sm:$0xff]  ;;  %v2880_v30 = vld [vmem:[#allocation10 + $0x598] sm:$0xff] }
 0x383   :  { %4468 = vmatpush1.bf16.msra.mxu0 %v6800_v49  ;;  %v2835_v49 = vld [vmem:[#allocation10 + $0x430] sm:$0xff] }
 0x384   :  { %4554 = vmatpush1.bf16.msra.mxu1 %v6802_v46  ;;  %4469 = vmatprep.subr.bf16.mxu0 %v6809_v24  ;;  %v2832_v46 = vld [vmem:[#allocation10 + $0x418] sm:$0xff]  ;;  %v6865_v33 = vcombine.high %v2831_v36, %v2835_v49 }
 0x385   :  { %4555 = vmatprep.subr.bf16.mxu1 %v6811_v25  ;;  %v2836_v24 = vld [vmem:[#allocation10 + $0x438] sm:$0xff]  ;;  %v6856_v25 = vcombine.low %v2823_v39, %v2827_v57  ;;  %v2879_v57 = vld [vmem:[#allocation10 + $0x590] sm:$0xff] }
 0x386   :  { %v6867_v34 = vcombine.high %v2832_v46, %v2836_v24  ;;  %v6866_v52 = vcombine.low %v2832_v46, %v2836_v24  ;;  %v2891_v46 = vld [vmem:[#allocation10 + $0x5f0] sm:$0xff]  ;;  %v2888_v24 = vld [vmem:[#allocation10 + $0x5d8] sm:$0xff] }
 0x387   :  { %4470 = vmatpush1.bf16.msra.mxu0 %v6808_v27  ;;  %v2843_v27 = vld [vmem:[#allocation10 + $0x470] sm:$0xff] }
 0x388   :  { %4556 = vmatpush1.bf16.msra.mxu1 %v6810_v38  ;;  %4471 = vmatprep.subr.bf16.mxu0 %v6817_v40  ;;  %v6864_v38 = vcombine.low %v2831_v36, %v2835_v49  ;;  %v2840_v40 = vld [vmem:[#allocation10 + $0x458] sm:$0xff]  ;;  %v6873_v53 = vcombine.high %v2839_v0, %v2843_v27  ;;  %v2887_v49 = vld [vmem:[#allocation10 + $0x5d0] sm:$0xff] }
 0x389   :  { %4557 = vmatprep.subr.bf16.mxu1 %v6819_v4  ;;  %v2844_v4 = vld [vmem:[#allocation10 + $0x478] sm:$0xff] }
 0x38a   :  { %v6874_v6 = vcombine.low %v2840_v40, %v2844_v4 }
 0x38b   :  { %4472 = vmatpush1.bf16.msra.mxu0 %v6816_v63  ;;  %v6875_v63 = vcombine.high %v2840_v40, %v2844_v4  ;;  %v2896_v40 = vld [vmem:[#allocation10 + $0x618] sm:$0xff] }
 0x38c   :  { %4558 = vmatpush1.bf16.msra.mxu1 %v6818_v1  ;;  %4473 = vmatprep.subr.bf16.mxu0 %v6825_v2  ;;  %v2848_v1 = vld [vmem:[#allocation10 + $0x498] sm:$0xff] }
 0x38d   :  { %4559 = vmatprep.subr.bf16.mxu1 %v6827_v28  ;;  %v2852_v2 = vld [vmem:[#allocation10 + $0x4b8] sm:$0xff]  ;;  %v6872_v28 = vcombine.low %v2839_v0, %v2843_v27  ;;  %v2895_v27 = vld [vmem:[#allocation10 + $0x610] sm:$0xff] }
 0x38e   :  { %v6883_v8 = vcombine.high %v2848_v1, %v2852_v2  ;;  %v2900_v4 = vld [vmem:[#allocation10 + $0x638] sm:$0xff] }
 0x38f   :  { %4474 = vmatpush1.bf16.msra.mxu0 %v6824_v11  ;;  %v2859_v11 = vld [vmem:[#allocation10 + $0x4f0] sm:$0xff] }
 0x390   :  { %4560 = vmatpush1.bf16.msra.mxu1 %v6826_v12  ;;  %4475 = vmatprep.subr.bf16.mxu0 %v6833_v42  ;;  %v2856_v12 = vld [vmem:[#allocation10 + $0x4d8] sm:$0xff]  ;;  %v6889_v44 = vcombine.high %v2855_v9, %v2859_v11 }
 0x391   :  { %4561 = vmatprep.subr.bf16.mxu1 %v6835_v43  ;;  %v2860_v42 = vld [vmem:[#allocation10 + $0x4f8] sm:$0xff]  ;;  %v6880_v43 = vcombine.low %v2847_v59, %v2851_v62  ;;  %v6931_v62 = vcombine.high %v2896_v40, %v2900_v4 }
 0x392   :  { %v6891_v16 = vcombine.high %v2856_v12, %v2860_v42 }
 0x393   :  { %4476 = vmatpush1.bf16.msra.mxu0 %v6832_v50  ;;  %v2864_v50 = vld [vmem:[#allocation10 + $0x518] sm:$0xff] }
 0x394   :  { %4562 = vmatpush1.bf16.msra.mxu1 %v6834_v51  ;;  %4477 = vmatprep.subr.bf16.mxu0 %v6841_v54  ;;  %v2868_v51 = vld [vmem:[#allocation10 + $0x538] sm:$0xff]  ;;  %v6890_v54 = vcombine.low %v2856_v12, %v2860_v42  ;;  %v2915_v12 = vld [vmem:[#allocation10 + $0x6b0] sm:$0xff] }
 0x395   :  { %4563 = vmatprep.subr.bf16.mxu1 %v6843_v55  ;;  %v6897_v55 = vcombine.high %v2863_v58, %v2867_v47  ;;  %v6899_v56 = vcombine.high %v2864_v50, %v2868_v51  ;;  %v2912_v42 = vld [vmem:[#allocation10 + $0x698] sm:$0xff] }
 0x397   :  { %4478 = vmatpush1.bf16.msra.mxu0 %v6840_v20  ;;  %v2876_v20 = vld [vmem:[#allocation10 + $0x578] sm:$0xff] }
 0x398   :  { %4564 = vmatpush1.bf16.msra.mxu1 %v6842_v21  ;;  %4479 = vmatprep.subr.bf16.mxu0 %v6849_v22  ;;  %v6896_v21 = vcombine.low %v2863_v58, %v2867_v47  ;;  %v6898_v22 = vcombine.low %v2864_v50, %v2868_v51  ;;  %v6907_v39 = vcombine.high %v2872_v61, %v2876_v20  ;;  %v2919_v47 = vld [vmem:[#allocation10 + $0x6d0] sm:$0xff]  ;;  %v2920_v51 = vld [vmem:[#allocation10 + $0x6d8] sm:$0xff] }
 0x399   :  { %4565 = vmatprep.subr.bf16.mxu1 %v6851_v26  ;;  %v6905_v26 = vcombine.high %v2871_v60, %v2875_v48  ;;  %v2923_v50 = vld [vmem:[#allocation10 + $0x6f0] sm:$0xff] }
 0x39b   :  { %4480 = vmatpush1.bf16.msra.mxu0 %v6848_v13  ;;  %v2884_v13 = vld [vmem:[#allocation10 + $0x5b8] sm:$0xff] }
 0x39c   :  { %4566 = vmatpush1.bf16.msra.mxu1 %v6850_v31  ;;  %4481 = vmatprep.subr.bf16.mxu0 %v6857_v14  ;;  %v6904_v31 = vcombine.low %v2871_v60, %v2875_v48  ;;  %v6906_v14 = vcombine.low %v2872_v61, %v2876_v20  ;;  %v6915_v36 = vcombine.high %v2880_v30, %v2884_v13  ;;  %v2927_v48 = vld [vmem:[#allocation10 + $0x710] sm:$0xff]  ;;  %v2928_v20 = vld [vmem:[#allocation10 + $0x718] sm:$0xff] }
 0x39d   :  { %4567 = vmatprep.subr.bf16.mxu1 %v6859_v23  ;;  %v6913_v23 = vcombine.high %v2879_v57, %v2883_v29  ;;  %v2931_v61 = vld [vmem:[#allocation10 + $0x730] sm:$0xff] }
 0x39f   :  { %4482 = vmatpush1.bf16.msra.mxu0 %v6856_v25  ;;  %v2892_v25 = vld [vmem:[#allocation10 + $0x5f8] sm:$0xff] }
 0x3a0   :  { %4568 = vmatpush1.bf16.msra.mxu1 %v6858_v32  ;;  %4494 = vmatprep.subr.bf16.mxu0 %v6865_v33  ;;  %v6912_v32 = vcombine.low %v2879_v57, %v2883_v29  ;;  %v6914_v33 = vcombine.low %v2880_v30, %v2884_v13  ;;  %v6923_v0 = vcombine.high %v2888_v24, %v2892_v25  ;;  %v2935_v29 = vld [vmem:[#allocation10 + $0x750] sm:$0xff]  ;;  %v2936_v13 = vld [vmem:[#allocation10 + $0x758] sm:$0xff] }
 0x3a1   :  { %4580 = vmatprep.subr.bf16.mxu1 %v6867_v34  ;;  %v6921_v34 = vcombine.high %v2887_v49, %v2891_v46  ;;  %v2939_v30 = vld [vmem:[#allocation10 + $0x770] sm:$0xff] }
 0x3a2   :  { %4484 = vmatmul.mubr.bf16.vlgmr.msra.gmra.mrb[16].mxu0 %v8194_v10 }
 0x3a3   :  { %4570 = vmatmul.mubr.bf16.vlgmr.msra.gmra.mrb[24].mxu1 %v8194_v10  ;;  %4495 = vmatpush1.bf16.msra.mxu0 %v6864_v38  ;;  %v6882_v10 = vcombine.low %v2848_v1, %v2852_v2  ;;  %v2899_v38 = vld [vmem:[#allocation10 + $0x630] sm:$0xff]  ;;  %v2904_v2 = vld [vmem:[#allocation10 + $0x658] sm:$0xff] }
 0x3a4   :  { %4526 = vmatprep.mubr.bf16.mxu0 %v8200_v5  ;;  %4581 = vmatpush1.bf16.msra.mxu1 %v6866_v52  ;;  %v6920_v52 = vcombine.low %v2887_v49, %v2891_v46  ;;  %v6929_v59 = vcombine.high %v2895_v27, %v2899_v38  ;;  %v2907_v1 = vld [vmem:[#allocation10 + $0x670] sm:$0xff] }
 0x3a5   :  { %4612 = vmatprep.mubr.bf16.mxu1 %v8200_v5  ;;  %4496 = vmatprep.subr.bf16.mxu0 %v6873_v53  ;;  %v6888_v5 = vcombine.low %v2855_v9, %v2859_v11  ;;  %v6922_v53 = vcombine.low %v2888_v24, %v2892_v25  ;;  %v2911_v11 = vld [vmem:[#allocation10 + $0x690] sm:$0xff]  ;;  %v2944_v25 = vld [vmem:[#allocation10 + $0x798] sm:$0xff] }
 0x3a6   :  { %4582 = vmatprep.subr.bf16.mxu1 %v6875_v63  ;;  %v2903_v63 = vld [vmem:[#allocation10 + $0x650] sm:$0xff] }
 0x3a7   :  { %4497 = vmatpush1.bf16.msra.mxu0 %v6872_v28  ;;  %v2908_v28 = vld [vmem:[#allocation10 + $0x678] sm:$0xff]  ;;  %v2943_v46 = vld [vmem:[#allocation10 + $0x790] sm:$0xff] }
 0x3a8   :  { %4583 = vmatpush1.bf16.msra.mxu1 %v6874_v6  ;;  %4498 = vmatprep.subr.bf16.mxu0 %v6881_v7  ;;  %v6928_v6 = vcombine.low %v2895_v27, %v2899_v38  ;;  %v6930_v7 = vcombine.low %v2896_v40, %v2900_v4  ;;  %v6939_v9 = vcombine.high %v2904_v2, %v2908_v28  ;;  %v2947_v24 = vld [vmem:[#allocation10 + $0x7b0] sm:$0xff]  ;;  %v2952_v4 = vld [vmem:[#allocation10 + $0x7d8] sm:$0xff] }
 0x3a9   :  { %4584 = vmatprep.subr.bf16.mxu1 %v6883_v8  ;;  %v6937_v8 = vcombine.high %v2903_v63, %v2907_v1  ;;  %v2951_v38 = vld [vmem:[#allocation10 + $0x7d0] sm:$0xff] }
 0x3aa   :  { %v2955_v40 = vld [vmem:[#allocation10 + $0x7f0] sm:$0xff] }
 0x3ab   :  { %4499 = vmatpush1.bf16.msra.mxu0 %v6880_v43  ;;  %v2916_v43 = vld [vmem:[#allocation10 + $0x6b8] sm:$0xff] }
 0x3ac   :  { %4585 = vmatpush1.bf16.msra.mxu1 %v6882_v10  ;;  %4500 = vmatprep.subr.bf16.mxu0 %v6889_v44  ;;  %v6936_v10 = vcombine.low %v2903_v63, %v2907_v1  ;;  %v6938_v44 = vcombine.low %v2904_v2, %v2908_v28  ;;  %v6947_v58 = vcombine.high %v2912_v42, %v2916_v43  ;;  %v7373_v28 = vld [vmem:[#allocation11 + $0x4] ss:$24 sps:$4 sm:$0xff]  }
 0x3ad   :  { %4586 = vmatprep.subr.bf16.mxu1 %v6891_v16  ;;  %v6945_v16 = vcombine.high %v2911_v11, %v2915_v12  ;;  %v6984_v1 = vcombine.low %v2951_v38, %v2955_v40 }
 0x3af   :  { %4501 = vmatpush1.bf16.msra.mxu0 %v6888_v5  ;;  %v2924_v5 = vld [vmem:[#allocation10 + $0x6f8] sm:$0xff] }
 0x3b0   :  { %4587 = vmatpush1.bf16.msra.mxu1 %v6890_v54  ;;  %4502 = vmatprep.subr.bf16.mxu0 %v6897_v55  ;;  %v6944_v54 = vcombine.low %v2911_v11, %v2915_v12  ;;  %v6946_v55 = vcombine.low %v2912_v42, %v2916_v43  ;;  %v6955_v60 = vcombine.high %v2920_v51, %v2924_v5  ;;  %v7382_v11 = vld [vmem:[#allocation11 + $0x3c] ss:$24 sps:$4 sm:$0xff]   ;;  %v7377_v12 = vld [vmem:[#allocation11 + $0x30] ss:$24 sps:$4 sm:$0xff]  }
 0x3b1   :  { %4588 = vmatprep.subr.bf16.mxu1 %v6899_v56  ;;  %v6953_v56 = vcombine.high %v2919_v47, %v2923_v50  ;;  %v7380_v42 = vld [vmem:[#allocation11 + $0x38] ss:$24 sps:$4 sm:$0xff]   ;;  %v7385_v43 = vld [vmem:[#allocation11 + $0x64] ss:$24 sps:$4 sm:$0xff]  }
 0x3b3   :  { %4503 = vmatpush1.bf16.msra.mxu0 %v6896_v21  ;;  %v2932_v21 = vld [vmem:[#allocation10 + $0x738] sm:$0xff] }
 0x3b4   :  { %4589 = vmatpush1.bf16.msra.mxu1 %v6898_v22  ;;  %4504 = vmatprep.subr.bf16.mxu0 %v6905_v26  ;;  %v6952_v22 = vcombine.low %v2919_v47, %v2923_v50  ;;  %v6954_v26 = vcombine.low %v2920_v51, %v2924_v5  ;;  %v6963_v57 = vcombine.high %v2928_v20, %v2932_v21  ;;  %v7394_v47 = vld [vmem:[#allocation11 + $0x9c] ss:$24 sps:$4 sm:$0xff]   ;;  %v7389_v50 = vld [vmem:[#allocation11 + $0x90] ss:$24 sps:$4 sm:$0xff]   ;;  %v7400_v5 = vld [vmem:[#allocation11 + $0xcc] ss:$24 sps:$4 sm:$0xff]  }
 0x3b5   :  { %4590 = vmatprep.subr.bf16.mxu1 %v6907_v39  ;;  %v6961_v39 = vcombine.high %v2927_v48, %v2931_v61  ;;  %v7397_v51 = vld [vmem:[#allocation11 + $0xc4] ss:$24 sps:$4 sm:$0xff]  }
 0x3b7   :  { %4505 = vmatpush1.bf16.msra.mxu0 %v6904_v31  ;;  %v2940_v31 = vld [vmem:[#allocation10 + $0x778] sm:$0xff] }
 0x3b8   :  { %4591 = vmatpush1.bf16.msra.mxu1 %v6906_v14  ;;  %4506 = vmatprep.subr.bf16.mxu0 %v6913_v23  ;;  %v6960_v14 = vcombine.low %v2927_v48, %v2931_v61  ;;  %v6962_v23 = vcombine.low %v2928_v20, %v2932_v21  ;;  %v6971_v49 = vcombine.high %v2936_v13, %v2940_v31  ;;  %v7401_v48 = vld [vmem:[#allocation11 + $0xf0] ss:$24 sps:$4 sm:$0xff]   ;;  %v7409_v20 = vld [vmem:[#allocation11 + $0x124] ss:$24 sps:$4 sm:$0xff]  }
 0x3b9   :  { %4592 = vmatprep.subr.bf16.mxu1 %v6915_v36  ;;  %v6969_v36 = vcombine.high %v2935_v29, %v2939_v30  ;;  %v7404_v61 = vld [vmem:[#allocation11 + $0xf8] ss:$24 sps:$4 sm:$0xff]   ;;  %v7412_v21 = vld [vmem:[#allocation11 + $0x12c] ss:$24 sps:$4 sm:$0xff]  }
 0x3bb   :  { %4507 = vmatpush1.bf16.msra.mxu0 %v6912_v32  ;;  %v2948_v32 = vld [vmem:[#allocation10 + $0x7b8] sm:$0xff] }
 0x3bc   :  { %4593 = vmatpush1.bf16.msra.mxu1 %v6914_v33  ;;  %4508 = vmatprep.subr.bf16.mxu0 %v6921_v34  ;;  %v6968_v33 = vcombine.low %v2935_v29, %v2939_v30  ;;  %v6970_v34 = vcombine.low %v2936_v13, %v2940_v31  ;;  %v6979_v27 = vcombine.high %v2944_v25, %v2948_v32  ;;  %v7413_v29 = vld [vmem:[#allocation11 + $0x150] ss:$24 sps:$4 sm:$0xff]   ;;  %v7421_v13 = vld [vmem:[#allocation11 + $0x184] ss:$24 sps:$4 sm:$0xff]  }
 0x3bd   :  { %4594 = vmatprep.subr.bf16.mxu1 %v6923_v0  ;;  %v6977_v0 = vcombine.high %v2943_v46, %v2947_v24  ;;  %v7416_v30 = vld [vmem:[#allocation11 + $0x158] ss:$24 sps:$4 sm:$0xff]   ;;  %v7424_v31 = vld [vmem:[#allocation11 + $0x18c] ss:$24 sps:$4 sm:$0xff]  }
 0x3bf   :  { %4509 = vmatpush1.bf16.msra.mxu0 %v6920_v52  ;;  %v2956_v52 = vld [vmem:[#allocation10 + $0x7f8] sm:$0xff] }
 0x3c0   :  { %4595 = vmatpush1.bf16.msra.mxu1 %v6922_v53  ;;  %4510 = vmatprep.subr.bf16.mxu0 %v6929_v59  ;;  %v6976_v53 = vcombine.low %v2943_v46, %v2947_v24  ;;  %v6978_v59 = vcombine.low %v2944_v25, %v2948_v32  ;;  %v6987_v63 = vcombine.high %v2952_v4, %v2956_v52  ;;  %v7425_v46 = vld [vmem:[#allocation11 + $0x1b0] ss:$24 sps:$4 sm:$0xff]   ;;  %v7433_v25 = vld [vmem:[#allocation11 + $0x1e4] ss:$24 sps:$4 sm:$0xff]  }
 0x3c1   :  { %4596 = vmatprep.subr.bf16.mxu1 %v6931_v62  ;;  %v6985_v62 = vcombine.high %v2951_v38, %v2955_v40  ;;  %v6986_v2 = vcombine.low %v2952_v4, %v2956_v52  ;;  %v7428_v24 = vld [vmem:[#allocation11 + $0x1b8] ss:$24 sps:$4 sm:$0xff]   ;;  %v7436_v32 = vld [vmem:[#allocation11 + $0x1ec] ss:$24 sps:$4 sm:$0xff]  }
 0x3c2   :  { %v7437_v38 = vld [vmem:[#allocation11 + $0x210] ss:$24 sps:$4 sm:$0xff]   ;;  %v7445_v4 = vld [vmem:[#allocation11 + $0x244] ss:$24 sps:$4 sm:$0xff]  }
 0x3c3   :  { %4511 = vmatpush1.bf16.msra.mxu0 %v6928_v6  ;;  %v7376_v6 = vld [vmem:[#allocation11 + $0xc] ss:$24 sps:$4 sm:$0xff]   ;;  %v7440_v40 = vld [vmem:[#allocation11 + $0x218] ss:$24 sps:$4 sm:$0xff]  }
 0x3c4   :  { %4597 = vmatpush1.bf16.msra.mxu1 %v6930_v7  ;;  %4512 = vmatprep.subr.bf16.mxu0 %v6937_v8  ;;  %v7371_v7 = vld [vmem:[#allocation11] ss:$24 sps:$4 sm:$0xff]   ;;  %v7448_v52 = vld [vmem:[#allocation11 + $0x24c] ss:$24 sps:$4 sm:$0xff]  }
 0x3c5   :  { %4598 = vmatprep.subr.bf16.mxu1 %v6939_v9  ;;  %v7374_v8 = vld [vmem:[#allocation11 + $0x8] ss:$24 sps:$4 sm:$0xff]   ;;  %v7379_v9 = vld [vmem:[#allocation11 + $0x34] ss:$24 sps:$4 sm:$0xff]  }
 0x3c7   :  { %4513 = vmatpush1.bf16.msra.mxu0 %v6936_v10  ;;  %v7388_v10 = vld [vmem:[#allocation11 + $0x6c] ss:$24 sps:$4 sm:$0xff]  }
 0x3c8   :  { %4599 = vmatpush1.bf16.msra.mxu1 %v6938_v44  ;;  %4514 = vmatprep.subr.bf16.mxu0 %v6945_v16  ;;  %v7383_v44 = vld [vmem:[#allocation11 + $0x60] ss:$24 sps:$4 sm:$0xff]  }
 0x3c9   :  { %4600 = vmatprep.subr.bf16.mxu1 %v6947_v58  ;;  %v7386_v16 = vld [vmem:[#allocation11 + $0x68] ss:$24 sps:$4 sm:$0xff]   ;;  %v7391_v58 = vld [vmem:[#allocation11 + $0x94] ss:$24 sps:$4 sm:$0xff]  }
 0x3cb   :  { %4515 = vmatpush1.bf16.msra.mxu0 %v6944_v54  ;;  %v7395_v54 = vld [vmem:[#allocation11 + $0xc0] ss:$24 sps:$4 sm:$0xff]  }
 0x3cc   :  { %4601 = vmatpush1.bf16.msra.mxu1 %v6946_v55  ;;  %4516 = vmatprep.subr.bf16.mxu0 %v6953_v56  ;;  %v7398_v55 = vld [vmem:[#allocation11 + $0xc8] ss:$24 sps:$4 sm:$0xff]   ;;  %v7403_v56 = vld [vmem:[#allocation11 + $0xf4] ss:$24 sps:$4 sm:$0xff]  }
 0x3cd   :  { %4602 = vmatprep.subr.bf16.mxu1 %v6955_v60  ;;  %v7406_v60 = vld [vmem:[#allocation11 + $0xfc] ss:$24 sps:$4 sm:$0xff]  }
 0x3cf   :  { %4517 = vmatpush1.bf16.msra.mxu0 %v6952_v22  ;;  %v7407_v22 = vld [vmem:[#allocation11 + $0x120] ss:$24 sps:$4 sm:$0xff]  }
 0x3d0   :  { %4603 = vmatpush1.bf16.msra.mxu1 %v6954_v26  ;;  %4518 = vmatprep.subr.bf16.mxu0 %v6961_v39  ;;  %v7410_v26 = vld [vmem:[#allocation11 + $0x128] ss:$24 sps:$4 sm:$0xff]   ;;  %v7415_v39 = vld [vmem:[#allocation11 + $0x154] ss:$24 sps:$4 sm:$0xff]  }
 0x3d1   :  { %4604 = vmatprep.subr.bf16.mxu1 %v6963_v57  ;;  %v7418_v57 = vld [vmem:[#allocation11 + $0x15c] ss:$24 sps:$4 sm:$0xff]  }
 0x3d3   :  { %4519 = vmatpush1.bf16.msra.mxu0 %v6960_v14  ;;  %v7419_v14 = vld [vmem:[#allocation11 + $0x180] ss:$24 sps:$4 sm:$0xff]  }
 0x3d4   :  { %4605 = vmatpush1.bf16.msra.mxu1 %v6962_v23  ;;  %4520 = vmatprep.subr.bf16.mxu0 %v6969_v36  ;;  %v7422_v23 = vld [vmem:[#allocation11 + $0x188] ss:$24 sps:$4 sm:$0xff]   ;;  %v7427_v36 = vld [vmem:[#allocation11 + $0x1b4] ss:$24 sps:$4 sm:$0xff]  }
 0x3d5   :  { %4606 = vmatprep.subr.bf16.mxu1 %v6971_v49  ;;  %v7430_v49 = vld [vmem:[#allocation11 + $0x1bc] ss:$24 sps:$4 sm:$0xff]  }
 0x3d7   :  { %4521 = vmatpush1.bf16.msra.mxu0 %v6968_v33  ;;  %v7431_v33 = vld [vmem:[#allocation11 + $0x1e0] ss:$24 sps:$4 sm:$0xff]  }
 0x3d8   :  { %4607 = vmatpush1.bf16.msra.mxu1 %v6970_v34  ;;  %4522 = vmatprep.subr.bf16.mxu0 %v6977_v0  ;;  %v7434_v34 = vld [vmem:[#allocation11 + $0x1e8] ss:$24 sps:$4 sm:$0xff]   ;;  %v7439_v0 = vld [vmem:[#allocation11 + $0x214] ss:$24 sps:$4 sm:$0xff]  }
 0x3d9   :  { %4608 = vmatprep.subr.bf16.mxu1 %v6979_v27  ;;  %v7442_v27 = vld [vmem:[#allocation11 + $0x21c] ss:$24 sps:$4 sm:$0xff]  }
 0x3db   :  { %4523 = vmatpush1.bf16.msra.mxu0 %v6976_v53  ;;  %v7443_v53 = vld [vmem:[#allocation11 + $0x240] ss:$24 sps:$4 sm:$0xff]  }
 0x3dc   :  { %4609 = vmatpush1.bf16.msra.mxu1 %v6978_v59  ;;  %4524 = vmatprep.subr.bf16.mxu0 %v6985_v62  ;;  %v7446_v59 = vld [vmem:[#allocation11 + $0x248] ss:$24 sps:$4 sm:$0xff]  }
 0x3dd   :  { %4610 = vmatprep.subr.bf16.mxu1 %v6987_v63 }
 0x3df   :  { %4525 = vmatpush1.bf16.msra.mxu0 %v6984_v1  ;;  %v7451_v1 = vld [vmem:[#allocation11 + $0x274] ss:$24 sps:$4 sm:$0xff]  }
 0x3e0   :  { %4611 = vmatpush1.bf16.msra.mxu1 %v6986_v2  ;;  %5827 = vmatprep.subr.bf16.mxu0 %v7373_v28  ;;  %v7454_v2 = vld [vmem:[#allocation11 + $0x27c] ss:$24 sps:$4 sm:$0xff]  }
 0x3e1   :  { %5913 = vmatprep.subr.bf16.mxu1 %v7376_v6 }
 0x3e2   :  { %4527 = vmatmul.mubr.bf16.vlgmr.msra.gmra.mrb[16].mxu0 %v8196_v3 }
 0x3e3   :  { %4613 = vmatmul.mubr.bf16.vlgmr.msra.gmra.mrb[24].mxu1 %v8196_v3  ;;  %5828 = vmatpush1.bf16.msra.mxu0 %v7371_v7  ;;  %v7392_v3 = vld [vmem:[#allocation11 + $0x98] ss:$24 sps:$4 sm:$0xff]  }
 0x3e4   :  { %5914 = vmatpush1.bf16.msra.mxu1 %v7374_v8  ;;  %5829 = vmatprep.subr.bf16.mxu0 %v7379_v9  ;;  %v7449_v7 = vld [vmem:[#allocation11 + $0x270] ss:$24 sps:$4 sm:$0xff]  }
 0x3e5   :  { %5915 = vmatprep.subr.bf16.mxu1 %v7382_v11  ;;  %v7452_v8 = vld [vmem:[#allocation11 + $0x278] ss:$24 sps:$4 sm:$0xff]  }
 0x3e7   :  { %5830 = vmatpush1.bf16.msra.mxu0 %v7377_v12 }
 0x3e8   :  { %5916 = vmatpush1.bf16.msra.mxu1 %v7380_v42  ;;  %5831 = vmatprep.subr.bf16.mxu0 %v7385_v43  ;;  %v7457_v43 = vld [vmem:[#allocation11 + $0x2a4] ss:$24 sps:$4 sm:$0xff]  }
 0x3e9   :  { %5917 = vmatprep.subr.bf16.mxu1 %v7388_v10  ;;  %v7460_v10 = vld [vmem:[#allocation11 + $0x2ac] ss:$24 sps:$4 sm:$0xff]  }
 0x3eb   :  { %5832 = vmatpush1.bf16.msra.mxu0 %v7383_v44  ;;  %v7455_v44 = vld [vmem:[#allocation11 + $0x2a0] ss:$24 sps:$4 sm:$0xff]  }
 0x3ec   :  { %5918 = vmatpush1.bf16.msra.mxu1 %v7386_v16  ;;  %5833 = vmatprep.subr.bf16.mxu0 %v7391_v58  ;;  %v7458_v16 = vld [vmem:[#allocation11 + $0x2a8] ss:$24 sps:$4 sm:$0xff]   ;;  %v7463_v58 = vld [vmem:[#allocation11 + $0x2d4] ss:$24 sps:$4 sm:$0xff]  }
 0x3ed   :  { %5919 = vmatprep.subr.bf16.mxu1 %v7394_v47  ;;  %v7466_v47 = vld [vmem:[#allocation11 + $0x2dc] ss:$24 sps:$4 sm:$0xff]  }
 0x3ef   :  { %5834 = vmatpush1.bf16.msra.mxu0 %v7389_v50  ;;  %v7461_v50 = vld [vmem:[#allocation11 + $0x2d0] ss:$24 sps:$4 sm:$0xff]  }
 0x3f0   :  { %5920 = vmatpush1.bf16.msra.mxu1 %v7392_v3  ;;  %5835 = vmatprep.subr.bf16.mxu0 %v7397_v51  ;;  %v7464_v3 = vld [vmem:[#allocation11 + $0x2d8] ss:$24 sps:$4 sm:$0xff]   ;;  %v7469_v51 = vld [vmem:[#allocation11 + $0x304] ss:$24 sps:$4 sm:$0xff]  }
 0x3f1   :  { %5921 = vmatprep.subr.bf16.mxu1 %v7400_v5  ;;  %v7472_v5 = vld [vmem:[#allocation11 + $0x30c] ss:$24 sps:$4 sm:$0xff]  }
 0x3f3   :  { %5836 = vmatpush1.bf16.msra.mxu0 %v7395_v54  ;;  %v2957_v54 = vld [vmem:[%s8288_s6] sm:$0xff] }
 0x3f4   :  { %5922 = vmatpush1.bf16.msra.mxu1 %v7398_v55  ;;  %5837 = vmatprep.subr.bf16.mxu0 %v7403_v56  ;;  %v2962_v55 = vrot.slane %v2957_v54, %v8081_v15  ;;  %v2970_v56 = vrot.slane %v2957_v54, %v8125_v35 }
 0x3f5   :  { %5923 = vmatprep.subr.bf16.mxu1 %v7406_v60  ;;  %v2966_v60 = vrot.slane %v2957_v54, %v8089_v18 }
 0x3f7   :  { %5838 = vmatpush1.bf16.msra.mxu0 %v7401_v48  ;;  %v2974_v48 = vrot.slane %v2957_v54, %v8131_v41 }
 0x3f8   :  { %5924 = vmatpush1.bf16.msra.mxu1 %v7404_v61  ;;  %5839 = vmatprep.subr.bf16.mxu0 %v7409_v20  ;;  %v2978_v61 = vrot.slane %v2957_v54, %v8086_v17  ;;  %v2986_v20 = vrot.slane %v2957_v54, %v8128_v37 }
 0x3f9   :  { %5925 = vmatprep.subr.bf16.mxu1 %v7412_v21  ;;  %v2982_v21 = vrot.slane %v2957_v54, %v8092_v19 }
 0x3fb   :  { %5840 = vmatpush1.bf16.msra.mxu0 %v7407_v22  ;;  %v2990_v22 = vrot.slane %v2957_v54, %v8134_v45  ;;  %v7476_v54 = vld [vmem:[#allocation11 + $0x338] ss:$24 sps:$4 sm:$0xff]  }
 0x3fc   :  { %5926 = vmatpush1.bf16.msra.mxu1 %v7410_v26  ;;  %5841 = vmatprep.subr.bf16.mxu0 %v7415_v39 }
 0x3fd   :  { %5927 = vmatprep.subr.bf16.mxu1 %v7418_v57 }
 0x3ff   :  { %5842 = vmatpush1.bf16.msra.mxu0 %v7413_v29 }
 0x400   :  { %5928 = vmatpush1.bf16.msra.mxu1 %v7416_v30  ;;  %5843 = vmatprep.subr.bf16.mxu0 %v7421_v13 }
 0x401   :  { %5929 = vmatprep.subr.bf16.mxu1 %v7424_v31 }
 0x403   :  { %5844 = vmatpush1.bf16.msra.mxu0 %v7419_v14 }
 0x404   :  { %5930 = vmatpush1.bf16.msra.mxu1 %v7422_v23  ;;  %5845 = vmatprep.subr.bf16.mxu0 %v7427_v36 }
 0x405   :  { %5931 = vmatprep.subr.bf16.mxu1 %v7430_v49 }
 0x407   :  { %5846 = vmatpush1.bf16.msra.mxu0 %v7425_v46 }
 0x408   :  { %5932 = vmatpush1.bf16.msra.mxu1 %v7428_v24  ;;  %5847 = vmatprep.subr.bf16.mxu0 %v7433_v25 }
 0x409   :  { %5933 = vmatprep.subr.bf16.mxu1 %v7436_v32 }
 0x40b   :  { %5848 = vmatpush1.bf16.msra.mxu0 %v7431_v33 }
 0x40c   :  { %5934 = vmatpush1.bf16.msra.mxu1 %v7434_v34  ;;  %5849 = vmatprep.subr.bf16.mxu0 %v7439_v0 }
 0x40d   :  { %5935 = vmatprep.subr.bf16.mxu1 %v7442_v27 }
 0x40f   :  { %5850 = vmatpush1.bf16.msra.mxu0 %v7437_v38 }
 0x410   :  { %5936 = vmatpush1.bf16.msra.mxu1 %v7440_v40  ;;  %5851 = vmatprep.subr.bf16.mxu0 %v7445_v4 }
 0x411   :  { %5937 = vmatprep.subr.bf16.mxu1 %v7448_v52 }
 0x413   :  { %5852 = vmatpush1.bf16.msra.mxu0 %v7443_v53 }
 0x414   :  { %5938 = vmatpush1.bf16.msra.mxu1 %v7446_v59  ;;  %5853 = vmatprep.subr.bf16.mxu0 %v7451_v1 }
 0x415   :  { %5939 = vmatprep.subr.bf16.mxu1 %v7454_v2 }
 0x417   :  { %5854 = vmatpush1.bf16.msra.mxu0 %v7449_v7 }
 0x418   :  { %5940 = vmatpush1.bf16.msra.mxu1 %v7452_v8  ;;  %5855 = vmatprep.subr.bf16.mxu0 %v7457_v43 }
 0x419   :  { %5941 = vmatprep.subr.bf16.mxu1 %v7460_v10 }
 0x41b   :  { %5856 = vmatpush1.bf16.msra.mxu0 %v7455_v44 }
 0x41c   :  { %5942 = vmatpush1.bf16.msra.mxu1 %v7458_v16  ;;  %5857 = vmatprep.subr.bf16.mxu0 %v7463_v58 }
 0x41d   :  { %5943 = vmatprep.subr.bf16.mxu1 %v7466_v47  ;;  %v7470_v47 = vld [vmem:[#allocation11 + $0x308] ss:$24 sps:$4 sm:$0xff]  }
 0x41f   :  { %5858 = vmatpush1.bf16.msra.mxu0 %v7461_v50 }
 0x420   :  { %5944 = vmatpush1.bf16.msra.mxu1 %v7464_v3  ;;  %5870 = vmatprep.subr.bf16.mxu0 %v7469_v51  ;;  %v7475_v3 = vld [vmem:[#allocation11 + $0x334] ss:$24 sps:$4 sm:$0xff]  }
 0x421   :  { %5956 = vmatprep.subr.bf16.mxu1 %v7472_v5  ;;  %v7478_v51 = vld [vmem:[#allocation11 + $0x33c] ss:$24 sps:$4 sm:$0xff]   ;;  %v7473_v5 = vld [vmem:[#allocation11 + $0x330] ss:$24 sps:$4 sm:$0xff]  }
 0x435   :  { %v4356_v62 = vpop.f32.mrb[12].mxu0  ;;  %v4442_v63 = vpop.f32.mrb[20].mxu1 }
 0x436   :  { %v4358_v28 = vpop.f32.mrb[13].mxu0  ;;  %v4444_v6 = vpop.f32.mrb[21].mxu1  ;;  %v7281_v26 = vadd.f32 %v4356_v62, %v2962_v55  ;;  %v7285_v57 = vadd.f32 %v4442_v63, %v2970_v56 }
 0x437   :  { %v4360_v9 = vpop.f32.mrb[14].mxu0  ;;  %v4446_v11 = vpop.f32.mrb[22].mxu1  ;;  %v7282_v29 = vadd.f32 %v4358_v28, %v2966_v60  ;;  %v7286_v30 = vadd.f32 %v4444_v6, %v2974_v48 }
 0x438   :  { %v4362_v12 = vpop.f32.mrb[15].mxu0  ;;  %v4448_v42 = vpop.f32.mrb[23].mxu1  ;;  %v7283_v23 = vadd.f32 %v4360_v9, %v2962_v55  ;;  %v7287_v36 = vadd.f32 %v4446_v11, %v2970_v56  ;;  %v7481_v55 = vld [vmem:[#allocation11 + $0x364] ss:$24 sps:$4 sm:$0xff]  }
 0x439   :  { %v7284_v32 = vadd.f32 %v4362_v12, %v2966_v60  ;;  %v7288_v53 = vadd.f32 %v4448_v42, %v2974_v48  ;;  %v7467_v42 = vld [vmem:[#allocation11 + $0x300] ss:$24 sps:$4 sm:$0xff]   ;;  %v7484_v56 = vld [vmem:[#allocation11 + $0x36c] ss:$24 sps:$4 sm:$0xff]  }
 0x43a   :  { %v7479_v60 = vld [vmem:[#allocation11 + $0x360] ss:$24 sps:$4 sm:$0xff]  }
 0x43b   :  { %v7482_v48 = vld [vmem:[#allocation11 + $0x368] ss:$24 sps:$4 sm:$0xff]  }
 0x4b5   :  { %v4528_v39 = vpop.f32.mrb[16].mxu0 }
 0x4b6   :  { %v7289_v13 = vadd.f32 %v4528_v39, %v2978_v61  ;;  %v4614_v31 = vpop.f32.mrb[24].mxu1  ;;  %v4530_v14 = vpop.f32.mrb[17].mxu0  ;;  %v7496_v39 = vld [vmem:[#allocation11 + $0x3cc] ss:$24 sps:$4 sm:$0xff]  }
 0x4b7   :  { %v7293_v49 = vadd.f32 %v4614_v31, %v2986_v20  ;;  %v7290_v46 = vadd.f32 %v4530_v14, %v2982_v21  ;;  %v4616_v24 = vpop.f32.mrb[25].mxu1  ;;  %v4532_v25 = vpop.f32.mrb[18].mxu0  ;;  %v7497_v31 = vld [vmem:[#allocation11 + $0x3f0] ss:$24 sps:$4 sm:$0xff]  }
 0x4b8   :  { %v4623_v37 = vmax.f32 %v7281_v26, %v7289_v13  ;;  %v7294_v33 = vadd.f32 %v4616_v24, %v2990_v22  ;;  %v7291_v34 = vadd.f32 %v4532_v25, %v2978_v61  ;;  %v4618_v0 = vpop.f32.mrb[26].mxu1  ;;  %v4534_v45 = vpop.f32.mrb[19].mxu0  ;;  %v7487_v61 = vld [vmem:[#allocation11 + $0x394] ss:$24 sps:$4 sm:$0xff]   ;;  %v7493_v26 = vld [vmem:[#allocation11 + $0x3c4] ss:$24 sps:$4 sm:$0xff]  }
 0x4b9   :  { %v4625_v27 = vmax.f32 %v7285_v57, %v7293_v49  ;;  %v4624_v38 = vmax.f32 %v7282_v29, %v7290_v46  ;;  %v7295_v40 = vadd.f32 %v4618_v0, %v2986_v20  ;;  %v7292_v4 = vadd.f32 %v4534_v45, %v2982_v21  ;;  %v4620_v52 = vpop.f32.mrb[27].mxu1  ;;  %v7490_v20 = vld [vmem:[#allocation11 + $0x39c] ss:$24 sps:$4 sm:$0xff]   ;;  %v7485_v21 = vld [vmem:[#allocation11 + $0x390] ss:$24 sps:$4 sm:$0xff]  }
 0x4ba   :  { %v4626_v59 = vmax.f32 %v7286_v30, %v7294_v33  ;;  %v4627_v62 = vmax.f32 %v7283_v23, %v7291_v34  ;;  %v7296_v63 = vadd.f32 %v4620_v52, %v2990_v22  ;;  %v4631_v28 = vmax.f32 %v4623_v37, 0.0  ;;  %v7488_v22 = vld [vmem:[#allocation11 + $0x398] ss:$24 sps:$4 sm:$0xff]   ;;  %v7494_v29 = vld [vmem:[#allocation11 + $0x3c8] ss:$24 sps:$4 sm:$0xff]  }
 0x4bb   :  { %v4629_v1 = vmax.f32 %v7287_v36, %v7295_v40  ;;  %v4628_v2 = vmax.f32 %v7284_v32, %v7292_v4  ;;  %v4633_v8 = vmax.f32 %v4625_v27, 0.0  ;;  %v4632_v9 = vmax.f32 %v4624_v38, 0.0  ;;  %v7491_v57 = vld [vmem:[#allocation11 + $0x3c0] ss:$24 sps:$4 sm:$0xff]   ;;  %v7499_v30 = vld [vmem:[#allocation11 + $0x3f4] ss:$24 sps:$4 sm:$0xff]  }
 0x4bc   :  { %v4635_v6 = vmax.f32 %v4627_v62, 0.0  ;;  %v4630_v7 = vmax.f32 %v7288_v53, %v7296_v63  ;;  %v4634_v43 = vmax.f32 %v4626_v59, 0.0  ;;  %v7502_v13 = vld [vmem:[#allocation11 + $0x3fc] ss:$24 sps:$4 sm:$0xff]   ;;  %v7500_v14 = vld [vmem:[#allocation11 + $0x3f8] ss:$24 sps:$4 sm:$0xff]  }
 0x4bd   :  { %v4637_v11 = vmax.f32 %v4629_v1, 0.0  ;;  %v4636_v12 = vmax.f32 %v4628_v2, 0.0  ;;  %v7505_v23 = vld [vmem:[#allocation11 + $0x424] ss:$24 sps:$4 sm:$0xff]   ;;  %v7503_v49 = vld [vmem:[#allocation11 + $0x420] ss:$24 sps:$4 sm:$0xff]  }
 0x4be   :  { %v8235_v10 = vpack.c.bf16 %v4635_v6, %v4631_v28  ;;  %v4638_v44 = vmax.f32 %v4630_v7, 0.0  ;;  %v7508_v36 = vld [vmem:[#allocation11 + $0x42c] ss:$24 sps:$4 sm:$0xff]   ;;  %v7506_v46 = vld [vmem:[#allocation11 + $0x428] ss:$24 sps:$4 sm:$0xff]  }
 0x4bf   :  { %v8237_v16 = vpack.c.bf16 %v4637_v11, %v4633_v8  ;;  %v8239_v58 = vpack.c.bf16 %v4636_v12, %v4632_v9  ;;  %v7511_v24 = vld [vmem:[#allocation11 + $0x454] ss:$24 sps:$4 sm:$0xff]   ;;  %v7509_v32 = vld [vmem:[#allocation11 + $0x450] ss:$24 sps:$4 sm:$0xff]   ;;  %v7517_v33 = vld [vmem:[#allocation11 + $0x484] ss:$24 sps:$4 sm:$0xff]  }
 0x4c0   :  { %v8241_v50 = vpack.c.bf16 %v4638_v44, %v4634_v43  ;;  %v7514_v25 = vld [vmem:[#allocation11 + $0x45c] ss:$24 sps:$4 sm:$0xff]   ;;  %v7512_v37 = vld [vmem:[#allocation11 + $0x458] ss:$24 sps:$4 sm:$0xff]   ;;  %v7520_v34 = vld [vmem:[#allocation11 + $0x48c] ss:$24 sps:$4 sm:$0xff]  }
 0x4c1   :  { %5859 = vmatprep.mubr.bf16.mxu0 %v8239_v58  ;;  %5945 = vmatprep.mubr.bf16.mxu1 %v8239_v58  ;;  %v7515_v0 = vld [vmem:[#allocation11 + $0x480] ss:$24 sps:$4 sm:$0xff]   ;;  %v7523_v27 = vld [vmem:[#allocation11 + $0x4b4] ss:$24 sps:$4 sm:$0xff]   ;;  %v7521_v40 = vld [vmem:[#allocation11 + $0x4b0] ss:$24 sps:$4 sm:$0xff]  }
 0x4c2   :  { %5860 = vmatmul.mubr.bf16.vlgmr.msra.gmra.mrb[20].mxu0 %v8235_v10  ;;  %5946 = vmatmul.mubr.bf16.vlgmr.msra.gmra.mrb[28].mxu1 %v8235_v10  ;;  %v7518_v45 = vld [vmem:[#allocation11 + $0x488] ss:$24 sps:$4 sm:$0xff]   ;;  %v7526_v38 = vld [vmem:[#allocation11 + $0x4bc] ss:$24 sps:$4 sm:$0xff]   ;;  %v7524_v4 = vld [vmem:[#allocation11 + $0x4b8] ss:$24 sps:$4 sm:$0xff]  }
 0x4c3   :  { %5871 = vmatpush1.bf16.msra.mxu0 %v7467_v42  ;;  %5957 = vmatpush1.bf16.msra.mxu1 %v7470_v47  ;;  %v7529_v52 = vld [vmem:[#allocation11 + $0x4e4] ss:$24 sps:$4 sm:$0xff]   ;;  %v7527_v59 = vld [vmem:[#allocation11 + $0x4e0] ss:$24 sps:$4 sm:$0xff]   ;;  %v7535_v63 = vld [vmem:[#allocation11 + $0x514] ss:$24 sps:$4 sm:$0xff]  }
 0x4c4   :  { %5902 = vmatprep.mubr.bf16.mxu0 %v8241_v50  ;;  %5988 = vmatprep.mubr.bf16.mxu1 %v8241_v50  ;;  %v7532_v53 = vld [vmem:[#allocation11 + $0x4ec] ss:$24 sps:$4 sm:$0xff]   ;;  %v7530_v62 = vld [vmem:[#allocation11 + $0x4e8] ss:$24 sps:$4 sm:$0xff]   ;;  %v7538_v1 = vld [vmem:[#allocation11 + $0x51c] ss:$24 sps:$4 sm:$0xff]  }
 0x4c5   :  { %5872 = vmatprep.subr.bf16.mxu0 %v7475_v3  ;;  %5958 = vmatprep.subr.bf16.mxu1 %v7478_v51  ;;  %v7533_v2 = vld [vmem:[#allocation11 + $0x510] ss:$24 sps:$4 sm:$0xff]   ;;  %v7541_v6 = vld [vmem:[#allocation11 + $0x544] ss:$24 sps:$4 sm:$0xff]   ;;  %v7539_v8 = vld [vmem:[#allocation11 + $0x540] ss:$24 sps:$4 sm:$0xff]  }
 0x4c6   :  { %v7536_v28 = vld [vmem:[#allocation11 + $0x518] ss:$24 sps:$4 sm:$0xff]   ;;  %v7544_v7 = vld [vmem:[#allocation11 + $0x54c] ss:$24 sps:$4 sm:$0xff]   ;;  %v7542_v9 = vld [vmem:[#allocation11 + $0x548] ss:$24 sps:$4 sm:$0xff]  }
 0x4c7   :  { %5873 = vmatpush1.bf16.msra.mxu0 %v7473_v5  ;;  %5959 = vmatpush1.bf16.msra.mxu1 %v7476_v54  ;;  %v7547_v11 = vld [vmem:[#allocation11 + $0x574] ss:$24 sps:$4 sm:$0xff]   ;;  %v7545_v43 = vld [vmem:[#allocation11 + $0x570] ss:$24 sps:$4 sm:$0xff]   ;;  %v7553_v42 = vld [vmem:[#allocation11 + $0x5a4] ss:$24 sps:$4 sm:$0xff]  }
 0x4c8   :  { %5874 = vmatprep.subr.bf16.mxu0 %v7481_v55  ;;  %5960 = vmatprep.subr.bf16.mxu1 %v7484_v56  ;;  %v7550_v12 = vld [vmem:[#allocation11 + $0x57c] ss:$24 sps:$4 sm:$0xff]   ;;  %v7548_v44 = vld [vmem:[#allocation11 + $0x578] ss:$24 sps:$4 sm:$0xff]   ;;  %v7556_v47 = vld [vmem:[#allocation11 + $0x5ac] ss:$24 sps:$4 sm:$0xff]  }
 0x4c9   :  { %v7551_v3 = vld [vmem:[#allocation11 + $0x5a0] ss:$24 sps:$4 sm:$0xff]   ;;  %v7559_v5 = vld [vmem:[#allocation11 + $0x5d4] ss:$24 sps:$4 sm:$0xff]   ;;  %v7557_v55 = vld [vmem:[#allocation11 + $0x5d0] ss:$24 sps:$4 sm:$0xff]  }
 0x4ca   :  { %v7554_v51 = vld [vmem:[#allocation11 + $0x5a8] ss:$24 sps:$4 sm:$0xff]   ;;  %v7562_v54 = vld [vmem:[#allocation11 + $0x5dc] ss:$24 sps:$4 sm:$0xff]   ;;  %v7560_v56 = vld [vmem:[#allocation11 + $0x5d8] ss:$24 sps:$4 sm:$0xff]  }
 0x4cb   :  { %5875 = vmatpush1.bf16.msra.mxu0 %v7479_v60  ;;  %5961 = vmatpush1.bf16.msra.mxu1 %v7482_v48  ;;  %v7565_v60 = vld [vmem:[#allocation11 + $0x14] ss:$24 sps:$4 sm:$0xff]   ;;  %v7563_v48 = vld [vmem:[#allocation11 + $0x10] ss:$24 sps:$4 sm:$0xff]  }
 0x4cc   :  { %5876 = vmatprep.subr.bf16.mxu0 %v7487_v61  ;;  %5962 = vmatprep.subr.bf16.mxu1 %v7490_v20  ;;  %v7568_v61 = vld [vmem:[#allocation11 + $0x44] ss:$24 sps:$4 sm:$0xff]   ;;  %v7566_v20 = vld [vmem:[#allocation11 + $0x40] ss:$24 sps:$4 sm:$0xff]  }
 0x4cf   :  { %5877 = vmatpush1.bf16.msra.mxu0 %v7485_v21  ;;  %5963 = vmatpush1.bf16.msra.mxu1 %v7488_v22  ;;  %v7571_v21 = vld [vmem:[#allocation11 + $0x74] ss:$24 sps:$4 sm:$0xff]   ;;  %v7569_v22 = vld [vmem:[#allocation11 + $0x70] ss:$24 sps:$4 sm:$0xff]  }
 0x4d0   :  { %5878 = vmatprep.subr.bf16.mxu0 %v7493_v26  ;;  %5964 = vmatprep.subr.bf16.mxu1 %v7496_v39  ;;  %v7574_v26 = vld [vmem:[#allocation11 + $0xa4] ss:$24 sps:$4 sm:$0xff]   ;;  %v7572_v39 = vld [vmem:[#allocation11 + $0xa0] ss:$24 sps:$4 sm:$0xff]  }
 0x4d3   :  { %5879 = vmatpush1.bf16.msra.mxu0 %v7491_v57  ;;  %5965 = vmatpush1.bf16.msra.mxu1 %v7494_v29  ;;  %v7577_v57 = vld [vmem:[#allocation11 + $0xd4] ss:$24 sps:$4 sm:$0xff]   ;;  %v7575_v29 = vld [vmem:[#allocation11 + $0xd0] ss:$24 sps:$4 sm:$0xff]  }
 0x4d4   :  { %5880 = vmatprep.subr.bf16.mxu0 %v7499_v30  ;;  %5966 = vmatprep.subr.bf16.mxu1 %v7502_v13  ;;  %v7580_v30 = vld [vmem:[#allocation11 + $0x104] ss:$24 sps:$4 sm:$0xff]   ;;  %v7578_v13 = vld [vmem:[#allocation11 + $0x100] ss:$24 sps:$4 sm:$0xff]  }
 0x4d7   :  { %5881 = vmatpush1.bf16.msra.mxu0 %v7497_v31  ;;  %5967 = vmatpush1.bf16.msra.mxu1 %v7500_v14  ;;  %v7583_v31 = vld [vmem:[#allocation11 + $0x134] ss:$24 sps:$4 sm:$0xff]   ;;  %v7586_v14 = vld [vmem:[#allocation11 + $0x164] ss:$24 sps:$4 sm:$0xff]  }
 0x4d8   :  { %5882 = vmatprep.subr.bf16.mxu0 %v7505_v23  ;;  %5968 = vmatprep.subr.bf16.mxu1 %v7508_v36  ;;  %v7584_v23 = vld [vmem:[#allocation11 + $0x160] ss:$24 sps:$4 sm:$0xff]   ;;  %v7589_v36 = vld [vmem:[#allocation11 + $0x194] ss:$24 sps:$4 sm:$0xff]  }
 0x4db   :  { %5883 = vmatpush1.bf16.msra.mxu0 %v7503_v49  ;;  %5969 = vmatpush1.bf16.msra.mxu1 %v7506_v46  ;;  %v7587_v49 = vld [vmem:[#allocation11 + $0x190] ss:$24 sps:$4 sm:$0xff]   ;;  %v7592_v46 = vld [vmem:[#allocation11 + $0x1c4] ss:$24 sps:$4 sm:$0xff]  }
 0x4dc   :  { %5884 = vmatprep.subr.bf16.mxu0 %v7511_v24  ;;  %5970 = vmatprep.subr.bf16.mxu1 %v7514_v25  ;;  %v7590_v24 = vld [vmem:[#allocation11 + $0x1c0] ss:$24 sps:$4 sm:$0xff]   ;;  %v7595_v25 = vld [vmem:[#allocation11 + $0x1f4] ss:$24 sps:$4 sm:$0xff]  }
 0x4df   :  { %5885 = vmatpush1.bf16.msra.mxu0 %v7509_v32  ;;  %5971 = vmatpush1.bf16.msra.mxu1 %v7512_v37  ;;  %v7593_v32 = vld [vmem:[#allocation11 + $0x1f0] ss:$24 sps:$4 sm:$0xff]   ;;  %v7598_v37 = vld [vmem:[#allocation11 + $0x224] ss:$24 sps:$4 sm:$0xff]  }
 0x4e0   :  { %5886 = vmatprep.subr.bf16.mxu0 %v7517_v33  ;;  %5972 = vmatprep.subr.bf16.mxu1 %v7520_v34  ;;  %v7596_v33 = vld [vmem:[#allocation11 + $0x220] ss:$24 sps:$4 sm:$0xff]   ;;  %v7601_v34 = vld [vmem:[#allocation11 + $0x254] ss:$24 sps:$4 sm:$0xff]  }
 0x4e3   :  { %5887 = vmatpush1.bf16.msra.mxu0 %v7515_v0  ;;  %5973 = vmatpush1.bf16.msra.mxu1 %v7518_v45  ;;  %v7599_v0 = vld [vmem:[#allocation11 + $0x250] ss:$24 sps:$4 sm:$0xff]   ;;  %v7604_v45 = vld [vmem:[#allocation11 + $0x284] ss:$24 sps:$4 sm:$0xff]  }
 0x4e4   :  { %5888 = vmatprep.subr.bf16.mxu0 %v7523_v27  ;;  %5974 = vmatprep.subr.bf16.mxu1 %v7526_v38  ;;  %v7602_v27 = vld [vmem:[#allocation11 + $0x280] ss:$24 sps:$4 sm:$0xff]   ;;  %v7607_v38 = vld [vmem:[#allocation11 + $0x2b4] ss:$24 sps:$4 sm:$0xff]  }
 0x4e7   :  { %5889 = vmatpush1.bf16.msra.mxu0 %v7521_v40  ;;  %5975 = vmatpush1.bf16.msra.mxu1 %v7524_v4  ;;  %v7605_v40 = vld [vmem:[#allocation11 + $0x2b0] ss:$24 sps:$4 sm:$0xff]   ;;  %v7610_v4 = vld [vmem:[#allocation11 + $0x2e4] ss:$24 sps:$4 sm:$0xff]  }
 0x4e8   :  { %5890 = vmatprep.subr.bf16.mxu0 %v7529_v52  ;;  %5976 = vmatprep.subr.bf16.mxu1 %v7532_v53  ;;  %v7608_v52 = vld [vmem:[#allocation11 + $0x2e0] ss:$24 sps:$4 sm:$0xff]   ;;  %v7613_v53 = vld [vmem:[#allocation11 + $0x314] ss:$24 sps:$4 sm:$0xff]  }
 0x4eb   :  { %5891 = vmatpush1.bf16.msra.mxu0 %v7527_v59  ;;  %5977 = vmatpush1.bf16.msra.mxu1 %v7530_v62  ;;  %v7611_v59 = vld [vmem:[#allocation11 + $0x310] ss:$24 sps:$4 sm:$0xff]   ;;  %v7616_v62 = vld [vmem:[#allocation11 + $0x344] ss:$24 sps:$4 sm:$0xff]  }
 0x4ec   :  { %5892 = vmatprep.subr.bf16.mxu0 %v7535_v63  ;;  %5978 = vmatprep.subr.bf16.mxu1 %v7538_v1  ;;  %v7614_v63 = vld [vmem:[#allocation11 + $0x340] ss:$24 sps:$4 sm:$0xff]   ;;  %v7619_v1 = vld [vmem:[#allocation11 + $0x374] ss:$24 sps:$4 sm:$0xff]  }
 0x4ef   :  { %5893 = vmatpush1.bf16.msra.mxu0 %v7533_v2  ;;  %5979 = vmatpush1.bf16.msra.mxu1 %v7536_v28  ;;  %v7617_v2 = vld [vmem:[#allocation11 + $0x370] ss:$24 sps:$4 sm:$0xff]   ;;  %v7622_v28 = vld [vmem:[#allocation11 + $0x3a4] ss:$24 sps:$4 sm:$0xff]  }
 0x4f0   :  { %5894 = vmatprep.subr.bf16.mxu0 %v7541_v6  ;;  %5980 = vmatprep.subr.bf16.mxu1 %v7544_v7  ;;  %v7620_v6 = vld [vmem:[#allocation11 + $0x3a0] ss:$24 sps:$4 sm:$0xff]   ;;  %v7625_v7 = vld [vmem:[#allocation11 + $0x3d4] ss:$24 sps:$4 sm:$0xff]  }
 0x4f3   :  { %5895 = vmatpush1.bf16.msra.mxu0 %v7539_v8  ;;  %5981 = vmatpush1.bf16.msra.mxu1 %v7542_v9  ;;  %v7623_v8 = vld [vmem:[#allocation11 + $0x3d0] ss:$24 sps:$4 sm:$0xff]   ;;  %v7628_v9 = vld [vmem:[#allocation11 + $0x404] ss:$24 sps:$4 sm:$0xff]  }
 0x4f4   :  { %5896 = vmatprep.subr.bf16.mxu0 %v7547_v11  ;;  %5982 = vmatprep.subr.bf16.mxu1 %v7550_v12  ;;  %v7631_v11 = vld [vmem:[#allocation11 + $0x434] ss:$24 sps:$4 sm:$0xff]   ;;  %v7634_v12 = vld [vmem:[#allocation11 + $0x464] ss:$24 sps:$4 sm:$0xff]  }
 0x4f7   :  { %5897 = vmatpush1.bf16.msra.mxu0 %v7545_v43  ;;  %5983 = vmatpush1.bf16.msra.mxu1 %v7548_v44  ;;  %v7632_v43 = vld [vmem:[#allocation11 + $0x460] ss:$24 sps:$4 sm:$0xff]   ;;  %v7637_v44 = vld [vmem:[#allocation11 + $0x494] ss:$24 sps:$4 sm:$0xff]  }
 0x4f8   :  { %5898 = vmatprep.subr.bf16.mxu0 %v7553_v42  ;;  %5984 = vmatprep.subr.bf16.mxu1 %v7556_v47  ;;  %v7635_v42 = vld [vmem:[#allocation11 + $0x490] ss:$24 sps:$4 sm:$0xff]   ;;  %v7659_v47 = vld [vmem:[#allocation13 + $0x40] sm:$0xff]  }
 0x4fb   :  { %5899 = vmatpush1.bf16.msra.mxu0 %v7551_v3  ;;  %5985 = vmatpush1.bf16.msra.mxu1 %v7554_v51  ;;  %v7660_v3 = vld [vmem:[#allocation13] sm:$0xff]   ;;  %v7661_v51 = vld [vmem:[#allocation13 + $0x48] sm:$0xff]  }
 0x4fc   :  { %5900 = vmatprep.subr.bf16.mxu0 %v7559_v5  ;;  %5986 = vmatprep.subr.bf16.mxu1 %v7562_v54  ;;  %v7640_v5 = vld [vmem:[#allocation11 + $0x4c4] ss:$24 sps:$4 sm:$0xff]   ;;  %v7662_v54 = vld [vmem:[#allocation13 + $0x8] sm:$0xff]  }
 0x4ff   :  { %5901 = vmatpush1.bf16.msra.mxu0 %v7557_v55  ;;  %5987 = vmatpush1.bf16.msra.mxu1 %v7560_v56  ;;  %v7638_v55 = vld [vmem:[#allocation11 + $0x4c0] ss:$24 sps:$4 sm:$0xff]   ;;  %v7663_v56 = vld [vmem:[#allocation13 + $0x50] sm:$0xff]  }
 0x500   :  { %5999 = vmatprep.subr.bf16.mxu0 %v7565_v60  ;;  %7214 = vmatprep.subr.bf16.mxu1 %v7659_v47  ;;  %v7643_v60 = vld [vmem:[#allocation11 + $0x4f4] ss:$24 sps:$4 sm:$0xff]  }
 0x502   :  { %5903 = vmatmul.mubr.bf16.vlgmr.msra.gmra.mrb[20].mxu0 %v8237_v16  ;;  %5989 = vmatmul.mubr.bf16.vlgmr.msra.gmra.mrb[28].mxu1 %v8237_v16 }
 0x503   :  { %6000 = vmatpush1.bf16.msra.mxu0 %v7563_v48  ;;  %6031 = vmatprep.mubr.bf16.mxu0 %v8239_v58  ;;  %v7581_v58 = vld [vmem:[#allocation11 + $0x130] ss:$24 sps:$4 sm:$0xff]  }
 0x504   :  { %6001 = vmatprep.subr.bf16.mxu0 %v7568_v61  ;;  %7215 = vmatpush3.bf16.msra.mxu1 %v7660_v3  ;;  %v7664_v48 = vld [vmem:[#allocation13 + $0x10] sm:$0xff]  }
 0x505   :  { %7216 = vmatprep.subr.bf16.mxu1 %v7661_v51  ;;  %v7641_v61 = vld [vmem:[#allocation11 + $0x4f0] ss:$24 sps:$4 sm:$0xff]  }
 0x507   :  { %6002 = vmatpush1.bf16.msra.mxu0 %v7566_v20  ;;  %v7665_v20 = vld [vmem:[#allocation13 + $0x58] sm:$0xff]  }
 0x508   :  { %6003 = vmatprep.subr.bf16.mxu0 %v7571_v21  ;;  %7217 = vmatpush3.bf16.msra.mxu1 %v7662_v54  ;;  %v7646_v21 = vld [vmem:[#allocation11 + $0x524] ss:$24 sps:$4 sm:$0xff]  }
 0x509   :  { %7218 = vmatprep.subr.bf16.mxu1 %v7663_v56 }
 0x50b   :  { %6004 = vmatpush1.bf16.msra.mxu0 %v7569_v22  ;;  %v7666_v22 = vld [vmem:[#allocation13 + $0x18] sm:$0xff]  }
 0x50c   :  { %6005 = vmatprep.subr.bf16.mxu0 %v7574_v26  ;;  %7219 = vmatpush3.bf16.msra.mxu1 %v7664_v48  ;;  %v7644_v26 = vld [vmem:[#allocation11 + $0x520] ss:$24 sps:$4 sm:$0xff]  }
 0x50d   :  { %7220 = vmatprep.subr.bf16.mxu1 %v7665_v20 }
 0x50f   :  { %6006 = vmatpush1.bf16.msra.mxu0 %v7572_v39  ;;  %v7667_v39 = vld [vmem:[#allocation13 + $0x60] sm:$0xff]  }
 0x510   :  { %6007 = vmatprep.subr.bf16.mxu0 %v7577_v57  ;;  %v7649_v57 = vld [vmem:[#allocation11 + $0x554] ss:$24 sps:$4 sm:$0xff]   ;;  %7221 = vmatpush3.bf16.msra.mxu1 %v7666_v22  ;;  %v7675_v22 = vld [vmem:[#allocation13 + $0x80] sm:$0xff]  }
 0x511   :  { %7222 = vmatprep.subr.bf16.mxu1 %v7667_v39  ;;  %v7676_v39 = vld [vmem:[#allocation13 + $0x88] sm:$0xff]  }
 0x513   :  { %6008 = vmatpush1.bf16.msra.mxu0 %v7575_v29  ;;  %v7668_v29 = vld [vmem:[#allocation13 + $0x20] sm:$0xff]  }
 0x514   :  { %6009 = vmatprep.subr.bf16.mxu0 %v7580_v30  ;;  %v7647_v30 = vld [vmem:[#allocation11 + $0x550] ss:$24 sps:$4 sm:$0xff]   ;;  %7223 = vmatpush3.bf16.msra.mxu1 %v7668_v29  ;;  %v7678_v29 = vld [vmem:[#allocation13 + $0x98] sm:$0xff]  }
 0x517   :  { %6010 = vmatpush1.bf16.msra.mxu0 %v7578_v13  ;;  %v7669_v13 = vld [vmem:[#allocation13 + $0x68] sm:$0xff]  }
 0x518   :  { %6011 = vmatprep.subr.bf16.mxu0 %v7583_v31  ;;  %v7652_v31 = vld [vmem:[#allocation11 + $0x584] ss:$24 sps:$4 sm:$0xff]   ;;  %7224 = vmatprep.subr.bf16.mxu1 %v7669_v13  ;;  %v7680_v13 = vld [vmem:[#allocation13 + $0xa8] sm:$0xff]  }
 0x51b   :  { %6012 = vmatpush1.bf16.msra.mxu0 %v7581_v58  ;;  %v7650_v58 = vld [vmem:[#allocation11 + $0x580] ss:$24 sps:$4 sm:$0xff]  }
 0x51c   :  { %6013 = vmatprep.subr.bf16.mxu0 %v7586_v14  ;;  %v7655_v14 = vld [vmem:[#allocation11 + $0x5b4] ss:$24 sps:$4 sm:$0xff]  }
 0x51f   :  { %6014 = vmatpush1.bf16.msra.mxu0 %v7584_v23  ;;  %v7653_v23 = vld [vmem:[#allocation11 + $0x5b0] ss:$24 sps:$4 sm:$0xff]  }
 0x520   :  { %6015 = vmatprep.subr.bf16.mxu0 %v7589_v36  ;;  %v7658_v36 = vld [vmem:[#allocation11 + $0x5e4] ss:$24 sps:$4 sm:$0xff]  }
 0x523   :  { %6016 = vmatpush1.bf16.msra.mxu0 %v7587_v49  ;;  %v7656_v49 = vld [vmem:[#allocation11 + $0x5e0] ss:$24 sps:$4 sm:$0xff]  }
 0x524   :  { %6017 = vmatprep.subr.bf16.mxu0 %v7592_v46  ;;  %v4835_v46 = vld [vmem:[%s8290_s8] sm:$0x3f] }
 0x527   :  { %6018 = vmatpush1.bf16.msra.mxu0 %v7590_v24  ;;  %v4840_v24 = vrot.slane %v4835_v46, %v8081_v15 }
 0x528   :  { %6019 = vmatprep.subr.bf16.mxu0 %v7595_v25  ;;  %v4852_v25 = vrot.slane %v4835_v46, %v8131_v41  ;;  %v7673_v41 = vld [vmem:[#allocation13 + $0x78] sm:$0xff]  }
 0x52b   :  { %6020 = vmatpush1.bf16.msra.mxu0 %v7593_v32  ;;  %v7670_v32 = vld [vmem:[#allocation13 + $0x28] sm:$0xff]  }
 0x52c   :  { %6021 = vmatprep.subr.bf16.mxu0 %v7598_v37  ;;  %7225 = vmatpush3.bf16.msra.mxu1 %v7670_v32 }
 0x52f   :  { %6022 = vmatpush1.bf16.msra.mxu0 %v7596_v33 }
 0x530   :  { %6023 = vmatprep.subr.bf16.mxu0 %v7601_v34 }
 0x533   :  { %6024 = vmatpush1.bf16.msra.mxu0 %v7599_v0 }
 0x534   :  { %6025 = vmatprep.subr.bf16.mxu0 %v7604_v45 }
 0x537   :  { %6026 = vmatpush1.bf16.msra.mxu0 %v7602_v27 }
 0x538   :  { %6027 = vmatprep.subr.bf16.mxu0 %v7607_v38 }
 0x53b   :  { %6028 = vmatpush1.bf16.msra.mxu0 %v7605_v40 }
 0x53c   :  { %6029 = vmatprep.subr.bf16.mxu0 %v7610_v4  ;;  %v7671_v4 = vld [vmem:[#allocation13 + $0x70] sm:$0xff]  }
 0x53d   :  { %7226 = vmatprep.subr.bf16.mxu1 %v7671_v4 }
 0x53f   :  { %6030 = vmatpush1.bf16.msra.mxu0 %v7608_v52 }
 0x540   :  { %6042 = vmatprep.subr.bf16.mxu0 %v7613_v53 }
 0x542   :  { %6032 = vmatmul.mubr.bf16.vlgmr.msra.gmra.mrb[24].mxu0 %v8235_v10  ;;  %v7626_v10 = vld [vmem:[#allocation11 + $0x400] ss:$24 sps:$4 sm:$0xff]  }
 0x543   :  { %6043 = vmatpush1.bf16.msra.mxu0 %v7611_v59  ;;  %6074 = vmatprep.mubr.bf16.mxu0 %v8241_v50  ;;  %v7629_v50 = vld [vmem:[#allocation11 + $0x430] ss:$24 sps:$4 sm:$0xff]  }
 0x544   :  { %6044 = vmatprep.subr.bf16.mxu0 %v7616_v62  ;;  %v7672_v59 = vld [vmem:[#allocation13 + $0x30] sm:$0xff]  }
 0x545   :  { %7227 = vmatpush3.bf16.msra.mxu1 %v7672_v59 }
 0x546   :  { %7228 = vmatprep.subr.bf16.mxu1 %v7673_v41 }
 0x547   :  { %6045 = vmatpush1.bf16.msra.mxu0 %v7614_v63 }
 0x548   :  { %6046 = vmatprep.subr.bf16.mxu0 %v7619_v1  ;;  %v7674_v1 = vld [vmem:[#allocation13 + $0x38] sm:$0xff]  }
 0x549   :  { %7229 = vmatpush3.bf16.msra.mxu1 %v7674_v1 }
 0x54b   :  { %6047 = vmatpush1.bf16.msra.mxu0 %v7617_v2 }
 0x54c   :  { %6048 = vmatprep.subr.bf16.mxu0 %v7622_v28 }
 0x54f   :  { %6049 = vmatpush1.bf16.msra.mxu0 %v7620_v6 }
 0x550   :  { %6050 = vmatprep.subr.bf16.mxu0 %v7625_v7  ;;  %v7883_v7 = vmov 0.0  }
 0x551   :  { %7245 = vmatprep.subr.bf16.mxu1 %v7883_v7 }
 0x553   :  { %6051 = vmatpush1.bf16.msra.mxu0 %v7623_v8  ;;  %v4844_v8 = vrot.slane %v4835_v46, %v8089_v18 }
 0x554   :  { %6052 = vmatprep.subr.bf16.mxu0 %v7628_v9  ;;  %v4856_v9 = vrot.slane %v4835_v46, %v8086_v17 }
 0x557   :  { %6053 = vmatpush1.bf16.msra.mxu0 %v7626_v10  ;;  %v4848_v10 = vrot.slane %v4835_v46, %v8125_v35 }
 0x558   :  { %6054 = vmatprep.subr.bf16.mxu0 %v7631_v11  ;;  %v4860_v11 = vrot.slane %v4835_v46, %v8092_v19 }
 0x55b   :  { %6055 = vmatpush1.bf16.msra.mxu0 %v7629_v50 }
 0x55c   :  { %6056 = vmatprep.subr.bf16.mxu0 %v7634_v12 }
 0x55f   :  { %6057 = vmatpush1.bf16.msra.mxu0 %v7632_v43 }
 0x560   :  { %6058 = vmatprep.subr.bf16.mxu0 %v7637_v44 }
 0x563   :  { %6059 = vmatpush1.bf16.msra.mxu0 %v7635_v42 }
 0x564   :  { %6060 = vmatprep.subr.bf16.mxu0 %v7640_v5 }
 0x567   :  { %6061 = vmatpush1.bf16.msra.mxu0 %v7638_v55 }
 0x568   :  { %6062 = vmatprep.subr.bf16.mxu0 %v7643_v60 }
 0x56b   :  { %6063 = vmatpush1.bf16.msra.mxu0 %v7641_v61 }
 0x56c   :  { %6064 = vmatprep.subr.bf16.mxu0 %v7646_v21 }
 0x56f   :  { %6065 = vmatpush1.bf16.msra.mxu0 %v7644_v26 }
 0x570   :  { %6066 = vmatprep.subr.bf16.mxu0 %v7649_v57  ;;  %v7677_v57 = vld [vmem:[#allocation13 + $0x90] sm:$0xff]  }
 0x573   :  { %6067 = vmatpush1.bf16.msra.mxu0 %v7647_v30  ;;  %v7679_v30 = vld [vmem:[#allocation13 + $0xa0] sm:$0xff]  }
 0x574   :  { %6068 = vmatprep.subr.bf16.mxu0 %v7652_v31  ;;  %v7681_v31 = vld [vmem:[#allocation13 + $0xb0] sm:$0xff]  }
 0x577   :  { %6069 = vmatpush1.bf16.msra.mxu0 %v7650_v58  ;;  %v7682_v58 = vld [vmem:[#allocation13 + $0xb8] sm:$0xff]  }
 0x578   :  { %6070 = vmatprep.subr.bf16.mxu0 %v7655_v14 }
 0x57b   :  { %6071 = vmatpush1.bf16.msra.mxu0 %v7653_v23 }
 0x57c   :  { %6072 = vmatprep.subr.bf16.mxu0 %v7658_v36 }
 0x57f   :  { %6073 = vmatpush1.bf16.msra.mxu0 %v7656_v49 }
 0x582   :  { %6075 = vmatmul.mubr.bf16.vlgmr.msra.gmra.mrb[24].mxu0 %v8237_v16 }
 0x5d5   :  { %v5904_v37 = vpop.f32.mrb[20].mxu0  ;;  %v5990_v33 = vpop.f32.mrb[28].mxu1 }
 0x5d6   :  { %v7297_v34 = vadd.f32 %v5904_v37, %v4840_v24  ;;  %v5906_v0 = vpop.f32.mrb[21].mxu0  ;;  %v5992_v45 = vpop.f32.mrb[29].mxu1  ;;  %v7301_v42 = vadd.f32 %v5990_v33, %v4848_v10 }
 0x5d7   :  { %v7302_v27 = vadd.f32 %v5992_v45, %v4852_v25  ;;  %v5908_v38 = vpop.f32.mrb[22].mxu0  ;;  %v5994_v40 = vpop.f32.mrb[30].mxu1  ;;  %v7298_v12 = vadd.f32 %v5906_v0, %v4844_v8 }
 0x5d8   :  { %v7299_v16 = vadd.f32 %v5908_v38, %v4840_v24  ;;  %v5910_v52 = vpop.f32.mrb[23].mxu0  ;;  %v5996_v53 = vpop.f32.mrb[31].mxu1  ;;  %v7303_v56 = vadd.f32 %v5994_v40, %v4848_v10 }
 0x5d9   :  { %v6085_v62 = vmax.f32 %v7297_v34, %v7302_v27  ;;  %v7304_v63 = vadd.f32 %v5996_v53, %v4852_v25  ;;  %v7300_v51 = vadd.f32 %v5910_v52, %v4844_v8  ;;  %v7180_v25 = vld [vmem:[%s8292_s10] ss:$0 sm:$0xff] }
 0x5db   :  { %v6088_v15 = vmax.f32 %v7299_v16, %v7304_v63  ;;  %v6091_v2 = vmax.f32 %v6085_v62, 0.0 }
 0x5dd   :  { %v6094_v28 = vmax.f32 %v6088_v15, 0.0 }
 0x5df   :  { %v6097_v6 = vpack.c.bf16 %v6094_v28, %v6091_v2 }
 0x655   :  { %v6076_v50 = vpop.f32.mrb[24].mxu0 }
 0x656   :  { %v7305_v43 = vadd.f32 %v6076_v50, %v4856_v9  ;;  %v6078_v44 = vpop.f32.mrb[25].mxu0 }
 0x657   :  { %v7306_v47 = vadd.f32 %v6078_v44, %v4860_v11  ;;  %v6080_v3 = vpop.f32.mrb[26].mxu0 }
 0x658   :  { %v6086_v5 = vmax.f32 %v7298_v12, %v7305_v43  ;;  %v7307_v54 = vadd.f32 %v6080_v3, %v4856_v9  ;;  %v6082_v55 = vpop.f32.mrb[27].mxu0 }
 0x659   :  { %v6087_v60 = vmax.f32 %v7301_v42, %v7306_v47  ;;  %v7308_v18 = vadd.f32 %v6082_v55, %v4860_v11 }
 0x65a   :  { %v6089_v48 = vmax.f32 %v7300_v51, %v7307_v54  ;;  %v6092_v61 = vmax.f32 %v6086_v5, 0.0 }
 0x65b   :  { %v6090_v17 = vmax.f32 %v7303_v56, %v7308_v18  ;;  %v6093_v20 = vmax.f32 %v6087_v60, 0.0 }
 0x65c   :  { %v6095_v35 = vmax.f32 %v6089_v48, 0.0 }
 0x65d   :  { %v6096_v19 = vmax.f32 %v6090_v17, 0.0 }
 0x65e   :  { %v6098_v21 = vpack.c.bf16 %v6095_v35, %v6092_v61 }
 0x65f   :  { %v6099_v26 = vpack.c.bf16 %v6096_v19, %v6093_v20 }
 0x660   :  { %6331 = vmatprep.mubr.bf16.mxu1 %v6098_v21 }
 0x661   :  { %6332 = vmatmul.mubr.bf16.vlgmr.msra.gmra.mrb[32].mxu1 %v6097_v6 }
 0x662   :  { %7246 = vmatpush3.bf16.msra.mxu1 %v7675_v22  ;;  %7261 = vmatprep.mubr.msk.bf16.mxu1 %vm7884_vm0, %v7883_v7 }
 0x663   :  { %7247 = vmatprep.subr.bf16.mxu1 %v7883_v7 }
 0x666   :  { %7248 = vmatpush3.bf16.msra.mxu1 %v7676_v39 }
 0x667   :  { %7249 = vmatprep.subr.bf16.mxu1 %v7883_v7 }
 0x66a   :  { %7250 = vmatpush3.bf16.msra.mxu1 %v7677_v57 }
 0x66b   :  { %7251 = vmatprep.subr.bf16.mxu1 %v7883_v7 }
 0x66e   :  { %7252 = vmatpush3.bf16.msra.mxu1 %v7678_v29 }
 0x66f   :  { %7253 = vmatprep.subr.bf16.mxu1 %v7883_v7 }
 0x672   :  { %7254 = vmatpush3.bf16.msra.mxu1 %v7679_v30 }
 0x673   :  { %7255 = vmatprep.subr.bf16.mxu1 %v7883_v7 }
 0x676   :  { %7256 = vmatpush3.bf16.msra.mxu1 %v7680_v13 }
 0x677   :  { %7257 = vmatprep.subr.bf16.mxu1 %v7883_v7 }
 0x67a   :  { %7258 = vmatpush3.bf16.msra.mxu1 %v7681_v31 }
 0x67b   :  { %7259 = vmatprep.subr.bf16.mxu1 %v7883_v7 }
 0x67e   :  { %7260 = vmatpush3.bf16.msra.mxu1 %v7682_v58 }
 0x681   :  { %7262 = vmatmul.mubr.bf16.vlgmr.msra.gmra.mrb[36].mxu1 %v6099_v26 }
 0x734   :  { %v7230_v14 = vpop.f32.mrb[32].mxu1 }
 0x735   :  { %v7231_v23 = vpop.f32.mrb[33].mxu1 }
 0x736   :  { %v7232_v36 = vadd.f32 %v7231_v23, %v7230_v14  ;;  %v7233_v49 = vpop.f32.mrb[34].mxu1 }
 0x737   :  { %v7234_v46 = vpop.f32.mrb[35].mxu1 }
 0x738   :  { %v7235_v24 = vadd.f32 %v7234_v46, %v7233_v49  ;;  %v6334_v32 = vadd.f32 %v7232_v36, %v7180_v25 }
 0x73a   :  { %v6337_v0 = vadd.f32 %v7235_v24, %v7180_v25 }
 0x754   :  { %v6374_v37 = vpop.f32.mrb[36].mxu1 }
 0x755   :  { %v6375_v33 = vadd.f32 %v6374_v37, %v6334_v32  ;;  %v7263_v34 = vpop.f32.mrb[37].mxu1 }
 0x756   :  { %v6377_v45 = vpop.f32.mrb[38].mxu1 }
 0x757   :  { %v6378_v27 = vadd.f32 %v6377_v45, %v6337_v0  ;;  %v7264_v38 = vpop.f32.mrb[39].mxu1 }
 0x759   :  { %v7212_v40 = vpack.c.bf16 %v6378_v27, %v6375_v33 }
 0x75b   :  { %7213 = vst [vmem:[#allocation14] sm:$0xff] %v7212_v40  }
 0x75c   :  { %7848 = shalt.err (!%p7845_p4)
}
 0x75d   :  { %s7849_s19 = scalar_lea.hbm %s8293_s11, 128 }
 0x75e   :  { %p7850_p5 = scmp.ne.s32.totalorder %s8293_s11, %s7849_s19  ;;  %p7853_p6 = scmp.lt.u32.totalorder %s7849_s19, %s8293_s11 }
 0x760   :  { %p7855_p7 = pnand %p7853_p6, %p7850_p5 }
 0x762   :  { %7858 = shalt.err (!%p7855_p7)
}
 0x763   :  { %6402 = dma.vmem_to_hbm [thread:$0]  %s6397_s14, 128, %s8293_s11, [#allocation4], %s7877_s7, %s7877_s7, %s7878_s15  }
 0x764   :  { %7867 = dma.done.wait [#allocation4], 128  }
 0x765   :  { %7868 = vsyncadd [#allocation4], 4294967168 }
 0x766   :  { %6406 = vsyncpa [#allocation3], 1 }
 0x767   :  { %6407 = vsyncpa [#allocation6], 1 }
 0x768   :  { %6408 = vsyncpa [#allocation9], 1 }
 0x769   :  { %6409 = vsyncpa [#allocation12], 1 }
 0x76a   :  { %6410 = vsyncpa [#allocation4], 1 }

</bundles_post_ra>
